<compile_context>
chip_gen: v7x
topology: tpu7x:2x2x1
jax: 0.10.0
libtpu: 0.0.40
codegen_flags: <defaults>
</compile_context>

<pallas_src>
import functools

import jax
import jax.numpy as jnp
from jax.experimental import pallas as pl
from jax.experimental.pallas import tpu as pltpu

_MM_DTYPE = jnp.bfloat16   # MXU operand dtype (accumulation is always f32)
_GUARD = 128               # lane-aligned halo around the flattened image window


def _pad8(n):
    return ((n + 7) // 8) * 8


def _ru128(n):
    return ((n + 127) // 128) * 128


# ---------------------------------------------------------------------------
# Host-side layout helpers (tiny): zero-pad H/W by 1, flatten spatially, pad
# channels to the uniform cpad and the spatial axis to a multiple of 128.
# ---------------------------------------------------------------------------
def _prep_input(x, cpad, nwin):
    B, C, H, W = x.shape
    xp = jnp.pad(x, ((0, 0), (0, cpad - C), (1, 1), (1, 1)))
    xf = xp.reshape(B, cpad, (H + 2) * (W + 2))
    return jnp.pad(xf, ((0, 0), (0, 0), (0, nwin - (H + 2) * (W + 2))))


def _interior_masks(H, W, nwin):
    """(1,nwin) and (nwin,1) f32 masks: 1 at interior pixels of the padded
    grid, 0 at the zero-padding border and the lane-padding tail."""
    Wp = W + 2
    Np = (H + 2) * Wp
    idx = jnp.arange(nwin)
    r = idx // Wp
    c = idx % Wp
    ok = (idx < Np) & (r >= 1) & (r <= H) & (c >= 1) & (c <= W)
    m = ok.astype(jnp.float32)
    return m.reshape(1, nwin), m.reshape(nwin, 1)


# ---------------------------------------------------------------------------
# The fused kernel: runs the whole MergeNet for one image.
# ---------------------------------------------------------------------------
def _mergenet_fused_kernel(*args, plan, nwin, offsets, mm_dtype):
    x_ref, mrow_ref, mcol_ref = args[0], args[1], args[2]
    o_ref, buf_ref, stk_ref = args[-3], args[-2], args[-1]
    wrefs = args[3:-3]

    cpad = x_ref.shape[1]
    mask = mrow_ref[...]                       # (1, nwin): 1 interior, 0 pad
    kmask = mcol_ref[...]                      # (nwin, 1): same, key layout
    x_win = x_ref[0]                           # (cpad, nwin) original input

    # zero the 128-lane halo of the guarded conv buffer once per image
    zg = jnp.zeros((cpad, _GUARD), jnp.float32)
    buf_ref[:, :_GUARD] = zg
    buf_ref[:, _GUARD + nwin:] = zg

    wi = 0
    cur = x_win
    for entry in plan:
        if entry[0] == "dncnn":
            _, depth, residual = entry
            blk_in = cur
            for l in range(depth):
                w_ref, sh_ref = wrefs[wi], wrefs[wi + 1]
                wi += 2
                # guarded buffer <- current (masked) activation window
                buf_ref[:, _GUARD:_GUARD + nwin] = cur
                # K-stacked im2col operand: 9 shifted copies of the activation
                for t, off in enumerate(offsets):
                    stk_ref[t * cpad:(t + 1) * cpad, :] = (
                        buf_ref[:, _GUARD + off:_GUARD + off + nwin])
                acc = jnp.dot(w_ref[...],                     # (cpad, 9*cpad)
                              stk_ref[...].astype(mm_dtype),  # (9*cpad, nwin)
                              preferred_element_type=jnp.float32)
                acc = acc + sh_ref[...]                       # folded bias+BN
                if l < depth - 1:
                    acc = jnp.maximum(acc, 0.0)               # ReLU
                # restore exact zeros at padded-border / tail positions so the
                # next layer's shifted taps see proper zero padding
                cur = acc * mask
            if residual:                # DnCNN channel-wise residual (plain add;
                cur = cur + blk_in      # padded channels are zero on both sides)
        else:
            # merge_block: fused q/k/g projection -> flash-style online softmax
            # over 128-wide key tiles -> output projection -> residual.
            _, L = entry
            wqkg_ref, bqkg_ref, wo_ref, bo_ref = wrefs[wi:wi + 4]
            wi += 4
            xm = cur                                           # (cpad, nwin)
            qkg = jnp.dot(wqkg_ref[...], xm.astype(mm_dtype),
                          preferred_element_type=jnp.float32) + bqkg_ref[...]
            q_mm = qkg[:L, :].astype(mm_dtype)                 # (L, nwin)
            k_cn = qkg[L:2 * L, :]                             # (L, nwin)
            g_cn = qkg[2 * L:, :]                              # (cpad, nwin)
            m_i = jnp.full((1, nwin), -1e30, jnp.float32)
            l_i = jnp.zeros((1, nwin), jnp.float32)
            acc = jnp.zeros((cpad, nwin), jnp.float32)
            # queries stay on lanes -> all softmax state is lane-dense.
            # (few chunks at these sizes; switch to lax.fori_loop for large N)
            for s0 in range(0, nwin, 128):
                kj = k_cn[:, s0:s0 + 128].astype(mm_dtype)     # (L, 128)
                gj = g_cn[:, s0:s0 + 128].astype(mm_dtype)     # (cpad, 128)
                km = kmask[s0:s0 + 128, :]                     # (128, 1)
                s = jax.lax.dot_general(
                    kj, q_mm, (((0,), (0,)), ((), ())),
                    preferred_element_type=jnp.float32)        # (128, nwin)
                m_new = jnp.maximum(m_i, jnp.max(s, axis=0, keepdims=True))
                alpha = jnp.exp(m_i - m_new)
                p = jnp.exp(s - m_new) * km        # drop non-interior keys
                l_i = alpha * l_i + jnp.sum(p, axis=0, keepdims=True)
                acc = alpha * acc + jax.lax.dot_general(
                    gj, p.astype(mm_dtype), (((1,), (0,)), ((), ())),
                    preferred_element_type=jnp.float32)        # (cpad, nwin)
                m_i = m_new
            y = acc * pl.reciprocal(l_i, approx=True)
            out_cn = jnp.dot(wo_ref[...], y.astype(mm_dtype),
                             preferred_element_type=jnp.float32) + bo_ref[...]
            cur = (xm + out_cn) * mask
    # fused MergeNet global residual: x + model(x)
    o_ref[0] = (cur + x_win).astype(o_ref.dtype)


# ---------------------------------------------------------------------------
# Wrapper: builds operands / specs and launches the single fused kernel.
# ---------------------------------------------------------------------------
def mergenet_forward(x, blocks):
    x = x.astype(jnp.float32)
    B, C, H, W = x.shape
    Wp = W + 2
    Np = (H + 2) * Wp
    step = Wp + 1
    assert step <= _GUARD, "TODO(synk): halo spatial tiling needed for W > 125"
    nwin = _ru128(Np)
    cpad = blocks[0]["layers"][0]["w"].shape[0]
    assert C <= cpad
    offsets = tuple((ky - 1) * Wp + (kx - 1)
                    for ky in range(3) for kx in range(3))

    xg = _prep_input(x, cpad, nwin)                 # (B, cpad, nwin)
    mrow, mcol = _interior_masks(H, W, nwin)        # (1, nwin), (nwin, 1)

    operands = [xg, mrow, mcol]
    in_specs = [pl.BlockSpec((1, cpad, nwin), lambda b: (b, 0, 0)),
                pl.BlockSpec((1, nwin), lambda b: (0, 0)),
                pl.BlockSpec((nwin, 1), lambda b: (0, 0))]
    plan = []
    flops = 0
    n_merge = 0
    for blk in blocks:
        if blk["type"] == "dncnn":
            plan.append(("dncnn", len(blk["layers"]), blk["residual"]))
            for lyr in blk["layers"]:
                operands += [lyr["w"], lyr["shift"]]
                in_specs += [pl.BlockSpec(lyr["w"].shape, lambda b: (0, 0)),
                             pl.BlockSpec(lyr["shift"].shape, lambda b: (0, 0))]
                flops += 2 * nwin * lyr["w"].shape[0] * lyr["w"].shape[1]
        else:
            plan.append(("merge", blk["L"]))
            n_merge += 1
            operands += [blk["wqkgT"], blk["bqkgT"], blk["woT"], blk["boT"]]
            for arr in (blk["wqkgT"], blk["bqkgT"], blk["woT"], blk["boT"]):
                in_specs.append(pl.BlockSpec(arr.shape, lambda b: (0, 0)))
            L = blk["L"]
            flops += 2 * nwin * ((2 * L + cpad) * cpad
                                 + nwin * L + nwin * cpad + cpad * cpad)

    kernel = functools.partial(_mergenet_fused_kernel, plan=tuple(plan),
                               nwin=nwin, offsets=offsets, mm_dtype=_MM_DTYPE)

    bytes_accessed = 4 * (int(xg.size) + B * cpad * nwin) + sum(
        int(a.size) * a.dtype.itemsize for a in operands[1:])

    # NOTE: total VMEM use here is ~1-2 MiB, far below the scoped default on
    # every generation, so vmem_limit_bytes is intentionally not raised.
    out = pl.pallas_call(
        kernel,
        out_shape=jax.ShapeDtypeStruct((B, cpad, nwin), jnp.float32),
        grid=(B,),
        in_specs=in_specs,
        out_specs=pl.BlockSpec((1, cpad, nwin), lambda b: (b, 0, 0)),
        scratch_shapes=[
            pltpu.VMEM((cpad, nwin + 2 * _GUARD), jnp.float32),   # guarded act
            pltpu.VMEM((9 * cpad, nwin), jnp.float32),            # im2col stack
        ],
        compiler_params=pltpu.CompilerParams(
            dimension_semantics=("parallel",)),
        cost_estimate=pl.CostEstimate(
            flops=int(B * flops),
            transcendentals=int(B * n_merge * nwin * nwin),
            bytes_accessed=int(bytes_accessed)),
    )(*operands)
    out = out[:, :C, :Np].reshape(B, C, H + 2, W + 2)[:, :, 1:H + 1, 1:W + 1]
    return out


# ---------------------------------------------------------------------------
# Deterministic parameter construction (synthetic weights, no checkpoint).
# Eval-mode BatchNorm, the conv bias and the 1/sqrt(L) query scale are folded
# into the packed weights; channel dims are zero-padded to the uniform cpad.
# ---------------------------------------------------------------------------
def _init_conv_layer(key, cin, cout, use_bias, use_bn, cpad):
    ks = jax.random.split(key, 6)
    w = 0.1 * jax.random.normal(ks[0], (3, 3, cin, cout), jnp.float32)
    b = (0.05 * jax.random.normal(ks[1], (cout, 1), jnp.float32)
         if use_bias else jnp.zeros((cout, 1), jnp.float32))
    if use_bn:
        gamma = 1.0 + 0.1 * jax.random.normal(ks[2], (cout, 1), jnp.float32)
        beta = 0.05 * jax.random.normal(ks[3], (cout, 1), jnp.float32)
        mean = 0.05 * jax.random.normal(ks[4], (cout, 1), jnp.float32)
        var = 1.0 + 0.1 * jax.random.uniform(ks[5], (cout, 1), jnp.float32)
        inv = gamma / jnp.sqrt(var + 1e-5)
        scale, shift = inv, beta - mean * inv
    else:
        scale = jnp.ones((cout, 1), jnp.float32)
        shift = jnp.zeros((cout, 1), jnp.float32)
    shift_eff = b * scale + shift                 # fold conv bias into BN shift
    # pad channels to cpad, fold BN scale into the weights, pack as
    # (cpad, 9*cpad): one matmul covers all 9 taps (K-stacked im2col).
    w9 = jnp.pad(w.reshape(9, cin, cout),
                 ((0, 0), (0, cpad - cin), (0, cpad - cout)))
    scale_p = jnp.pad(scale, ((0, cpad - cout), (0, 0)))
    shift_p = jnp.pad(shift_eff, ((0, cpad - cout), (0, 0)))
    wpk = jnp.transpose(w9, (2, 0, 1)).reshape(cpad, 9 * cpad) * scale_p
    return dict(w=wpk.astype(_MM_DTYPE), shift=shift_p)


def _init_dncnn(key, nin, nout, features, depth, residual, bn, cpad):
    keys = jax.random.split(key, depth)
    layers = [_init_conv_layer(keys[0], nin, features, True, False, cpad)]
    for i in range(depth - 2):
        layers.append(_init_conv_layer(keys[1 + i], features, features,
                                       not bn, bn, cpad))
    layers.append(_init_conv_layer(keys[depth - 1], features, nout,
                                   True, False, cpad))
    return dict(type="dncnn", layers=layers, residual=residual)


def _init_merge(key, c, vector_length, cpad):
    ks = jax.random.split(key, 8)

    def lin(kw, kb, cin, cout):
        return (0.1 * jax.random.normal(kw, (cin, cout), jnp.float32),
                0.05 * jax.random.normal(kb, (1, cout), jnp.float32))

    wt, bt = lin(ks[0], ks[1], c, vector_length)     # theta: C -> L (queries)
    wp, bp = lin(ks[2], ks[3], c, vector_length)     # phi:   C -> L (keys)
    wg, bg = lin(ks[4], ks[5], c, c)                 # g:     C -> C (values)
    wo, bo = lin(ks[6], ks[7], c, c)                 # W:     C -> C (out proj)
    inv = 1.0 / float(vector_length) ** 0.5          # fold 1/sqrt(L) into q
    pc = cpad - c
    wt = jnp.pad(wt * inv, ((0, pc), (0, 0)))
    bt = bt * inv
    wp = jnp.pad(wp, ((0, pc), (0, 0)))
    wg = jnp.pad(wg, ((0, pc), (0, pc)))
    bg = jnp.pad(bg, ((0, 0), (0, pc)))
    wo = jnp.pad(wo, ((0, pc), (0, pc)))
    bo = jnp.pad(bo, ((0, 0), (0, pc)))
    wqkgT = jnp.transpose(jnp.concatenate([wt, wp, wg], axis=1))  # (2L+cp, cp)
    bqkgT = jnp.transpose(jnp.concatenate([bt, bp, bg], axis=1))  # (2L+cp, 1)
    return dict(type="merge", L=vector_length,
                wqkgT=wqkgT.astype(_MM_DTYPE), bqkgT=bqkgT,
                woT=jnp.transpose(wo).astype(_MM_DTYPE),
                boT=jnp.transpose(bo))


def init_mergenet(key, in_channels, intermediate_channels, vector_length,
                  use_multiple_size, dncnn_depth, num_merge_block):
    del use_multiple_size  # TODO(synk): multi-size matching path not implemented.
    cpad = _pad8(max(in_channels, intermediate_channels))
    blocks = []
    keys = jax.random.split(key, 2 * num_merge_block + 1)
    ki = 0
    for i in range(num_merge_block):
        nin = in_channels if i == 0 else intermediate_channels
        blocks.append(_init_dncnn(keys[ki], nin, intermediate_channels,
                                  intermediate_channels, dncnn_depth,
                                  True, True, cpad)); ki += 1
        blocks.append(_init_merge(keys[ki], intermediate_channels,
                                  vector_length, cpad)); ki += 1
    blocks.append(_init_dncnn(keys[ki], intermediate_channels, in_channels,
                              intermediate_channels, dncnn_depth,
                              False, True, cpad))
    return blocks


if __name__ == "__main__":
    key = jax.random.PRNGKey(0)
    kx, kp = jax.random.split(key)

    in_channels = 4
    intermediate_channels = 8
    vector_length = 8
    use_multiple_size = False
    dncnn_depth = 3
    num_merge_block = 2

    x = jax.random.normal(kx, (2, in_channels, 16, 16), jnp.float32)
    blocks = init_mergenet(kp, in_channels, intermediate_channels, vector_length,
                           use_multiple_size, dncnn_depth, num_merge_block)

    fwd = jax.jit(lambda inp: mergenet_forward(inp, blocks))
    y = jax.block_until_ready(fwd(x))
    assert y.shape == x.shape and y.dtype == jnp.float32
    assert bool(jnp.all(jnp.isfinite(y)))
    print("KERNEL_OK")
</pallas_src>

<mosaic_0001>
module attributes {stable_mosaic.version = 11 : i64} {
  func.func @_mergenet_fused_kernel(%arg0: i32, %arg1: memref<1x8x384xf32, #tpu.memory_space<vmem>>, %arg2: memref<1x384xf32, #tpu.memory_space<vmem>>, %arg3: memref<384x1xf32, #tpu.memory_space<vmem>>, %arg4: memref<8x72xbf16, #tpu.memory_space<vmem>>, %arg5: memref<8x1xf32, #tpu.memory_space<vmem>>, %arg6: memref<8x72xbf16, #tpu.memory_space<vmem>>, %arg7: memref<8x1xf32, #tpu.memory_space<vmem>>, %arg8: memref<8x72xbf16, #tpu.memory_space<vmem>>, %arg9: memref<8x1xf32, #tpu.memory_space<vmem>>, %arg10: memref<24x8xbf16, #tpu.memory_space<vmem>>, %arg11: memref<24x1xf32, #tpu.memory_space<vmem>>, %arg12: memref<8x8xbf16, #tpu.memory_space<vmem>>, %arg13: memref<8x1xf32, #tpu.memory_space<vmem>>, %arg14: memref<8x72xbf16, #tpu.memory_space<vmem>>, %arg15: memref<8x1xf32, #tpu.memory_space<vmem>>, %arg16: memref<8x72xbf16, #tpu.memory_space<vmem>>, %arg17: memref<8x1xf32, #tpu.memory_space<vmem>>, %arg18: memref<8x72xbf16, #tpu.memory_space<vmem>>, %arg19: memref<8x1xf32, #tpu.memory_space<vmem>>, %arg20: memref<24x8xbf16, #tpu.memory_space<vmem>>, %arg21: memref<24x1xf32, #tpu.memory_space<vmem>>, %arg22: memref<8x8xbf16, #tpu.memory_space<vmem>>, %arg23: memref<8x1xf32, #tpu.memory_space<vmem>>, %arg24: memref<8x72xbf16, #tpu.memory_space<vmem>>, %arg25: memref<8x1xf32, #tpu.memory_space<vmem>>, %arg26: memref<8x72xbf16, #tpu.memory_space<vmem>>, %arg27: memref<8x1xf32, #tpu.memory_space<vmem>>, %arg28: memref<8x72xbf16, #tpu.memory_space<vmem>>, %arg29: memref<8x1xf32, #tpu.memory_space<vmem>>, %arg30: memref<1x8x384xf32, #tpu.memory_space<vmem>>, %arg31: memref<8x640xf32, #tpu.memory_space<vmem>>, %arg32: memref<72x384xf32, #tpu.memory_space<vmem>>) attributes {dimension_semantics = [#tpu.dimension_semantics<parallel>], iteration_bounds = array<i64: 2>, scalar_prefetch = 0 : i64, scratch_operands = 2 : i64, tpu.core_type = #tpu.core_type<tc>, window_params = [{transform_indices = @transform_0, window_bounds = array<i64: 1, 8, 384>}, {pipeline_mode = #tpu.pipeline_mode<synchronous>, transform_indices = @transform_1, window_bounds = array<i64: 1, 384>}, {pipeline_mode = #tpu.pipeline_mode<synchronous>, transform_indices = @transform_2, window_bounds = array<i64: 384, 1>}, {pipeline_mode = #tpu.pipeline_mode<synchronous>, transform_indices = @transform_3, window_bounds = array<i64: 8, 72>}, {pipeline_mode = #tpu.pipeline_mode<synchronous>, transform_indices = @transform_4, window_bounds = array<i64: 8, 1>}, {pipeline_mode = #tpu.pipeline_mode<synchronous>, transform_indices = @transform_5, window_bounds = array<i64: 8, 72>}, {pipeline_mode = #tpu.pipeline_mode<synchronous>, transform_indices = @transform_6, window_bounds = array<i64: 8, 1>}, {pipeline_mode = #tpu.pipeline_mode<synchronous>, transform_indices = @transform_7, window_bounds = array<i64: 8, 72>}, {pipeline_mode = #tpu.pipeline_mode<synchronous>, transform_indices = @transform_8, window_bounds = array<i64: 8, 1>}, {pipeline_mode = #tpu.pipeline_mode<synchronous>, transform_indices = @transform_9, window_bounds = array<i64: 24, 8>}, {pipeline_mode = #tpu.pipeline_mode<synchronous>, transform_indices = @transform_10, window_bounds = array<i64: 24, 1>}, {pipeline_mode = #tpu.pipeline_mode<synchronous>, transform_indices = @transform_11, window_bounds = array<i64: 8, 8>}, {pipeline_mode = #tpu.pipeline_mode<synchronous>, transform_indices = @transform_12, window_bounds = array<i64: 8, 1>}, {pipeline_mode = #tpu.pipeline_mode<synchronous>, transform_indices = @transform_13, window_bounds = array<i64: 8, 72>}, {pipeline_mode = #tpu.pipeline_mode<synchronous>, transform_indices = @transform_14, window_bounds = array<i64: 8, 1>}, {pipeline_mode = #tpu.pipeline_mode<synchronous>, transform_indices = @transform_15, window_bounds = array<i64: 8, 72>}, {pipeline_mode = #tpu.pipeline_mode<synchronous>, transform_indices = @transform_16, window_bounds = array<i64: 8, 1>}, {pipeline_mode = #tpu.pipeline_mode<synchronous>, transform_indices = @transform_17, window_bounds = array<i64: 8, 72>}, {pipeline_mode = #tpu.pipeline_mode<synchronous>, transform_indices = @transform_18, window_bounds = array<i64: 8, 1>}, {pipeline_mode = #tpu.pipeline_mode<synchronous>, transform_indices = @transform_19, window_bounds = array<i64: 24, 8>}, {pipeline_mode = #tpu.pipeline_mode<synchronous>, transform_indices = @transform_20, window_bounds = array<i64: 24, 1>}, {pipeline_mode = #tpu.pipeline_mode<synchronous>, transform_indices = @transform_21, window_bounds = array<i64: 8, 8>}, {pipeline_mode = #tpu.pipeline_mode<synchronous>, transform_indices = @transform_22, window_bounds = array<i64: 8, 1>}, {pipeline_mode = #tpu.pipeline_mode<synchronous>, transform_indices = @transform_23, window_bounds = array<i64: 8, 72>}, {pipeline_mode = #tpu.pipeline_mode<synchronous>, transform_indices = @transform_24, window_bounds = array<i64: 8, 1>}, {pipeline_mode = #tpu.pipeline_mode<synchronous>, transform_indices = @transform_25, window_bounds = array<i64: 8, 72>}, {pipeline_mode = #tpu.pipeline_mode<synchronous>, transform_indices = @transform_26, window_bounds = array<i64: 8, 1>}, {pipeline_mode = #tpu.pipeline_mode<synchronous>, transform_indices = @transform_27, window_bounds = array<i64: 8, 72>}, {pipeline_mode = #tpu.pipeline_mode<synchronous>, transform_indices = @transform_28, window_bounds = array<i64: 8, 1>}, {transform_indices = @transform_29, window_bounds = array<i64: 1, 8, 384>}]} {
    %c0 = arith.constant 0 : index
    %c0_0 = arith.constant 0 : index
    %0 = vector.load %arg2[%c0, %c0_0] : memref<1x384xf32, #tpu.memory_space<vmem>>, vector<1x384xf32>
    %c0_1 = arith.constant 0 : index
    %c0_2 = arith.constant 0 : index
    %1 = vector.load %arg3[%c0_1, %c0_2] : memref<384x1xf32, #tpu.memory_space<vmem>>, vector<384x1xf32>
    %c0_3 = arith.constant 0 : index
    %c0_4 = arith.constant 0 : index
    %c0_5 = arith.constant 0 : index
    %2 = vector.load %arg1[%c0_3, %c0_4, %c0_5] : memref<1x8x384xf32, #tpu.memory_space<vmem>>, vector<1x8x384xf32>
    %3 = vector.shape_cast %2 : vector<1x8x384xf32> to vector<8x384xf32>
    %cst = arith.constant 0.000000e+00 : f32
    %4 = vector.broadcast %cst : f32 to vector<8x128xf32>
    %c0_6 = arith.constant 0 : index
    %c0_7 = arith.constant 0 : index
    %5 = vector.load %arg31[%c0_6, %c0_7] : memref<8x640xf32, #tpu.memory_space<vmem>>, vector<8x128xf32>
    tpu.vector_store %arg31[%c0_6, %c0_7], %4 {strides = array<i32>} : memref<8x640xf32, #tpu.memory_space<vmem>>, vector<8x128xf32>,
    %c0_8 = arith.constant 0 : index
    %c512 = arith.constant 512 : index
    %6 = vector.load %arg31[%c0_8, %c512] : memref<8x640xf32, #tpu.memory_space<vmem>>, vector<8x128xf32>
    tpu.vector_store %arg31[%c0_8, %c512], %4 {strides = array<i32>} : memref<8x640xf32, #tpu.memory_space<vmem>>, vector<8x128xf32>,
    %c0_9 = arith.constant 0 : index
    %c128 = arith.constant 128 : index
    %7 = vector.load %arg31[%c0_9, %c128] : memref<8x640xf32, #tpu.memory_space<vmem>>, vector<8x384xf32>
    tpu.vector_store %arg31[%c0_9, %c128], %3 {strides = array<i32>} : memref<8x640xf32, #tpu.memory_space<vmem>>, vector<8x384xf32>,
    %c0_10 = arith.constant 0 : index
    %c109 = arith.constant 109 : index
    %8 = vector.load %arg31[%c0_10, %c109] : memref<8x640xf32, #tpu.memory_space<vmem>>, vector<8x384xf32>
    %c0_11 = arith.constant 0 : index
    %c0_12 = arith.constant 0 : index
    %9 = vector.load %arg32[%c0_11, %c0_12] : memref<72x384xf32, #tpu.memory_space<vmem>>, vector<8x384xf32>
    tpu.vector_store %arg32[%c0_11, %c0_12], %8 {strides = array<i32>} : memref<72x384xf32, #tpu.memory_space<vmem>>, vector<8x384xf32>,
    %c0_13 = arith.constant 0 : index
    %c110 = arith.constant 110 : index
    %10 = vector.load %arg31[%c0_13, %c110] : memref<8x640xf32, #tpu.memory_space<vmem>>, vector<8x384xf32>
    %c8 = arith.constant 8 : index
    %c0_14 = arith.constant 0 : index
    %11 = vector.load %arg32[%c8, %c0_14] : memref<72x384xf32, #tpu.memory_space<vmem>>, vector<8x384xf32>
    tpu.vector_store %arg32[%c8, %c0_14], %10 {strides = array<i32>} : memref<72x384xf32, #tpu.memory_space<vmem>>, vector<8x384xf32>,
    %c0_15 = arith.constant 0 : index
    %c111 = arith.constant 111 : index
    %12 = vector.load %arg31[%c0_15, %c111] : memref<8x640xf32, #tpu.memory_space<vmem>>, vector<8x384xf32>
    %c16 = arith.constant 16 : index
    %c0_16 = arith.constant 0 : index
    %13 = vector.load %arg32[%c16, %c0_16] : memref<72x384xf32, #tpu.memory_space<vmem>>, vector<8x384xf32>
    tpu.vector_store %arg32[%c16, %c0_16], %12 {strides = array<i32>} : memref<72x384xf32, #tpu.memory_space<vmem>>, vector<8x384xf32>,
    %c0_17 = arith.constant 0 : index
    %c127 = arith.constant 127 : index
    %14 = vector.load %arg31[%c0_17, %c127] : memref<8x640xf32, #tpu.memory_space<vmem>>, vector<8x384xf32>
    %c24 = arith.constant 24 : index
    %c0_18 = arith.constant 0 : index
    %15 = vector.load %arg32[%c24, %c0_18] : memref<72x384xf32, #tpu.memory_space<vmem>>, vector<8x384xf32>
    tpu.vector_store %arg32[%c24, %c0_18], %14 {strides = array<i32>} : memref<72x384xf32, #tpu.memory_space<vmem>>, vector<8x384xf32>,
    %c0_19 = arith.constant 0 : index
    %c128_20 = arith.constant 128 : index
    %16 = vector.load %arg31[%c0_19, %c128_20] : memref<8x640xf32, #tpu.memory_space<vmem>>, vector<8x384xf32>
    %c32 = arith.constant 32 : index
    %c0_21 = arith.constant 0 : index
    %17 = vector.load %arg32[%c32, %c0_21] : memref<72x384xf32, #tpu.memory_space<vmem>>, vector<8x384xf32>
    tpu.vector_store %arg32[%c32, %c0_21], %16 {strides = array<i32>} : memref<72x384xf32, #tpu.memory_space<vmem>>, vector<8x384xf32>,
    %c0_22 = arith.constant 0 : index
    %c129 = arith.constant 129 : index
    %18 = vector.load %arg31[%c0_22, %c129] : memref<8x640xf32, #tpu.memory_space<vmem>>, vector<8x384xf32>
    %c40 = arith.constant 40 : index
    %c0_23 = arith.constant 0 : index
    %19 = vector.load %arg32[%c40, %c0_23] : memref<72x384xf32, #tpu.memory_space<vmem>>, vector<8x384xf32>
    tpu.vector_store %arg32[%c40, %c0_23], %18 {strides = array<i32>} : memref<72x384xf32, #tpu.memory_space<vmem>>, vector<8x384xf32>,
    %c0_24 = arith.constant 0 : index
    %c145 = arith.constant 145 : index
    %20 = vector.load %arg31[%c0_24, %c145] : memref<8x640xf32, #tpu.memory_space<vmem>>, vector<8x384xf32>
    %c48 = arith.constant 48 : index
    %c0_25 = arith.constant 0 : index
    %21 = vector.load %arg32[%c48, %c0_25] : memref<72x384xf32, #tpu.memory_space<vmem>>, vector<8x384xf32>
    tpu.vector_store %arg32[%c48, %c0_25], %20 {strides = array<i32>} : memref<72x384xf32, #tpu.memory_space<vmem>>, vector<8x384xf32>,
    %c0_26 = arith.constant 0 : index
    %c146 = arith.constant 146 : index
    %22 = vector.load %arg31[%c0_26, %c146] : memref<8x640xf32, #tpu.memory_space<vmem>>, vector<8x384xf32>
    %c56 = arith.constant 56 : index
    %c0_27 = arith.constant 0 : index
    %23 = vector.load %arg32[%c56, %c0_27] : memref<72x384xf32, #tpu.memory_space<vmem>>, vector<8x384xf32>
    tpu.vector_store %arg32[%c56, %c0_27], %22 {strides = array<i32>} : memref<72x384xf32, #tpu.memory_space<vmem>>, vector<8x384xf32>,
    %c0_28 = arith.constant 0 : index
    %c147 = arith.constant 147 : index
    %24 = vector.load %arg31[%c0_28, %c147] : memref<8x640xf32, #tpu.memory_space<vmem>>, vector<8x384xf32>
    %c64 = arith.constant 64 : index
    %c0_29 = arith.constant 0 : index
    %25 = vector.load %arg32[%c64, %c0_29] : memref<72x384xf32, #tpu.memory_space<vmem>>, vector<8x384xf32>
    tpu.vector_store %arg32[%c64, %c0_29], %24 {strides = array<i32>} : memref<72x384xf32, #tpu.memory_space<vmem>>, vector<8x384xf32>,
    %c0_30 = arith.constant 0 : index
    %c0_31 = arith.constant 0 : index
    %26 = vector.load %arg4[%c0_30, %c0_31] : memref<8x72xbf16, #tpu.memory_space<vmem>>, vector<8x72xbf16>
    %c0_32 = arith.constant 0 : index
    %c0_33 = arith.constant 0 : index
    %27 = vector.load %arg32[%c0_32, %c0_33] : memref<72x384xf32, #tpu.memory_space<vmem>>, vector<72x384xf32>
    %28 = arith.truncf %27 : vector<72x384xf32> to vector<72x384xbf16>
    %cst_34 = arith.constant dense<0.000000e+00> : vector<8x384xf32>
    %29 = tpu.matmul %26, %28, %cst_34 {dimension_numbers = #tpu.dot_dimension_numbers<[1], [0], [0], [1], [0, 0, 1, 1], [], []>} : vector<8x72xbf16>, vector<72x384xbf16>, vector<8x384xf32> -> vector<8x384xf32>
    %c0_35 = arith.constant 0 : index
    %c0_36 = arith.constant 0 : index
    %30 = vector.load %arg5[%c0_35, %c0_36] : memref<8x1xf32, #tpu.memory_space<vmem>>, vector<8x1xf32>
    %31 = vector.broadcast %30 : vector<8x1xf32> to vector<8x384xf32>
    %32 = arith.addf %29, %31 : vector<8x384xf32>
    %cst_37 = arith.constant 0.000000e+00 : f32
    %33 = vector.broadcast %cst_37 : f32 to vector<8x384xf32>
    %34 = arith.maximumf %32, %33 : vector<8x384xf32>
    %35 = vector.broadcast %0 : vector<1x384xf32> to vector<8x384xf32>
    %36 = arith.mulf %34, %35 : vector<8x384xf32>
    %c0_38 = arith.constant 0 : index
    %c128_39 = arith.constant 128 : index
    %37 = vector.load %arg31[%c0_38, %c128_39] : memref<8x640xf32, #tpu.memory_space<vmem>>, vector<8x384xf32>
    tpu.vector_store %arg31[%c0_38, %c128_39], %36 {strides = array<i32>} : memref<8x640xf32, #tpu.memory_space<vmem>>, vector<8x384xf32>,
    %c0_40 = arith.constant 0 : index
    %c109_41 = arith.constant 109 : index
    %38 = vector.load %arg31[%c0_40, %c109_41] : memref<8x640xf32, #tpu.memory_space<vmem>>, vector<8x384xf32>
    %c0_42 = arith.constant 0 : index
    %c0_43 = arith.constant 0 : index
    %39 = vector.load %arg32[%c0_42, %c0_43] : memref<72x384xf32, #tpu.memory_space<vmem>>, vector<8x384xf32>
    tpu.vector_store %arg32[%c0_42, %c0_43], %38 {strides = array<i32>} : memref<72x384xf32, #tpu.memory_space<vmem>>, vector<8x384xf32>,
    %c0_44 = arith.constant 0 : index
    %c110_45 = arith.constant 110 : index
    %40 = vector.load %arg31[%c0_44, %c110_45] : memref<8x640xf32, #tpu.memory_space<vmem>>, vector<8x384xf32>
    %c8_46 = arith.constant 8 : index
    %c0_47 = arith.constant 0 : index
    %41 = vector.load %arg32[%c8_46, %c0_47] : memref<72x384xf32, #tpu.memory_space<vmem>>, vector<8x384xf32>
    tpu.vector_store %arg32[%c8_46, %c0_47], %40 {strides = array<i32>} : memref<72x384xf32, #tpu.memory_space<vmem>>, vector<8x384xf32>,
    %c0_48 = arith.constant 0 : index
    %c111_49 = arith.constant 111 : index
    %42 = vector.load %arg31[%c0_48, %c111_49] : memref<8x640xf32, #tpu.memory_space<vmem>>, vector<8x384xf32>
    %c16_50 = arith.constant 16 : index
    %c0_51 = arith.constant 0 : index
    %43 = vector.load %arg32[%c16_50, %c0_51] : memref<72x384xf32, #tpu.memory_space<vmem>>, vector<8x384xf32>
    tpu.vector_store %arg32[%c16_50, %c0_51], %42 {strides = array<i32>} : memref<72x384xf32, #tpu.memory_space<vmem>>, vector<8x384xf32>,
    %c0_52 = arith.constant 0 : index
    %c127_53 = arith.constant 127 : index
    %44 = vector.load %arg31[%c0_52, %c127_53] : memref<8x640xf32, #tpu.memory_space<vmem>>, vector<8x384xf32>
    %c24_54 = arith.constant 24 : index
    %c0_55 = arith.constant 0 : index
    %45 = vector.load %arg32[%c24_54, %c0_55] : memref<72x384xf32, #tpu.memory_space<vmem>>, vector<8x384xf32>
    tpu.vector_store %arg32[%c24_54, %c0_55], %44 {strides = array<i32>} : memref<72x384xf32, #tpu.memory_space<vmem>>, vector<8x384xf32>,
    %c0_56 = arith.constant 0 : index
    %c128_57 = arith.constant 128 : index
    %46 = vector.load %arg31[%c0_56, %c128_57] : memref<8x640xf32, #tpu.memory_space<vmem>>, vector<8x384xf32>
    %c32_58 = arith.constant 32 : index
    %c0_59 = arith.constant 0 : index
    %47 = vector.load %arg32[%c32_58, %c0_59] : memref<72x384xf32, #tpu.memory_space<vmem>>, vector<8x384xf32>
    tpu.vector_store %arg32[%c32_58, %c0_59], %46 {strides = array<i32>} : memref<72x384xf32, #tpu.memory_space<vmem>>, vector<8x384xf32>,
    %c0_60 = arith.constant 0 : index
    %c129_61 = arith.constant 129 : index
    %48 = vector.load %arg31[%c0_60, %c129_61] : memref<8x640xf32, #tpu.memory_space<vmem>>, vector<8x384xf32>
    %c40_62 = arith.constant 40 : index
    %c0_63 = arith.constant 0 : index
    %49 = vector.load %arg32[%c40_62, %c0_63] : memref<72x384xf32, #tpu.memory_space<vmem>>, vector<8x384xf32>
    tpu.vector_store %arg32[%c40_62, %c0_63], %48 {strides = array<i32>} : memref<72x384xf32, #tpu.memory_space<vmem>>, vector<8x384xf32>,
    %c0_64 = arith.constant 0 : index
    %c145_65 = arith.constant 145 : index
    %50 = vector.load %arg31[%c0_64, %c145_65] : memref<8x640xf32, #tpu.memory_space<vmem>>, vector<8x384xf32>
    %c48_66 = arith.constant 48 : index
    %c0_67 = arith.constant 0 : index
    %51 = vector.load %arg32[%c48_66, %c0_67] : memref<72x384xf32, #tpu.memory_space<vmem>>, vector<8x384xf32>
    tpu.vector_store %arg32[%c48_66, %c0_67], %50 {strides = array<i32>} : memref<72x384xf32, #tpu.memory_space<vmem>>, vector<8x384xf32>,
    %c0_68 = arith.constant 0 : index
    %c146_69 = arith.constant 146 : index
    %52 = vector.load %arg31[%c0_68, %c146_69] : memref<8x640xf32, #tpu.memory_space<vmem>>, vector<8x384xf32>
    %c56_70 = arith.constant 56 : index
    %c0_71 = arith.constant 0 : index
    %53 = vector.load %arg32[%c56_70, %c0_71] : memref<72x384xf32, #tpu.memory_space<vmem>>, vector<8x384xf32>
    tpu.vector_store %arg32[%c56_70, %c0_71], %52 {strides = array<i32>} : memref<72x384xf32, #tpu.memory_space<vmem>>, vector<8x384xf32>,
    %c0_72 = arith.constant 0 : index
    %c147_73 = arith.constant 147 : index
    %54 = vector.load %arg31[%c0_72, %c147_73] : memref<8x640xf32, #tpu.memory_space<vmem>>, vector<8x384xf32>
    %c64_74 = arith.constant 64 : index
    %c0_75 = arith.constant 0 : index
    %55 = vector.load %arg32[%c64_74, %c0_75] : memref<72x384xf32, #tpu.memory_space<vmem>>, vector<8x384xf32>
    tpu.vector_store %arg32[%c64_74, %c0_75], %54 {strides = array<i32>} : memref<72x384xf32, #tpu.memory_space<vmem>>, vector<8x384xf32>,
    %c0_76 = arith.constant 0 : index
    %c0_77 = arith.constant 0 : index
    %56 = vector.load %arg6[%c0_76, %c0_77] : memref<8x72xbf16, #tpu.memory_space<vmem>>, vector<8x72xbf16>
    %c0_78 = arith.constant 0 : index
    %c0_79 = arith.constant 0 : index
    %57 = vector.load %arg32[%c0_78, %c0_79] : memref<72x384xf32, #tpu.memory_space<vmem>>, vector<72x384xf32>
    %58 = arith.truncf %57 : vector<72x384xf32> to vector<72x384xbf16>
    %cst_80 = arith.constant dense<0.000000e+00> : vector<8x384xf32>
    %59 = tpu.matmul %56, %58, %cst_80 {dimension_numbers = #tpu.dot_dimension_numbers<[1], [0], [0], [1], [0, 0, 1, 1], [], []>} : vector<8x72xbf16>, vector<72x384xbf16>, vector<8x384xf32> -> vector<8x384xf32>
    %c0_81 = arith.constant 0 : index
    %c0_82 = arith.constant 0 : index
    %60 = vector.load %arg7[%c0_81, %c0_82] : memref<8x1xf32, #tpu.memory_space<vmem>>, vector<8x1xf32>
    %61 = vector.broadcast %60 : vector<8x1xf32> to vector<8x384xf32>
    %62 = arith.addf %59, %61 : vector<8x384xf32>
    %cst_83 = arith.constant 0.000000e+00 : f32
    %63 = vector.broadcast %cst_83 : f32 to vector<8x384xf32>
    %64 = arith.maximumf %62, %63 : vector<8x384xf32>
    %65 = vector.broadcast %0 : vector<1x384xf32> to vector<8x384xf32>
    %66 = arith.mulf %64, %65 : vector<8x384xf32>
    %c0_84 = arith.constant 0 : index
    %c128_85 = arith.constant 128 : index
    %67 = vector.load %arg31[%c0_84, %c128_85] : memref<8x640xf32, #tpu.memory_space<vmem>>, vector<8x384xf32>
    tpu.vector_store %arg31[%c0_84, %c128_85], %66 {strides = array<i32>} : memref<8x640xf32, #tpu.memory_space<vmem>>, vector<8x384xf32>,
    %c0_86 = arith.constant 0 : index
    %c109_87 = arith.constant 109 : index
    %68 = vector.load %arg31[%c0_86, %c109_87] : memref<8x640xf32, #tpu.memory_space<vmem>>, vector<8x384xf32>
    %c0_88 = arith.constant 0 : index
    %c0_89 = arith.constant 0 : index
    %69 = vector.load %arg32[%c0_88, %c0_89] : memref<72x384xf32, #tpu.memory_space<vmem>>, vector<8x384xf32>
    tpu.vector_store %arg32[%c0_88, %c0_89], %68 {strides = array<i32>} : memref<72x384xf32, #tpu.memory_space<vmem>>, vector<8x384xf32>,
    %c0_90 = arith.constant 0 : index
    %c110_91 = arith.constant 110 : index
    %70 = vector.load %arg31[%c0_90, %c110_91] : memref<8x640xf32, #tpu.memory_space<vmem>>, vector<8x384xf32>
    %c8_92 = arith.constant 8 : index
    %c0_93 = arith.constant 0 : index
    %71 = vector.load %arg32[%c8_92, %c0_93] : memref<72x384xf32, #tpu.memory_space<vmem>>, vector<8x384xf32>
    tpu.vector_store %arg32[%c8_92, %c0_93], %70 {strides = array<i32>} : memref<72x384xf32, #tpu.memory_space<vmem>>, vector<8x384xf32>,
    %c0_94 = arith.constant 0 : index
    %c111_95 = arith.constant 111 : index
    %72 = vector.load %arg31[%c0_94, %c111_95] : memref<8x640xf32, #tpu.memory_space<vmem>>, vector<8x384xf32>
    %c16_96 = arith.constant 16 : index
    %c0_97 = arith.constant 0 : index
    %73 = vector.load %arg32[%c16_96, %c0_97] : memref<72x384xf32, #tpu.memory_space<vmem>>, vector<8x384xf32>
    tpu.vector_store %arg32[%c16_96, %c0_97], %72 {strides = array<i32>} : memref<72x384xf32, #tpu.memory_space<vmem>>, vector<8x384xf32>,
    %c0_98 = arith.constant 0 : index
    %c127_99 = arith.constant 127 : index
    %74 = vector.load %arg31[%c0_98, %c127_99] : memref<8x640xf32, #tpu.memory_space<vmem>>, vector<8x384xf32>
    %c24_100 = arith.constant 24 : index
    %c0_101 = arith.constant 0 : index
    %75 = vector.load %arg32[%c24_100, %c0_101] : memref<72x384xf32, #tpu.memory_space<vmem>>, vector<8x384xf32>
    tpu.vector_store %arg32[%c24_100, %c0_101], %74 {strides = array<i32>} : memref<72x384xf32, #tpu.memory_space<vmem>>, vector<8x384xf32>,
    %c0_102 = arith.constant 0 : index
    %c128_103 = arith.constant 128 : index
    %76 = vector.load %arg31[%c0_102, %c128_103] : memref<8x640xf32, #tpu.memory_space<vmem>>, vector<8x384xf32>
    %c32_104 = arith.constant 32 : index
    %c0_105 = arith.constant 0 : index
    %77 = vector.load %arg32[%c32_104, %c0_105] : memref<72x384xf32, #tpu.memory_space<vmem>>, vector<8x384xf32>
    tpu.vector_store %arg32[%c32_104, %c0_105], %76 {strides = array<i32>} : memref<72x384xf32, #tpu.memory_space<vmem>>, vector<8x384xf32>,
    %c0_106 = arith.constant 0 : index
    %c129_107 = arith.constant 129 : index
    %78 = vector.load %arg31[%c0_106, %c129_107] : memref<8x640xf32, #tpu.memory_space<vmem>>, vector<8x384xf32>
    %c40_108 = arith.constant 40 : index
    %c0_109 = arith.constant 0 : index
    %79 = vector.load %arg32[%c40_108, %c0_109] : memref<72x384xf32, #tpu.memory_space<vmem>>, vector<8x384xf32>
    tpu.vector_store %arg32[%c40_108, %c0_109], %78 {strides = array<i32>} : memref<72x384xf32, #tpu.memory_space<vmem>>, vector<8x384xf32>,
    %c0_110 = arith.constant 0 : index
    %c145_111 = arith.constant 145 : index
    %80 = vector.load %arg31[%c0_110, %c145_111] : memref<8x640xf32, #tpu.memory_space<vmem>>, vector<8x384xf32>
    %c48_112 = arith.constant 48 : index
    %c0_113 = arith.constant 0 : index
    %81 = vector.load %arg32[%c48_112, %c0_113] : memref<72x384xf32, #tpu.memory_space<vmem>>, vector<8x384xf32>
    tpu.vector_store %arg32[%c48_112, %c0_113], %80 {strides = array<i32>} : memref<72x384xf32, #tpu.memory_space<vmem>>, vector<8x384xf32>,
    %c0_114 = arith.constant 0 : index
    %c146_115 = arith.constant 146 : index
    %82 = vector.load %arg31[%c0_114, %c146_115] : memref<8x640xf32, #tpu.memory_space<vmem>>, vector<8x384xf32>
    %c56_116 = arith.constant 56 : index
    %c0_117 = arith.constant 0 : index
    %83 = vector.load %arg32[%c56_116, %c0_117] : memref<72x384xf32, #tpu.memory_space<vmem>>, vector<8x384xf32>
    tpu.vector_store %arg32[%c56_116, %c0_117], %82 {strides = array<i32>} : memref<72x384xf32, #tpu.memory_space<vmem>>, vector<8x384xf32>,
    %c0_118 = arith.constant 0 : index
    %c147_119 = arith.constant 147 : index
    %84 = vector.load %arg31[%c0_118, %c147_119] : memref<8x640xf32, #tpu.memory_space<vmem>>, vector<8x384xf32>
    %c64_120 = arith.constant 64 : index
    %c0_121 = arith.constant 0 : index
    %85 = vector.load %arg32[%c64_120, %c0_121] : memref<72x384xf32, #tpu.memory_space<vmem>>, vector<8x384xf32>
    tpu.vector_store %arg32[%c64_120, %c0_121], %84 {strides = array<i32>} : memref<72x384xf32, #tpu.memory_space<vmem>>, vector<8x384xf32>,
    %c0_122 = arith.constant 0 : index
    %c0_123 = arith.constant 0 : index
    %86 = vector.load %arg8[%c0_122, %c0_123] : memref<8x72xbf16, #tpu.memory_space<vmem>>, vector<8x72xbf16>
    %c0_124 = arith.constant 0 : index
    %c0_125 = arith.constant 0 : index
    %87 = vector.load %arg32[%c0_124, %c0_125] : memref<72x384xf32, #tpu.memory_space<vmem>>, vector<72x384xf32>
    %88 = arith.truncf %87 : vector<72x384xf32> to vector<72x384xbf16>
    %cst_126 = arith.constant dense<0.000000e+00> : vector<8x384xf32>
    %89 = tpu.matmul %86, %88, %cst_126 {dimension_numbers = #tpu.dot_dimension_numbers<[1], [0], [0], [1], [0, 0, 1, 1], [], []>} : vector<8x72xbf16>, vector<72x384xbf16>, vector<8x384xf32> -> vector<8x384xf32>
    %c0_127 = arith.constant 0 : index
    %c0_128 = arith.constant 0 : index
    %90 = vector.load %arg9[%c0_127, %c0_128] : memref<8x1xf32, #tpu.memory_space<vmem>>, vector<8x1xf32>
    %91 = vector.broadcast %90 : vector<8x1xf32> to vector<8x384xf32>
    %92 = arith.addf %89, %91 : vector<8x384xf32>
    %93 = vector.broadcast %0 : vector<1x384xf32> to vector<8x384xf32>
    %94 = arith.mulf %92, %93 : vector<8x384xf32>
    %95 = arith.addf %94, %3 : vector<8x384xf32>
    %c0_129 = arith.constant 0 : index
    %c0_130 = arith.constant 0 : index
    %96 = vector.load %arg10[%c0_129, %c0_130] : memref<24x8xbf16, #tpu.memory_space<vmem>>, vector<24x8xbf16>
    %97 = arith.truncf %95 : vector<8x384xf32> to vector<8x384xbf16>
    %cst_131 = arith.constant dense<0.000000e+00> : vector<24x384xf32>
    %98 = tpu.matmul %96, %97, %cst_131 {dimension_numbers = #tpu.dot_dimension_numbers<[1], [0], [0], [1], [0, 0, 1, 1], [], []>} : vector<24x8xbf16>, vector<8x384xbf16>, vector<24x384xf32> -> vector<24x384xf32>
    %c0_132 = arith.constant 0 : index
    %c0_133 = arith.constant 0 : index
    %99 = vector.load %arg11[%c0_132, %c0_133] : memref<24x1xf32, #tpu.memory_space<vmem>>, vector<24x1xf32>
    %100 = vector.broadcast %99 : vector<24x1xf32> to vector<24x384xf32>
    %101 = arith.addf %98, %100 : vector<24x384xf32>
    %102 = vector.extract_strided_slice %101 {offsets = [0, 0], sizes = [8, 384], strides = [1, 1]} : vector<24x384xf32> to vector<8x384xf32>
    %103 = arith.truncf %102 : vector<8x384xf32> to vector<8x384xbf16>
    %104 = vector.extract_strided_slice %101 {offsets = [8, 0], sizes = [8, 384], strides = [1, 1]} : vector<24x384xf32> to vector<8x384xf32>
    %105 = vector.extract_strided_slice %101 {offsets = [16, 0], sizes = [8, 384], strides = [1, 1]} : vector<24x384xf32> to vector<8x384xf32>
    %cst_134 = arith.constant -1.000000e+30 : f32
    %106 = vector.broadcast %cst_134 : f32 to vector<1x384xf32>
    %cst_135 = arith.constant 0.000000e+00 : f32
    %107 = vector.broadcast %cst_135 : f32 to vector<1x384xf32>
    %cst_136 = arith.constant 0.000000e+00 : f32
    %108 = vector.broadcast %cst_136 : f32 to vector<8x384xf32>
    %109 = vector.extract_strided_slice %104 {offsets = [0, 0], sizes = [8, 128], strides = [1, 1]} : vector<8x384xf32> to vector<8x128xf32>
    %110 = arith.truncf %109 : vector<8x128xf32> to vector<8x128xbf16>
    %111 = vector.extract_strided_slice %105 {offsets = [0, 0], sizes = [8, 128], strides = [1, 1]} : vector<8x384xf32> to vector<8x128xf32>
    %112 = arith.truncf %111 : vector<8x128xf32> to vector<8x128xbf16>
    %113 = vector.extract_strided_slice %1 {offsets = [0, 0], sizes = [128, 1], strides = [1, 1]} : vector<384x1xf32> to vector<128x1xf32>
    %cst_137 = arith.constant dense<0.000000e+00> : vector<128x384xf32>
    %114 = tpu.matmul %110, %103, %cst_137 {dimension_numbers = #tpu.dot_dimension_numbers<[0], [0], [1], [1], [0, 1, 1, 1], [], []>} : vector<8x128xbf16>, vector<8x384xbf16>, vector<128x384xf32> -> vector<128x384xf32>
    %cst_138 = arith.constant dense<0xFF800000> : vector<384xf32>
    %115 = vector.multi_reduction <maximumf>, %114, %cst_138 [0] : vector<128x384xf32> to vector<384xf32>
    %116 = vector.shape_cast %115 : vector<384xf32> to vector<1x384xf32>
    %117 = arith.maximumf %106, %116 : vector<1x384xf32>
    %118 = arith.subf %106, %117 : vector<1x384xf32>
    %119 = math.exp %118 : vector<1x384xf32>
    %120 = vector.broadcast %117 : vector<1x384xf32> to vector<128x384xf32>
    %121 = arith.subf %114, %120 : vector<128x384xf32>
    %122 = math.exp %121 : vector<128x384xf32>
    %123 = vector.broadcast %113 : vector<128x1xf32> to vector<128x384xf32>
    %124 = arith.mulf %122, %123 : vector<128x384xf32>
    %125 = arith.mulf %119, %107 : vector<1x384xf32>
    %cst_139 = arith.constant dense<0.000000e+00> : vector<384xf32>
    %126 = vector.multi_reduction <add>, %124, %cst_139 [0] : vector<128x384xf32> to vector<384xf32>
    %127 = vector.shape_cast %126 : vector<384xf32> to vector<1x384xf32>
    %128 = arith.addf %125, %127 : vector<1x384xf32>
    %129 = vector.broadcast %119 : vector<1x384xf32> to vector<8x384xf32>
    %130 = arith.mulf %129, %108 : vector<8x384xf32>
    %131 = arith.truncf %124 : vector<128x384xf32> to vector<128x384xbf16>
    %cst_140 = arith.constant dense<0.000000e+00> : vector<8x384xf32>
    %132 = tpu.matmul %112, %131, %cst_140 {dimension_numbers = #tpu.dot_dimension_numbers<[1], [0], [0], [1], [0, 0, 1, 1], [], []>} : vector<8x128xbf16>, vector<128x384xbf16>, vector<8x384xf32> -> vector<8x384xf32>
    %133 = arith.addf %130, %132 : vector<8x384xf32>
    %134 = vector.extract_strided_slice %104 {offsets = [0, 128], sizes = [8, 128], strides = [1, 1]} : vector<8x384xf32> to vector<8x128xf32>
    %135 = arith.truncf %134 : vector<8x128xf32> to vector<8x128xbf16>
    %136 = vector.extract_strided_slice %105 {offsets = [0, 128], sizes = [8, 128], strides = [1, 1]} : vector<8x384xf32> to vector<8x128xf32>
    %137 = arith.truncf %136 : vector<8x128xf32> to vector<8x128xbf16>
    %138 = vector.extract_strided_slice %1 {offsets = [128, 0], sizes = [128, 1], strides = [1, 1]} : vector<384x1xf32> to vector<128x1xf32>
    %cst_141 = arith.constant dense<0.000000e+00> : vector<128x384xf32>
    %139 = tpu.matmul %135, %103, %cst_141 {dimension_numbers = #tpu.dot_dimension_numbers<[0], [0], [1], [1], [0, 1, 1, 1], [], []>} : vector<8x128xbf16>, vector<8x384xbf16>, vector<128x384xf32> -> vector<128x384xf32>
    %cst_142 = arith.constant dense<0xFF800000> : vector<384xf32>
    %140 = vector.multi_reduction <maximumf>, %139, %cst_142 [0] : vector<128x384xf32> to vector<384xf32>
    %141 = vector.shape_cast %140 : vector<384xf32> to vector<1x384xf32>
    %142 = arith.maximumf %117, %141 : vector<1x384xf32>
    %143 = arith.subf %117, %142 : vector<1x384xf32>
    %144 = math.exp %143 : vector<1x384xf32>
    %145 = vector.broadcast %142 : vector<1x384xf32> to vector<128x384xf32>
    %146 = arith.subf %139, %145 : vector<128x384xf32>
    %147 = math.exp %146 : vector<128x384xf32>
    %148 = vector.broadcast %138 : vector<128x1xf32> to vector<128x384xf32>
    %149 = arith.mulf %147, %148 : vector<128x384xf32>
    %150 = arith.mulf %144, %128 : vector<1x384xf32>
    %cst_143 = arith.constant dense<0.000000e+00> : vector<384xf32>
    %151 = vector.multi_reduction <add>, %149, %cst_143 [0] : vector<128x384xf32> to vector<384xf32>
    %152 = vector.shape_cast %151 : vector<384xf32> to vector<1x384xf32>
    %153 = arith.addf %150, %152 : vector<1x384xf32>
    %154 = vector.broadcast %144 : vector<1x384xf32> to vector<8x384xf32>
    %155 = arith.mulf %154, %133 : vector<8x384xf32>
    %156 = arith.truncf %149 : vector<128x384xf32> to vector<128x384xbf16>
    %cst_144 = arith.constant dense<0.000000e+00> : vector<8x384xf32>
    %157 = tpu.matmul %137, %156, %cst_144 {dimension_numbers = #tpu.dot_dimension_numbers<[1], [0], [0], [1], [0, 0, 1, 1], [], []>} : vector<8x128xbf16>, vector<128x384xbf16>, vector<8x384xf32> -> vector<8x384xf32>
    %158 = arith.addf %155, %157 : vector<8x384xf32>
    %159 = vector.extract_strided_slice %104 {offsets = [0, 256], sizes = [8, 128], strides = [1, 1]} : vector<8x384xf32> to vector<8x128xf32>
    %160 = arith.truncf %159 : vector<8x128xf32> to vector<8x128xbf16>
    %161 = vector.extract_strided_slice %105 {offsets = [0, 256], sizes = [8, 128], strides = [1, 1]} : vector<8x384xf32> to vector<8x128xf32>
    %162 = arith.truncf %161 : vector<8x128xf32> to vector<8x128xbf16>
    %163 = vector.extract_strided_slice %1 {offsets = [256, 0], sizes = [128, 1], strides = [1, 1]} : vector<384x1xf32> to vector<128x1xf32>
    %cst_145 = arith.constant dense<0.000000e+00> : vector<128x384xf32>
    %164 = tpu.matmul %160, %103, %cst_145 {dimension_numbers = #tpu.dot_dimension_numbers<[0], [0], [1], [1], [0, 1, 1, 1], [], []>} : vector<8x128xbf16>, vector<8x384xbf16>, vector<128x384xf32> -> vector<128x384xf32>
    %cst_146 = arith.constant dense<0xFF800000> : vector<384xf32>
    %165 = vector.multi_reduction <maximumf>, %164, %cst_146 [0] : vector<128x384xf32> to vector<384xf32>
    %166 = vector.shape_cast %165 : vector<384xf32> to vector<1x384xf32>
    %167 = arith.maximumf %142, %166 : vector<1x384xf32>
    %168 = arith.subf %142, %167 : vector<1x384xf32>
    %169 = math.exp %168 : vector<1x384xf32>
    %170 = vector.broadcast %167 : vector<1x384xf32> to vector<128x384xf32>
    %171 = arith.subf %164, %170 : vector<128x384xf32>
    %172 = math.exp %171 : vector<128x384xf32>
    %173 = vector.broadcast %163 : vector<128x1xf32> to vector<128x384xf32>
    %174 = arith.mulf %172, %173 : vector<128x384xf32>
    %175 = arith.mulf %169, %153 : vector<1x384xf32>
    %cst_147 = arith.constant dense<0.000000e+00> : vector<384xf32>
    %176 = vector.multi_reduction <add>, %174, %cst_147 [0] : vector<128x384xf32> to vector<384xf32>
    %177 = vector.shape_cast %176 : vector<384xf32> to vector<1x384xf32>
    %178 = arith.addf %175, %177 : vector<1x384xf32>
    %179 = vector.broadcast %169 : vector<1x384xf32> to vector<8x384xf32>
    %180 = arith.mulf %179, %158 : vector<8x384xf32>
    %181 = arith.truncf %174 : vector<128x384xf32> to vector<128x384xbf16>
    %cst_148 = arith.constant dense<0.000000e+00> : vector<8x384xf32>
    %182 = tpu.matmul %162, %181, %cst_148 {dimension_numbers = #tpu.dot_dimension_numbers<[1], [0], [0], [1], [0, 0, 1, 1], [], []>} : vector<8x128xbf16>, vector<128x384xbf16>, vector<8x384xf32> -> vector<8x384xf32>
    %183 = arith.addf %180, %182 : vector<8x384xf32>
    %184 = tpu.reciprocal %178 {approx = true} : vector<1x384xf32> -> vector<1x384xf32>
    %185 = vector.broadcast %184 : vector<1x384xf32> to vector<8x384xf32>
    %186 = arith.mulf %183, %185 : vector<8x384xf32>
    %c0_149 = arith.constant 0 : index
    %c0_150 = arith.constant 0 : index
    %187 = vector.load %arg12[%c0_149, %c0_150] : memref<8x8xbf16, #tpu.memory_space<vmem>>, vector<8x8xbf16>
    %188 = arith.truncf %186 : vector<8x384xf32> to vector<8x384xbf16>
    %cst_151 = arith.constant dense<0.000000e+00> : vector<8x384xf32>
    %189 = tpu.matmul %187, %188, %cst_151 {dimension_numbers = #tpu.dot_dimension_numbers<[1], [0], [0], [1], [0, 0, 1, 1], [], []>} : vector<8x8xbf16>, vector<8x384xbf16>, vector<8x384xf32> -> vector<8x384xf32>
    %c0_152 = arith.constant 0 : index
    %c0_153 = arith.constant 0 : index
    %190 = vector.load %arg13[%c0_152, %c0_153] : memref<8x1xf32, #tpu.memory_space<vmem>>, vector<8x1xf32>
    %191 = vector.broadcast %190 : vector<8x1xf32> to vector<8x384xf32>
    %192 = arith.addf %189, %191 : vector<8x384xf32>
    %193 = arith.addf %95, %192 : vector<8x384xf32>
    %194 = vector.broadcast %0 : vector<1x384xf32> to vector<8x384xf32>
    %195 = arith.mulf %193, %194 : vector<8x384xf32>
    %c0_154 = arith.constant 0 : index
    %c128_155 = arith.constant 128 : index
    %196 = vector.load %arg31[%c0_154, %c128_155] : memref<8x640xf32, #tpu.memory_space<vmem>>, vector<8x384xf32>
    tpu.vector_store %arg31[%c0_154, %c128_155], %195 {strides = array<i32>} : memref<8x640xf32, #tpu.memory_space<vmem>>, vector<8x384xf32>,
    %c0_156 = arith.constant 0 : index
    %c109_157 = arith.constant 109 : index
    %197 = vector.load %arg31[%c0_156, %c109_157] : memref<8x640xf32, #tpu.memory_space<vmem>>, vector<8x384xf32>
    %c0_158 = arith.constant 0 : index
    %c0_159 = arith.constant 0 : index
    %198 = vector.load %arg32[%c0_158, %c0_159] : memref<72x384xf32, #tpu.memory_space<vmem>>, vector<8x384xf32>
    tpu.vector_store %arg32[%c0_158, %c0_159], %197 {strides = array<i32>} : memref<72x384xf32, #tpu.memory_space<vmem>>, vector<8x384xf32>,
    %c0_160 = arith.constant 0 : index
    %c110_161 = arith.constant 110 : index
    %199 = vector.load %arg31[%c0_160, %c110_161] : memref<8x640xf32, #tpu.memory_space<vmem>>, vector<8x384xf32>
    %c8_162 = arith.constant 8 : index
    %c0_163 = arith.constant 0 : index
    %200 = vector.load %arg32[%c8_162, %c0_163] : memref<72x384xf32, #tpu.memory_space<vmem>>, vector<8x384xf32>
    tpu.vector_store %arg32[%c8_162, %c0_163], %199 {strides = array<i32>} : memref<72x384xf32, #tpu.memory_space<vmem>>, vector<8x384xf32>,
    %c0_164 = arith.constant 0 : index
    %c111_165 = arith.constant 111 : index
    %201 = vector.load %arg31[%c0_164, %c111_165] : memref<8x640xf32, #tpu.memory_space<vmem>>, vector<8x384xf32>
    %c16_166 = arith.constant 16 : index
    %c0_167 = arith.constant 0 : index
    %202 = vector.load %arg32[%c16_166, %c0_167] : memref<72x384xf32, #tpu.memory_space<vmem>>, vector<8x384xf32>
    tpu.vector_store %arg32[%c16_166, %c0_167], %201 {strides = array<i32>} : memref<72x384xf32, #tpu.memory_space<vmem>>, vector<8x384xf32>,
    %c0_168 = arith.constant 0 : index
    %c127_169 = arith.constant 127 : index
    %203 = vector.load %arg31[%c0_168, %c127_169] : memref<8x640xf32, #tpu.memory_space<vmem>>, vector<8x384xf32>
    %c24_170 = arith.constant 24 : index
    %c0_171 = arith.constant 0 : index
    %204 = vector.load %arg32[%c24_170, %c0_171] : memref<72x384xf32, #tpu.memory_space<vmem>>, vector<8x384xf32>
    tpu.vector_store %arg32[%c24_170, %c0_171], %203 {strides = array<i32>} : memref<72x384xf32, #tpu.memory_space<vmem>>, vector<8x384xf32>,
    %c0_172 = arith.constant 0 : index
    %c128_173 = arith.constant 128 : index
    %205 = vector.load %arg31[%c0_172, %c128_173] : memref<8x640xf32, #tpu.memory_space<vmem>>, vector<8x384xf32>
    %c32_174 = arith.constant 32 : index
    %c0_175 = arith.constant 0 : index
    %206 = vector.load %arg32[%c32_174, %c0_175] : memref<72x384xf32, #tpu.memory_space<vmem>>, vector<8x384xf32>
    tpu.vector_store %arg32[%c32_174, %c0_175], %205 {strides = array<i32>} : memref<72x384xf32, #tpu.memory_space<vmem>>, vector<8x384xf32>,
    %c0_176 = arith.constant 0 : index
    %c129_177 = arith.constant 129 : index
    %207 = vector.load %arg31[%c0_176, %c129_177] : memref<8x640xf32, #tpu.memory_space<vmem>>, vector<8x384xf32>
    %c40_178 = arith.constant 40 : index
    %c0_179 = arith.constant 0 : index
    %208 = vector.load %arg32[%c40_178, %c0_179] : memref<72x384xf32, #tpu.memory_space<vmem>>, vector<8x384xf32>
    tpu.vector_store %arg32[%c40_178, %c0_179], %207 {strides = array<i32>} : memref<72x384xf32, #tpu.memory_space<vmem>>, vector<8x384xf32>,
    %c0_180 = arith.constant 0 : index
    %c145_181 = arith.constant 145 : index
    %209 = vector.load %arg31[%c0_180, %c145_181] : memref<8x640xf32, #tpu.memory_space<vmem>>, vector<8x384xf32>
    %c48_182 = arith.constant 48 : index
    %c0_183 = arith.constant 0 : index
    %210 = vector.load %arg32[%c48_182, %c0_183] : memref<72x384xf32, #tpu.memory_space<vmem>>, vector<8x384xf32>
    tpu.vector_store %arg32[%c48_182, %c0_183], %209 {strides = array<i32>} : memref<72x384xf32, #tpu.memory_space<vmem>>, vector<8x384xf32>,
    %c0_184 = arith.constant 0 : index
    %c146_185 = arith.constant 146 : index
    %211 = vector.load %arg31[%c0_184, %c146_185] : memref<8x640xf32, #tpu.memory_space<vmem>>, vector<8x384xf32>
    %c56_186 = arith.constant 56 : index
    %c0_187 = arith.constant 0 : index
    %212 = vector.load %arg32[%c56_186, %c0_187] : memref<72x384xf32, #tpu.memory_space<vmem>>, vector<8x384xf32>
    tpu.vector_store %arg32[%c56_186, %c0_187], %211 {strides = array<i32>} : memref<72x384xf32, #tpu.memory_space<vmem>>, vector<8x384xf32>,
    %c0_188 = arith.constant 0 : index
    %c147_189 = arith.constant 147 : index
    %213 = vector.load %arg31[%c0_188, %c147_189] : memref<8x640xf32, #tpu.memory_space<vmem>>, vector<8x384xf32>
    %c64_190 = arith.constant 64 : index
    %c0_191 = arith.constant 0 : index
    %214 = vector.load %arg32[%c64_190, %c0_191] : memref<72x384xf32, #tpu.memory_space<vmem>>, vector<8x384xf32>
    tpu.vector_store %arg32[%c64_190, %c0_191], %213 {strides = array<i32>} : memref<72x384xf32, #tpu.memory_space<vmem>>, vector<8x384xf32>,
    %c0_192 = arith.constant 0 : index
    %c0_193 = arith.constant 0 : index
    %215 = vector.load %arg14[%c0_192, %c0_193] : memref<8x72xbf16, #tpu.memory_space<vmem>>, vector<8x72xbf16>
    %c0_194 = arith.constant 0 : index
    %c0_195 = arith.constant 0 : index
    %216 = vector.load %arg32[%c0_194, %c0_195] : memref<72x384xf32, #tpu.memory_space<vmem>>, vector<72x384xf32>
    %217 = arith.truncf %216 : vector<72x384xf32> to vector<72x384xbf16>
    %cst_196 = arith.constant dense<0.000000e+00> : vector<8x384xf32>
    %218 = tpu.matmul %215, %217, %cst_196 {dimension_numbers = #tpu.dot_dimension_numbers<[1], [0], [0], [1], [0, 0, 1, 1], [], []>} : vector<8x72xbf16>, vector<72x384xbf16>, vector<8x384xf32> -> vector<8x384xf32>
    %c0_197 = arith.constant 0 : index
    %c0_198 = arith.constant 0 : index
    %219 = vector.load %arg15[%c0_197, %c0_198] : memref<8x1xf32, #tpu.memory_space<vmem>>, vector<8x1xf32>
    %220 = vector.broadcast %219 : vector<8x1xf32> to vector<8x384xf32>
    %221 = arith.addf %218, %220 : vector<8x384xf32>
    %cst_199 = arith.constant 0.000000e+00 : f32
    %222 = vector.broadcast %cst_199 : f32 to vector<8x384xf32>
    %223 = arith.maximumf %221, %222 : vector<8x384xf32>
    %224 = vector.broadcast %0 : vector<1x384xf32> to vector<8x384xf32>
    %225 = arith.mulf %223, %224 : vector<8x384xf32>
    %c0_200 = arith.constant 0 : index
    %c128_201 = arith.constant 128 : index
    %226 = vector.load %arg31[%c0_200, %c128_201] : memref<8x640xf32, #tpu.memory_space<vmem>>, vector<8x384xf32>
    tpu.vector_store %arg31[%c0_200, %c128_201], %225 {strides = array<i32>} : memref<8x640xf32, #tpu.memory_space<vmem>>, vector<8x384xf32>,
    %c0_202 = arith.constant 0 : index
    %c109_203 = arith.constant 109 : index
    %227 = vector.load %arg31[%c0_202, %c109_203] : memref<8x640xf32, #tpu.memory_space<vmem>>, vector<8x384xf32>
    %c0_204 = arith.constant 0 : index
    %c0_205 = arith.constant 0 : index
    %228 = vector.load %arg32[%c0_204, %c0_205] : memref<72x384xf32, #tpu.memory_space<vmem>>, vector<8x384xf32>
    tpu.vector_store %arg32[%c0_204, %c0_205], %227 {strides = array<i32>} : memref<72x384xf32, #tpu.memory_space<vmem>>, vector<8x384xf32>,
    %c0_206 = arith.constant 0 : index
    %c110_207 = arith.constant 110 : index
    %229 = vector.load %arg31[%c0_206, %c110_207] : memref<8x640xf32, #tpu.memory_space<vmem>>, vector<8x384xf32>
    %c8_208 = arith.constant 8 : index
    %c0_209 = arith.constant 0 : index
    %230 = vector.load %arg32[%c8_208, %c0_209] : memref<72x384xf32, #tpu.memory_space<vmem>>, vector<8x384xf32>
    tpu.vector_store %arg32[%c8_208, %c0_209], %229 {strides = array<i32>} : memref<72x384xf32, #tpu.memory_space<vmem>>, vector<8x384xf32>,
    %c0_210 = arith.constant 0 : index
    %c111_211 = arith.constant 111 : index
    %231 = vector.load %arg31[%c0_210, %c111_211] : memref<8x640xf32, #tpu.memory_space<vmem>>, vector<8x384xf32>
    %c16_212 = arith.constant 16 : index
    %c0_213 = arith.constant 0 : index
    %232 = vector.load %arg32[%c16_212, %c0_213] : memref<72x384xf32, #tpu.memory_space<vmem>>, vector<8x384xf32>
    tpu.vector_store %arg32[%c16_212, %c0_213], %231 {strides = array<i32>} : memref<72x384xf32, #tpu.memory_space<vmem>>, vector<8x384xf32>,
    %c0_214 = arith.constant 0 : index
    %c127_215 = arith.constant 127 : index
    %233 = vector.load %arg31[%c0_214, %c127_215] : memref<8x640xf32, #tpu.memory_space<vmem>>, vector<8x384xf32>
    %c24_216 = arith.constant 24 : index
    %c0_217 = arith.constant 0 : index
    %234 = vector.load %arg32[%c24_216, %c0_217] : memref<72x384xf32, #tpu.memory_space<vmem>>, vector<8x384xf32>
    tpu.vector_store %arg32[%c24_216, %c0_217], %233 {strides = array<i32>} : memref<72x384xf32, #tpu.memory_space<vmem>>, vector<8x384xf32>,
    %c0_218 = arith.constant 0 : index
    %c128_219 = arith.constant 128 : index
    %235 = vector.load %arg31[%c0_218, %c128_219] : memref<8x640xf32, #tpu.memory_space<vmem>>, vector<8x384xf32>
    %c32_220 = arith.constant 32 : index
    %c0_221 = arith.constant 0 : index
    %236 = vector.load %arg32[%c32_220, %c0_221] : memref<72x384xf32, #tpu.memory_space<vmem>>, vector<8x384xf32>
    tpu.vector_store %arg32[%c32_220, %c0_221], %235 {strides = array<i32>} : memref<72x384xf32, #tpu.memory_space<vmem>>, vector<8x384xf32>,
    %c0_222 = arith.constant 0 : index
    %c129_223 = arith.constant 129 : index
    %237 = vector.load %arg31[%c0_222, %c129_223] : memref<8x640xf32, #tpu.memory_space<vmem>>, vector<8x384xf32>
    %c40_224 = arith.constant 40 : index
    %c0_225 = arith.constant 0 : index
    %238 = vector.load %arg32[%c40_224, %c0_225] : memref<72x384xf32, #tpu.memory_space<vmem>>, vector<8x384xf32>
    tpu.vector_store %arg32[%c40_224, %c0_225], %237 {strides = array<i32>} : memref<72x384xf32, #tpu.memory_space<vmem>>, vector<8x384xf32>,
    %c0_226 = arith.constant 0 : index
    %c145_227 = arith.constant 145 : index
    %239 = vector.load %arg31[%c0_226, %c145_227] : memref<8x640xf32, #tpu.memory_space<vmem>>, vector<8x384xf32>
    %c48_228 = arith.constant 48 : index
    %c0_229 = arith.constant 0 : index
    %240 = vector.load %arg32[%c48_228, %c0_229] : memref<72x384xf32, #tpu.memory_space<vmem>>, vector<8x384xf32>
    tpu.vector_store %arg32[%c48_228, %c0_229], %239 {strides = array<i32>} : memref<72x384xf32, #tpu.memory_space<vmem>>, vector<8x384xf32>,
    %c0_230 = arith.constant 0 : index
    %c146_231 = arith.constant 146 : index
    %241 = vector.load %arg31[%c0_230, %c146_231] : memref<8x640xf32, #tpu.memory_space<vmem>>, vector<8x384xf32>
    %c56_232 = arith.constant 56 : index
    %c0_233 = arith.constant 0 : index
    %242 = vector.load %arg32[%c56_232, %c0_233] : memref<72x384xf32, #tpu.memory_space<vmem>>, vector<8x384xf32>
    tpu.vector_store %arg32[%c56_232, %c0_233], %241 {strides = array<i32>} : memref<72x384xf32, #tpu.memory_space<vmem>>, vector<8x384xf32>,
    %c0_234 = arith.constant 0 : index
    %c147_235 = arith.constant 147 : index
    %243 = vector.load %arg31[%c0_234, %c147_235] : memref<8x640xf32, #tpu.memory_space<vmem>>, vector<8x384xf32>
    %c64_236 = arith.constant 64 : index
    %c0_237 = arith.constant 0 : index
    %244 = vector.load %arg32[%c64_236, %c0_237] : memref<72x384xf32, #tpu.memory_space<vmem>>, vector<8x384xf32>
    tpu.vector_store %arg32[%c64_236, %c0_237], %243 {strides = array<i32>} : memref<72x384xf32, #tpu.memory_space<vmem>>, vector<8x384xf32>,
    %c0_238 = arith.constant 0 : index
    %c0_239 = arith.constant 0 : index
    %245 = vector.load %arg16[%c0_238, %c0_239] : memref<8x72xbf16, #tpu.memory_space<vmem>>, vector<8x72xbf16>
    %c0_240 = arith.constant 0 : index
    %c0_241 = arith.constant 0 : index
    %246 = vector.load %arg32[%c0_240, %c0_241] : memref<72x384xf32, #tpu.memory_space<vmem>>, vector<72x384xf32>
    %247 = arith.truncf %246 : vector<72x384xf32> to vector<72x384xbf16>
    %cst_242 = arith.constant dense<0.000000e+00> : vector<8x384xf32>
    %248 = tpu.matmul %245, %247, %cst_242 {dimension_numbers = #tpu.dot_dimension_numbers<[1], [0], [0], [1], [0, 0, 1, 1], [], []>} : vector<8x72xbf16>, vector<72x384xbf16>, vector<8x384xf32> -> vector<8x384xf32>
    %c0_243 = arith.constant 0 : index
    %c0_244 = arith.constant 0 : index
    %249 = vector.load %arg17[%c0_243, %c0_244] : memref<8x1xf32, #tpu.memory_space<vmem>>, vector<8x1xf32>
    %250 = vector.broadcast %249 : vector<8x1xf32> to vector<8x384xf32>
    %251 = arith.addf %248, %250 : vector<8x384xf32>
    %cst_245 = arith.constant 0.000000e+00 : f32
    %252 = vector.broadcast %cst_245 : f32 to vector<8x384xf32>
    %253 = arith.maximumf %251, %252 : vector<8x384xf32>
    %254 = vector.broadcast %0 : vector<1x384xf32> to vector<8x384xf32>
    %255 = arith.mulf %253, %254 : vector<8x384xf32>
    %c0_246 = arith.constant 0 : index
    %c128_247 = arith.constant 128 : index
    %256 = vector.load %arg31[%c0_246, %c128_247] : memref<8x640xf32, #tpu.memory_space<vmem>>, vector<8x384xf32>
    tpu.vector_store %arg31[%c0_246, %c128_247], %255 {strides = array<i32>} : memref<8x640xf32, #tpu.memory_space<vmem>>, vector<8x384xf32>,
    %c0_248 = arith.constant 0 : index
    %c109_249 = arith.constant 109 : index
    %257 = vector.load %arg31[%c0_248, %c109_249] : memref<8x640xf32, #tpu.memory_space<vmem>>, vector<8x384xf32>
    %c0_250 = arith.constant 0 : index
    %c0_251 = arith.constant 0 : index
    %258 = vector.load %arg32[%c0_250, %c0_251] : memref<72x384xf32, #tpu.memory_space<vmem>>, vector<8x384xf32>
    tpu.vector_store %arg32[%c0_250, %c0_251], %257 {strides = array<i32>} : memref<72x384xf32, #tpu.memory_space<vmem>>, vector<8x384xf32>,
    %c0_252 = arith.constant 0 : index
    %c110_253 = arith.constant 110 : index
    %259 = vector.load %arg31[%c0_252, %c110_253] : memref<8x640xf32, #tpu.memory_space<vmem>>, vector<8x384xf32>
    %c8_254 = arith.constant 8 : index
    %c0_255 = arith.constant 0 : index
    %260 = vector.load %arg32[%c8_254, %c0_255] : memref<72x384xf32, #tpu.memory_space<vmem>>, vector<8x384xf32>
    tpu.vector_store %arg32[%c8_254, %c0_255], %259 {strides = array<i32>} : memref<72x384xf32, #tpu.memory_space<vmem>>, vector<8x384xf32>,
    %c0_256 = arith.constant 0 : index
    %c111_257 = arith.constant 111 : index
    %261 = vector.load %arg31[%c0_256, %c111_257] : memref<8x640xf32, #tpu.memory_space<vmem>>, vector<8x384xf32>
    %c16_258 = arith.constant 16 : index
    %c0_259 = arith.constant 0 : index
    %262 = vector.load %arg32[%c16_258, %c0_259] : memref<72x384xf32, #tpu.memory_space<vmem>>, vector<8x384xf32>
    tpu.vector_store %arg32[%c16_258, %c0_259], %261 {strides = array<i32>} : memref<72x384xf32, #tpu.memory_space<vmem>>, vector<8x384xf32>,
    %c0_260 = arith.constant 0 : index
    %c127_261 = arith.constant 127 : index
    %263 = vector.load %arg31[%c0_260, %c127_261] : memref<8x640xf32, #tpu.memory_space<vmem>>, vector<8x384xf32>
    %c24_262 = arith.constant 24 : index
    %c0_263 = arith.constant 0 : index
    %264 = vector.load %arg32[%c24_262, %c0_263] : memref<72x384xf32, #tpu.memory_space<vmem>>, vector<8x384xf32>
    tpu.vector_store %arg32[%c24_262, %c0_263], %263 {strides = array<i32>} : memref<72x384xf32, #tpu.memory_space<vmem>>, vector<8x384xf32>,
    %c0_264 = arith.constant 0 : index
    %c128_265 = arith.constant 128 : index
    %265 = vector.load %arg31[%c0_264, %c128_265] : memref<8x640xf32, #tpu.memory_space<vmem>>, vector<8x384xf32>
    %c32_266 = arith.constant 32 : index
    %c0_267 = arith.constant 0 : index
    %266 = vector.load %arg32[%c32_266, %c0_267] : memref<72x384xf32, #tpu.memory_space<vmem>>, vector<8x384xf32>
    tpu.vector_store %arg32[%c32_266, %c0_267], %265 {strides = array<i32>} : memref<72x384xf32, #tpu.memory_space<vmem>>, vector<8x384xf32>,
    %c0_268 = arith.constant 0 : index
    %c129_269 = arith.constant 129 : index
    %267 = vector.load %arg31[%c0_268, %c129_269] : memref<8x640xf32, #tpu.memory_space<vmem>>, vector<8x384xf32>
    %c40_270 = arith.constant 40 : index
    %c0_271 = arith.constant 0 : index
    %268 = vector.load %arg32[%c40_270, %c0_271] : memref<72x384xf32, #tpu.memory_space<vmem>>, vector<8x384xf32>
    tpu.vector_store %arg32[%c40_270, %c0_271], %267 {strides = array<i32>} : memref<72x384xf32, #tpu.memory_space<vmem>>, vector<8x384xf32>,
    %c0_272 = arith.constant 0 : index
    %c145_273 = arith.constant 145 : index
    %269 = vector.load %arg31[%c0_272, %c145_273] : memref<8x640xf32, #tpu.memory_space<vmem>>, vector<8x384xf32>
    %c48_274 = arith.constant 48 : index
    %c0_275 = arith.constant 0 : index
    %270 = vector.load %arg32[%c48_274, %c0_275] : memref<72x384xf32, #tpu.memory_space<vmem>>, vector<8x384xf32>
    tpu.vector_store %arg32[%c48_274, %c0_275], %269 {strides = array<i32>} : memref<72x384xf32, #tpu.memory_space<vmem>>, vector<8x384xf32>,
    %c0_276 = arith.constant 0 : index
    %c146_277 = arith.constant 146 : index
    %271 = vector.load %arg31[%c0_276, %c146_277] : memref<8x640xf32, #tpu.memory_space<vmem>>, vector<8x384xf32>
    %c56_278 = arith.constant 56 : index
    %c0_279 = arith.constant 0 : index
    %272 = vector.load %arg32[%c56_278, %c0_279] : memref<72x384xf32, #tpu.memory_space<vmem>>, vector<8x384xf32>
    tpu.vector_store %arg32[%c56_278, %c0_279], %271 {strides = array<i32>} : memref<72x384xf32, #tpu.memory_space<vmem>>, vector<8x384xf32>,
    %c0_280 = arith.constant 0 : index
    %c147_281 = arith.constant 147 : index
    %273 = vector.load %arg31[%c0_280, %c147_281] : memref<8x640xf32, #tpu.memory_space<vmem>>, vector<8x384xf32>
    %c64_282 = arith.constant 64 : index
    %c0_283 = arith.constant 0 : index
    %274 = vector.load %arg32[%c64_282, %c0_283] : memref<72x384xf32, #tpu.memory_space<vmem>>, vector<8x384xf32>
    tpu.vector_store %arg32[%c64_282, %c0_283], %273 {strides = array<i32>} : memref<72x384xf32, #tpu.memory_space<vmem>>, vector<8x384xf32>,
    %c0_284 = arith.constant 0 : index
    %c0_285 = arith.constant 0 : index
    %275 = vector.load %arg18[%c0_284, %c0_285] : memref<8x72xbf16, #tpu.memory_space<vmem>>, vector<8x72xbf16>
    %c0_286 = arith.constant 0 : index
    %c0_287 = arith.constant 0 : index
    %276 = vector.load %arg32[%c0_286, %c0_287] : memref<72x384xf32, #tpu.memory_space<vmem>>, vector<72x384xf32>
    %277 = arith.truncf %276 : vector<72x384xf32> to vector<72x384xbf16>
    %cst_288 = arith.constant dense<0.000000e+00> : vector<8x384xf32>
    %278 = tpu.matmul %275, %277, %cst_288 {dimension_numbers = #tpu.dot_dimension_numbers<[1], [0], [0], [1], [0, 0, 1, 1], [], []>} : vector<8x72xbf16>, vector<72x384xbf16>, vector<8x384xf32> -> vector<8x384xf32>
    %c0_289 = arith.constant 0 : index
    %c0_290 = arith.constant 0 : index
    %279 = vector.load %arg19[%c0_289, %c0_290] : memref<8x1xf32, #tpu.memory_space<vmem>>, vector<8x1xf32>
    %280 = vector.broadcast %279 : vector<8x1xf32> to vector<8x384xf32>
    %281 = arith.addf %278, %280 : vector<8x384xf32>
    %282 = vector.broadcast %0 : vector<1x384xf32> to vector<8x384xf32>
    %283 = arith.mulf %281, %282 : vector<8x384xf32>
    %284 = arith.addf %283, %195 : vector<8x384xf32>
    %c0_291 = arith.constant 0 : index
    %c0_292 = arith.constant 0 : index
    %285 = vector.load %arg20[%c0_291, %c0_292] : memref<24x8xbf16, #tpu.memory_space<vmem>>, vector<24x8xbf16>
    %286 = arith.truncf %284 : vector<8x384xf32> to vector<8x384xbf16>
    %cst_293 = arith.constant dense<0.000000e+00> : vector<24x384xf32>
    %287 = tpu.matmul %285, %286, %cst_293 {dimension_numbers = #tpu.dot_dimension_numbers<[1], [0], [0], [1], [0, 0, 1, 1], [], []>} : vector<24x8xbf16>, vector<8x384xbf16>, vector<24x384xf32> -> vector<24x384xf32>
    %c0_294 = arith.constant 0 : index
    %c0_295 = arith.constant 0 : index
    %288 = vector.load %arg21[%c0_294, %c0_295] : memref<24x1xf32, #tpu.memory_space<vmem>>, vector<24x1xf32>
    %289 = vector.broadcast %288 : vector<24x1xf32> to vector<24x384xf32>
    %290 = arith.addf %287, %289 : vector<24x384xf32>
    %291 = vector.extract_strided_slice %290 {offsets = [0, 0], sizes = [8, 384], strides = [1, 1]} : vector<24x384xf32> to vector<8x384xf32>
    %292 = arith.truncf %291 : vector<8x384xf32> to vector<8x384xbf16>
    %293 = vector.extract_strided_slice %290 {offsets = [8, 0], sizes = [8, 384], strides = [1, 1]} : vector<24x384xf32> to vector<8x384xf32>
    %294 = vector.extract_strided_slice %290 {offsets = [16, 0], sizes = [8, 384], strides = [1, 1]} : vector<24x384xf32> to vector<8x384xf32>
    %cst_296 = arith.constant -1.000000e+30 : f32
    %295 = vector.broadcast %cst_296 : f32 to vector<1x384xf32>
    %cst_297 = arith.constant 0.000000e+00 : f32
    %296 = vector.broadcast %cst_297 : f32 to vector<1x384xf32>
    %cst_298 = arith.constant 0.000000e+00 : f32
    %297 = vector.broadcast %cst_298 : f32 to vector<8x384xf32>
    %298 = vector.extract_strided_slice %293 {offsets = [0, 0], sizes = [8, 128], strides = [1, 1]} : vector<8x384xf32> to vector<8x128xf32>
    %299 = arith.truncf %298 : vector<8x128xf32> to vector<8x128xbf16>
    %300 = vector.extract_strided_slice %294 {offsets = [0, 0], sizes = [8, 128], strides = [1, 1]} : vector<8x384xf32> to vector<8x128xf32>
    %301 = arith.truncf %300 : vector<8x128xf32> to vector<8x128xbf16>
    %302 = vector.extract_strided_slice %1 {offsets = [0, 0], sizes = [128, 1], strides = [1, 1]} : vector<384x1xf32> to vector<128x1xf32>
    %cst_299 = arith.constant dense<0.000000e+00> : vector<128x384xf32>
    %303 = tpu.matmul %299, %292, %cst_299 {dimension_numbers = #tpu.dot_dimension_numbers<[0], [0], [1], [1], [0, 1, 1, 1], [], []>} : vector<8x128xbf16>, vector<8x384xbf16>, vector<128x384xf32> -> vector<128x384xf32>
    %cst_300 = arith.constant dense<0xFF800000> : vector<384xf32>
    %304 = vector.multi_reduction <maximumf>, %303, %cst_300 [0] : vector<128x384xf32> to vector<384xf32>
    %305 = vector.shape_cast %304 : vector<384xf32> to vector<1x384xf32>
    %306 = arith.maximumf %295, %305 : vector<1x384xf32>
    %307 = arith.subf %295, %306 : vector<1x384xf32>
    %308 = math.exp %307 : vector<1x384xf32>
    %309 = vector.broadcast %306 : vector<1x384xf32> to vector<128x384xf32>
    %310 = arith.subf %303, %309 : vector<128x384xf32>
    %311 = math.exp %310 : vector<128x384xf32>
    %312 = vector.broadcast %302 : vector<128x1xf32> to vector<128x384xf32>
    %313 = arith.mulf %311, %312 : vector<128x384xf32>
    %314 = arith.mulf %308, %296 : vector<1x384xf32>
    %cst_301 = arith.constant dense<0.000000e+00> : vector<384xf32>
    %315 = vector.multi_reduction <add>, %313, %cst_301 [0] : vector<128x384xf32> to vector<384xf32>
    %316 = vector.shape_cast %315 : vector<384xf32> to vector<1x384xf32>
    %317 = arith.addf %314, %316 : vector<1x384xf32>
    %318 = vector.broadcast %308 : vector<1x384xf32> to vector<8x384xf32>
    %319 = arith.mulf %318, %297 : vector<8x384xf32>
    %320 = arith.truncf %313 : vector<128x384xf32> to vector<128x384xbf16>
    %cst_302 = arith.constant dense<0.000000e+00> : vector<8x384xf32>
    %321 = tpu.matmul %301, %320, %cst_302 {dimension_numbers = #tpu.dot_dimension_numbers<[1], [0], [0], [1], [0, 0, 1, 1], [], []>} : vector<8x128xbf16>, vector<128x384xbf16>, vector<8x384xf32> -> vector<8x384xf32>
    %322 = arith.addf %319, %321 : vector<8x384xf32>
    %323 = vector.extract_strided_slice %293 {offsets = [0, 128], sizes = [8, 128], strides = [1, 1]} : vector<8x384xf32> to vector<8x128xf32>
    %324 = arith.truncf %323 : vector<8x128xf32> to vector<8x128xbf16>
    %325 = vector.extract_strided_slice %294 {offsets = [0, 128], sizes = [8, 128], strides = [1, 1]} : vector<8x384xf32> to vector<8x128xf32>
    %326 = arith.truncf %325 : vector<8x128xf32> to vector<8x128xbf16>
    %327 = vector.extract_strided_slice %1 {offsets = [128, 0], sizes = [128, 1], strides = [1, 1]} : vector<384x1xf32> to vector<128x1xf32>
    %cst_303 = arith.constant dense<0.000000e+00> : vector<128x384xf32>
    %328 = tpu.matmul %324, %292, %cst_303 {dimension_numbers = #tpu.dot_dimension_numbers<[0], [0], [1], [1], [0, 1, 1, 1], [], []>} : vector<8x128xbf16>, vector<8x384xbf16>, vector<128x384xf32> -> vector<128x384xf32>
    %cst_304 = arith.constant dense<0xFF800000> : vector<384xf32>
    %329 = vector.multi_reduction <maximumf>, %328, %cst_304 [0] : vector<128x384xf32> to vector<384xf32>
    %330 = vector.shape_cast %329 : vector<384xf32> to vector<1x384xf32>
    %331 = arith.maximumf %306, %330 : vector<1x384xf32>
    %332 = arith.subf %306, %331 : vector<1x384xf32>
    %333 = math.exp %332 : vector<1x384xf32>
    %334 = vector.broadcast %331 : vector<1x384xf32> to vector<128x384xf32>
    %335 = arith.subf %328, %334 : vector<128x384xf32>
    %336 = math.exp %335 : vector<128x384xf32>
    %337 = vector.broadcast %327 : vector<128x1xf32> to vector<128x384xf32>
    %338 = arith.mulf %336, %337 : vector<128x384xf32>
    %339 = arith.mulf %333, %317 : vector<1x384xf32>
    %cst_305 = arith.constant dense<0.000000e+00> : vector<384xf32>
    %340 = vector.multi_reduction <add>, %338, %cst_305 [0] : vector<128x384xf32> to vector<384xf32>
    %341 = vector.shape_cast %340 : vector<384xf32> to vector<1x384xf32>
    %342 = arith.addf %339, %341 : vector<1x384xf32>
    %343 = vector.broadcast %333 : vector<1x384xf32> to vector<8x384xf32>
    %344 = arith.mulf %343, %322 : vector<8x384xf32>
    %345 = arith.truncf %338 : vector<128x384xf32> to vector<128x384xbf16>
    %cst_306 = arith.constant dense<0.000000e+00> : vector<8x384xf32>
    %346 = tpu.matmul %326, %345, %cst_306 {dimension_numbers = #tpu.dot_dimension_numbers<[1], [0], [0], [1], [0, 0, 1, 1], [], []>} : vector<8x128xbf16>, vector<128x384xbf16>, vector<8x384xf32> -> vector<8x384xf32>
    %347 = arith.addf %344, %346 : vector<8x384xf32>
    %348 = vector.extract_strided_slice %293 {offsets = [0, 256], sizes = [8, 128], strides = [1, 1]} : vector<8x384xf32> to vector<8x128xf32>
    %349 = arith.truncf %348 : vector<8x128xf32> to vector<8x128xbf16>
    %350 = vector.extract_strided_slice %294 {offsets = [0, 256], sizes = [8, 128], strides = [1, 1]} : vector<8x384xf32> to vector<8x128xf32>
    %351 = arith.truncf %350 : vector<8x128xf32> to vector<8x128xbf16>
    %352 = vector.extract_strided_slice %1 {offsets = [256, 0], sizes = [128, 1], strides = [1, 1]} : vector<384x1xf32> to vector<128x1xf32>
    %cst_307 = arith.constant dense<0.000000e+00> : vector<128x384xf32>
    %353 = tpu.matmul %349, %292, %cst_307 {dimension_numbers = #tpu.dot_dimension_numbers<[0], [0], [1], [1], [0, 1, 1, 1], [], []>} : vector<8x128xbf16>, vector<8x384xbf16>, vector<128x384xf32> -> vector<128x384xf32>
    %cst_308 = arith.constant dense<0xFF800000> : vector<384xf32>
    %354 = vector.multi_reduction <maximumf>, %353, %cst_308 [0] : vector<128x384xf32> to vector<384xf32>
    %355 = vector.shape_cast %354 : vector<384xf32> to vector<1x384xf32>
    %356 = arith.maximumf %331, %355 : vector<1x384xf32>
    %357 = arith.subf %331, %356 : vector<1x384xf32>
    %358 = math.exp %357 : vector<1x384xf32>
    %359 = vector.broadcast %356 : vector<1x384xf32> to vector<128x384xf32>
    %360 = arith.subf %353, %359 : vector<128x384xf32>
    %361 = math.exp %360 : vector<128x384xf32>
    %362 = vector.broadcast %352 : vector<128x1xf32> to vector<128x384xf32>
    %363 = arith.mulf %361, %362 : vector<128x384xf32>
    %364 = arith.mulf %358, %342 : vector<1x384xf32>
    %cst_309 = arith.constant dense<0.000000e+00> : vector<384xf32>
    %365 = vector.multi_reduction <add>, %363, %cst_309 [0] : vector<128x384xf32> to vector<384xf32>
    %366 = vector.shape_cast %365 : vector<384xf32> to vector<1x384xf32>
    %367 = arith.addf %364, %366 : vector<1x384xf32>
    %368 = vector.broadcast %358 : vector<1x384xf32> to vector<8x384xf32>
    %369 = arith.mulf %368, %347 : vector<8x384xf32>
    %370 = arith.truncf %363 : vector<128x384xf32> to vector<128x384xbf16>
    %cst_310 = arith.constant dense<0.000000e+00> : vector<8x384xf32>
    %371 = tpu.matmul %351, %370, %cst_310 {dimension_numbers = #tpu.dot_dimension_numbers<[1], [0], [0], [1], [0, 0, 1, 1], [], []>} : vector<8x128xbf16>, vector<128x384xbf16>, vector<8x384xf32> -> vector<8x384xf32>
    %372 = arith.addf %369, %371 : vector<8x384xf32>
    %373 = tpu.reciprocal %367 {approx = true} : vector<1x384xf32> -> vector<1x384xf32>
    %374 = vector.broadcast %373 : vector<1x384xf32> to vector<8x384xf32>
    %375 = arith.mulf %372, %374 : vector<8x384xf32>
    %c0_311 = arith.constant 0 : index
    %c0_312 = arith.constant 0 : index
    %376 = vector.load %arg22[%c0_311, %c0_312] : memref<8x8xbf16, #tpu.memory_space<vmem>>, vector<8x8xbf16>
    %377 = arith.truncf %375 : vector<8x384xf32> to vector<8x384xbf16>
    %cst_313 = arith.constant dense<0.000000e+00> : vector<8x384xf32>
    %378 = tpu.matmul %376, %377, %cst_313 {dimension_numbers = #tpu.dot_dimension_numbers<[1], [0], [0], [1], [0, 0, 1, 1], [], []>} : vector<8x8xbf16>, vector<8x384xbf16>, vector<8x384xf32> -> vector<8x384xf32>
    %c0_314 = arith.constant 0 : index
    %c0_315 = arith.constant 0 : index
    %379 = vector.load %arg23[%c0_314, %c0_315] : memref<8x1xf32, #tpu.memory_space<vmem>>, vector<8x1xf32>
    %380 = vector.broadcast %379 : vector<8x1xf32> to vector<8x384xf32>
    %381 = arith.addf %378, %380 : vector<8x384xf32>
    %382 = arith.addf %284, %381 : vector<8x384xf32>
    %383 = vector.broadcast %0 : vector<1x384xf32> to vector<8x384xf32>
    %384 = arith.mulf %382, %383 : vector<8x384xf32>
    %c0_316 = arith.constant 0 : index
    %c128_317 = arith.constant 128 : index
    %385 = vector.load %arg31[%c0_316, %c128_317] : memref<8x640xf32, #tpu.memory_space<vmem>>, vector<8x384xf32>
    tpu.vector_store %arg31[%c0_316, %c128_317], %384 {strides = array<i32>} : memref<8x640xf32, #tpu.memory_space<vmem>>, vector<8x384xf32>,
    %c0_318 = arith.constant 0 : index
    %c109_319 = arith.constant 109 : index
    %386 = vector.load %arg31[%c0_318, %c109_319] : memref<8x640xf32, #tpu.memory_space<vmem>>, vector<8x384xf32>
    %c0_320 = arith.constant 0 : index
    %c0_321 = arith.constant 0 : index
    %387 = vector.load %arg32[%c0_320, %c0_321] : memref<72x384xf32, #tpu.memory_space<vmem>>, vector<8x384xf32>
    tpu.vector_store %arg32[%c0_320, %c0_321], %386 {strides = array<i32>} : memref<72x384xf32, #tpu.memory_space<vmem>>, vector<8x384xf32>,
    %c0_322 = arith.constant 0 : index
    %c110_323 = arith.constant 110 : index
    %388 = vector.load %arg31[%c0_322, %c110_323] : memref<8x640xf32, #tpu.memory_space<vmem>>, vector<8x384xf32>
    %c8_324 = arith.constant 8 : index
    %c0_325 = arith.constant 0 : index
    %389 = vector.load %arg32[%c8_324, %c0_325] : memref<72x384xf32, #tpu.memory_space<vmem>>, vector<8x384xf32>
    tpu.vector_store %arg32[%c8_324, %c0_325], %388 {strides = array<i32>} : memref<72x384xf32, #tpu.memory_space<vmem>>, vector<8x384xf32>,
    %c0_326 = arith.constant 0 : index
    %c111_327 = arith.constant 111 : index
    %390 = vector.load %arg31[%c0_326, %c111_327] : memref<8x640xf32, #tpu.memory_space<vmem>>, vector<8x384xf32>
    %c16_328 = arith.constant 16 : index
    %c0_329 = arith.constant 0 : index
    %391 = vector.load %arg32[%c16_328, %c0_329] : memref<72x384xf32, #tpu.memory_space<vmem>>, vector<8x384xf32>
    tpu.vector_store %arg32[%c16_328, %c0_329], %390 {strides = array<i32>} : memref<72x384xf32, #tpu.memory_space<vmem>>, vector<8x384xf32>,
    %c0_330 = arith.constant 0 : index
    %c127_331 = arith.constant 127 : index
    %392 = vector.load %arg31[%c0_330, %c127_331] : memref<8x640xf32, #tpu.memory_space<vmem>>, vector<8x384xf32>
    %c24_332 = arith.constant 24 : index
    %c0_333 = arith.constant 0 : index
    %393 = vector.load %arg32[%c24_332, %c0_333] : memref<72x384xf32, #tpu.memory_space<vmem>>, vector<8x384xf32>
    tpu.vector_store %arg32[%c24_332, %c0_333], %392 {strides = array<i32>} : memref<72x384xf32, #tpu.memory_space<vmem>>, vector<8x384xf32>,
    %c0_334 = arith.constant 0 : index
    %c128_335 = arith.constant 128 : index
    %394 = vector.load %arg31[%c0_334, %c128_335] : memref<8x640xf32, #tpu.memory_space<vmem>>, vector<8x384xf32>
    %c32_336 = arith.constant 32 : index
    %c0_337 = arith.constant 0 : index
    %395 = vector.load %arg32[%c32_336, %c0_337] : memref<72x384xf32, #tpu.memory_space<vmem>>, vector<8x384xf32>
    tpu.vector_store %arg32[%c32_336, %c0_337], %394 {strides = array<i32>} : memref<72x384xf32, #tpu.memory_space<vmem>>, vector<8x384xf32>,
    %c0_338 = arith.constant 0 : index
    %c129_339 = arith.constant 129 : index
    %396 = vector.load %arg31[%c0_338, %c129_339] : memref<8x640xf32, #tpu.memory_space<vmem>>, vector<8x384xf32>
    %c40_340 = arith.constant 40 : index
    %c0_341 = arith.constant 0 : index
    %397 = vector.load %arg32[%c40_340, %c0_341] : memref<72x384xf32, #tpu.memory_space<vmem>>, vector<8x384xf32>
    tpu.vector_store %arg32[%c40_340, %c0_341], %396 {strides = array<i32>} : memref<72x384xf32, #tpu.memory_space<vmem>>, vector<8x384xf32>,
    %c0_342 = arith.constant 0 : index
    %c145_343 = arith.constant 145 : index
    %398 = vector.load %arg31[%c0_342, %c145_343] : memref<8x640xf32, #tpu.memory_space<vmem>>, vector<8x384xf32>
    %c48_344 = arith.constant 48 : index
    %c0_345 = arith.constant 0 : index
    %399 = vector.load %arg32[%c48_344, %c0_345] : memref<72x384xf32, #tpu.memory_space<vmem>>, vector<8x384xf32>
    tpu.vector_store %arg32[%c48_344, %c0_345], %398 {strides = array<i32>} : memref<72x384xf32, #tpu.memory_space<vmem>>, vector<8x384xf32>,
    %c0_346 = arith.constant 0 : index
    %c146_347 = arith.constant 146 : index
    %400 = vector.load %arg31[%c0_346, %c146_347] : memref<8x640xf32, #tpu.memory_space<vmem>>, vector<8x384xf32>
    %c56_348 = arith.constant 56 : index
    %c0_349 = arith.constant 0 : index
    %401 = vector.load %arg32[%c56_348, %c0_349] : memref<72x384xf32, #tpu.memory_space<vmem>>, vector<8x384xf32>
    tpu.vector_store %arg32[%c56_348, %c0_349], %400 {strides = array<i32>} : memref<72x384xf32, #tpu.memory_space<vmem>>, vector<8x384xf32>,
    %c0_350 = arith.constant 0 : index
    %c147_351 = arith.constant 147 : index
    %402 = vector.load %arg31[%c0_350, %c147_351] : memref<8x640xf32, #tpu.memory_space<vmem>>, vector<8x384xf32>
    %c64_352 = arith.constant 64 : index
    %c0_353 = arith.constant 0 : index
    %403 = vector.load %arg32[%c64_352, %c0_353] : memref<72x384xf32, #tpu.memory_space<vmem>>, vector<8x384xf32>
    tpu.vector_store %arg32[%c64_352, %c0_353], %402 {strides = array<i32>} : memref<72x384xf32, #tpu.memory_space<vmem>>, vector<8x384xf32>,
    %c0_354 = arith.constant 0 : index
    %c0_355 = arith.constant 0 : index
    %404 = vector.load %arg24[%c0_354, %c0_355] : memref<8x72xbf16, #tpu.memory_space<vmem>>, vector<8x72xbf16>
    %c0_356 = arith.constant 0 : index
    %c0_357 = arith.constant 0 : index
    %405 = vector.load %arg32[%c0_356, %c0_357] : memref<72x384xf32, #tpu.memory_space<vmem>>, vector<72x384xf32>
    %406 = arith.truncf %405 : vector<72x384xf32> to vector<72x384xbf16>
    %cst_358 = arith.constant dense<0.000000e+00> : vector<8x384xf32>
    %407 = tpu.matmul %404, %406, %cst_358 {dimension_numbers = #tpu.dot_dimension_numbers<[1], [0], [0], [1], [0, 0, 1, 1], [], []>} : vector<8x72xbf16>, vector<72x384xbf16>, vector<8x384xf32> -> vector<8x384xf32>
    %c0_359 = arith.constant 0 : index
    %c0_360 = arith.constant 0 : index
    %408 = vector.load %arg25[%c0_359, %c0_360] : memref<8x1xf32, #tpu.memory_space<vmem>>, vector<8x1xf32>
    %409 = vector.broadcast %408 : vector<8x1xf32> to vector<8x384xf32>
    %410 = arith.addf %407, %409 : vector<8x384xf32>
    %cst_361 = arith.constant 0.000000e+00 : f32
    %411 = vector.broadcast %cst_361 : f32 to vector<8x384xf32>
    %412 = arith.maximumf %410, %411 : vector<8x384xf32>
    %413 = vector.broadcast %0 : vector<1x384xf32> to vector<8x384xf32>
    %414 = arith.mulf %412, %413 : vector<8x384xf32>
    %c0_362 = arith.constant 0 : index
    %c128_363 = arith.constant 128 : index
    %415 = vector.load %arg31[%c0_362, %c128_363] : memref<8x640xf32, #tpu.memory_space<vmem>>, vector<8x384xf32>
    tpu.vector_store %arg31[%c0_362, %c128_363], %414 {strides = array<i32>} : memref<8x640xf32, #tpu.memory_space<vmem>>, vector<8x384xf32>,
    %c0_364 = arith.constant 0 : index
    %c109_365 = arith.constant 109 : index
    %416 = vector.load %arg31[%c0_364, %c109_365] : memref<8x640xf32, #tpu.memory_space<vmem>>, vector<8x384xf32>
    %c0_366 = arith.constant 0 : index
    %c0_367 = arith.constant 0 : index
    %417 = vector.load %arg32[%c0_366, %c0_367] : memref<72x384xf32, #tpu.memory_space<vmem>>, vector<8x384xf32>
    tpu.vector_store %arg32[%c0_366, %c0_367], %416 {strides = array<i32>} : memref<72x384xf32, #tpu.memory_space<vmem>>, vector<8x384xf32>,
    %c0_368 = arith.constant 0 : index
    %c110_369 = arith.constant 110 : index
    %418 = vector.load %arg31[%c0_368, %c110_369] : memref<8x640xf32, #tpu.memory_space<vmem>>, vector<8x384xf32>
    %c8_370 = arith.constant 8 : index
    %c0_371 = arith.constant 0 : index
    %419 = vector.load %arg32[%c8_370, %c0_371] : memref<72x384xf32, #tpu.memory_space<vmem>>, vector<8x384xf32>
    tpu.vector_store %arg32[%c8_370, %c0_371], %418 {strides = array<i32>} : memref<72x384xf32, #tpu.memory_space<vmem>>, vector<8x384xf32>,
    %c0_372 = arith.constant 0 : index
    %c111_373 = arith.constant 111 : index
    %420 = vector.load %arg31[%c0_372, %c111_373] : memref<8x640xf32, #tpu.memory_space<vmem>>, vector<8x384xf32>
    %c16_374 = arith.constant 16 : index
    %c0_375 = arith.constant 0 : index
    %421 = vector.load %arg32[%c16_374, %c0_375] : memref<72x384xf32, #tpu.memory_space<vmem>>, vector<8x384xf32>
    tpu.vector_store %arg32[%c16_374, %c0_375], %420 {strides = array<i32>} : memref<72x384xf32, #tpu.memory_space<vmem>>, vector<8x384xf32>,
    %c0_376 = arith.constant 0 : index
    %c127_377 = arith.constant 127 : index
    %422 = vector.load %arg31[%c0_376, %c127_377] : memref<8x640xf32, #tpu.memory_space<vmem>>, vector<8x384xf32>
    %c24_378 = arith.constant 24 : index
    %c0_379 = arith.constant 0 : index
    %423 = vector.load %arg32[%c24_378, %c0_379] : memref<72x384xf32, #tpu.memory_space<vmem>>, vector<8x384xf32>
    tpu.vector_store %arg32[%c24_378, %c0_379], %422 {strides = array<i32>} : memref<72x384xf32, #tpu.memory_space<vmem>>, vector<8x384xf32>,
    %c0_380 = arith.constant 0 : index
    %c128_381 = arith.constant 128 : index
    %424 = vector.load %arg31[%c0_380, %c128_381] : memref<8x640xf32, #tpu.memory_space<vmem>>, vector<8x384xf32>
    %c32_382 = arith.constant 32 : index
    %c0_383 = arith.constant 0 : index
    %425 = vector.load %arg32[%c32_382, %c0_383] : memref<72x384xf32, #tpu.memory_space<vmem>>, vector<8x384xf32>
    tpu.vector_store %arg32[%c32_382, %c0_383], %424 {strides = array<i32>} : memref<72x384xf32, #tpu.memory_space<vmem>>, vector<8x384xf32>,
    %c0_384 = arith.constant 0 : index
    %c129_385 = arith.constant 129 : index
    %426 = vector.load %arg31[%c0_384, %c129_385] : memref<8x640xf32, #tpu.memory_space<vmem>>, vector<8x384xf32>
    %c40_386 = arith.constant 40 : index
    %c0_387 = arith.constant 0 : index
    %427 = vector.load %arg32[%c40_386, %c0_387] : memref<72x384xf32, #tpu.memory_space<vmem>>, vector<8x384xf32>
    tpu.vector_store %arg32[%c40_386, %c0_387], %426 {strides = array<i32>} : memref<72x384xf32, #tpu.memory_space<vmem>>, vector<8x384xf32>,
    %c0_388 = arith.constant 0 : index
    %c145_389 = arith.constant 145 : index
    %428 = vector.load %arg31[%c0_388, %c145_389] : memref<8x640xf32, #tpu.memory_space<vmem>>, vector<8x384xf32>
    %c48_390 = arith.constant 48 : index
    %c0_391 = arith.constant 0 : index
    %429 = vector.load %arg32[%c48_390, %c0_391] : memref<72x384xf32, #tpu.memory_space<vmem>>, vector<8x384xf32>
    tpu.vector_store %arg32[%c48_390, %c0_391], %428 {strides = array<i32>} : memref<72x384xf32, #tpu.memory_space<vmem>>, vector<8x384xf32>,
    %c0_392 = arith.constant 0 : index
    %c146_393 = arith.constant 146 : index
    %430 = vector.load %arg31[%c0_392, %c146_393] : memref<8x640xf32, #tpu.memory_space<vmem>>, vector<8x384xf32>
    %c56_394 = arith.constant 56 : index
    %c0_395 = arith.constant 0 : index
    %431 = vector.load %arg32[%c56_394, %c0_395] : memref<72x384xf32, #tpu.memory_space<vmem>>, vector<8x384xf32>
    tpu.vector_store %arg32[%c56_394, %c0_395], %430 {strides = array<i32>} : memref<72x384xf32, #tpu.memory_space<vmem>>, vector<8x384xf32>,
    %c0_396 = arith.constant 0 : index
    %c147_397 = arith.constant 147 : index
    %432 = vector.load %arg31[%c0_396, %c147_397] : memref<8x640xf32, #tpu.memory_space<vmem>>, vector<8x384xf32>
    %c64_398 = arith.constant 64 : index
    %c0_399 = arith.constant 0 : index
    %433 = vector.load %arg32[%c64_398, %c0_399] : memref<72x384xf32, #tpu.memory_space<vmem>>, vector<8x384xf32>
    tpu.vector_store %arg32[%c64_398, %c0_399], %432 {strides = array<i32>} : memref<72x384xf32, #tpu.memory_space<vmem>>, vector<8x384xf32>,
    %c0_400 = arith.constant 0 : index
    %c0_401 = arith.constant 0 : index
    %434 = vector.load %arg26[%c0_400, %c0_401] : memref<8x72xbf16, #tpu.memory_space<vmem>>, vector<8x72xbf16>
    %c0_402 = arith.constant 0 : index
    %c0_403 = arith.constant 0 : index
    %435 = vector.load %arg32[%c0_402, %c0_403] : memref<72x384xf32, #tpu.memory_space<vmem>>, vector<72x384xf32>
    %436 = arith.truncf %435 : vector<72x384xf32> to vector<72x384xbf16>
    %cst_404 = arith.constant dense<0.000000e+00> : vector<8x384xf32>
    %437 = tpu.matmul %434, %436, %cst_404 {dimension_numbers = #tpu.dot_dimension_numbers<[1], [0], [0], [1], [0, 0, 1, 1], [], []>} : vector<8x72xbf16>, vector<72x384xbf16>, vector<8x384xf32> -> vector<8x384xf32>
    %c0_405 = arith.constant 0 : index
    %c0_406 = arith.constant 0 : index
    %438 = vector.load %arg27[%c0_405, %c0_406] : memref<8x1xf32, #tpu.memory_space<vmem>>, vector<8x1xf32>
    %439 = vector.broadcast %438 : vector<8x1xf32> to vector<8x384xf32>
    %440 = arith.addf %437, %439 : vector<8x384xf32>
    %cst_407 = arith.constant 0.000000e+00 : f32
    %441 = vector.broadcast %cst_407 : f32 to vector<8x384xf32>
    %442 = arith.maximumf %440, %441 : vector<8x384xf32>
    %443 = vector.broadcast %0 : vector<1x384xf32> to vector<8x384xf32>
    %444 = arith.mulf %442, %443 : vector<8x384xf32>
    %c0_408 = arith.constant 0 : index
    %c128_409 = arith.constant 128 : index
    %445 = vector.load %arg31[%c0_408, %c128_409] : memref<8x640xf32, #tpu.memory_space<vmem>>, vector<8x384xf32>
    tpu.vector_store %arg31[%c0_408, %c128_409], %444 {strides = array<i32>} : memref<8x640xf32, #tpu.memory_space<vmem>>, vector<8x384xf32>,
    %c0_410 = arith.constant 0 : index
    %c109_411 = arith.constant 109 : index
    %446 = vector.load %arg31[%c0_410, %c109_411] : memref<8x640xf32, #tpu.memory_space<vmem>>, vector<8x384xf32>
    %c0_412 = arith.constant 0 : index
    %c0_413 = arith.constant 0 : index
    %447 = vector.load %arg32[%c0_412, %c0_413] : memref<72x384xf32, #tpu.memory_space<vmem>>, vector<8x384xf32>
    tpu.vector_store %arg32[%c0_412, %c0_413], %446 {strides = array<i32>} : memref<72x384xf32, #tpu.memory_space<vmem>>, vector<8x384xf32>,
    %c0_414 = arith.constant 0 : index
    %c110_415 = arith.constant 110 : index
    %448 = vector.load %arg31[%c0_414, %c110_415] : memref<8x640xf32, #tpu.memory_space<vmem>>, vector<8x384xf32>
    %c8_416 = arith.constant 8 : index
    %c0_417 = arith.constant 0 : index
    %449 = vector.load %arg32[%c8_416, %c0_417] : memref<72x384xf32, #tpu.memory_space<vmem>>, vector<8x384xf32>
    tpu.vector_store %arg32[%c8_416, %c0_417], %448 {strides = array<i32>} : memref<72x384xf32, #tpu.memory_space<vmem>>, vector<8x384xf32>,
    %c0_418 = arith.constant 0 : index
    %c111_419 = arith.constant 111 : index
    %450 = vector.load %arg31[%c0_418, %c111_419] : memref<8x640xf32, #tpu.memory_space<vmem>>, vector<8x384xf32>
    %c16_420 = arith.constant 16 : index
    %c0_421 = arith.constant 0 : index
    %451 = vector.load %arg32[%c16_420, %c0_421] : memref<72x384xf32, #tpu.memory_space<vmem>>, vector<8x384xf32>
    tpu.vector_store %arg32[%c16_420, %c0_421], %450 {strides = array<i32>} : memref<72x384xf32, #tpu.memory_space<vmem>>, vector<8x384xf32>,
    %c0_422 = arith.constant 0 : index
    %c127_423 = arith.constant 127 : index
    %452 = vector.load %arg31[%c0_422, %c127_423] : memref<8x640xf32, #tpu.memory_space<vmem>>, vector<8x384xf32>
    %c24_424 = arith.constant 24 : index
    %c0_425 = arith.constant 0 : index
    %453 = vector.load %arg32[%c24_424, %c0_425] : memref<72x384xf32, #tpu.memory_space<vmem>>, vector<8x384xf32>
    tpu.vector_store %arg32[%c24_424, %c0_425], %452 {strides = array<i32>} : memref<72x384xf32, #tpu.memory_space<vmem>>, vector<8x384xf32>,
    %c0_426 = arith.constant 0 : index
    %c128_427 = arith.constant 128 : index
    %454 = vector.load %arg31[%c0_426, %c128_427] : memref<8x640xf32, #tpu.memory_space<vmem>>, vector<8x384xf32>
    %c32_428 = arith.constant 32 : index
    %c0_429 = arith.constant 0 : index
    %455 = vector.load %arg32[%c32_428, %c0_429] : memref<72x384xf32, #tpu.memory_space<vmem>>, vector<8x384xf32>
    tpu.vector_store %arg32[%c32_428, %c0_429], %454 {strides = array<i32>} : memref<72x384xf32, #tpu.memory_space<vmem>>, vector<8x384xf32>,
    %c0_430 = arith.constant 0 : index
    %c129_431 = arith.constant 129 : index
    %456 = vector.load %arg31[%c0_430, %c129_431] : memref<8x640xf32, #tpu.memory_space<vmem>>, vector<8x384xf32>
    %c40_432 = arith.constant 40 : index
    %c0_433 = arith.constant 0 : index
    %457 = vector.load %arg32[%c40_432, %c0_433] : memref<72x384xf32, #tpu.memory_space<vmem>>, vector<8x384xf32>
    tpu.vector_store %arg32[%c40_432, %c0_433], %456 {strides = array<i32>} : memref<72x384xf32, #tpu.memory_space<vmem>>, vector<8x384xf32>,
    %c0_434 = arith.constant 0 : index
    %c145_435 = arith.constant 145 : index
    %458 = vector.load %arg31[%c0_434, %c145_435] : memref<8x640xf32, #tpu.memory_space<vmem>>, vector<8x384xf32>
    %c48_436 = arith.constant 48 : index
    %c0_437 = arith.constant 0 : index
    %459 = vector.load %arg32[%c48_436, %c0_437] : memref<72x384xf32, #tpu.memory_space<vmem>>, vector<8x384xf32>
    tpu.vector_store %arg32[%c48_436, %c0_437], %458 {strides = array<i32>} : memref<72x384xf32, #tpu.memory_space<vmem>>, vector<8x384xf32>,
    %c0_438 = arith.constant 0 : index
    %c146_439 = arith.constant 146 : index
    %460 = vector.load %arg31[%c0_438, %c146_439] : memref<8x640xf32, #tpu.memory_space<vmem>>, vector<8x384xf32>
    %c56_440 = arith.constant 56 : index
    %c0_441 = arith.constant 0 : index
    %461 = vector.load %arg32[%c56_440, %c0_441] : memref<72x384xf32, #tpu.memory_space<vmem>>, vector<8x384xf32>
    tpu.vector_store %arg32[%c56_440, %c0_441], %460 {strides = array<i32>} : memref<72x384xf32, #tpu.memory_space<vmem>>, vector<8x384xf32>,
    %c0_442 = arith.constant 0 : index
    %c147_443 = arith.constant 147 : index
    %462 = vector.load %arg31[%c0_442, %c147_443] : memref<8x640xf32, #tpu.memory_space<vmem>>, vector<8x384xf32>
    %c64_444 = arith.constant 64 : index
    %c0_445 = arith.constant 0 : index
    %463 = vector.load %arg32[%c64_444, %c0_445] : memref<72x384xf32, #tpu.memory_space<vmem>>, vector<8x384xf32>
    tpu.vector_store %arg32[%c64_444, %c0_445], %462 {strides = array<i32>} : memref<72x384xf32, #tpu.memory_space<vmem>>, vector<8x384xf32>,
    %c0_446 = arith.constant 0 : index
    %c0_447 = arith.constant 0 : index
    %464 = vector.load %arg28[%c0_446, %c0_447] : memref<8x72xbf16, #tpu.memory_space<vmem>>, vector<8x72xbf16>
    %c0_448 = arith.constant 0 : index
    %c0_449 = arith.constant 0 : index
    %465 = vector.load %arg32[%c0_448, %c0_449] : memref<72x384xf32, #tpu.memory_space<vmem>>, vector<72x384xf32>
    %466 = arith.truncf %465 : vector<72x384xf32> to vector<72x384xbf16>
    %cst_450 = arith.constant dense<0.000000e+00> : vector<8x384xf32>
    %467 = tpu.matmul %464, %466, %cst_450 {dimension_numbers = #tpu.dot_dimension_numbers<[1], [0], [0], [1], [0, 0, 1, 1], [], []>} : vector<8x72xbf16>, vector<72x384xbf16>, vector<8x384xf32> -> vector<8x384xf32>
    %c0_451 = arith.constant 0 : index
    %c0_452 = arith.constant 0 : index
    %468 = vector.load %arg29[%c0_451, %c0_452] : memref<8x1xf32, #tpu.memory_space<vmem>>, vector<8x1xf32>
    %469 = vector.broadcast %468 : vector<8x1xf32> to vector<8x384xf32>
    %470 = arith.addf %467, %469 : vector<8x384xf32>
    %471 = vector.broadcast %0 : vector<1x384xf32> to vector<8x384xf32>
    %472 = arith.mulf %470, %471 : vector<8x384xf32>
    %473 = arith.addf %472, %3 : vector<8x384xf32>
    %c0_453 = arith.constant 0 : index
    %c0_454 = arith.constant 0 : index
    %c0_455 = arith.constant 0 : index
    %474 = vector.load %arg30[%c0_453, %c0_454, %c0_455] : memref<1x8x384xf32, #tpu.memory_space<vmem>>, vector<1x8x384xf32>
    %475 = vector.shape_cast %474 : vector<1x8x384xf32> to vector<8x384xf32>
    %476 = vector.shape_cast %473 : vector<8x384xf32> to vector<1x8x384xf32>
    tpu.vector_store %arg30[%c0_453, %c0_454, %c0_455], %476 {strides = array<i32>} : memref<1x8x384xf32, #tpu.memory_space<vmem>>, vector<1x8x384xf32>,
    return
  }
  func.func @transform_0(%arg0: i32) -> (i32, i32, i32) {
    %c0_i32 = arith.constant 0 : i32
    %c0_i32_0 = arith.constant 0 : i32
    %c0_i32_1 = arith.constant 0 : i32
    return %arg0, %c0_i32, %c0_i32_0 : i32, i32, i32
  }
  func.func @transform_1(%arg0: i32) -> (i32, i32) {
    %c0_i32 = arith.constant 0 : i32
    %c0_i32_0 = arith.constant 0 : i32
    %c0_i32_1 = arith.constant 0 : i32
    return %c0_i32, %c0_i32_0 : i32, i32
  }
  func.func @transform_2(%arg0: i32) -> (i32, i32) {
    %c0_i32 = arith.constant 0 : i32
    %c0_i32_0 = arith.constant 0 : i32
    %c0_i32_1 = arith.constant 0 : i32
    return %c0_i32, %c0_i32_0 : i32, i32
  }
  func.func @transform_3(%arg0: i32) -> (i32, i32) {
    %c0_i32 = arith.constant 0 : i32
    %c0_i32_0 = arith.constant 0 : i32
    %c0_i32_1 = arith.constant 0 : i32
    return %c0_i32, %c0_i32_0 : i32, i32
  }
  func.func @transform_4(%arg0: i32) -> (i32, i32) {
    %c0_i32 = arith.constant 0 : i32
    %c0_i32_0 = arith.constant 0 : i32
    %c0_i32_1 = arith.constant 0 : i32
    return %c0_i32, %c0_i32_0 : i32, i32
  }
  func.func @transform_5(%arg0: i32) -> (i32, i32) {
    %c0_i32 = arith.constant 0 : i32
    %c0_i32_0 = arith.constant 0 : i32
    %c0_i32_1 = arith.constant 0 : i32
    return %c0_i32, %c0_i32_0 : i32, i32
  }
  func.func @transform_6(%arg0: i32) -> (i32, i32) {
    %c0_i32 = arith.constant 0 : i32
    %c0_i32_0 = arith.constant 0 : i32
    %c0_i32_1 = arith.constant 0 : i32
    return %c0_i32, %c0_i32_0 : i32, i32
  }
  func.func @transform_7(%arg0: i32) -> (i32, i32) {
    %c0_i32 = arith.constant 0 : i32
    %c0_i32_0 = arith.constant 0 : i32
    %c0_i32_1 = arith.constant 0 : i32
    return %c0_i32, %c0_i32_0 : i32, i32
  }
  func.func @transform_8(%arg0: i32) -> (i32, i32) {
    %c0_i32 = arith.constant 0 : i32
    %c0_i32_0 = arith.constant 0 : i32
    %c0_i32_1 = arith.constant 0 : i32
    return %c0_i32, %c0_i32_0 : i32, i32
  }
  func.func @transform_9(%arg0: i32) -> (i32, i32) {
    %c0_i32 = arith.constant 0 : i32
    %c0_i32_0 = arith.constant 0 : i32
    %c0_i32_1 = arith.constant 0 : i32
    return %c0_i32, %c0_i32_0 : i32, i32
  }
  func.func @transform_10(%arg0: i32) -> (i32, i32) {
    %c0_i32 = arith.constant 0 : i32
    %c0_i32_0 = arith.constant 0 : i32
    %c0_i32_1 = arith.constant 0 : i32
    return %c0_i32, %c0_i32_0 : i32, i32
  }
  func.func @transform_11(%arg0: i32) -> (i32, i32) {
    %c0_i32 = arith.constant 0 : i32
    %c0_i32_0 = arith.constant 0 : i32
    %c0_i32_1 = arith.constant 0 : i32
    return %c0_i32, %c0_i32_0 : i32, i32
  }
  func.func @transform_12(%arg0: i32) -> (i32, i32) {
    %c0_i32 = arith.constant 0 : i32
    %c0_i32_0 = arith.constant 0 : i32
    %c0_i32_1 = arith.constant 0 : i32
    return %c0_i32, %c0_i32_0 : i32, i32
  }
  func.func @transform_13(%arg0: i32) -> (i32, i32) {
    %c0_i32 = arith.constant 0 : i32
    %c0_i32_0 = arith.constant 0 : i32
    %c0_i32_1 = arith.constant 0 : i32
    return %c0_i32, %c0_i32_0 : i32, i32
  }
  func.func @transform_14(%arg0: i32) -> (i32, i32) {
    %c0_i32 = arith.constant 0 : i32
    %c0_i32_0 = arith.constant 0 : i32
    %c0_i32_1 = arith.constant 0 : i32
    return %c0_i32, %c0_i32_0 : i32, i32
  }
  func.func @transform_15(%arg0: i32) -> (i32, i32) {
    %c0_i32 = arith.constant 0 : i32
    %c0_i32_0 = arith.constant 0 : i32
    %c0_i32_1 = arith.constant 0 : i32
    return %c0_i32, %c0_i32_0 : i32, i32
  }
  func.func @transform_16(%arg0: i32) -> (i32, i32) {
    %c0_i32 = arith.constant 0 : i32
    %c0_i32_0 = arith.constant 0 : i32
    %c0_i32_1 = arith.constant 0 : i32
    return %c0_i32, %c0_i32_0 : i32, i32
  }
  func.func @transform_17(%arg0: i32) -> (i32, i32) {
    %c0_i32 = arith.constant 0 : i32
    %c0_i32_0 = arith.constant 0 : i32
    %c0_i32_1 = arith.constant 0 : i32
    return %c0_i32, %c0_i32_0 : i32, i32
  }
  func.func @transform_18(%arg0: i32) -> (i32, i32) {
    %c0_i32 = arith.constant 0 : i32
    %c0_i32_0 = arith.constant 0 : i32
    %c0_i32_1 = arith.constant 0 : i32
    return %c0_i32, %c0_i32_0 : i32, i32
  }
  func.func @transform_19(%arg0: i32) -> (i32, i32) {
    %c0_i32 = arith.constant 0 : i32
    %c0_i32_0 = arith.constant 0 : i32
    %c0_i32_1 = arith.constant 0 : i32
    return %c0_i32, %c0_i32_0 : i32, i32
  }
  func.func @transform_20(%arg0: i32) -> (i32, i32) {
    %c0_i32 = arith.constant 0 : i32
    %c0_i32_0 = arith.constant 0 : i32
    %c0_i32_1 = arith.constant 0 : i32
    return %c0_i32, %c0_i32_0 : i32, i32
  }
  func.func @transform_21(%arg0: i32) -> (i32, i32) {
    %c0_i32 = arith.constant 0 : i32
    %c0_i32_0 = arith.constant 0 : i32
    %c0_i32_1 = arith.constant 0 : i32
    return %c0_i32, %c0_i32_0 : i32, i32
  }
  func.func @transform_22(%arg0: i32) -> (i32, i32) {
    %c0_i32 = arith.constant 0 : i32
    %c0_i32_0 = arith.constant 0 : i32
    %c0_i32_1 = arith.constant 0 : i32
    return %c0_i32, %c0_i32_0 : i32, i32
  }
  func.func @transform_23(%arg0: i32) -> (i32, i32) {
    %c0_i32 = arith.constant 0 : i32
    %c0_i32_0 = arith.constant 0 : i32
    %c0_i32_1 = arith.constant 0 : i32
    return %c0_i32, %c0_i32_0 : i32, i32
  }
  func.func @transform_24(%arg0: i32) -> (i32, i32) {
    %c0_i32 = arith.constant 0 : i32
    %c0_i32_0 = arith.constant 0 : i32
    %c0_i32_1 = arith.constant 0 : i32
    return %c0_i32, %c0_i32_0 : i32, i32
  }
  func.func @transform_25(%arg0: i32) -> (i32, i32) {
    %c0_i32 = arith.constant 0 : i32
    %c0_i32_0 = arith.constant 0 : i32
    %c0_i32_1 = arith.constant 0 : i32
    return %c0_i32, %c0_i32_0 : i32, i32
  }
  func.func @transform_26(%arg0: i32) -> (i32, i32) {
    %c0_i32 = arith.constant 0 : i32
    %c0_i32_0 = arith.constant 0 : i32
    %c0_i32_1 = arith.constant 0 : i32
    return %c0_i32, %c0_i32_0 : i32, i32
  }
  func.func @transform_27(%arg0: i32) -> (i32, i32) {
    %c0_i32 = arith.constant 0 : i32
    %c0_i32_0 = arith.constant 0 : i32
    %c0_i32_1 = arith.constant 0 : i32
    return %c0_i32, %c0_i32_0 : i32, i32
  }
  func.func @transform_28(%arg0: i32) -> (i32, i32) {
    %c0_i32 = arith.constant 0 : i32
    %c0_i32_0 = arith.constant 0 : i32
    %c0_i32_1 = arith.constant 0 : i32
    return %c0_i32, %c0_i32_0 : i32, i32
  }
  func.func @transform_29(%arg0: i32) -> (i32, i32, i32) {
    %c0_i32 = arith.constant 0 : i32
    %c0_i32_0 = arith.constant 0 : i32
    %c0_i32_1 = arith.constant 0 : i32
    return %arg0, %c0_i32, %c0_i32_0 : i32, i32, i32
  }
}

</mosaic_0001>

<bundles_post_ra>
// kernel: _lambda_.1
= control target key start
LH: loop header
LB: loop body
LE: loop exit
PB: predicated region body
PF: predicated region fallthrough
CT: control target
= control target key end

     0   :  { %s11170_s6 = smov 1   ;;  %s11171_s10 = smov 2   ;;  %s14891_s0 = inlined_call_operand.smem [shape: u32[30], index: -1, kind: input, shape index: {}] }
   0x1   :  { %s11218_s5 = sld [smem:[%s14891_s0]]   ;;  %s11172_s14 = smov 3  }
   0x2   :  { %s11223_s9 = sld [smem:[%s14891_s0 + %s11170_s6]]   ;;  %s11173_s18 = smov 4  }
   0x3   :  { %s11228_s13 = sld [smem:[%s14891_s0 + %s11171_s10]]   ;;  %s11174_s22 = smov 5  }
   0x4   :  { %s11233_s17 = sld [smem:[%s14891_s0 + %s11172_s14]]   ;;  %s11175_s26 = smov 6  }
   0x5   :  { %s11238_s21 = sld [smem:[%s14891_s0 + %s11173_s18]]   ;;  %s11176_s30 = smov 7  }
   0x6   :  { %s11243_s25 = sld [smem:[%s14891_s0 + %s11174_s22]]   ;;  %s11177_s4 = smov 8  }
   0x7   :  { %s11248_s29 = sld [smem:[%s14891_s0 + %s11175_s26]]   ;;  %s11178_s10 = smov 9  }
   0x8   :  { %s11253_s3 = sld [smem:[%s14891_s0 + %s11176_s30]]   ;;  %s11179_s15 = smov 10  }
   0x9   :  { %s11258_s8 = sld [smem:[%s14891_s0 + %s11177_s4]]   ;;  %s11180_s20 = smov 11  }
   0xa   :  { %s11263_s14 = sld [smem:[%s14891_s0 + %s11178_s10]]   ;;  %s11181_s26 = smov 12  }
   0xb   :  { %s11268_s19 = sld [smem:[%s14891_s0 + %s11179_s15]]   ;;  %s11182_s1 = smov 13  }
   0xc   :  { %s11273_s24 = sld [smem:[%s14891_s0 + %s11180_s20]]   ;;  %s11183_s7 = smov 14  }
   0xd   :  { %s11278_s30 = sld [smem:[%s14891_s0 + %s11181_s26]]   ;;  %s11184_s15 = smov 15  }
   0xe   :  { %s11283_s6 = sld [smem:[%s14891_s0 + %s11182_s1]]   ;;  %s11185_s22 = smov 16  }
   0xf   :  { %s11288_s12 = sld [smem:[%s14891_s0 + %s11183_s7]]   ;;  %s11186_s28 = smov 17  }
  0x10   :  { %s11293_s20 = sld [smem:[%s14891_s0 + %s11184_s15]]   ;;  %s11187_s7 = smov 18  }
  0x11   :  { %s11298_s27 = sld [smem:[%s14891_s0 + %s11185_s22]]   ;;  %s11188_s15 = smov 19  }
  0x12   :  { %s11303_s4 = sld [smem:[%s14891_s0 + %s11186_s28]]   ;;  %s11189_s22 = smov 20  }
  0x13   :  { %s11190_s28 = smov 21  }
  0x14   :  { %15093 = sst [smem:[#allocation4_spill]] %s11283_s6 }
  0x15   :  { %s11308_s6 = sld [smem:[%s14891_s0 + %s11187_s7]]   ;;  %s11191_s7 = smov 22  }
  0x16   :  { %15094 = sst [smem:[#allocation5_spill]] %s11293_s20 }
  0x17   :  { %15095 = sst [smem:[#allocation6_spill]] %s11298_s27 }
  0x18   :  { %15096 = sst [smem:[#allocation7_spill]] %s11303_s4 }
  0x19   :  { %s11313_s20 = sld [smem:[%s14891_s0 + %s11188_s15]]   ;;  %s11192_s15 = smov 23  }
  0x1a   :  { %s11318_s27 = sld [smem:[%s14891_s0 + %s11189_s22]]   ;;  %s11193_s22 = smov 24  }
  0x1b   :  { %15097 = sst [smem:[#allocation8_spill]] %s11308_s6 }
  0x1c   :  { %s11323_s4 = sld [smem:[%s14891_s0 + %s11190_s28]]   ;;  %s11194_s28 = smov 25  }
  0x1d   :  { %s11328_s6 = sld [smem:[%s14891_s0 + %s11191_s7]]   ;;  %s11195_s7 = smov 26  }
  0x1f   :  { %15098 = sst [smem:[#allocation9_spill]] %s11313_s20 }
  0x20   :  { %15099 = sst [smem:[#allocation10_spill]] %s11318_s27 }
  0x21   :  { %s11333_s20 = sld [smem:[%s14891_s0 + %s11192_s15]]   ;;  %s11196_s15 = smov 27  }
  0x22   :  { %15100 = sst [smem:[#allocation11_spill]] %s11323_s4 }
  0x23   :  { %15101 = sst [smem:[#allocation12_spill]] %s11328_s6 }
  0x24   :  { %s11338_s27 = sld [smem:[%s14891_s0 + %s11193_s22]]   ;;  %s11197_s22 = smov 28  }
  0x25   :  { %s11343_s4 = sld [smem:[%s14891_s0 + %s11194_s28]]   ;;  %s11198_s28 = smov 29  }
  0x26   :  { %s11348_s6 = sld [smem:[%s14891_s0 + %s11195_s7]]   ;;  %s11365_s7 = smov 0  }
  0x27   :  { %15102 = sst [smem:[#allocation13_spill]] %s11333_s20 }
  0x28   :  { %s11353_s20 = sld [smem:[%s14891_s0 + %s11196_s15]]  }
  0x2a   :  { %15103 = sst [smem:[#allocation14_spill]] %s11338_s27 }
  0x2b   :  { %15104 = sst [smem:[#allocation15_spill]] %s11343_s4 }
  0x2c   :  { %s11358_s27 = sld [smem:[%s14891_s0 + %s11197_s22]]  }
  0x2d   :  { %s11363_s4 = sld [smem:[%s14891_s0 + %s11198_s28]]  }
  0x2e LB: > { %s9259_s10 = sadd.s32 4294967295, %s11168_s7   ;;  %p9263_p0 = scmp.ge.s32.totalorder %s11168_s7, 1  ;;  %s11168_s7 = sphi %s11365_s7, %s69_s7  }
  0x2f   : > { %p817_p1 = scmp.lt.s32.totalorder %s11168_s7, 3 }
  0x31   : > { %p818_p2 = pnand %p9263_p0, %p817_p1 }
  0x33   : > { %821 = sbr.rel (%p818_p2) target bundleno = 7057 (0x1b91), region = 136 }
  0x3a   : > { %p893_p3 = scmp.lt.s32.totalorder %s9259_s10, 1  ;;  %v14896_v0 = vmov 0.0   ;;  %s11200_s15 = smov 19   ;;  %v14894_v7 = vmov 0   ;;  %vm11209_vm0 = vmmov 0   ;;  %v1218_v8 = vld [vmem:[%s11238_s21] sm:$0xff] }
  0x3b   : > { %9589 = vmatprep.subr.bf16.mxu1 %v14896_v0  ;;  %s11201_s16 = smov 18   ;;  %s15089_s18 = smov 1   ;;  %1270 = vmatprep.mubr.bf16.mxu0 %v14894_v7  ;;  %vm977_vm1 = vcmask 154624   ;;  %vm1003_vm2 = vcmask 146432   ;;  %vm1055_vm3 = vcmask 7168   ;;  %vm1029_vm4 = vcmask 138240  }
  0x3c   : > { %s15416_s10 = smov (!%p893_p3, %s9259_s10), 1  ;;  %s11203_s22 = smov 17   ;;  %9599 = vmatprep.mubr.msk.bf16.mxu1 %vm11209_vm0, %v14896_v0  ;;  %10076 = vset.pattern.permute.xlu0 %v14894_v7  ;;  %vm1087_vm5 = vcmask 1039360   ;;  %vm1139_vm6 = vcmask 900096   ;;  %vm1113_vm7 = vcmask 908288   ;;  %vm1165_vm8 = vcmask 891904  }
  0x3d   : > { %s15030_s0 = smul.u32 24, %s15416_s10  ;;  %s11204_s23 = smov 127   ;;  %10167 = vset.pattern.permute.xlu1 %v14894_v7  ;;  %vm1228_vm9 = vcmask 1043456   ;;  %vm1224_vm10 = vcmask 588800   ;;  %vm2087_vm11 = vcmask 64512  }
  0x3e   : > { %s15091_s26 = smov 110   ;;  %s15087_s28 = smov 111  }
  0x3f   : > { %s11380_s11 = scalar_lea.vmem %s11218_s5, %s15030_s0  ;;  %s15031_s1 = smov 109  }
  0x40   : > { %v11383_v1 = vld [vmem:[%s11380_s11 + $0x10] sm:$0xff]  ;;  %v11386_v2 = vld [vmem:[%s11380_s11] sm:$0xff]  ;;  %v11389_v3 = vld [vmem:[%s11380_s11 + $0x8] sm:$0xff]  ;;  %s15257_s2 = sld [smem:[#allocation4_spill]]  ;;  %s15261_s0 = sld [smem:[#allocation10_spill]] }
  0x41   : > { %v10036_v4 = vpack.i.bf16 %v11383_v1, %v14896_v0  ;;  %v10026_v5 = vpack.i.bf16 %v11389_v3, %v11386_v2  ;;  %v10056_v6 = vpack.i.bf16 %v11383_v1, %v11389_v3 }
  0x43   : > { %10037 = vrot.lane.b32.xlu1 %v10036_v4, %s11200_s15  ;;  %10027 = vrot.lane.b32.xlu0 %v10026_v5, %s11200_s15 }
  0x47   : > { %10042 = vrot.lane.b32.xlu1 %v10036_v4, %s11201_s16  ;;  %10032 = vrot.lane.b32.xlu0 %v10026_v5, %s11201_s16 }
  0x4b   : > { %10052 = vrot.lane.b32.xlu1 %v10026_v5, %s15089_s18  ;;  %10047 = vrot.lane.b32.xlu0 %v10026_v5, %s11203_s22 }
  0x4f   : > { %1047 = vrot.lane.b32.xlu1 %v14896_v0, %s15089_s18  ;;  %1021 = vrot.lane.b32.xlu0 %v14896_v0, %s11203_s22 }
  0x53   : > { %1079 = vrot.lane.b32.xlu1 %v11386_v2, %s11204_s23  ;;  %10057 = vrot.lane.b32.xlu0 %v10056_v6, %s11204_s23 }
  0x57   : > { %10067 = vrot.lane.b32.xlu1 %v10056_v6, %s15091_s26  ;;  %10062 = vrot.lane.b32.xlu0 %v10056_v6, %s15087_s28 }
  0x5b   : > { %1131 = vrot.lane.b32.xlu1 %v11386_v2, %s15091_s26  ;;  %1105 = vrot.lane.b32.xlu0 %v11386_v2, %s15087_s28 }
  0x5f   : > { %1053 = vrot.lane.b32.xlu1 %v11383_v1, %s15089_s18  ;;  %1027 = vrot.lane.b32.xlu0 %v11383_v1, %s11203_s22 }
  0x63   : > { %1161 = vrot.lane.b32.xlu1 %v11383_v1, %s15031_s1  ;;  %10072 = vrot.lane.b32.xlu0 %v10026_v5, %s15031_s1 }
  0x67   : > { %1111 = vrot.lane.b32.xlu1 %v14896_v0, %s15087_s28  ;;  %1085 = vrot.lane.b32.xlu0 %v14896_v0, %s11204_s23 }
  0x6b   : > { %1163 = vrot.lane.b32.xlu1 %v14896_v0, %s15031_s1  ;;  %1137 = vrot.lane.b32.xlu0 %v14896_v0, %s15091_s26 }
  0x6f   : > { %1221 = vperm.xlu0 %10076, %v1218_v8   ;;  %1427 = vrot.lane.b32.xlu1 %v14896_v0, %s15089_s18 }
  0x73   : > { %1402 = vrot.lane.b32.xlu0 %v14896_v0, %s11203_s22 }
  0xb5   : > { %v10038_v9 = vpop.permute.xlu1 %10037  ;;  %v10028_v10 = vpop.permute.xlu0 %10027 }
  0xb6   : > { %v10040_v11 = vunpack.i.h.bf16 %v10038_v9  ;;  %v10030_v12 = vunpack.i.h.bf16 %v10028_v10  ;;  %v10029_v13 = vunpack.i.l.bf16 %v10028_v10  ;;  %v10039_v14 = vunpack.i.l.bf16 %v10038_v9 }
  0xb8   : > { %v979_v21 = vsel %vm977_vm1, %v10029_v13, %v10030_v12  ;;  %v980_v22 = vsel %vm977_vm1, %v10030_v12, %v10040_v11  ;;  %v978_v25 = vsel %vm977_vm1, %v10039_v14, %v10029_v13 }
  0xb9   : > { %v10043_v15 = vpop.permute.xlu1 %10042  ;;  %v10033_v16 = vpop.permute.xlu0 %10032 }
  0xba   : > { %v10045_v17 = vunpack.i.h.bf16 %v10043_v15  ;;  %v10044_v18 = vunpack.i.l.bf16 %v10043_v15  ;;  %v10035_v19 = vunpack.i.h.bf16 %v10033_v16  ;;  %v10034_v20 = vunpack.i.l.bf16 %v10033_v16 }
  0xbc   : > { %v1005_v23 = vsel %vm1003_vm2, %v10034_v20, %v10035_v19  ;;  %v1006_v24 = vsel %vm1003_vm2, %v10035_v19, %v10045_v17  ;;  %v1004_v26 = vsel %vm1003_vm2, %v10044_v18, %v10034_v20 }
  0xbd   : > { %v10053_v27 = vpop.permute.xlu1 %10052  ;;  %v10048_v28 = vpop.permute.xlu0 %10047  ;;  %v1204_v29 = vpack.c.bf16 %v1005_v23, %v979_v21  ;;  %v1205_v30 = vpack.c.bf16 %v1006_v24, %v980_v22  ;;  %v1203_v31 = vpack.c.bf16 %v1004_v26, %v978_v25  ;;  %v1175_v23 = vld [vmem:[%s11233_s17] sm:$0xf] }
  0xbe   : > { %v10055_v32 = vunpack.i.h.bf16 %v10053_v27  ;;  %v10054_v33 = vunpack.i.l.bf16 %v10053_v27  ;;  %v10050_v34 = vunpack.i.h.bf16 %v10048_v28  ;;  %v10049_v35 = vunpack.i.l.bf16 %v10048_v28 }
  0xbf   : > { %1238 = vmatprep.subr.bf16.mxu0 %v1204_v29  ;;  %9590 = vmatpush3.bf16.msra.mxu1 %v1205_v30 }
  0xc0   : > { %1239 = vmatpush1.bf16.msra.mxu0 %v1203_v31  ;;  %v1031_v36 = vsel %vm1029_vm4, %v10049_v35, %v10050_v34  ;;  %v1057_v37 = vsel %vm1055_vm3, %v10054_v33, %v10055_v32  ;;  %9591 = vmatprep.subr.bf16.mxu1 %v14896_v0  ;;  %v1323_v31 = vlaneseq }
  0xc1   : > { %v1048_v38 = vpop.permute.xlu1 %1047  ;;  %v1022_v39 = vpop.permute.xlu0 %1021  ;;  %v1207_v40 = vpack.c.bf16 %v1057_v37, %v1031_v36 }
  0xc2   : > { %v1056_v41 = vsel %vm1055_vm3, %v1048_v38, %v10054_v33  ;;  %v1030_v42 = vsel %vm1029_vm4, %v1022_v39, %v10049_v35  ;;  %v904_v38 = vld [vmem:[%s11223_s9] sm:$0x7] }
  0xc3   : > { %v1206_v43 = vpack.c.bf16 %v1056_v41, %v1030_v42  ;;  %1240 = vmatprep.subr.bf16.mxu0 %v1207_v40 }
  0xc5   : > { %v1080_v44 = vpop.permute.xlu1 %1079  ;;  %v10058_v45 = vpop.permute.xlu0 %10057  ;;  %1241 = vmatpush1.bf16.msra.mxu0 %v1206_v43 }
  0xc6   : > { %v10060_v46 = vunpack.i.h.bf16 %v10058_v45  ;;  %v10059_v47 = vunpack.i.l.bf16 %v10058_v45 }
  0xc8   : > { %v1089_v48 = vsel %vm1087_vm5, %v10059_v47, %v10060_v46  ;;  %v1088_v49 = vsel %vm1087_vm5, %v1080_v44, %v10059_v47 }
  0xc9   : > { %v10068_v50 = vpop.permute.xlu1 %10067  ;;  %v10063_v51 = vpop.permute.xlu0 %10062  ;;  %v1210_v52 = vpack.c.bf16 %v1089_v48, %v11389_v3  ;;  %v1209_v53 = vpack.c.bf16 %v1088_v49, %v11386_v2 }
  0xca   : > { %v10070_v54 = vunpack.i.h.bf16 %v10068_v50  ;;  %v10069_v55 = vunpack.i.l.bf16 %v10068_v50  ;;  %v10065_v56 = vunpack.i.h.bf16 %v10063_v51  ;;  %v10064_v57 = vunpack.i.l.bf16 %v10063_v51 }
  0xcb   : > { %1242 = vmatprep.subr.bf16.mxu0 %v1210_v52 }
  0xcc   : > { %1243 = vmatpush1.bf16.msra.mxu0 %v1209_v53  ;;  %v1115_v58 = vsel %vm1113_vm7, %v10064_v57, %v10065_v56  ;;  %v1141_v59 = vsel %vm1139_vm6, %v10069_v55, %v10070_v54 }
  0xcd   : > { %v1132_v60 = vpop.permute.xlu1 %1131  ;;  %v1106_v61 = vpop.permute.xlu0 %1105  ;;  %v1213_v62 = vpack.c.bf16 %v1141_v59, %v1115_v58 }
  0xce   : > { %v1140_v63 = vsel %vm1139_vm6, %v1132_v60, %v10069_v55  ;;  %v1114_v3 = vsel %vm1113_vm7, %v1106_v61, %v10064_v57  ;;  %v1593_v61 = vld [vmem:[%s11248_s29] sm:$0xff] }
  0xcf   : > { %v1212_v2 = vpack.c.bf16 %v1140_v63, %v1114_v3  ;;  %1244 = vmatprep.subr.bf16.mxu0 %v1213_v62 }
  0xd1   : > { %v1054_v4 = vpop.permute.xlu1 %1053  ;;  %v1028_v5 = vpop.permute.xlu0 %1027  ;;  %1245 = vmatpush1.bf16.msra.mxu0 %v1212_v2 }
  0xd2   : > { %v1058_v6 = vsel %vm1055_vm3, %v10055_v32, %v1054_v4  ;;  %v1032_v8 = vsel %vm1029_vm4, %v10050_v34, %v1028_v5  ;;  %v1324_v34 = vshrl.u32 %v1323_v31, 7 }
  0xd3   : > { %v1208_v9 = vpack.c.bf16 %v1058_v6, %v1032_v8 }
  0xd4   : > { %v1333_v37 = vsub.s32 2, %v1324_v34  ;;  %v1325_v44 = vsub.s32 0, %v1324_v34  ;;  %v1329_v51 = vsub.s32 1, %v1324_v34 }
  0xd5   : > { %v1162_v10 = vpop.permute.xlu1 %1161  ;;  %v10073_v11 = vpop.permute.xlu0 %10072  ;;  %9592 = vmatpush3.bf16.msra.mxu1 %v1208_v9 }
  0xd6   : > { %v10075_v12 = vunpack.i.h.bf16 %v10073_v11  ;;  %v10074_v13 = vunpack.i.l.bf16 %v10073_v11  ;;  %9593 = vmatprep.subr.bf16.mxu1 %v14896_v0  ;;  %v11483_v42 = vrot.slane %v904_v38, %v1333_v37  ;;  %v11488_v50 = vrot.slane %v904_v38, %v1325_v44 }
  0xd7   : > { %v11497_v57 = vrot.slane %v904_v38, %v1329_v51 }
  0xd8   : > { %v1167_v14 = vsel %vm1165_vm8, %v10075_v12, %v1162_v10  ;;  %v1166_v15 = vsel %vm1165_vm8, %v10074_v13, %v10075_v12  ;;  %15105 = vst [vmem:[#allocation16_spill] sm:$0xff] %v11483_v42  ;;  %15106 = vst [vmem:[#allocation17_spill] sm:$0xff] %v11488_v50 }
  0xd9   : > { %v1112_v16 = vpop.permute.xlu1 %1111  ;;  %v1086_v17 = vpop.permute.xlu0 %1085  ;;  %v1216_v18 = vpack.c.bf16 %v1167_v14, %v1167_v14  ;;  %v1215_v19 = vpack.c.bf16 %v1166_v15, %v1166_v15  ;;  %15107 = vst [vmem:[#allocation18_spill] sm:$0xff] %v11497_v57 }
  0xda   : > { %v1090_v20 = vsel %vm1087_vm5, %v10060_v46, %v1086_v17  ;;  %v1116_v26 = vsel %vm1113_vm7, %v10065_v56, %v1112_v16 }
  0xdb   : > { %v1211_v21 = vpack.c.bf16 %v1090_v20, %v11383_v1  ;;  %9266 = vmatprep.subr.msk.bf16.mxu0 %vm1228_vm9, %v1216_v18  ;;  %v1230_v22 = vsel %vm1228_vm9, %v1215_v19, 0 }
  0xdc   : > { %1247 = vmatpush1.bf16.msra.mxu0 %v1230_v22 }
  0xdd   : > { %v1164_v24 = vpop.permute.xlu1 %1163  ;;  %v1138_v25 = vpop.permute.xlu0 %1137  ;;  %9594 = vmatpush3.bf16.msra.mxu1 %v1211_v21 }
  0xde   : > { %v1168_v27 = vsel %vm1165_vm8, %v1162_v10, %v1164_v24  ;;  %v1142_v28 = vsel %vm1139_vm6, %v10070_v54, %v1138_v25  ;;  %9595 = vmatprep.subr.bf16.mxu1 %v14896_v0 }
  0xdf   : > { %v1214_v29 = vpack.c.bf16 %v1142_v28, %v1116_v26  ;;  %9267 = vmatmul.mubr.msk.bf16.vlgmr.msra.gmra.mrb[0].mxu0 %vm1224_vm10, %v1175_v23  ;;  %v1217_v1 = vpack.c.bf16 %v1168_v27, %v1168_v27 }
  0xe0   : > { %1643 = vmatprep.mubr.bf16.mxu0 %v14894_v7 }
  0xe1   : > { %9596 = vmatpush3.bf16.msra.mxu1 %v1214_v29  ;;  %v1236_v30 = vsel %vm1228_vm9, %v1217_v1, 0  ;;  %v1428_v62 = vpop.permute.xlu1 %1427 }
  0xe2   : > { %9597 = vmatprep.subr.bf16.mxu1 %v14896_v0 }
  0xe5   : > { %9598 = vmatpush3.bf16.msra.mxu1 %v1236_v30 }
  0xe6   : > { %9603 = vmatprep.subr.bf16.mxu1 %v14896_v0 }
  0xe8   : > { %9600 = vmatmul.mubr.msk.bf16.vlgmr.msra.gmra.mrb[0].mxu1 %vm1224_vm10, %v1175_v23 }
  0xe9   : > { %9613 = vmatprep.mubr.msk.bf16.mxu1 %vm11209_vm0, %v14896_v0 }
  0xee   : > { %v1222_v39 = vpop.permute.xlu0 %1221 }
  0xf2   : > { %v1403_v63 = vpop.permute.xlu0 %1402 }
 0x1b2   : > { %v1272_v32 = vpop.f32.mrb[0].mxu0 }
 0x1b3   : > { %v1274_v33 = vpop.f32.mrb[1].mxu0  ;;  %v1273_v46 = vadd.f32 %v1272_v32, %v1222_v39 }
 0x1b4   : > { %v1276_v35 = vpop.f32.mrb[2].mxu0  ;;  %v1275_v53 = vadd.f32 %v1274_v33, %v1222_v39 }
 0x1b5   : > { %v1277_v36 = vpop.f32.mrb[3].mxu0  ;;  %v1319_v52 = vmax.f32 %v1273_v46, 0.0 }
 0x1b6   : > { %v1320_v56 = vmax.f32 %v1275_v53, 0.0 }
 0x1b7   : > { %v11495_v55 = vmul.f32 %v11488_v50, %v1319_v52 }
 0x1b8   : > { %v11504_v58 = vmul.f32 %v11497_v57, %v1320_v56 }
 0x1ba   : > { %v10097_v59 = vpack.i.bf16 %v11504_v58, %v11495_v55 }
 0x1bb   : > { %v1313_v40 = vpop.f32.mrb[0].mxu1 }
 0x1bc   : > { %v1314_v41 = vadd.f32 %v1313_v40, %v1222_v39  ;;  %v9601_v43 = vpop.f32.mrb[1].mxu1 }
 0x1bd   : > { %v1316_v45 = vpop.f32.mrb[2].mxu1 }
 0x1be   : > { %v1321_v47 = vmax.f32 %v1314_v41, 0.0  ;;  %v9602_v48 = vpop.f32.mrb[3].mxu1 }
 0x1c0   : > { %v11486_v49 = vmul.f32 %v11483_v42, %v1321_v47 }
 0x1c2   : > { %v10082_v54 = vpack.i.bf16 %v11486_v49, %v14896_v0  ;;  %v10107_v60 = vpack.i.bf16 %v11486_v49, %v11504_v58 }
 0x1c4   : > { %10083 = vrot.lane.b32.xlu1 %v10082_v54, %s11201_s16  ;;  %10078 = vrot.lane.b32.xlu0 %v10082_v54, %s11200_s15 }
 0x1c8   : > { %1408 = vrot.lane.b32.xlu0 %v11486_v49, %s11203_s22  ;;  %1458 = vrot.lane.b32.xlu1 %v11495_v55, %s11204_s23 }
 0x1cc   : > { %1483 = vrot.lane.b32.xlu0 %v11495_v55, %s15087_s28  ;;  %1508 = vrot.lane.b32.xlu1 %v11495_v55, %s15091_s26 }
 0x1d0   : > { %10098 = vrot.lane.b32.xlu0 %v10097_v59, %s11203_s22  ;;  %10088 = vrot.lane.b32.xlu1 %v10097_v59, %s11200_s15 }
 0x1d4   : > { %10108 = vrot.lane.b32.xlu0 %v10107_v60, %s11204_s23  ;;  %10093 = vrot.lane.b32.xlu1 %v10097_v59, %s11201_s16 }
 0x1d8   : > { %10113 = vrot.lane.b32.xlu0 %v10107_v60, %s15087_s28  ;;  %10103 = vrot.lane.b32.xlu1 %v10097_v59, %s15089_s18 }
 0x1dc   : > { %10123 = vrot.lane.b32.xlu0 %v10097_v59, %s15031_s1  ;;  %1433 = vrot.lane.b32.xlu1 %v11486_v49, %s15089_s18 }
 0x1e0   : > { %1464 = vrot.lane.b32.xlu0 %v14896_v0, %s11204_s23  ;;  %10118 = vrot.lane.b32.xlu1 %v10107_v60, %s15091_s26 }
 0x1e4   : > { %1514 = vrot.lane.b32.xlu0 %v14896_v0, %s15091_s26  ;;  %1537 = vrot.lane.b32.xlu1 %v11486_v49, %s15031_s1 }
 0x1e8   : > { %1596 = vperm.xlu0 %10076, %v1593_v61   ;;  %1489 = vrot.lane.b32.xlu1 %v14896_v0, %s15087_s28 }
 0x1ec   : > { %1539 = vrot.lane.b32.xlu1 %v14896_v0, %s15031_s1  ;;  %1734 = vrot.lane.b32.xlu0 %v14896_v0, %s11201_s16 }
 0x1f0   : > { %1709 = vrot.lane.b32.xlu1 %v14896_v0, %s11200_s15  ;;  %1784 = vrot.lane.b32.xlu0 %v14896_v0, %s15089_s18 }
 0x1f4   : > { %1759 = vrot.lane.b32.xlu1 %v14896_v0, %s11203_s22 }
 0x236   : > { %v10084_v3 = vpop.permute.xlu1 %10083  ;;  %v10079_v2 = vpop.permute.xlu0 %10078 }
 0x237   : > { %v10086_v13 = vunpack.i.h.bf16 %v10084_v3  ;;  %v10085_v14 = vunpack.i.l.bf16 %v10084_v3  ;;  %v10081_v15 = vunpack.i.h.bf16 %v10079_v2  ;;  %v10080_v16 = vunpack.i.l.bf16 %v10079_v2 }
 0x23a   : > { %v1409_v4 = vpop.permute.xlu0 %1408  ;;  %v1459_v5 = vpop.permute.xlu1 %1458 }
 0x23e   : > { %v11543_v6 = vpop.permute.xlu0 %1483  ;;  %v11545_v8 = vpop.permute.xlu1 %1508 }
 0x242   : > { %v10099_v9 = vpop.permute.xlu0 %10098  ;;  %v10089_v10 = vpop.permute.xlu1 %10088 }
 0x243   : > { %v10091_v11 = vunpack.i.h.bf16 %v10089_v10  ;;  %v10090_v12 = vunpack.i.l.bf16 %v10089_v10  ;;  %v10101_v19 = vunpack.i.h.bf16 %v10099_v9  ;;  %v10100_v20 = vunpack.i.l.bf16 %v10099_v9 }
 0x245   : > { %v1362_v23 = vsel %vm977_vm1, %v10091_v11, %v10081_v15  ;;  %v1360_v24 = vsel %vm977_vm1, %v10080_v16, %v10090_v12  ;;  %v1361_v26 = vsel %vm977_vm1, %v10090_v12, %v10091_v11  ;;  %v1410_v37 = vsel %vm1029_vm4, %v1403_v63, %v10100_v20 }
 0x246   : > { %v10109_v17 = vpop.permute.xlu0 %10108  ;;  %v10094_v18 = vpop.permute.xlu1 %10093  ;;  %v1411_v38 = vsel %vm1029_vm4, %v10100_v20, %v10101_v19  ;;  %v1412_v47 = vsel %vm1029_vm4, %v10101_v19, %v1409_v4 }
 0x247   : > { %v10096_v21 = vunpack.i.h.bf16 %v10094_v18  ;;  %v10095_v22 = vunpack.i.l.bf16 %v10094_v18  ;;  %v10111_v25 = vunpack.i.h.bf16 %v10109_v17  ;;  %v10110_v27 = vunpack.i.l.bf16 %v10109_v17 }
 0x249   : > { %v1387_v28 = vsel %vm1003_vm2, %v10096_v21, %v10086_v13  ;;  %v1385_v29 = vsel %vm1003_vm2, %v10085_v14, %v10095_v22  ;;  %v1386_v1 = vsel %vm1003_vm2, %v10095_v22, %v10096_v21  ;;  %v1467_v41 = vsel %vm1087_vm5, %v10110_v27, %v10111_v25  ;;  %v1550_v21 = vld [vmem:[%s11243_s25] sm:$0xf] }
 0x24a   : > { %v11553_v30 = vpop.permute.xlu0 %10113  ;;  %v10104_v31 = vpop.permute.xlu1 %10103  ;;  %v1579_v32 = vpack.c.bf16 %v1386_v1, %v1361_v26  ;;  %v1580_v33 = vpack.c.bf16 %v1387_v28, %v1362_v23  ;;  %v1578_v34 = vpack.c.bf16 %v1385_v29, %v1360_v24  ;;  %v1466_v51 = vsel %vm1087_vm5, %v1459_v5, %v10110_v27 }
 0x24b   : > { %v10106_v35 = vunpack.i.h.bf16 %v10104_v31  ;;  %v10105_v36 = vunpack.i.l.bf16 %v10104_v31  ;;  %v10115_v52 = vunpack.i.l.bf16 %v11553_v30  ;;  %v1585_v54 = vpack.c.bf16 %v1467_v41, %v11504_v58 }
 0x24c   : > { %1611 = vmatprep.subr.bf16.mxu0 %v1579_v32  ;;  %9604 = vmatpush3.bf16.msra.mxu1 %v1580_v33  ;;  %v10116_v56 = vunpack.i.h.bf16 %v11553_v30  ;;  %v1584_v63 = vpack.c.bf16 %v1466_v51, %v11495_v55  ;;  %v905_v51 = vld [vmem:[%s11228_s13] sm:$0xff] }
 0x24d   : > { %v1435_v39 = vsel %vm1055_vm3, %v1428_v62, %v10105_v36  ;;  %1612 = vmatpush1.bf16.msra.mxu0 %v1578_v34  ;;  %v1436_v40 = vsel %vm1055_vm3, %v10105_v36, %v10106_v35  ;;  %9605 = vmatprep.subr.bf16.mxu1 %v14896_v0  ;;  %v1491_v58 = vsel %vm1113_vm7, %v11543_v6, %v10115_v52 }
 0x24e   : > { %v10124_v43 = vpop.permute.xlu0 %10123  ;;  %v1434_v44 = vpop.permute.xlu1 %1433  ;;  %v1582_v45 = vpack.c.bf16 %v1436_v40, %v1411_v38  ;;  %v1581_v46 = vpack.c.bf16 %v1435_v39, %v1410_v37  ;;  %v1492_v10 = vsel %vm1113_vm7, %v10115_v52, %v10116_v56  ;;  %v906_v52 = vld [vmem:[%s11228_s13 + $0x8] sm:$0xff] }
 0x24f   : > { %v1437_v48 = vsel %vm1055_vm3, %v10106_v35, %v1434_v44  ;;  %v10126_v59 = vunpack.i.h.bf16 %v10124_v43  ;;  %v10125_v60 = vunpack.i.l.bf16 %v10124_v43 }
 0x250   : > { %v1583_v53 = vpack.c.bf16 %v1437_v48, %v1412_v47  ;;  %1613 = vmatprep.subr.bf16.mxu0 %v1582_v45  ;;  %v1950_v47 = vld [vmem:[%s11258_s8] sm:$0xff] }
 0x251   : > { %1614 = vmatpush1.bf16.msra.mxu0 %v1581_v46  ;;  %v1541_v55 = vsel %vm1165_vm8, %v10125_v60, %v10126_v59  ;;  %v2062_v46 = vld [vmem:[%s11268_s19 + $0x8] sm:$0xff]  ;;  %v2061_v48 = vld [vmem:[%s11268_s19] sm:$0xff]  ;;  %v911_v60 = vld [vmem:[%s11228_s13 + $0x30] sm:$0xff] }
 0x252   : > { %v1465_v61 = vpop.permute.xlu0 %1464  ;;  %v10119_v62 = vpop.permute.xlu1 %10118  ;;  %1615 = vmatprep.subr.bf16.mxu0 %v1585_v54  ;;  %9606 = vmatpush3.bf16.msra.mxu1 %v1583_v53  ;;  %v907_v53 = vld [vmem:[%s11228_s13 + $0x10] sm:$0xff]  ;;  %v908_v54 = vld [vmem:[%s11228_s13 + $0x18] sm:$0xff] }
 0x253   : > { %v1468_v3 = vsel %vm1087_vm5, %v10111_v25, %v1465_v61  ;;  %v10121_v2 = vunpack.i.h.bf16 %v10119_v62  ;;  %v10120_v4 = vunpack.i.l.bf16 %v10119_v62  ;;  %9607 = vmatprep.subr.bf16.mxu1 %v14896_v0  ;;  %v912_v61 = vld [vmem:[%s11228_s13 + $0x38] sm:$0xff]  ;;  %v914_v62 = vld [vmem:[%s11228_s13 + $0x48] sm:$0xff] }
 0x254   : > { %v1586_v5 = vpack.c.bf16 %v1468_v3, %v11486_v49  ;;  %v916_v3 = vld [vmem:[%s11228_s13 + $0x58] sm:$0xff] }
 0x255   : > { %v1516_v9 = vsel %vm1139_vm6, %v11545_v8, %v10120_v4  ;;  %1616 = vmatpush1.bf16.msra.mxu0 %v1584_v63  ;;  %v1517_v11 = vsel %vm1139_vm6, %v10120_v4, %v10121_v2  ;;  %v1590_v8 = vpack.c.bf16 %v1541_v55, %v1541_v55  ;;  %v915_v63 = vld [vmem:[%s11228_s13 + $0x50] sm:$0xff]  ;;  %v918_v4 = vld [vmem:[%s11228_s13 + $0x68] sm:$0xff] }
 0x256   : > { %v1538_v12 = vpop.permute.xlu1 %1537  ;;  %9608 = vmatpush3.bf16.msra.mxu1 %v1586_v5  ;;  %v1588_v13 = vpack.c.bf16 %v1517_v11, %v1492_v10  ;;  %v1587_v14 = vpack.c.bf16 %v1516_v9, %v1491_v58  ;;  %v1515_v49 = vpop.permute.xlu0 %1514  ;;  %v919_v58 = vld [vmem:[%s11228_s13 + $0x70] sm:$0xff]  ;;  %v920_v5 = vld [vmem:[%s11228_s13 + $0x78] sm:$0xff] }
 0x257   : > { %v1542_v15 = vsel %vm1165_vm8, %v10126_v59, %v1538_v12  ;;  %9609 = vmatprep.subr.bf16.mxu1 %v14896_v0  ;;  %v1518_v17 = vsel %vm1139_vm6, %v10121_v2, %v1515_v49  ;;  %v1603_v20 = vsel %vm1228_vm9, %v1590_v8, 0  ;;  %v910_v59 = vld [vmem:[%s11228_s13 + $0x28] sm:$0xff]  ;;  %v917_v2 = vld [vmem:[%s11228_s13 + $0x60] sm:$0xff]  ;;  %v2063_v11 = vld [vmem:[%s11268_s19 + $0x10] sm:$0xff] }
 0x258   : > { %v1591_v6 = vpack.c.bf16 %v1542_v15, %v1542_v15  ;;  %1617 = vmatprep.subr.bf16.mxu0 %v1588_v13 }
 0x259   : > { %1618 = vmatpush1.bf16.msra.mxu0 %v1587_v14 }
 0x25a   : > { %v1490_v16 = vpop.permute.xlu1 %1489  ;;  %9269 = vmatprep.subr.msk.bf16.mxu0 %vm1228_vm9, %v1591_v6 }
 0x25b   : > { %v1493_v18 = vsel %vm1113_vm7, %v10116_v56, %v1490_v16  ;;  %v909_v56 = vld [vmem:[%s11228_s13 + $0x20] sm:$0xff] }
 0x25c   : > { %v1589_v19 = vpack.c.bf16 %v1518_v17, %v1493_v18 }
 0x25d   : > { %1620 = vmatpush1.bf16.msra.mxu0 %v1603_v20 }
 0x25e   : > { %v1540_v22 = vpop.permute.xlu1 %1539  ;;  %9610 = vmatpush3.bf16.msra.mxu1 %v1589_v19 }
 0x25f   : > { %v1543_v23 = vsel %vm1165_vm8, %v1538_v12, %v1540_v22  ;;  %9611 = vmatprep.subr.bf16.mxu1 %v14896_v0 }
 0x260   : > { %v1592_v24 = vpack.c.bf16 %v1543_v23, %v1543_v23  ;;  %9270 = vmatmul.mubr.msk.bf16.vlgmr.msra.gmra.mrb[4].mxu0 %vm1224_vm10, %v1550_v21 }
 0x261   : > { %2000 = vmatprep.mubr.bf16.mxu0 %v14894_v7 }
 0x262   : > { %v1609_v25 = vsel %vm1228_vm9, %v1592_v24, 0  ;;  %v1710_v10 = vpop.permute.xlu1 %1709 }
 0x263   : > { %9612 = vmatpush3.bf16.msra.mxu1 %v1609_v25 }
 0x264   : > { %9617 = vmatprep.subr.bf16.mxu1 %v14896_v0 }
 0x266   : > { %9614 = vmatmul.mubr.msk.bf16.vlgmr.msra.gmra.mrb[4].mxu1 %vm1224_vm10, %v1550_v21  ;;  %v1760_v12 = vpop.permute.xlu1 %1759 }
 0x267   : > { %9627 = vmatprep.mubr.msk.bf16.mxu1 %vm11209_vm0, %v14896_v0  ;;  %v1597_v26 = vpop.permute.xlu0 %1596 }
 0x26b   : > { %v1735_v9 = vpop.permute.xlu0 %1734 }
 0x26f   : > { %v1785_v55 = vpop.permute.xlu0 %1784 }
 0x333   : > { %v1645_v27 = vpop.f32.mrb[4].mxu0 }
 0x334   : > { %v1646_v28 = vadd.f32 %v1645_v27, %v1597_v26  ;;  %v1647_v29 = vpop.f32.mrb[5].mxu0 }
 0x335   : > { %v1648_v1 = vadd.f32 %v1647_v29, %v1597_v26  ;;  %v1649_v30 = vpop.f32.mrb[6].mxu0 }
 0x336   : > { %v1692_v31 = vmax.f32 %v1646_v28, 0.0  ;;  %v1650_v32 = vpop.f32.mrb[7].mxu0 }
 0x337   : > { %v1693_v33 = vmax.f32 %v1648_v1, 0.0 }
 0x338   : > { %v11595_v34 = vmul.f32 %v1692_v31, %v11488_v50 }
 0x339   : > { %v11598_v35 = vmul.f32 %v1693_v33, %v11497_v57  ;;  %v1686_v36 = vpop.f32.mrb[4].mxu1 }
 0x33a   : > { %v1687_v37 = vadd.f32 %v1686_v36, %v1597_v26  ;;  %1840 = vrot.lane.b32.xlu1 %v11595_v34, %s15087_s28  ;;  %1815 = vrot.lane.b32.xlu0 %v11595_v34, %s11204_s23  ;;  %v9615_v38 = vpop.f32.mrb[5].mxu1 }
 0x33b   : > { %v1689_v39 = vpop.f32.mrb[6].mxu1  ;;  %v10127_v40 = vpack.i.bf16 %v11598_v35, %v11595_v34 }
 0x33c   : > { %v1694_v41 = vmax.f32 %v1687_v37, 0.0  ;;  %v9616_v43 = vpop.f32.mrb[7].mxu1 }
 0x33e   : > { %10128 = vrot.lane.b32.xlu1 %v10127_v40, %s11200_s15  ;;  %10133 = vrot.lane.b32.xlu0 %v10127_v40, %s11201_s16  ;;  %v11609_v44 = vmul.f32 %v1694_v41, %v11483_v42 }
 0x340   : > { %v10147_v45 = vpack.i.bf16 %v11609_v44, %v11598_v35 }
 0x342   : > { %10138 = vrot.lane.b32.xlu1 %v10127_v40, %s11203_s22  ;;  %10143 = vrot.lane.b32.xlu0 %v10127_v40, %s15089_s18 }
 0x346   : > { %10148 = vrot.lane.b32.xlu1 %v10147_v45, %s11204_s23  ;;  %1865 = vrot.lane.b32.xlu0 %v11595_v34, %s15091_s26 }
 0x34a   : > { %10153 = vrot.lane.b32.xlu1 %v10147_v45, %s15087_s28  ;;  %10158 = vrot.lane.b32.xlu0 %v10147_v45, %s15091_s26 }
 0x34e   : > { %10163 = vrot.lane.b32.xlu1 %v10127_v40, %s15031_s1  ;;  %1894 = vrot.lane.b32.xlu0 %v11609_v44, %s15031_s1 }
 0x352   : > { %1715 = vrot.lane.b32.xlu1 %v11609_v44, %s11200_s15  ;;  %1740 = vrot.lane.b32.xlu0 %v11609_v44, %s11201_s16 }
 0x356   : > { %1765 = vrot.lane.b32.xlu1 %v11609_v44, %s11203_s22  ;;  %1790 = vrot.lane.b32.xlu0 %v11609_v44, %s15089_s18 }
 0x35a   : > { %1821 = vrot.lane.b32.xlu1 %v14896_v0, %s11204_s23  ;;  %1846 = vrot.lane.b32.xlu0 %v14896_v0, %s15087_s28 }
 0x35e   : > { %1871 = vrot.lane.b32.xlu1 %v14896_v0, %s15091_s26  ;;  %1896 = vrot.lane.b32.xlu0 %v14896_v0, %s15031_s1 }
 0x362   : > { %2071 = vperm.xlu0 %10076, %v2062_v46   ;;  %1953 = vperm.xlu1 %10167, %v1950_v47  }
 0x366   : > { %2066 = vperm.xlu1 %10167, %v2061_v48  }
 0x36a   : > { %2687 = vperm.xlu1 %10167, %v905_v51  }
 0x36e   : > { %2692 = vperm.xlu1 %10167, %v906_v52  }
 0x372   : > { %2697 = vperm.xlu1 %10167, %v907_v53  }
 0x376   : > { %2702 = vperm.xlu1 %10167, %v908_v54  }
 0x37a   : > { %2707 = vperm.xlu1 %10167, %v909_v56  }
 0x37e   : > { %2712 = vperm.xlu1 %10167, %v910_v59  }
 0x382   : > { %2717 = vperm.xlu1 %10167, %v911_v60  }
 0x386   : > { %2722 = vperm.xlu1 %10167, %v912_v61  }
 0x38a   : > { %2732 = vperm.xlu1 %10167, %v914_v62  }
 0x38e   : > { %2737 = vperm.xlu1 %10167, %v915_v63  }
 0x392   : > { %2742 = vperm.xlu1 %10167, %v916_v3  }
 0x396   : > { %2747 = vperm.xlu1 %10167, %v917_v2  }
 0x39a   : > { %2752 = vperm.xlu1 %10167, %v918_v4  }
 0x39e   : > { %2757 = vperm.xlu1 %10167, %v919_v58  }
 0x3a2   : > { %2762 = vperm.xlu1 %10167, %v920_v5  }
 0x3a6   : > { %2076 = vperm.xlu1 %10167, %v2063_v11  }
 0x3ac   : > { %v1841_v13 = vpop.permute.xlu1 %1840  ;;  %v1816_v14 = vpop.permute.xlu0 %1815 }
 0x3b0   : > { %v11658_v15 = vpop.permute.xlu1 %10128  ;;  %v11660_v49 = vpop.permute.xlu0 %10133 }
 0x3b1   : > { %v10131_v6 = vunpack.i.h.bf16 %v11658_v15  ;;  %v10130_v8 = vunpack.i.l.bf16 %v11658_v15  ;;  %v10136_v16 = vunpack.i.h.bf16 %v11660_v49  ;;  %v10135_v17 = vunpack.i.l.bf16 %v11660_v49  ;;  %v1907_v15 = vld [vmem:[%s11253_s3] sm:$0xf] }
 0x3b3   : > { %v1717_v18 = vsel %vm977_vm1, %v1710_v10, %v10130_v8  ;;  %v1742_v19 = vsel %vm1003_vm2, %v1735_v9, %v10135_v17  ;;  %v1718_v20 = vsel %vm977_vm1, %v10130_v8, %v10131_v6  ;;  %v1743_v21 = vsel %vm1003_vm2, %v10135_v17, %v10136_v16 }
 0x3b4   : > { %v11670_v22 = vpop.permute.xlu1 %10138  ;;  %v11672_v23 = vpop.permute.xlu0 %10143  ;;  %v1936_v24 = vpack.c.bf16 %v1743_v21, %v1718_v20  ;;  %v1935_v25 = vpack.c.bf16 %v1742_v19, %v1717_v18 }
 0x3b5   : > { %v10141_v26 = vunpack.i.h.bf16 %v11670_v22  ;;  %v10140_v27 = vunpack.i.l.bf16 %v11670_v22  ;;  %v10146_v28 = vunpack.i.h.bf16 %v11672_v23  ;;  %v10145_v29 = vunpack.i.l.bf16 %v11672_v23 }
 0x3b6   : > { %1968 = vmatprep.subr.bf16.mxu0 %v1936_v24 }
 0x3b7   : > { %v1767_v1 = vsel %vm1029_vm4, %v1760_v12, %v10140_v27  ;;  %v1792_v30 = vsel %vm1055_vm3, %v1785_v55, %v10145_v29  ;;  %1969 = vmatpush1.bf16.msra.mxu0 %v1935_v25  ;;  %v1768_v31 = vsel %vm1029_vm4, %v10140_v27, %v10141_v26  ;;  %v1793_v32 = vsel %vm1055_vm3, %v10145_v29, %v10146_v28 }
 0x3b8   : > { %v10149_v33 = vpop.permute.xlu1 %10148  ;;  %v1866_v36 = vpop.permute.xlu0 %1865  ;;  %v1939_v37 = vpack.c.bf16 %v1793_v32, %v1768_v31  ;;  %v1938_v38 = vpack.c.bf16 %v1792_v30, %v1767_v1 }
 0x3b9   : > { %v10151_v39 = vunpack.i.h.bf16 %v10149_v33  ;;  %v10150_v40 = vunpack.i.l.bf16 %v10149_v33 }
 0x3ba   : > { %1970 = vmatprep.subr.bf16.mxu0 %v1939_v37 }
 0x3bb   : > { %v1823_v41 = vsel %vm1087_vm5, %v1816_v14, %v10150_v40  ;;  %1971 = vmatpush1.bf16.msra.mxu0 %v1938_v38  ;;  %v1824_v43 = vsel %vm1087_vm5, %v10150_v40, %v10151_v39 }
 0x3bc   : > { %v10154_v45 = vpop.permute.xlu1 %10153  ;;  %v10159_v46 = vpop.permute.xlu0 %10158  ;;  %v1942_v47 = vpack.c.bf16 %v1824_v43, %v11598_v35  ;;  %v1941_v48 = vpack.c.bf16 %v1823_v41, %v11595_v34  ;;  %v11157_v41 = vld [vmem:[%s11380_s11 + $0x8] sm:$0xff] }
 0x3bd   : > { %v10156_v51 = vunpack.i.h.bf16 %v10154_v45  ;;  %v10155_v52 = vunpack.i.l.bf16 %v10154_v45  ;;  %v10161_v53 = vunpack.i.h.bf16 %v10159_v46  ;;  %v10160_v54 = vunpack.i.l.bf16 %v10159_v46 }
 0x3be   : > { %1972 = vmatprep.subr.bf16.mxu0 %v1942_v47 }
 0x3bf   : > { %v1848_v56 = vsel %vm1113_vm7, %v1841_v13, %v10155_v52  ;;  %v1873_v59 = vsel %vm1139_vm6, %v1866_v36, %v10160_v54  ;;  %1973 = vmatpush1.bf16.msra.mxu0 %v1941_v48  ;;  %v1849_v60 = vsel %vm1113_vm7, %v10155_v52, %v10156_v51  ;;  %v1874_v61 = vsel %vm1139_vm6, %v10160_v54, %v10161_v53  ;;  %v10528_v48 = vld [vmem:[%s11263_s14] sm:$0xff]  }
 0x3c0   : > { %v10164_v62 = vpop.permute.xlu1 %10163  ;;  %v1895_v63 = vpop.permute.xlu0 %1894  ;;  %v1945_v3 = vpack.c.bf16 %v1874_v61, %v1849_v60  ;;  %v1944_v35 = vpack.c.bf16 %v1873_v59, %v1848_v56  ;;  %v11158_v61 = vld [vmem:[%s11380_s11 + $0x10] sm:$0xff] }
 0x3c1   : > { %v10166_v2 = vunpack.i.h.bf16 %v10164_v62  ;;  %v10165_v34 = vunpack.i.l.bf16 %v10164_v62 }
 0x3c2   : > { %1974 = vmatprep.subr.bf16.mxu0 %v1945_v3 }
 0x3c3   : > { %v1899_v4 = vsel %vm1165_vm8, %v10166_v2, %v1895_v63  ;;  %1975 = vmatpush1.bf16.msra.mxu0 %v1944_v35  ;;  %v1898_v58 = vsel %vm1165_vm8, %v10165_v34, %v10166_v2 }
 0x3c4   : > { %v1948_v5 = vpack.c.bf16 %v1899_v4, %v1899_v4  ;;  %v1716_v9 = vpop.permute.xlu1 %1715  ;;  %v1741_v10 = vpop.permute.xlu0 %1740  ;;  %v1947_v11 = vpack.c.bf16 %v1898_v58, %v1898_v58 }
 0x3c5   : > { %v1719_v55 = vsel %vm977_vm1, %v10131_v6, %v1716_v9  ;;  %v1744_v12 = vsel %vm1003_vm2, %v10136_v16, %v1741_v10 }
 0x3c6   : > { %v1937_v13 = vpack.c.bf16 %v1744_v12, %v1719_v55  ;;  %9272 = vmatprep.subr.msk.bf16.mxu0 %vm1228_vm9, %v1948_v5  ;;  %v1960_v14 = vsel %vm1228_vm9, %v1947_v11, 0 }
 0x3c7   : > { %1977 = vmatpush1.bf16.msra.mxu0 %v1960_v14 }
 0x3c8   : > { %v1766_v49 = vpop.permute.xlu1 %1765  ;;  %v1791_v8 = vpop.permute.xlu0 %1790  ;;  %9618 = vmatpush3.bf16.msra.mxu1 %v1937_v13 }
 0x3c9   : > { %v1769_v17 = vsel %vm1029_vm4, %v10141_v26, %v1766_v49  ;;  %v1794_v18 = vsel %vm1055_vm3, %v10146_v28, %v1791_v8  ;;  %9619 = vmatprep.subr.bf16.mxu1 %v14896_v0 }
 0x3ca   : > { %v1940_v19 = vpack.c.bf16 %v1794_v18, %v1769_v17  ;;  %9273 = vmatmul.mubr.msk.bf16.vlgmr.msra.gmra.mrb[8].mxu0 %vm1224_vm10, %v1907_v15 }
 0x3cb   : > { %2135 = vmatprep.mubr.bf16.mxu0 %v14894_v7 }
 0x3cc   : > { %v1822_v6 = vpop.permute.xlu1 %1821  ;;  %v1847_v16 = vpop.permute.xlu0 %1846  ;;  %9620 = vmatpush3.bf16.msra.mxu1 %v1940_v19 }
 0x3cd   : > { %v1825_v20 = vsel %vm1087_vm5, %v10151_v39, %v1822_v6  ;;  %9621 = vmatprep.subr.bf16.mxu1 %v14896_v0  ;;  %v1850_v24 = vsel %vm1113_vm7, %v10156_v51, %v1847_v16  ;;  %v11156_v39 = vld [vmem:[%s11380_s11] sm:$0xff]  ;;  %v10529_v51 = vld [vmem:[%s11263_s14 + $0x8] ss:$0 sps:$4 sm:$0xff]  }
 0x3ce   : > { %v1943_v21 = vpack.c.bf16 %v1825_v20, %v11609_v44 }
 0x3d0   : > { %v1872_v22 = vpop.permute.xlu1 %1871  ;;  %v1897_v23 = vpop.permute.xlu0 %1896  ;;  %9622 = vmatpush3.bf16.msra.mxu1 %v1943_v21 }
 0x3d1   : > { %v1875_v25 = vsel %vm1139_vm6, %v10161_v53, %v1872_v22  ;;  %v1900_v26 = vsel %vm1165_vm8, %v1895_v63, %v1897_v23  ;;  %9623 = vmatprep.subr.bf16.mxu1 %v14896_v0 }
 0x3d2   : > { %v1946_v27 = vpack.c.bf16 %v1875_v25, %v1850_v24  ;;  %v1949_v28 = vpack.c.bf16 %v1900_v26, %v1900_v26  ;;  %v930_v25 = vld [vmem:[%s11228_s13 + $0xc8] sm:$0xff]  ;;  %v937_v26 = vld [vmem:[%s11228_s13 + $0x100] sm:$0xff] }
 0x3d4   : > { %9624 = vmatpush3.bf16.msra.mxu1 %v1946_v27  ;;  %v1966_v44 = vsel %vm1228_vm9, %v1949_v28, 0  ;;  %v913_v27 = vld [vmem:[%s11228_s13 + $0x40] sm:$0xff]  ;;  %v938_v28 = vld [vmem:[%s11228_s13 + $0x108] sm:$0xff] }
 0x3d5   : > { %9625 = vmatprep.subr.bf16.mxu1 %v14896_v0 }
 0x3d8   : > { %9626 = vmatpush3.bf16.msra.mxu1 %v1966_v44  ;;  %v921_v44 = vld [vmem:[%s11228_s13 + $0x80] sm:$0xff] }
 0x3db   : > { %9628 = vmatmul.mubr.msk.bf16.vlgmr.msra.gmra.mrb[8].mxu1 %vm1224_vm10, %v1907_v15 }
 0x3dc   : > { %2145 = vmatprep.mubr.bf16.mxu1 %v14894_v7 }
 0x3e1   : > { %v1954_v29 = vpop.permute.xlu1 %1953  ;;  %v11743_v35 = vpop.permute.xlu0 %2071 }
 0x3e5   : > { %v2067_v2 = vpop.permute.xlu1 %2066 }
 0x49d   : > { %v2002_v1 = vpop.f32.mrb[8].mxu0 }
 0x49e   : > { %v2003_v30 = vadd.f32 %v2002_v1, %v1954_v29  ;;  %v2004_v31 = vpop.f32.mrb[9].mxu0  ;;  %v922_v1 = vld [vmem:[%s11228_s13 + $0x88] sm:$0xff] }
 0x49f   : > { %v2005_v32 = vadd.f32 %v2004_v31, %v1954_v29  ;;  %v2006_v33 = vpop.f32.mrb[10].mxu0  ;;  %v923_v31 = vld [vmem:[%s11228_s13 + $0x90] sm:$0xff] }
 0x4a0   : > { %v2049_v36 = vmul.f32 %v2003_v30, %v11488_v50  ;;  %v2007_v37 = vpop.f32.mrb[11].mxu0  ;;  %v940_v30 = vld [vmem:[%s11228_s13 + $0x118] sm:$0xff] }
 0x4a1   : > { %v2050_v38 = vmul.f32 %v2005_v32, %v11497_v57  ;;  %v941_v32 = vld [vmem:[%s11228_s13 + $0x120] sm:$0xff]  ;;  %v924_v33 = vld [vmem:[%s11228_s13 + $0x98] sm:$0xff] }
 0x4a2   : > { %v11716_v40 = vadd.f32 %v11156_v39, %v2049_v36  ;;  %v942_v36 = vld [vmem:[%s11228_s13 + $0x128] sm:$0xff]  ;;  %v925_v37 = vld [vmem:[%s11228_s13 + $0xa0] sm:$0xff] }
 0x4a3   : > { %v11719_v43 = vadd.f32 %v11157_v41, %v2050_v38  ;;  %v943_v38 = vld [vmem:[%s11228_s13 + $0x130] sm:$0xff]  ;;  %v926_v39 = vld [vmem:[%s11228_s13 + $0xa8] sm:$0xff]  ;;  %v945_v41 = vld [vmem:[%s11228_s13 + $0x140] sm:$0xff] }
 0x4a4   : > { %15108 = vst [vmem:[#allocation19_spill] sm:$0xff] %v11716_v40  ;;  %v2058_v45 = vpack.c.bf16 %v11716_v40, %v11716_v40 }
 0x4a5   : > { %15109 = vst [vmem:[#allocation20_spill] sm:$0xff] %v11719_v43  ;;  %v2059_v46 = vpack.c.bf16 %v11719_v43, %v11719_v43 }
 0x4a6   : > { %v2095_v47 = vsel %vm1228_vm9, %v2058_v45, 0  ;;  %v927_v45 = vld [vmem:[%s11228_s13 + $0xb0] sm:$0xff] }
 0x4a7   : > { %9277 = vmatprep.subr.msk.bf16.mxu0 %vm1228_vm9, %v2059_v46  ;;  %9967 = vmatprep.subr.msk.bf16.mxu1 %vm1228_vm9, %v2059_v46  ;;  %v946_v46 = vld [vmem:[%s11228_s13 + $0x148] sm:$0xff] }
 0x4a8   : > { %2104 = vmatpush1.bf16.msra.mxu0 %v2095_v47  ;;  %9968 = vmatpush1.bf16.msra.mxu1 %v2095_v47  ;;  %v928_v47 = vld [vmem:[%s11228_s13 + $0xb8] sm:$0xff] }
 0x4ab   : > { %9278 = vmatmul.mubr.msk.bf16.vlgmr.msra.gmra.mrb[12].mxu0 %vm2087_vm11, %v10528_v48  ;;  %9279 = vmatmul.mubr.msk.bf16.vlgmr.msra.gmra.mrb[12].mxu1 %vm2087_vm11, %v10529_v51 }
 0x4ac   : > { %9633 = vmatprep.mubr.msk.bf16.mxu1 %vm2087_vm11, %v10528_v48  ;;  %v947_v48 = vld [vmem:[%s11228_s13 + $0x150] sm:$0xff] }
 0x4ae   : > { %v2043_v52 = vpop.f32.mrb[8].mxu1 }
 0x4af   : > { %v2044_v53 = vadd.f32 %v2043_v52, %v1954_v29  ;;  %v9629_v54 = vpop.f32.mrb[9].mxu1  ;;  %v939_v29 = vld [vmem:[%s11228_s13 + $0x110] sm:$0xff]  ;;  %v948_v52 = vld [vmem:[%s11228_s13 + $0x158] sm:$0xff] }
 0x4b0   : > { %v2046_v56 = vpop.f32.mrb[10].mxu1  ;;  %v949_v54 = vld [vmem:[%s11228_s13 + $0x160] sm:$0xff] }
 0x4b1   : > { %v2051_v59 = vmul.f32 %v2044_v53, %v11483_v42  ;;  %v9630_v60 = vpop.f32.mrb[11].mxu1  ;;  %v931_v53 = vld [vmem:[%s11228_s13 + $0xd0] sm:$0xff]  ;;  %v932_v56 = vld [vmem:[%s11228_s13 + $0xd8] sm:$0xff] }
 0x4b2   : > { %v933_v60 = vld [vmem:[%s11228_s13 + $0xe0] sm:$0xff] }
 0x4b3   : > { %v11735_v62 = vadd.f32 %v11158_v61, %v2051_v59  ;;  %v950_v59 = vld [vmem:[%s11228_s13 + $0x168] sm:$0xff]  ;;  %v951_v61 = vld [vmem:[%s11228_s13 + $0x170] sm:$0xff] }
 0x4b5   : > { %15110 = vst [vmem:[#allocation21_spill] sm:$0xff] %v11735_v62  ;;  %v2060_v63 = vpack.c.bf16 %v11735_v62, %v11735_v62 }
 0x4b7   : > { %9969 = vmatprep.subr.msk.bf16.mxu1 %vm1228_vm9, %v2060_v63  ;;  %v2101_v3 = vsel %vm1228_vm9, %v2060_v63, 0  ;;  %v934_v63 = vld [vmem:[%s11228_s13 + $0xe8] sm:$0xff] }
 0x4b8   : > { %9632 = vmatpush3.bf16.msra.mxu1 %v2101_v3  ;;  %v952_v3 = vld [vmem:[%s11228_s13 + $0x178] sm:$0xff] }
 0x4bb   : > { %9634 = vmatmul.mubr.msk.bf16.vlgmr.msra.gmra.mrb[16].mxu1 %vm2087_vm11, %v10529_v51  ;;  %v929_v51 = vld [vmem:[%s11228_s13 + $0xc0] sm:$0xff] }
 0x4bc   : > { %2288 = vmatprep.mubr.bf16.mxu1 %v14894_v7 }
 0x57e   : > { %v2137_v34 = vpop.f32.mrb[12].mxu0  ;;  %v11745_v4 = vpop.f32.mrb[12].mxu1 }
 0x57f   : > { %v2138_v58 = vadd.f32 %v2137_v34, %v2067_v2  ;;  %v2139_v5 = vpop.f32.mrb[13].mxu0  ;;  %v11747_v9 = vpop.f32.mrb[13].mxu1  ;;  %v4558_v34 = vld [vmem:[%s11278_s30] sm:$0xff] }
 0x580   : > { %15111 = vst [vmem:[#allocation22_spill] sm:$0xff] %v11747_v9  ;;  %v2140_v10 = vadd.f32 %v2139_v5, %v2067_v2  ;;  %v2141_v11 = vpop.f32.mrb[14].mxu0  ;;  %v2151_v55 = vpop.f32.mrb[14].mxu1 }
 0x581   : > { %v2202_v12 = vpack.c.bf16 %v2138_v58, %v2138_v58  ;;  %v2142_v13 = vadd.f32 %v2141_v11, %v11743_v35  ;;  %v2143_v14 = vpop.f32.mrb[15].mxu0  ;;  %v2152_v15 = vpop.f32.mrb[15].mxu1  ;;  %v936_v58 = vld [vmem:[%s11228_s13 + $0xf8] sm:$0xff] }
 0x582   : > { %v11750_v49 = vpack.c.bf16 %v2140_v10, %v2140_v10  ;;  %v2144_v8 = vadd.f32 %v2143_v14, %v11743_v35 }
 0x583   : > { %v11754_v17 = vsel %vm1228_vm9, %v2202_v12, 0  ;;  %v2205_v18 = vpack.c.bf16 %v2142_v13, %v2142_v13 }
 0x584   : > { %15112 = vst [vmem:[#allocation23_spill] sm:$0xff] %v11750_v49  ;;  %15113 = vst [vmem:[#allocation24_spill] sm:$0xff] %v11754_v17  ;;  %v2990_v19 = vpack.c.bf16 %v2144_v8, %v2144_v8  ;;  %9282 = vmatprep.subr.msk.bf16.mxu1 %vm1228_vm9, %v11750_v49 }
 0x585   : > { %2207 = vxpose.xlu0.c.b16.start.end [1/1] (short) %v2205_v18, 128  ;;  %2257 = vmatpush1.bf16.msra.mxu1 %v11754_v17 }
 0x586   : > { %2992 = vxpose.xlu1.c.b16.start.end [1/1] (short) %v2990_v19, 128  ;;  %9655 = vmatprep.subr.bf16.mxu1 %v14896_v0  ;;  %v11839_v19 = vpop.permute.xlu1 %2687 }
 0x587   : > { %15117 = vst [vmem:[#allocation28_spill] sm:$0xff] %v11839_v19 }
 0x58e   : > { %v11760_v6 = vpop.f32.mrb[16].mxu1 }
 0x58f   : > { %15114 = vst [vmem:[#allocation25_spill] sm:$0xff] %v11760_v6  ;;  %v2188_v16 = vpop.f32.mrb[17].mxu1 }
 0x590   : > { %v2189_v20 = vadd.f32 %v2188_v16, %v2067_v2  ;;  %v9636_v21 = vpop.f32.mrb[18].mxu1  ;;  %v935_v2 = vld [vmem:[%s11228_s13 + $0xf0] sm:$0xff]  ;;  %v11841_v16 = vpop.permute.xlu1 %2692 }
 0x591   : > { %v11762_v22 = vpop.f32.mrb[19].mxu1  ;;  %15118 = vst [vmem:[#allocation29_spill] sm:$0xff] %v11841_v16 }
 0x592   : > { %v11764_v23 = vpack.c.bf16 %v2189_v20, %v2189_v20  ;;  %v2192_v13 = vadd.f32 %v11762_v22, %v11743_v35  ;;  %v944_v35 = vld [vmem:[%s11228_s13 + $0x138] sm:$0xff] }
 0x594   : > { %15115 = vst [vmem:[#allocation26_spill] sm:$0xff] %v11764_v23  ;;  %9970 = vmatprep.subr.msk.bf16.mxu0 %vm1228_vm9, %v11764_v23  ;;  %v11770_v24 = vsel %vm1228_vm9, %v11764_v23, 0  ;;  %v3769_v15 = vpack.c.bf16 %v2192_v13, %v2192_v13  ;;  %v11843_v20 = vpop.permute.xlu1 %2697 }
 0x595   : > { %15116 = vst [vmem:[#allocation27_spill] sm:$0xff] %v11770_v24  ;;  %9638 = vmatpush3.bf16.msra.mxu0 %v11770_v24  ;;  %15119 = vst [vmem:[#allocation30_spill] sm:$0xff] %v11843_v20 }
 0x598   : > { %v11845_v21 = vpop.permute.xlu1 %2702 }
 0x599   : > { %15120 = vst [vmem:[#allocation31_spill] sm:$0xff] %v11845_v21 }
 0x5a6   : > { %3508 = vperm.xlu1 %10167, %v930_v25  }
 0x5aa   : > { %4242 = vperm.xlu1 %10167, %v937_v26   ;;  %2727 = vperm.xlu0 %10076, %v913_v27  }
 0x5ae   : > { %4247 = vperm.xlu1 %10167, %v938_v28   ;;  %3463 = vperm.xlu0 %10076, %v921_v44   ;;  %v11857_v44 = vpop.permute.xlu1 %2707 }
 0x5af   : > { %15121 = vst [vmem:[#allocation32_spill] sm:$0xff] %v11857_v44 }
 0x5b2   : > { %4252 = vperm.xlu1 %10167, %v939_v29   ;;  %3468 = vperm.xlu0 %10076, %v922_v1  }
 0x5b6   : > { %4257 = vperm.xlu1 %10167, %v940_v30   ;;  %3473 = vperm.xlu0 %10076, %v923_v31  }
 0x5ba   : > { %4262 = vperm.xlu1 %10167, %v941_v32   ;;  %3478 = vperm.xlu0 %10076, %v924_v33  }
 0x5be   : > { %4267 = vperm.xlu1 %10167, %v942_v36   ;;  %3483 = vperm.xlu0 %10076, %v925_v37  }
 0x5c2   : > { %4272 = vperm.xlu1 %10167, %v943_v38   ;;  %3488 = vperm.xlu0 %10076, %v926_v39  }
 0x5c6   : > { %4282 = vperm.xlu1 %10167, %v945_v41   ;;  %3493 = vperm.xlu0 %10076, %v927_v45   ;;  %v11879_v41 = vpop.permute.xlu1 %2712 }
 0x5c7   : > { %15122 = vst [vmem:[#allocation33_spill] sm:$0xff] %v11879_v41 }
 0x5ca   : > { %4287 = vperm.xlu1 %10167, %v946_v46   ;;  %3498 = vperm.xlu0 %10076, %v928_v47  }
 0x5ce   : > { %4292 = vperm.xlu1 %10167, %v947_v48   ;;  %3503 = vperm.xlu0 %10076, %v929_v51  }
 0x5d2   : > { %4297 = vperm.xlu1 %10167, %v948_v52   ;;  %3513 = vperm.xlu0 %10076, %v931_v53  }
 0x5d6   : > { %4302 = vperm.xlu1 %10167, %v949_v54   ;;  %3518 = vperm.xlu0 %10076, %v932_v56  }
 0x5da   : > { %4307 = vperm.xlu1 %10167, %v950_v59   ;;  %3523 = vperm.xlu0 %10076, %v933_v60  }
 0x5de   : > { %4312 = vperm.xlu1 %10167, %v951_v61   ;;  %3528 = vperm.xlu0 %10076, %v934_v63   ;;  %v11900_v61 = vpop.permute.xlu1 %2717 }
 0x5df   : > { %15123 = vst [vmem:[#allocation34_spill] sm:$0xff] %v11900_v61 }
 0x5e2   : > { %4317 = vperm.xlu1 %10167, %v952_v3   ;;  %3533 = vperm.xlu0 %10076, %v935_v2  }
 0x5e6   : > { %4561 = vperm.xlu1 %10167, %v4558_v34   ;;  %3538 = vperm.xlu0 %10076, %v936_v58  }
 0x5ea   : > { %4749 = vrot.lane.b32.xlu1 %v14896_v0, %s15089_s18 }
 0x5eb   : > { %v2215_v5 = vpop.trf.xlu0 }
 0x5ec   : > { %9283 = vmatmul.mubr.msk.bf16.vlgmr.msra.gmra.mrb[20].mxu1 %vm2087_vm11, %v2215_v5  ;;  %9639 = vmatprep.mubr.msk.bf16.mxu0 %vm2087_vm11, %v2215_v5 }
 0x5ed   : > { %2298 = vmatprep.mubr.bf16.mxu1 %v14894_v7 }
 0x5ef   : > { %v2216_v10 = vpop.trf.xlu0 }
 0x5f0   : > { %9640 = vmatmul.mubr.msk.bf16.vlgmr.msra.gmra.mrb[16].mxu0 %vm2087_vm11, %v2216_v10 }
 0x5f3   : > { %v2217_v11 = vpop.trf.xlu0 }
 0x5f4   : > { %9284 = vmatmul.mubr.msk.bf16.gmra.mrb[24].mxu1 %vm2087_vm11, %v2216_v10  ;;  %9643 = vmatprep.mubr.msk.bf16.mxu0 %vm2087_vm11, %v2217_v11 }
 0x5f5   : > { %2308 = vmatprep.mubr.bf16.mxu1 %v14894_v7 }
 0x5f7   : > { %v2218_v55 = vpop.trf.xlu0 }
 0x5f8   : > { %9644 = vmatmul.mubr.msk.bf16.gmra.mrb[20].mxu0 %vm2087_vm11, %v2218_v55 }
 0x5fb   : > { %v2219_v12 = vpop.trf.xlu0 }
 0x5fc   : > { %9285 = vmatmul.mubr.msk.bf16.gmra.mrb[28].mxu1 %vm2087_vm11, %v2217_v11  ;;  %9647 = vmatprep.mubr.msk.bf16.mxu0 %vm2087_vm11, %v2219_v12 }
 0x5fd   : > { %2318 = vmatprep.mubr.bf16.mxu1 %v14894_v7 }
 0x5ff   : > { %v2220_v14 = vpop.trf.xlu0 }
 0x600   : > { %9648 = vmatmul.mubr.msk.bf16.gmra.mrb[24].mxu0 %vm2087_vm11, %v2220_v14 }
 0x603   : > { %v2221_v8 = vpop.trf.xlu0 }
 0x604   : > { %3771 = vxpose.xlu0.c.b16.start.end [1/1] (short) %v3769_v15, 128  ;;  %9286 = vmatmul.mubr.msk.bf16.gmra.mrb[32].mxu1 %vm2087_vm11, %v2218_v55  ;;  %v11920_v15 = vpop.permute.xlu1 %2722 }
 0x605   : > { %9651 = vmatprep.mubr.msk.bf16.mxu0 %vm2087_vm11, %v2221_v8  ;;  %2328 = vmatprep.mubr.bf16.mxu1 %v14894_v7  ;;  %15124 = vst [vmem:[#allocation35_spill] sm:$0xff] %v11920_v15 }
 0x607   : > { %v2222_v18 = vpop.trf.xlu0 }
 0x608   : > { %9652 = vmatmul.mubr.msk.bf16.gmra.mrb[28].mxu0 %vm2087_vm11, %v2222_v18 }
 0x609   : > { %2938 = vmatprep.mubr.bf16.mxu0 %v14894_v7 }
 0x60c   : > { %9287 = vmatmul.mubr.msk.bf16.gmra.mrb[36].mxu1 %vm2087_vm11, %v2219_v12 }
 0x60d   : > { %2338 = vmatprep.mubr.bf16.mxu1 %v14894_v7 }
 0x614   : > { %9288 = vmatmul.mubr.msk.bf16.gmra.mrb[40].mxu1 %vm2087_vm11, %v2220_v14 }
 0x615   : > { %2348 = vmatprep.mubr.bf16.mxu1 %v14894_v7 }
 0x61c   : > { %9289 = vmatmul.mubr.msk.bf16.gmra.mrb[44].mxu1 %vm2087_vm11, %v2221_v8 }
 0x61d   : > { %2358 = vmatprep.mubr.bf16.mxu1 %v14894_v7  ;;  %v11941_v7 = vpop.permute.xlu1 %2732 }
 0x61e   : > { %15125 = vst [vmem:[#allocation36_spill] sm:$0xff] %v11941_v7 }
 0x621   : > { %v11958_v40 = vpop.permute.xlu1 %2737 }
 0x622   : > { %15128 = vst [vmem:[#allocation39_spill] sm:$0xff] %v11958_v40 }
 0x624   : > { %9290 = vmatmul.mubr.msk.bf16.gmra.mrb[48].mxu1 %vm2087_vm11, %v2222_v18 }
 0x625   : > { %9671 = vmatprep.mubr.msk.bf16.mxu1 %vm11209_vm0, %v14896_v0  ;;  %v11966_v49 = vpop.permute.xlu1 %2742 }
 0x626   : > { %15131 = vst [vmem:[#allocation42_spill] sm:$0xff] %v11966_v49 }
 0x629   : > { %4277 = vperm.xlu0 %10076, %v944_v35  }
 0x62d   : > { %4724 = vrot.lane.b32.xlu0 %v14896_v0, %s11203_s22 }
 0x6bf   : > { %v11847_v22 = vpop.f32.mrb[20].mxu1 }
 0x6c0   : > { %v11849_v25 = vpop.f32.mrb[21].mxu1 }
 0x6c1   : > { %v11851_v26 = vpop.f32.mrb[22].mxu1 }
 0x6c2   : > { %v11853_v27 = vpop.f32.mrb[23].mxu1 }
 0x6c3   : > { %v11855_v28 = vpop.f32.mrb[16].mxu0 }
 0x6c4   : > { %v11859_v29 = vpop.f32.mrb[17].mxu0 }
 0x6c5   : > { %v2508_v1 = vmax.f32 %v11859_v29, %v11855_v28  ;;  %v11863_v30 = vpop.f32.mrb[18].mxu0 }
 0x6c6   : > { %v11865_v31 = vpop.f32.mrb[19].mxu0 }
 0x6c7   : > { %v11867_v32 = vpop.f32.mrb[24].mxu1  ;;  %v2509_v33 = vmax.f32 %v11865_v31, %v11863_v30 }
 0x6c8   : > { %v2466_v36 = vmax.f32 %v11847_v22, %v11867_v32  ;;  %v11873_v37 = vpop.f32.mrb[25].mxu1 }
 0x6c9   : > { %v2487_v38 = vmax.f32 %v11849_v25, %v11873_v37  ;;  %v11877_v39 = vpop.f32.mrb[26].mxu1 }
 0x6ca   : > { %v2467_v45 = vmax.f32 %v11851_v26, %v11877_v39  ;;  %v11883_v46 = vpop.f32.mrb[27].mxu1 }
 0x6cb   : > { %v2488_v47 = vmax.f32 %v11853_v27, %v11883_v46  ;;  %v11887_v48 = vpop.f32.mrb[20].mxu0 }
 0x6cc   : > { %v11889_v51 = vpop.f32.mrb[21].mxu0 }
 0x6cd   : > { %v2510_v52 = vmax.f32 %v2508_v1, %v11889_v51  ;;  %v11892_v53 = vpop.f32.mrb[22].mxu0 }
 0x6ce   : > { %v11894_v54 = vpop.f32.mrb[23].mxu0 }
 0x6cf   : > { %v2511_v56 = vmax.f32 %v2509_v33, %v11894_v54  ;;  %v11897_v59 = vpop.f32.mrb[28].mxu1  ;;  %v2512_v60 = vmax.f32 %v2510_v52, %v11887_v48 }
 0x6d0   : > { %v2468_v63 = vmax.f32 %v2466_v36, %v11897_v59  ;;  %v11903_v3 = vpop.f32.mrb[29].mxu1 }
 0x6d1   : > { %v2489_v2 = vmax.f32 %v2487_v38, %v11903_v3  ;;  %v11906_v34 = vpop.f32.mrb[30].mxu1  ;;  %v2513_v58 = vmax.f32 %v2511_v56, %v11892_v53 }
 0x6d2   : > { %v2469_v5 = vmax.f32 %v2467_v45, %v11906_v34  ;;  %v11910_v10 = vpop.f32.mrb[31].mxu1 }
 0x6d3   : > { %v2490_v11 = vmax.f32 %v2488_v47, %v11910_v10  ;;  %v11913_v55 = vpop.f32.mrb[24].mxu0 }
 0x6d4   : > { %v11915_v12 = vpop.f32.mrb[25].mxu0 }
 0x6d5   : > { %v2514_v13 = vmax.f32 %v2512_v60, %v11915_v12  ;;  %v11918_v14 = vpop.f32.mrb[26].mxu0 }
 0x6d6   : > { %v11922_v8 = vpop.f32.mrb[27].mxu0 }
 0x6d7   : > { %v2515_v18 = vmax.f32 %v2513_v58, %v11922_v8  ;;  %v11925_v35 = vpop.f32.mrb[32].mxu1  ;;  %v2516_v1 = vmax.f32 %v2514_v13, %v11913_v55 }
 0x6d8   : > { %v2470_v33 = vmax.f32 %v2468_v63, %v11925_v35  ;;  %v11929_v36 = vpop.f32.mrb[33].mxu1 }
 0x6d9   : > { %v2491_v38 = vmax.f32 %v2489_v2, %v11929_v36  ;;  %v11932_v45 = vpop.f32.mrb[34].mxu1  ;;  %v2517_v47 = vmax.f32 %v2515_v18, %v11918_v14 }
 0x6da   : > { %v2471_v52 = vmax.f32 %v2469_v5, %v11932_v45  ;;  %v11936_v56 = vpop.f32.mrb[35].mxu1 }
 0x6db   : > { %v2492_v60 = vmax.f32 %v2490_v11, %v11936_v56  ;;  %v11939_v58 = vpop.f32.mrb[28].mxu0 }
 0x6dc   : > { %v11943_v13 = vpop.f32.mrb[29].mxu0 }
 0x6dd   : > { %v2518_v63 = vmax.f32 %v2516_v1, %v11943_v13  ;;  %v11946_v0 = vpop.f32.mrb[30].mxu0 }
 0x6de   : > { %v2454_v2 = vpop.f32.mrb[31].mxu0 }
 0x6df   : > { %v2520_v42 = vmax.f32 %v2518_v63, %v11939_v58  ;;  %v2519_v18 = vmax.f32 %v2517_v47, %v2454_v2  ;;  %v11949_v62 = vpop.f32.mrb[36].mxu1 }
 0x6e0   : > { %15126 = vst [vmem:[#allocation37_spill] sm:$0xff] %v11949_v62  ;;  %v2472_v5 = vmax.f32 %v2470_v33, %v11949_v62  ;;  %v11952_v57 = vpop.f32.mrb[37].mxu1 }
 0x6e1   : > { %v2521_v11 = vmax.f32 %v2519_v18, %v11946_v0  ;;  %v2493_v50 = vmax.f32 %v2491_v38, %v11952_v57  ;;  %v11956_v43 = vpop.f32.mrb[38].mxu1 }
 0x6e2   : > { %15127 = vst [vmem:[#allocation38_spill] sm:$0xff] %v11956_v43  ;;  %v2473_v1 = vmax.f32 %v2471_v52, %v11956_v43  ;;  %v11961_v6 = vpop.f32.mrb[39].mxu1 }
 0x6e3   : > { %15129 = vst [vmem:[#allocation40_spill] sm:$0xff] %v11961_v6  ;;  %v2522_v63 = vmax.f32 %v2520_v42, %v2521_v11  ;;  %v2494_v47 = vmax.f32 %v2492_v60, %v11961_v6 }
 0x6e5   : > { %v2523_v9 = vrot.slane %v2522_v63, 4 }
 0x6e7   : > { %v2524_v17 = vmax.f32 %v2522_v63, %v2523_v9  ;;  %v11964_v33 = vpop.f32.mrb[40].mxu1  ;;  %v11978_v63 = vpop.permute.xlu1 %2747 }
 0x6e8   : > { %15130 = vst [vmem:[#allocation41_spill] sm:$0xff] %v11964_v33  ;;  %v2474_v18 = vmax.f32 %v2472_v5, %v11964_v33  ;;  %v11969_v38 = vpop.f32.mrb[41].mxu1  ;;  %15134 = vst [vmem:[#allocation45_spill] sm:$0xff] %v11978_v63 }
 0x6e9   : > { %15132 = vst [vmem:[#allocation43_spill] sm:$0xff] %v11969_v38  ;;  %v2525_v24 = vrot.slane %v2524_v17, 2  ;;  %v2495_v23 = vmax.f32 %v2493_v50, %v11969_v38  ;;  %v11972_v62 = vpop.f32.mrb[42].mxu1 }
 0x6ea   : > { %15133 = vst [vmem:[#allocation44_spill] sm:$0xff] %v11972_v62  ;;  %v2475_v52 = vmax.f32 %v2473_v1, %v11972_v62  ;;  %v11975_v42 = vpop.f32.mrb[43].mxu1 }
 0x6eb   : > { %v2526_v60 = vmax.f32 %v2524_v17, %v2525_v24  ;;  %v2496_v9 = vmax.f32 %v2494_v47, %v11975_v42 }
 0x6ed   : > { %v2527_v11 = vrot.slane %v2526_v60, 1 }
 0x6ef   : > { %v2528_v43 = vmax.f32 %v2526_v60, %v2527_v11  ;;  %v11980_v6 = vpop.f32.mrb[44].mxu1 }
 0x6f0   : > { %15135 = vst [vmem:[#allocation46_spill] sm:$0xff] %v11980_v6  ;;  %v2476_v5 = vmax.f32 %v2474_v18, %v11980_v6  ;;  %v11983_v33 = vpop.f32.mrb[45].mxu1 }
 0x6f1   : > { %15136 = vst [vmem:[#allocation47_spill] sm:$0xff] %v11983_v33  ;;  %v11985_v50 = vmax.f32 %v2528_v43, -1e+30  ;;  %v2497_v38 = vmax.f32 %v2495_v23, %v11983_v33  ;;  %v11988_v1 = vpop.f32.mrb[46].mxu1  ;;  %v11999_v43 = vpop.permute.xlu1 %2752 }
 0x6f2   : > { %15138 = vst [vmem:[#allocation49_spill] sm:$0xff] %v11988_v1  ;;  %v2477_v17 = vmax.f32 %v2475_v52, %v11988_v1  ;;  %v11991_v24 = vpop.f32.mrb[47].mxu1  ;;  %15140 = vst [vmem:[#allocation51_spill] sm:$0xff] %v11999_v43 }
 0x6f3   : > { %15137 = vst [vmem:[#allocation48_spill] sm:$0xff] %v11985_v50  ;;  %15139 = vst [vmem:[#allocation50_spill] sm:$0xff] %v11991_v24  ;;  %v2582_v47 = vsub.f32 %v2454_v2, %v11985_v50  ;;  %v2498_v60 = vmax.f32 %v2496_v9, %v11991_v24  ;;  %v2543_v11 = vsub.f32 %v11859_v29, %v11985_v50 }
 0x6f4   : > { %v2546_v18 = vsub.f32 %v11865_v31, %v11985_v50  ;;  %v2549_v23 = vsub.f32 %v11855_v28, %v11985_v50  ;;  %v2552_v52 = vsub.f32 %v11863_v30, %v11985_v50  ;;  %v2555_v1 = vsub.f32 %v11889_v51, %v11985_v50 }
 0x6f5   : > { %v2671_v2 = vmul.f32 1.442695, %v2582_v47  ;;  %v2593_v6 = vmul.f32 1.442695, %v2543_v11  ;;  %v2558_v29 = vsub.f32 %v11894_v54, %v11985_v50  ;;  %v2561_v31 = vsub.f32 %v11887_v48, %v11985_v50 }
 0x6f6   : > { %v2599_v9 = vmul.f32 1.442695, %v2546_v18  ;;  %v2605_v24 = vmul.f32 1.442695, %v2549_v23  ;;  %v2611_v28 = vmul.f32 1.442695, %v2552_v52  ;;  %v2564_v30 = vsub.f32 %v11892_v53, %v11985_v50  ;;  %v12025_v52 = vpop.permute.xlu1 %2757 }
 0x6f7   : > { %10532 = vpow2.f32 %v2671_v2  ;;  %v12011_v33 = vpop.f32.mrb[48].mxu1  ;;  %v2617_v47 = vmul.f32 1.442695, %v2555_v1  ;;  %v2567_v54 = vsub.f32 %v11915_v12, %v11985_v50  ;;  %v2623_v48 = vmul.f32 1.442695, %v2558_v29  ;;  %15141 = vst [vmem:[#allocation52_spill] sm:$0xff] %v12025_v52 }
 0x6f8   : > { %v2478_v62 = vmax.f32 %v2476_v5, %v12011_v33  ;;  %v12016_v51 = vpop.f32.mrb[49].mxu1  ;;  %10534 = vpow2.f32 %v2593_v6  ;;  %v2570_v23 = vsub.f32 %v11922_v8, %v11985_v50  ;;  %v2629_v6 = vmul.f32 1.442695, %v2561_v31 }
 0x6f9   : > { %v2499_v11 = vmax.f32 %v2497_v38, %v12016_v51  ;;  %v12021_v18 = vpop.f32.mrb[50].mxu1  ;;  %10536 = vpow2.f32 %v2599_v9  ;;  %v2573_v12 = vsub.f32 %v11913_v55, %v11985_v50  ;;  %v2635_v1 = vmul.f32 1.442695, %v2564_v30 }
 0x6fa   : > { %v2479_v53 = vmax.f32 %v2477_v17, %v12021_v18  ;;  %v12028_v5 = vpop.f32.mrb[51].mxu1  ;;  %10538 = vpow2.f32 %v2605_v24  ;;  %v2576_v2 = vsub.f32 %v11918_v14, %v11985_v50  ;;  %v2641_v8 = vmul.f32 1.442695, %v2567_v54  ;;  %v12041_v14 = vpop.permute.xlu1 %2762 }
 0x6fb   : > { %v2500_v38 = vmax.f32 %v2498_v60, %v12028_v5  ;;  %10540 = vpow2.f32 %v2611_v28  ;;  %v2579_v17 = vsub.f32 %v11943_v13, %v11985_v50  ;;  %v2647_v24 = vmul.f32 1.442695, %v2570_v23  ;;  %15142 = vst [vmem:[#allocation53_spill] sm:$0xff] %v12041_v14 }
 0x6fc   : > { %v2480_v9 = vmax.f32 %v2478_v62, %v2479_v53  ;;  %10542 = vpow2.f32 %v2617_v47  ;;  %v2585_v31 = vsub.f32 %v11939_v58, %v11985_v50  ;;  %v2653_v60 = vmul.f32 1.442695, %v2573_v12 }
 0x6fd   : > { %v2501_v29 = vmax.f32 %v2499_v11, %v2500_v38  ;;  %10544 = vpow2.f32 %v2623_v48  ;;  %v2659_v30 = vmul.f32 1.442695, %v2576_v2  ;;  %v2588_v62 = vsub.f32 %v11946_v0, %v11985_v50  ;;  %v12055_v50 = vpop.permute.xlu0 %2727 }
 0x6fe   : > { %v2481_v55 = vrot.slane %v2480_v9, 4  ;;  %10546 = vpow2.f32 %v2629_v6  ;;  %v2665_v13 = vmul.f32 1.442695, %v2579_v17  ;;  %v2677_v48 = vmul.f32 1.442695, %v2585_v31  ;;  %15145 = vst [vmem:[#allocation55_spill] sm:$0xff] %v12055_v50 }
 0x6ff   : > { %v2502_v28 = vrot.slane %v2501_v29, 4  ;;  %10548 = vpow2.f32 %v2635_v1  ;;  %v2683_v38 = vmul.f32 1.442695, %v2588_v62 }
 0x700   : > { %v2482_v47 = vmax.f32 %v2480_v9, %v2481_v55  ;;  %10550 = vpow2.f32 %v2641_v8 }
 0x701   : > { %v10533_v54 = vpop.eup %10532  ;;  %v2503_v11 = vmax.f32 %v2501_v29, %v2502_v28  ;;  %10552 = vpow2.f32 %v2647_v24  ;;  %v12046_v24 = vpop.permute.xlu1 %2076 }
 0x702   : > { %v10535_v23 = vpop.eup %10534  ;;  %v2483_v58 = vrot.slane %v2482_v47, 2  ;;  %10554 = vpow2.f32 %v2653_v60  ;;  %15143 = vst [vmem:[#allocation54_spill] sm:$0xff] %v12046_v24  ;;  %v2148_v62 = vadd.f32 %v11745_v4, %v12046_v24 }
 0x703   : > { %v10537_v53 = vpop.eup %10536  ;;  %v2504_v6 = vrot.slane %v2503_v11, 2  ;;  %v2767_v12 = vmul.f32 %v10535_v23, %v11839_v19  ;;  %10556 = vpow2.f32 %v2659_v30 }
 0x704   : > { %v10539_v1 = vpop.eup %10538  ;;  %v2484_v0 = vmax.f32 %v2482_v47, %v2483_v58  ;;  %v2770_v2 = vmul.f32 %v10537_v53, %v11841_v16  ;;  %10558 = vpow2.f32 %v2665_v13 }
 0x705   : > { %v10541_v9 = vpop.eup %10540  ;;  %v2505_v8 = vmax.f32 %v2503_v11, %v2504_v6  ;;  %v2773_v17 = vmul.f32 %v10539_v1, %v11843_v20  ;;  %10560 = vpow2.f32 %v2677_v48 }
 0x706   : > { %v10543_v29 = vpop.eup %10542  ;;  %v2485_v31 = vrot.slane %v2484_v0, 1  ;;  %v2858_v55 = vadd.f32 %v2770_v2, %v2767_v12  ;;  %v2884_v60 = vpack.c.bf16 %v2770_v2, %v2767_v12  ;;  %v2776_v28 = vmul.f32 %v10541_v9, %v11845_v21 }
 0x707   : > { %v10545_v30 = vpop.eup %10544  ;;  %v2506_v47 = vrot.slane %v2505_v8, 1  ;;  %v2779_v13 = vmul.f32 %v10543_v29, %v11857_v44  ;;  %10562 = vpow2.f32 %v2683_v38  ;;  %v15144_v12 = vmov 0.0  }
 0x708   : > { %v10547_v11 = vpop.eup %10546  ;;  %v2486_v23 = vmax.f32 %v2484_v0, %v2485_v31  ;;  %9656 = vmatpush3.bf16.msra.mxu1 %v2884_v60  ;;  %v2859_v48 = vadd.f32 %v2858_v55, %v2773_v17  ;;  %v2887_v58 = vpack.c.bf16 %v2776_v28, %v2773_v17  ;;  %v2782_v53 = vmul.f32 %v10545_v30, %v11879_v41 }
 0x709   : > { %v10549_v6 = vpop.eup %10548  ;;  %v2507_v1 = vmax.f32 %v2505_v8, %v2506_v47  ;;  %9657 = vmatprep.subr.bf16.mxu1 %v15144_v12  ;;  %v2785_v2 = vmul.f32 %v10547_v11, %v11900_v61  ;;  %v12060_v55 = vpack.c.bf16 %v2148_v62, %v2148_v62  ;;  %v12066_v60 = vmul.f32 %v10533_v54, %v11999_v43 }
 0x70a   : > { %v10551_v9 = vpop.eup %10550  ;;  %v12057_v4 = vmax.f32 %v2486_v23, -1e+30  ;;  %v2860_v29 = vadd.f32 %v2859_v48, %v2776_v28  ;;  %v2890_v38 = vpack.c.bf16 %v2782_v53, %v2779_v13  ;;  %v2788_v0 = vmul.f32 %v10549_v6, %v11920_v15 }
 0x70b   : > { %v10553_v31 = vpop.eup %10552  ;;  %v12062_v17 = vmax.f32 %v2507_v1, -1e+30  ;;  %v2791_v8 = vmul.f32 %v10551_v9, %v12055_v50 }
 0x70c   : > { %v10555_v30 = vpop.eup %10554  ;;  %v2586_v47 = vsub.f32 %v12021_v18, %v12057_v4  ;;  %9658 = vmatpush3.bf16.msra.mxu1 %v2887_v58  ;;  %v2861_v11 = vadd.f32 %v2860_v29, %v2779_v13  ;;  %v2893_v28 = vpack.c.bf16 %v2788_v0, %v2785_v2  ;;  %v2794_v23 = vmul.f32 %v10553_v31, %v11941_v7 }
 0x70d   : > { %v10557_v48 = vpop.eup %10556  ;;  %v2587_v62 = vsub.f32 %v12028_v5, %v12062_v17  ;;  %9659 = vmatprep.subr.bf16.mxu1 %v15144_v12  ;;  %v12075_v6 = vmul.f32 %v10555_v30, %v11958_v40  ;;  %v2542_v54 = vsub.f32 %v11849_v25, %v12062_v17  ;;  %v2545_v18 = vsub.f32 %v11853_v27, %v12062_v17 }
 0x70e   : > { %v10559_v58 = vpop.eup %10558  ;;  %v2679_v13 = vmul.f32 1.442695, %v2586_v47  ;;  %v2862_v1 = vadd.f32 %v2861_v11, %v2782_v53  ;;  %v2896_v9 = vpack.c.bf16 %v2794_v23, %v2791_v8  ;;  %v12082_v29 = vmul.f32 %v10557_v48, %v11966_v49 }
 0x70f   : > { %v10561_v31 = vpop.eup %10560  ;;  %v2681_v5 = vmul.f32 1.442695, %v2587_v62  ;;  %v12085_v24 = vmul.f32 %v10559_v58, %v11978_v63  ;;  %v2591_v30 = vmul.f32 1.442695, %v2542_v54  ;;  %v2597_v43 = vmul.f32 1.442695, %v2545_v18 }
 0x710   : > { %10564 = vpow2.f32 %v2679_v13  ;;  %9660 = vmatpush3.bf16.msra.mxu1 %v2890_v38  ;;  %v2863_v25 = vadd.f32 %v2862_v1, %v2785_v2  ;;  %v2899_v27 = vpack.c.bf16 %v12082_v29, %v12075_v6  ;;  %v2541_v53 = vsub.f32 %v11847_v22, %v12057_v4 }
 0x711   : > { %v10563_v47 = vpop.eup %10562  ;;  %10566 = vpow2.f32 %v2681_v5  ;;  %9661 = vmatprep.subr.bf16.mxu1 %v15144_v12  ;;  %v2902_v11 = vpack.c.bf16 %v12066_v60, %v12085_v24  ;;  %v2544_v48 = vsub.f32 %v11851_v26, %v12057_v4  ;;  %v2548_v38 = vsub.f32 %v11873_v37, %v12062_v17 }
 0x712   : > { %v2864_v2 = vadd.f32 %v2863_v25, %v2788_v0  ;;  %10568 = vpow2.f32 %v2591_v30  ;;  %v2589_v62 = vmul.f32 1.442695, %v2541_v53  ;;  %v2551_v54 = vsub.f32 %v11883_v46, %v12062_v17 }
 0x713   : > { %10570 = vpow2.f32 %v2597_v43  ;;  %v2595_v22 = vmul.f32 1.442695, %v2544_v48  ;;  %v2603_v18 = vmul.f32 1.442695, %v2548_v38  ;;  %v12101_v58 = vmul.f32 %v10561_v31, %v12025_v52  ;;  %v12134_v48 = vpop.trf.xlu1 }
 0x714   : > { %9662 = vmatpush3.bf16.msra.mxu1 %v2893_v28  ;;  %v2865_v13 = vadd.f32 %v2864_v2, %v2791_v8  ;;  %10572 = vpow2.f32 %v2589_v62  ;;  %v2609_v1 = vmul.f32 1.442695, %v2551_v54  ;;  %v12104_v26 = vmul.f32 %v10563_v47, %v12041_v14 }
 0x715   : > { %9663 = vmatprep.subr.bf16.mxu1 %v15144_v12  ;;  %10574 = vpow2.f32 %v2595_v22  ;;  %v2547_v37 = vsub.f32 %v11867_v32, %v12057_v4  ;;  %v2550_v46 = vsub.f32 %v11877_v39, %v12057_v4  ;;  %v2554_v43 = vsub.f32 %v11903_v3, %v12062_v17 }
 0x716   : > { %v2866_v0 = vadd.f32 %v2865_v13, %v2794_v23  ;;  %10576 = vpow2.f32 %v2603_v18  ;;  %v2905_v8 = vpack.c.bf16 %v12104_v26, %v12101_v58  ;;  %v2557_v28 = vsub.f32 %v11910_v10, %v12062_v17  ;;  %v15146_v13 = vld [vmem:[#allocation40_spill] sm:$0xff] }
 0x717   : > { %10578 = vpow2.f32 %v2609_v1  ;;  %v2601_v31 = vmul.f32 1.442695, %v2547_v37  ;;  %v2607_v5 = vmul.f32 1.442695, %v2550_v46  ;;  %v2615_v30 = vmul.f32 1.442695, %v2554_v43 }
 0x718   : > { %9664 = vmatpush3.bf16.msra.mxu1 %v2896_v9  ;;  %v2867_v32 = vadd.f32 %v2866_v0, %v12075_v6  ;;  %v2621_v25 = vmul.f32 1.442695, %v2557_v28  ;;  %v2553_v39 = vsub.f32 %v11897_v59, %v12057_v4  ;;  %v2556_v3 = vsub.f32 %v11906_v34, %v12057_v4  ;;  %v15147_v28 = vld [vmem:[#allocation37_spill] sm:$0xff] }
 0x719   : > { %9665 = vmatprep.subr.bf16.mxu1 %v15144_v12  ;;  %10580 = vpow2.f32 %v2601_v31  ;;  %v2560_v10 = vsub.f32 %v11929_v36, %v12062_v17  ;;  %v2563_v23 = vsub.f32 %v11936_v56, %v12062_v17  ;;  %v2559_v9 = vsub.f32 %v11925_v35, %v12057_v4 }
 0x71a   : > { %v12129_v6 = vpop.eup %10564  ;;  %v2868_v53 = vadd.f32 %v2867_v32, %v12082_v29  ;;  %10582 = vpow2.f32 %v2607_v5  ;;  %v2613_v59 = vmul.f32 1.442695, %v2553_v39  ;;  %v2619_v47 = vmul.f32 1.442695, %v2556_v3 }
 0x71b   : > { %v12132_v34 = vpop.eup %10566  ;;  %10584 = vpow2.f32 %v2615_v30  ;;  %v2627_v38 = vmul.f32 1.442695, %v2560_v10  ;;  %v2633_v36 = vmul.f32 1.442695, %v2563_v23  ;;  %v2562_v56 = vsub.f32 %v11932_v45, %v12057_v4  ;;  %v12155_v10 = vpop.trf.xlu1 }
 0x71c   : > { %v10569_v2 = vpop.eup %10568  ;;  %9666 = vmatpush3.bf16.msra.mxu1 %v2899_v27  ;;  %v2869_v35 = vadd.f32 %v2868_v53, %v12085_v24  ;;  %10586 = vpow2.f32 %v2621_v25  ;;  %v2625_v62 = vmul.f32 1.442695, %v2559_v9  ;;  %v2566_v29 = vsub.f32 %v11952_v57, %v12062_v17  ;;  %v15148_v9 = vld [vmem:[#allocation38_spill] sm:$0xff] }
 0x71d   : > { %v10571_v54 = vpop.eup %10570  ;;  %9667 = vmatprep.subr.bf16.mxu1 %v15144_v12  ;;  %v2766_v22 = vmul.f32 %v10569_v2, %v11839_v19  ;;  %10588 = vpow2.f32 %v2613_v59  ;;  %v2631_v18 = vmul.f32 1.442695, %v2562_v56  ;;  %v2569_v1 = vsub.f32 %v15146_v13, %v12062_v17 }
 0x71e   : > { %v10573_v45 = vpop.eup %10572  ;;  %v2870_v27 = vadd.f32 %v2869_v35, %v12066_v60  ;;  %v2769_v37 = vmul.f32 %v10571_v54, %v11841_v16  ;;  %10590 = vpow2.f32 %v2619_v47  ;;  %v2639_v46 = vmul.f32 1.442695, %v2566_v29  ;;  %v15149_v35 = vld [vmem:[#allocation43_spill] sm:$0xff] }
 0x71f   : > { %v10575_v43 = vpop.eup %10574  ;;  %v2765_v57 = vmul.f32 %v10573_v45, %v11839_v19  ;;  %10592 = vpow2.f32 %v2627_v38  ;;  %v2645_v0 = vmul.f32 1.442695, %v2569_v1  ;;  %v2565_v31 = vsub.f32 %v15147_v28, %v12057_v4 }
 0x720   : > { %v10577_v5 = vpop.eup %10576  ;;  %9668 = vmatpush3.bf16.msra.mxu1 %v2902_v11  ;;  %v2837_v30 = vadd.f32 %v2769_v37, %v2766_v22  ;;  %v2883_v32 = vpack.c.bf16 %v2769_v37, %v2766_v22  ;;  %v2768_v25 = vmul.f32 %v10575_v43, %v11841_v16  ;;  %v2871_v39 = vadd.f32 %v2870_v27, %v12101_v58 }
 0x721   : > { %v10579_v3 = vpop.eup %10578  ;;  %9669 = vmatprep.subr.bf16.mxu1 %v15144_v12  ;;  %v2772_v23 = vmul.f32 %v10577_v5, %v11843_v20  ;;  %10594 = vpow2.f32 %v2633_v36  ;;  %v2568_v53 = vsub.f32 %v15148_v9, %v12057_v4  ;;  %v2637_v59 = vmul.f32 1.442695, %v2565_v31  ;;  %v15151_v31 = vld [vmem:[#allocation41_spill] sm:$0xff]  ;;  %v15153_v9 = vld [vmem:[#allocation44_spill] sm:$0xff] }
 0x722   : > { %2906 = vmatprep.subr.bf16.mxu0 %v2883_v32  ;;  %v2816_v24 = vadd.f32 %v2768_v25, %v2765_v57  ;;  %v2882_v60 = vpack.c.bf16 %v2768_v25, %v2765_v57  ;;  %v2775_v11 = vmul.f32 %v10579_v3, %v11845_v21  ;;  %v12163_v47 = vadd.f32 %v2871_v39, %v12104_v26  ;;  %v15152_v25 = vld [vmem:[#allocation27_spill] sm:$0xff] }
 0x723   : > { %v10581_v38 = vpop.eup %10580  ;;  %v2838_v56 = vadd.f32 %v2837_v30, %v2772_v23  ;;  %10596 = vpow2.f32 %v2625_v62  ;;  %v2643_v2 = vmul.f32 1.442695, %v2568_v53  ;;  %v2572_v29 = vsub.f32 %v15149_v35, %v12062_v17  ;;  %v15150_v62 = vld [vmem:[#allocation26_spill] sm:$0xff] }
 0x724   : > { %v10583_v36 = vpop.eup %10582  ;;  %2907 = vmatpush1.bf16.msra.mxu0 %v2882_v60  ;;  %v2886_v54 = vpack.c.bf16 %v2775_v11, %v2772_v23  ;;  %9670 = vmatpush3.bf16.msra.mxu1 %v2905_v8  ;;  %v2771_v22 = vmul.f32 %v10581_v38, %v11843_v20  ;;  %10598 = vpow2.f32 %v2631_v18  ;;  %v2575_v13 = vsub.f32 %v11975_v42, %v12062_v17  ;;  %v12177_v18 = vpop.trf.xlu1 }
 0x725   : > { %v10585_v1 = vpop.eup %10584  ;;  %v2839_v45 = vadd.f32 %v2838_v56, %v2775_v11  ;;  %9971 = vmatprep.subr.msk.bf16.mxu1 %vm1228_vm9, %v15150_v62  ;;  %v2774_v27 = vmul.f32 %v10583_v36, %v11845_v21  ;;  %10600 = vpow2.f32 %v2639_v46  ;;  %v2651_v37 = vmul.f32 1.442695, %v2572_v29 }
 0x726   : > { %v10587_v43 = vpop.eup %10586  ;;  %2908 = vmatprep.subr.bf16.mxu0 %v2886_v54  ;;  %v2817_v57 = vadd.f32 %v2816_v24, %v2771_v22  ;;  %v2778_v58 = vmul.f32 %v10585_v1, %v11857_v44  ;;  %10602 = vpow2.f32 %v2645_v0  ;;  %v2657_v26 = vmul.f32 1.442695, %v2575_v13  ;;  %v15155_v13 = vld [vmem:[#allocation50_spill] sm:$0xff] }
 0x727   : > { %v10589_v8 = vpop.eup %10588  ;;  %v2885_v42 = vpack.c.bf16 %v2774_v27, %v2771_v22  ;;  %9672 = vmatmul.mubr.bf16.vlgmr.msra.gmra.mrb[52].mxu1 %v12060_v55  ;;  %v2781_v28 = vmul.f32 %v10587_v43, %v11879_v41  ;;  %10604 = vpow2.f32 %v2637_v59  ;;  %v2571_v46 = vsub.f32 %v15151_v31, %v12057_v4  ;;  %v15156_v43 = vld [vmem:[#allocation46_spill] sm:$0xff] }
 0x728   : > { %v10591_v5 = vpop.eup %10590  ;;  %v2818_v30 = vadd.f32 %v2817_v57, %v2774_v27  ;;  %v2840_v32 = vadd.f32 %v2839_v45, %v2778_v58  ;;  %9676 = vmatpush3.bf16.msra.mxu1 %v15152_v25  ;;  %v2777_v0 = vmul.f32 %v10589_v8, %v11857_v44  ;;  %9677 = vmatprep.mubr.msk.bf16.mxu1 %vm2087_vm11, %v12134_v48  ;;  %10606 = vpow2.f32 %v2643_v2  ;;  %v15154_v2 = vld [vmem:[#allocation47_spill] sm:$0xff]  ;;  %v12196_v27 = vpop.trf.xlu1 }
 0x729   : > { %v10593_v39 = vpop.eup %10592  ;;  %2909 = vmatpush1.bf16.msra.mxu0 %v2885_v42  ;;  %v2889_v3 = vpack.c.bf16 %v2781_v28, %v2778_v58  ;;  %v2780_v23 = vmul.f32 %v10591_v5, %v11879_v41  ;;  %10608 = vpow2.f32 %v2651_v37  ;;  %v2574_v53 = vsub.f32 %v15153_v9, %v12057_v4  ;;  %v15157_v58 = vld [vmem:[#allocation49_spill] sm:$0xff] }
 0x72a   : > { %v2841_v59 = vadd.f32 %v2840_v32, %v2781_v28  ;;  %v2819_v24 = vadd.f32 %v2818_v30, %v2777_v0  ;;  %v2784_v60 = vmul.f32 %v10593_v39, %v11900_v61  ;;  %10610 = vpow2.f32 %v2657_v26 }
 0x72b   : > { %v10595_v11 = vpop.eup %10594  ;;  %2910 = vmatprep.subr.bf16.mxu0 %v2889_v3  ;;  %v2888_v38 = vpack.c.bf16 %v2780_v23, %v2777_v0  ;;  %v2649_v56 = vmul.f32 1.442695, %v2571_v46  ;;  %v2655_v35 = vmul.f32 1.442695, %v2574_v53  ;;  %v2578_v29 = vsub.f32 %v15154_v2, %v12062_v17 }
 0x72c   : > { %v2820_v36 = vadd.f32 %v2819_v24, %v2780_v23  ;;  %v2787_v54 = vmul.f32 %v10595_v11, %v11920_v15  ;;  %v2842_v22 = vadd.f32 %v2841_v59, %v2784_v60  ;;  %v2581_v1 = vsub.f32 %v15155_v13, %v12062_v17  ;;  %v12213_v2 = vpop.trf.xlu1 }
 0x72d   : > { %v10597_v45 = vpop.eup %10596  ;;  %2911 = vmatpush1.bf16.msra.mxu0 %v2888_v38  ;;  %10612 = vpow2.f32 %v2649_v56  ;;  %v2663_v37 = vmul.f32 1.442695, %v2578_v29  ;;  %v2577_v57 = vsub.f32 %v15156_v43, %v12057_v4  ;;  %v2580_v26 = vsub.f32 %v15157_v58, %v12057_v4 }
 0x72e   : > { %v10599_v8 = vpop.eup %10598  ;;  %v2843_v42 = vadd.f32 %v2842_v22, %v2787_v54  ;;  %v2892_v28 = vpack.c.bf16 %v2787_v54, %v2784_v60  ;;  %v2783_v31 = vmul.f32 %v10597_v45, %v11900_v61  ;;  %10614 = vpow2.f32 %v2655_v35 }
 0x72f   : > { %v10601_v46 = vpop.eup %10600  ;;  %v2786_v5 = vmul.f32 %v10599_v8, %v11920_v15  ;;  %9678 = vmatmul.mubr.msk.bf16.vlgmr.msra.gmra.mrb[56].mxu1 %vm2087_vm11, %v12155_v10  ;;  %10616 = vpow2.f32 %v2663_v37  ;;  %v2669_v30 = vmul.f32 1.442695, %v2581_v1  ;;  %v2661_v32 = vmul.f32 1.442695, %v2577_v57 }
 0x730   : > { %v10603_v0 = vpop.eup %10602  ;;  %2912 = vmatprep.subr.bf16.mxu0 %v2892_v28  ;;  %v2821_v39 = vadd.f32 %v2820_v36, %v2783_v31  ;;  %v2790_v3 = vmul.f32 %v10601_v46, %v12055_v50  ;;  %9681 = vmatprep.mubr.msk.bf16.mxu1 %vm2087_vm11, %v12177_v18  ;;  %v2667_v23 = vmul.f32 1.442695, %v2580_v26  ;;  %v2584_v9 = vsub.f32 %v12016_v51, %v12062_v17 }
 0x731   : > { %v10605_v53 = vpop.eup %10604  ;;  %v2891_v59 = vpack.c.bf16 %v2786_v5, %v2783_v31  ;;  %v2793_v24 = vmul.f32 %v10603_v0, %v11941_v7  ;;  %10618 = vpow2.f32 %v2669_v30  ;;  %v2583_v45 = vsub.f32 %v12011_v33, %v12057_v4 }
 0x732   : > { %v10607_v60 = vpop.eup %10606  ;;  %v2822_v11 = vadd.f32 %v2821_v39, %v2786_v5  ;;  %v2844_v38 = vadd.f32 %v2843_v42, %v2790_v3  ;;  %v2789_v56 = vmul.f32 %v10605_v53, %v12055_v50  ;;  %10620 = vpow2.f32 %v2661_v32  ;;  %v3005_v5 = vpop.trf.xlu1  ;;  %v15158_v53 = vld [vmem:[#allocation51_spill] sm:$0xff] }
 0x733   : > { %v10609_v35 = vpop.eup %10608  ;;  %2913 = vmatpush1.bf16.msra.mxu0 %v2891_v59  ;;  %v2895_v29 = vpack.c.bf16 %v2793_v24, %v2790_v3  ;;  %v2792_v36 = vmul.f32 %v10607_v60, %v11941_v7  ;;  %10622 = vpow2.f32 %v2667_v23  ;;  %v2675_v51 = vmul.f32 1.442695, %v2584_v9  ;;  %v15176_v7 = vld [vmem:[#allocation48_spill] sm:$0xff] }
 0x734   : > { %v10611_v54 = vpop.eup %10610  ;;  %v2845_v22 = vadd.f32 %v2844_v38, %v2793_v24  ;;  %v2823_v13 = vadd.f32 %v2822_v11, %v2789_v56  ;;  %v2796_v1 = vmul.f32 %v10609_v35, %v11958_v40  ;;  %v2673_v26 = vmul.f32 1.442695, %v2583_v45 }
 0x735   : > { %2914 = vmatprep.subr.bf16.mxu0 %v2895_v29  ;;  %v2894_v37 = vpack.c.bf16 %v2792_v36, %v2789_v56  ;;  %v2799_v43 = vmul.f32 %v10611_v54, %v11966_v49  ;;  %10624 = vpow2.f32 %v2675_v51  ;;  %v2811_v29 = vmul.f32 %v12132_v34, %v12041_v14 }
 0x736   : > { %v2824_v57 = vadd.f32 %v2823_v13, %v2792_v36  ;;  %v2846_v58 = vadd.f32 %v2845_v22, %v2796_v1  ;;  %10626 = vpow2.f32 %v2673_v26  ;;  %v3006_v51 = vpop.trf.xlu1  ;;  %v2810_v45 = vmul.f32 %v12129_v6, %v12041_v14 }
 0x737   : > { %v10613_v8 = vpop.eup %10612  ;;  %2915 = vmatpush1.bf16.msra.mxu0 %v2894_v37  ;;  %v2898_v42 = vpack.c.bf16 %v2799_v43, %v2796_v1  ;;  %9682 = vmatmul.mubr.msk.bf16.gmra.mrb[60].mxu1 %vm2087_vm11, %v12196_v27  ;;  %v15162_v6 = vmov 0  }
 0x738   : > { %v10615_v28 = vpop.eup %10614  ;;  %v2847_v31 = vadd.f32 %v2846_v58, %v2799_v43  ;;  %v2795_v46 = vmul.f32 %v10613_v8, %v11958_v40  ;;  %9685 = vmatprep.mubr.msk.bf16.mxu1 %vm2087_vm11, %v12213_v2 }
 0x739   : > { %v10617_v33 = vpop.eup %10616  ;;  %2916 = vmatprep.subr.bf16.mxu0 %v2898_v42  ;;  %v2798_v30 = vmul.f32 %v10615_v28, %v11966_v49 }
 0x73a   : > { %v2825_v32 = vadd.f32 %v2824_v57, %v2795_v46  ;;  %v2802_v0 = vmul.f32 %v10617_v33, %v11978_v63  ;;  %v3007_v42 = vpop.trf.xlu1 }
 0x73b   : > { %v10619_v39 = vpop.eup %10618  ;;  %v2897_v3 = vpack.c.bf16 %v2798_v30, %v2795_v46  ;;  %v15163_v46 = vld [vmem:[#allocation24_spill] sm:$0xff] }
 0x73c   : > { %v10621_v23 = vpop.eup %10620  ;;  %v2826_v9 = vadd.f32 %v2825_v32, %v2798_v30  ;;  %v2805_v59 = vmul.f32 %v10619_v39, %v15158_v53  ;;  %v2848_v24 = vadd.f32 %v2847_v31, %v2802_v0  ;;  %v15161_v31 = vld [vmem:[#allocation23_spill] sm:$0xff] }
 0x73d   : > { %v10623_v60 = vpop.eup %10622  ;;  %2917 = vmatpush1.bf16.msra.mxu0 %v2897_v3  ;;  %v2801_v11 = vmul.f32 %v10621_v23, %v11978_v63 }
 0x73e   : > { %v2849_v38 = vadd.f32 %v2848_v24, %v2805_v59  ;;  %v2901_v56 = vpack.c.bf16 %v2805_v59, %v2802_v0  ;;  %v2804_v35 = vmul.f32 %v10623_v60, %v15158_v53 }
 0x73f   : > { %v10625_v36 = vpop.eup %10624  ;;  %v2827_v54 = vadd.f32 %v2826_v9, %v2801_v11  ;;  %9686 = vmatmul.mubr.msk.bf16.gmra.mrb[64].mxu1 %vm2087_vm11, %v3005_v5 }
 0x740   : > { %2918 = vmatprep.subr.bf16.mxu0 %v2901_v56  ;;  %v2900_v22 = vpack.c.bf16 %v2804_v35, %v2801_v11  ;;  %v2808_v13 = vmul.f32 %v10625_v36, %v12025_v52  ;;  %9689 = vmatprep.mubr.msk.bf16.mxu1 %vm2087_vm11, %v3006_v51  ;;  %v10627_v37 = vpop.eup %10626 }
 0x741   : > { %v2828_v1 = vadd.f32 %v2827_v54, %v2804_v35  ;;  %v2807_v34 = vmul.f32 %v10627_v37, %v12025_v52 }
 0x742   : > { %2919 = vmatpush1.bf16.msra.mxu0 %v2900_v22  ;;  %v2850_v43 = vadd.f32 %v2849_v38, %v2808_v13  ;;  %v2904_v57 = vpack.c.bf16 %v2811_v29, %v2808_v13 }
 0x743   : > { %v2829_v26 = vadd.f32 %v2828_v1, %v2807_v34  ;;  %v2903_v8 = vpack.c.bf16 %v2810_v45, %v2807_v34 }
 0x744   : > { %v12238_v58 = vadd.f32 %v2850_v43, %v2811_v29  ;;  %2920 = vmatprep.subr.bf16.mxu0 %v2904_v57 }
 0x745   : > { %v12240_v28 = vadd.f32 %v2829_v26, %v2810_v45 }
 0x746   : > { %15159 = vst [vmem:[#allocation40_spill] sm:$0xff] %v12238_v58  ;;  %2921 = vmatpush1.bf16.msra.mxu0 %v2903_v8  ;;  %v12472_v58 = vpop.permute.xlu1 %3508 }
 0x747   : > { %15160 = vst [vmem:[#allocation37_spill] sm:$0xff] %v12240_v28  ;;  %9690 = vmatmul.mubr.msk.bf16.gmra.mrb[68].mxu1 %vm2087_vm11, %v3007_v42  ;;  %9299 = vmatprep.subr.msk.bf16.mxu0 %vm1228_vm9, %v15161_v31  ;;  %15183 = vst [vmem:[#allocation63_spill] sm:$0xff] %v12472_v58 }
 0x748   : > { %3717 = vmatprep.mubr.bf16.mxu1 %v15162_v6 }
 0x749   : > { %2939 = vmatmul.mubr.bf16.vlgmr.msra.gmra.mrb[32].mxu0 %v12060_v55 }
 0x74a   : > { %3033 = vmatpush1.bf16.msra.mxu0 %v15163_v46  ;;  %3064 = vmatprep.mubr.bf16.mxu0 %v15162_v6 }
 0x74b   : > { %9693 = vmatprep.subr.bf16.mxu0 %v15144_v12 }
 0x751   : > { %9300 = vmatmul.mubr.msk.bf16.vlgmr.msra.gmra.mrb[36].mxu0 %vm2087_vm11, %v12134_v48  ;;  %v12274_v48 = vpop.permute.xlu0 %3463 }
 0x752   : > { %3074 = vmatprep.mubr.bf16.mxu0 %v15162_v6  ;;  %15165 = vst [vmem:[#allocation43_spill] sm:$0xff] %v12274_v48 }
 0x759   : > { %9301 = vmatmul.mubr.msk.bf16.gmra.mrb[40].mxu0 %vm2087_vm11, %v12155_v10 }
 0x75a   : > { %3084 = vmatprep.mubr.bf16.mxu0 %v15162_v6 }
 0x761   : > { %9302 = vmatmul.mubr.msk.bf16.gmra.mrb[44].mxu0 %vm2087_vm11, %v12177_v18 }
 0x762   : > { %3094 = vmatprep.mubr.bf16.mxu0 %v15162_v6 }
 0x769   : > { %9303 = vmatmul.mubr.msk.bf16.gmra.mrb[48].mxu0 %vm2087_vm11, %v12196_v27 }
 0x76a   : > { %3104 = vmatprep.mubr.bf16.mxu0 %v15162_v6 }
 0x771   : > { %9304 = vmatmul.mubr.msk.bf16.gmra.mrb[52].mxu0 %vm2087_vm11, %v12213_v2  ;;  %v12276_v2 = vpop.permute.xlu0 %3468 }
 0x772   : > { %3114 = vmatprep.mubr.bf16.mxu0 %v15162_v6  ;;  %15166 = vst [vmem:[#allocation26_spill] sm:$0xff] %v12276_v2 }
 0x775   : > { %v12290_v3 = vpop.permute.xlu0 %3473 }
 0x776   : > { %15167 = vst [vmem:[#allocation41_spill] sm:$0xff] %v12290_v3 }
 0x779   : > { %9305 = vmatmul.mubr.msk.bf16.gmra.mrb[56].mxu0 %vm2087_vm11, %v3005_v5  ;;  %v12299_v60 = vpop.permute.xlu0 %3478 }
 0x77a   : > { %3124 = vmatprep.mubr.bf16.mxu0 %v15162_v6  ;;  %15168 = vst [vmem:[#allocation27_spill] sm:$0xff] %v12299_v60 }
 0x77d   : > { %v12308_v36 = vpop.permute.xlu0 %3483 }
 0x77e   : > { %15169 = vst [vmem:[#allocation44_spill] sm:$0xff] %v12308_v36 }
 0x781   : > { %9306 = vmatmul.mubr.msk.bf16.gmra.mrb[60].mxu0 %vm2087_vm11, %v3006_v51  ;;  %v12320_v43 = vpop.permute.xlu0 %3488 }
 0x782   : > { %3134 = vmatprep.mubr.bf16.mxu0 %v15162_v6  ;;  %15170 = vst [vmem:[#allocation47_spill] sm:$0xff] %v12320_v43 }
 0x789   : > { %9307 = vmatmul.mubr.msk.bf16.gmra.mrb[64].mxu0 %vm2087_vm11, %v3007_v42 }
 0x78a   : > { %9709 = vmatprep.mubr.msk.bf16.mxu0 %vm11209_vm0, %v15144_v12 }
 0x7fa   : > { %v12272_v55 = vpop.f32.mrb[52].mxu1 }
 0x7fb   : > { %15164 = vst [vmem:[#allocation38_spill] sm:$0xff] %v12272_v55  ;;  %v9673_v10 = vpop.f32.mrb[53].mxu1 }
 0x7fc   : > { %v2984_v18 = vpop.f32.mrb[54].mxu1 }
 0x7fd   : > { %v9674_v27 = vpop.f32.mrb[55].mxu1 }
 0x802   : > { %v12278_v33 = vpop.f32.mrb[56].mxu1 }
 0x803   : > { %v12280_v5 = vpop.f32.mrb[57].mxu1 }
 0x804   : > { %v3284_v30 = vmax.f32 %v12280_v5, %v12278_v33  ;;  %v12284_v32 = vpop.f32.mrb[58].mxu1 }
 0x805   : > { %v12286_v0 = vpop.f32.mrb[59].mxu1 }
 0x806   : > { %v3285_v39 = vmax.f32 %v12286_v0, %v12284_v32 }
 0x80a   : > { %v12292_v23 = vpop.f32.mrb[60].mxu1 }
 0x80b   : > { %v12294_v9 = vpop.f32.mrb[61].mxu1 }
 0x80c   : > { %v3286_v59 = vmax.f32 %v3284_v30, %v12294_v9  ;;  %v12297_v24 = vpop.f32.mrb[62].mxu1 }
 0x80d   : > { %v12301_v11 = vpop.f32.mrb[63].mxu1 }
 0x80e   : > { %v3287_v38 = vmax.f32 %v3285_v39, %v12301_v11  ;;  %v3288_v56 = vmax.f32 %v3286_v59, %v12292_v23  ;;  %v12334_v39 = vpop.permute.xlu0 %3493 }
 0x80f   : > { %15173 = vst [vmem:[#allocation49_spill] sm:$0xff] %v12334_v39 }
 0x810   : > { %v3289_v35 = vmax.f32 %v3287_v38, %v12297_v24 }
 0x812   : > { %v12306_v29 = vpop.f32.mrb[64].mxu1 }
 0x813   : > { %v12310_v51 = vpop.f32.mrb[65].mxu1 }
 0x814   : > { %v3290_v54 = vmax.f32 %v3288_v56, %v12310_v51  ;;  %v12313_v22 = vpop.f32.mrb[66].mxu1 }
 0x815   : > { %v12315_v13 = vpop.f32.mrb[67].mxu1 }
 0x816   : > { %v3291_v1 = vmax.f32 %v3289_v35, %v12315_v13  ;;  %v3292_v45 = vmax.f32 %v3290_v54, %v12306_v29 }
 0x818   : > { %v3293_v37 = vmax.f32 %v3291_v1, %v12313_v22  ;;  %v12337_v1 = vpop.permute.xlu0 %3498 }
 0x819   : > { %15174 = vst [vmem:[#allocation56_spill] sm:$0xff] %v12337_v1 }
 0x81a   : > { %v12322_v57 = vpop.f32.mrb[68].mxu1 }
 0x81b   : > { %v12324_v34 = vpop.f32.mrb[69].mxu1 }
 0x81c   : > { %v3294_v26 = vmax.f32 %v3292_v45, %v12324_v34  ;;  %v12327_v8 = vpop.f32.mrb[70].mxu1  ;;  %v12329_v42 = vpop.f32.mrb[32].mxu0 }
 0x81d   : > { %15171 = vst [vmem:[#allocation50_spill] sm:$0xff] %v12329_v42  ;;  %v3230_v10 = vpop.f32.mrb[71].mxu1  ;;  %v12331_v18 = vpop.f32.mrb[33].mxu0 }
 0x81e   : > { %15172 = vst [vmem:[#allocation46_spill] sm:$0xff] %v12331_v18  ;;  %v3296_v27 = vmax.f32 %v3294_v26, %v12322_v57  ;;  %v3295_v30 = vmax.f32 %v3293_v37, %v3230_v10  ;;  %v2944_v59 = vpop.f32.mrb[34].mxu0  ;;  %v12347_v40 = vpop.permute.xlu0 %3503 }
 0x81f   : > { %v2945_v38 = vpop.f32.mrb[35].mxu0  ;;  %15175 = vst [vmem:[#allocation57_spill] sm:$0xff] %v12347_v40 }
 0x820   : > { %v3297_v56 = vmax.f32 %v3295_v30, %v12327_v8 }
 0x822   : > { %v3298_v35 = vmax.f32 %v3296_v27, %v3297_v56  ;;  %v12366_v50 = vpop.permute.xlu0 %3513 }
 0x823   : > { %15178 = vst [vmem:[#allocation58_spill] sm:$0xff] %v12366_v50 }
 0x824   : > { %v3299_v54 = vrot.slane %v3298_v35, 4  ;;  %v12339_v45 = vpop.f32.mrb[36].mxu0 }
 0x825   : > { %v12341_v52 = vpop.f32.mrb[37].mxu0 }
 0x826   : > { %v3300_v14 = vmax.f32 %v3298_v35, %v3299_v54  ;;  %v12343_v63 = vpop.f32.mrb[38].mxu0 }
 0x827   : > { %v12345_v26 = vpop.f32.mrb[39].mxu0 }
 0x828   : > { %v3301_v49 = vrot.slane %v3300_v14, 2 }
 0x82a   : > { %v3302_v37 = vmax.f32 %v3300_v14, %v3301_v49 }
 0x82c   : > { %v3303_v59 = vrot.slane %v3302_v37, 1  ;;  %v12349_v38 = vpop.f32.mrb[40].mxu0 }
 0x82d   : > { %v3242_v30 = vmax.f32 %v12339_v45, %v12349_v38  ;;  %v12353_v56 = vpop.f32.mrb[41].mxu0 }
 0x82e   : > { %v3304_v27 = vmax.f32 %v3302_v37, %v3303_v59  ;;  %v3263_v35 = vmax.f32 %v12341_v52, %v12353_v56  ;;  %v12357_v54 = vpop.f32.mrb[42].mxu0 }
 0x82f   : > { %v3243_v49 = vmax.f32 %v12343_v63, %v12357_v54  ;;  %v12364_v14 = vpop.f32.mrb[43].mxu0 }
 0x830   : > { %v12360_v53 = vmax.f32 %v15176_v7, %v3304_v27  ;;  %v3264_v37 = vmax.f32 %v12345_v26, %v12364_v14 }
 0x832   : > { %15177 = vst [vmem:[#allocation48_spill] sm:$0xff] %v12360_v53  ;;  %v3358_v59 = vsub.f32 %v3230_v10, %v12360_v53  ;;  %v3319_v15 = vsub.f32 %v12280_v5, %v12360_v53  ;;  %v3322_v61 = vsub.f32 %v12286_v0, %v12360_v53  ;;  %v3325_v27 = vsub.f32 %v12278_v33, %v12360_v53 }
 0x833   : > { %v3328_v41 = vsub.f32 %v12284_v32, %v12360_v53  ;;  %v3331_v44 = vsub.f32 %v12294_v9, %v12360_v53  ;;  %v3334_v10 = vsub.f32 %v12301_v11, %v12360_v53  ;;  %v3337_v0 = vsub.f32 %v12292_v23, %v12360_v53 }
 0x834   : > { %v3447_v21 = vmul.f32 1.442695, %v3358_v59  ;;  %v3369_v20 = vmul.f32 1.442695, %v3319_v15  ;;  %v3375_v16 = vmul.f32 1.442695, %v3322_v61  ;;  %v3340_v15 = vsub.f32 %v12297_v24, %v12360_v53  ;;  %v12394_v61 = vpop.permute.xlu0 %3518 }
 0x835   : > { %v12383_v19 = vpop.f32.mrb[44].mxu0  ;;  %v3381_v5 = vmul.f32 1.442695, %v3325_v27  ;;  %v3387_v18 = vmul.f32 1.442695, %v3328_v41  ;;  %15179 = vst [vmem:[#allocation59_spill] sm:$0xff] %v12394_v61  ;;  %v3346_v24 = vsub.f32 %v12315_v13, %v12360_v53 }
 0x836   : > { %10628 = vpow2.f32 %v3447_v21  ;;  %v12388_v33 = vmax.f32 %v3242_v30, %v12383_v19  ;;  %v12390_v32 = vpop.f32.mrb[45].mxu0  ;;  %v3393_v59 = vmul.f32 1.442695, %v3331_v44  ;;  %v3343_v21 = vsub.f32 %v12310_v51, %v12360_v53 }
 0x837   : > { %v12397_v9 = vmax.f32 %v3263_v35, %v12390_v32  ;;  %v12399_v11 = vpop.f32.mrb[46].mxu0  ;;  %10630 = vpow2.f32 %v3369_v20  ;;  %v3399_v41 = vmul.f32 1.442695, %v3334_v10  ;;  %v3405_v27 = vmul.f32 1.442695, %v3337_v0 }
 0x838   : > { %v12404_v23 = vmax.f32 %v3243_v49, %v12399_v11  ;;  %v12406_v30 = vpop.f32.mrb[47].mxu0  ;;  %10632 = vpow2.f32 %v3375_v16  ;;  %v3349_v20 = vsub.f32 %v12306_v29, %v12360_v53  ;;  %v3411_v44 = vmul.f32 1.442695, %v3340_v15  ;;  %v12421_v10 = vpop.permute.xlu0 %3523 }
 0x839   : > { %v12411_v35 = vmax.f32 %v3264_v37, %v12406_v30  ;;  %10634 = vpow2.f32 %v3381_v5  ;;  %v3352_v51 = vsub.f32 %v12313_v22, %v12360_v53  ;;  %v3417_v49 = vmul.f32 1.442695, %v3343_v21  ;;  %15180 = vst [vmem:[#allocation60_spill] sm:$0xff] %v12421_v10 }
 0x83a   : > { %10636 = vpow2.f32 %v3387_v18  ;;  %v3355_v16 = vsub.f32 %v12324_v34, %v12360_v53  ;;  %v3423_v13 = vmul.f32 1.442695, %v3346_v24  ;;  %v3361_v37 = vsub.f32 %v12322_v57, %v12360_v53 }
 0x83b   : > { %10638 = vpow2.f32 %v3393_v59  ;;  %v3429_v29 = vmul.f32 1.442695, %v3349_v20  ;;  %v3364_v18 = vsub.f32 %v12327_v8, %v12360_v53  ;;  %v3435_v34 = vmul.f32 1.442695, %v3352_v51 }
 0x83c   : > { %10640 = vpow2.f32 %v3399_v41  ;;  %v12423_v5 = vpop.f32.mrb[48].mxu0  ;;  %v3441_v59 = vmul.f32 1.442695, %v3355_v16  ;;  %v3453_v8 = vmul.f32 1.442695, %v3361_v37 }
 0x83d   : > { %10642 = vpow2.f32 %v3405_v27  ;;  %v3246_v22 = vmax.f32 %v12388_v33, %v12423_v5  ;;  %v12429_v0 = vpop.f32.mrb[49].mxu0  ;;  %v3459_v20 = vmul.f32 1.442695, %v3364_v18 }
 0x83e   : > { %10644 = vpow2.f32 %v3411_v44  ;;  %v3267_v15 = vmax.f32 %v12397_v9, %v12429_v0  ;;  %v12433_v57 = vpop.f32.mrb[50].mxu0 }
 0x83f   : > { %10646 = vpow2.f32 %v3417_v49  ;;  %v3247_v41 = vmax.f32 %v12404_v23, %v12433_v57  ;;  %v12437_v24 = vpop.f32.mrb[51].mxu0  ;;  %v12442_v49 = vpop.permute.xlu0 %3528 }
 0x840   : > { %v10629_v21 = vpop.eup %10628  ;;  %10648 = vpow2.f32 %v3423_v13  ;;  %v3268_v27 = vmax.f32 %v12411_v35, %v12437_v24  ;;  %15181 = vst [vmem:[#allocation61_spill] sm:$0xff] %v12442_v49 }
 0x841   : > { %v10631_v33 = vpop.eup %10630  ;;  %10650 = vpow2.f32 %v3429_v29 }
 0x842   : > { %v10633_v44 = vpop.eup %10632  ;;  %v3543_v9 = vmul.f32 %v10631_v33, %v12274_v48  ;;  %10652 = vpow2.f32 %v3435_v34 }
 0x843   : > { %v10635_v51 = vpop.eup %10634  ;;  %v3546_v16 = vmul.f32 %v10633_v44, %v12276_v2  ;;  %10654 = vpow2.f32 %v3441_v59 }
 0x844   : > { %v10637_v23 = vpop.eup %10636  ;;  %v3549_v13 = vmul.f32 %v10635_v51, %v12290_v3  ;;  %10656 = vpow2.f32 %v3453_v8  ;;  %v12446_v42 = vpop.f32.mrb[52].mxu0 }
 0x845   : > { %v10639_v37 = vpop.eup %10638  ;;  %v3634_v35 = vadd.f32 %v3546_v16, %v3543_v9  ;;  %v3663_v29 = vpack.c.bf16 %v3546_v16, %v3543_v9  ;;  %v3552_v18 = vmul.f32 %v10637_v23, %v12299_v60  ;;  %10658 = vpow2.f32 %v3459_v20  ;;  %v12452_v55 = vpop.f32.mrb[53].mxu0 }
 0x846   : > { %v10641_v33 = vpop.eup %10640  ;;  %v12450_v34 = vmax.f32 %v3246_v22, %v12446_v42  ;;  %v3555_v59 = vmul.f32 %v10639_v37, %v12308_v36  ;;  %v12456_v51 = vmax.f32 %v3267_v15, %v12452_v55  ;;  %v12458_v8 = vpop.f32.mrb[54].mxu0 }
 0x847   : > { %v10643_v44 = vpop.eup %10642  ;;  %9694 = vmatpush3.bf16.msra.mxu0 %v3663_v29  ;;  %v3635_v46 = vadd.f32 %v3634_v35, %v3549_v13  ;;  %v3666_v9 = vpack.c.bf16 %v3552_v18, %v3549_v13  ;;  %v3558_v16 = vmul.f32 %v10641_v33, %v12320_v43  ;;  %v12462_v23 = vmax.f32 %v3247_v41, %v12458_v8  ;;  %v12464_v22 = vpop.f32.mrb[55].mxu0 }
 0x848   : > { %v10645_v20 = vpop.eup %10644  ;;  %9695 = vmatprep.subr.bf16.mxu0 %v15144_v12  ;;  %v3561_v37 = vmul.f32 %v10643_v44, %v12334_v39  ;;  %v12468_v15 = vpop.permute.xlu0 %3533  ;;  %v3270_v28 = vmax.f32 %v3268_v27, %v12464_v22 }
 0x849   : > { %v10647_v31 = vpop.eup %10646  ;;  %15182 = vst [vmem:[#allocation62_spill] sm:$0xff] %v12468_v15  ;;  %v3636_v29 = vadd.f32 %v3635_v46, %v3552_v18  ;;  %v3669_v35 = vpack.c.bf16 %v3558_v16, %v3555_v59  ;;  %v3564_v13 = vmul.f32 %v10645_v20, %v12337_v1  ;;  %v3582_v46 = vmul.f32 %v10629_v21, %v12442_v49 }
 0x84a   : > { %v10649_v33 = vpop.eup %10648  ;;  %v3567_v41 = vmul.f32 %v10647_v31, %v12347_v40 }
 0x84b   : > { %v10651_v43 = vpop.eup %10650  ;;  %9696 = vmatpush3.bf16.msra.mxu0 %v3666_v9  ;;  %v3637_v36 = vadd.f32 %v3636_v29, %v3555_v59  ;;  %v3672_v60 = vpack.c.bf16 %v3564_v13, %v3561_v37  ;;  %v3570_v44 = vmul.f32 %v10649_v33, %v12472_v58 }
 0x84c   : > { %v10653_v39 = vpop.eup %10652  ;;  %9697 = vmatprep.subr.bf16.mxu0 %v15144_v12  ;;  %v3573_v27 = vmul.f32 %v10651_v43, %v12366_v50  ;;  %v12479_v20 = vpop.f32.mrb[56].mxu0 }
 0x84d   : > { %v10655_v18 = vpop.eup %10654  ;;  %v3638_v1 = vadd.f32 %v3637_v36, %v3558_v16  ;;  %v3675_v6 = vpack.c.bf16 %v3570_v44, %v3567_v41  ;;  %v3576_v31 = vmul.f32 %v10653_v39, %v12394_v61  ;;  %v3250_v59 = vmax.f32 %v12450_v34, %v12479_v20  ;;  %v12484_v9 = vpop.f32.mrb[57].mxu0 }
 0x84e   : > { %v10657_v40 = vpop.eup %10656  ;;  %v3579_v29 = vmul.f32 %v10655_v18, %v12421_v10  ;;  %v12487_v58 = vpop.permute.xlu0 %3538  ;;  %v3271_v43 = vmax.f32 %v12456_v51, %v12484_v9 }
 0x84f   : > { %v10659_v33 = vpop.eup %10658  ;;  %15184 = vst [vmem:[#allocation64_spill] sm:$0xff] %v12487_v58  ;;  %v12491_v21 = vpop.f32.mrb[58].mxu0  ;;  %9698 = vmatpush3.bf16.msra.mxu0 %v3669_v35  ;;  %v3639_v36 = vadd.f32 %v3638_v1, %v3561_v37  ;;  %v3678_v16 = vpack.c.bf16 %v3576_v31, %v3573_v27  ;;  %v3585_v39 = vmul.f32 %v10657_v40, %v12468_v15  ;;  %v2873_v35 = vrot.slane %v12163_v47, 4 }
 0x850   : > { %v3251_v34 = vmax.f32 %v12462_v23, %v12491_v21  ;;  %v12496_v49 = vpop.f32.mrb[59].mxu0  ;;  %9699 = vmatprep.subr.bf16.mxu0 %v15144_v12  ;;  %v3681_v18 = vpack.c.bf16 %v3582_v46, %v3579_v29  ;;  %v3588_v10 = vmul.f32 %v10659_v33, %v12487_v58  ;;  %v2534_v40 = vsub.f32 -1e+30, %v15176_v7 }
 0x851   : > { %v3272_v61 = vmax.f32 %v3270_v28, %v12496_v49  ;;  %v3640_v51 = vadd.f32 %v3639_v36, %v3564_v13  ;;  %v2874_v33 = vadd.f32 %v2873_v35, %v12163_v47 }
 0x852   : > { %v3684_v50 = vpack.c.bf16 %v3588_v10, %v3585_v39  ;;  %v12520_v47 = vpop.trf.xlu0 }
 0x853   : > { %9700 = vmatpush3.bf16.msra.mxu0 %v3672_v60  ;;  %v3641_v1 = vadd.f32 %v3640_v51, %v3567_v41  ;;  %v2539_v41 = vmul.f32 1.442695, %v2534_v40 }
 0x854   : > { %9701 = vmatprep.subr.bf16.mxu0 %v15144_v12  ;;  %v12504_v23 = vpop.f32.mrb[60].mxu0 }
 0x855   : > { %v3642_v37 = vadd.f32 %v3641_v1, %v3570_v44  ;;  %v3252_v15 = vmax.f32 %v3250_v59, %v12504_v23  ;;  %v12507_v3 = vpop.f32.mrb[61].mxu0  ;;  %v3310_v44 = vsub.f32 %v15176_v7, %v12360_v53  ;;  %10660 = vpow2.f32 %v2539_v41  ;;  %v15185_v53 = vld [vmem:[#allocation54_spill] sm:$0xff] }
 0x856   : > { %v3273_v28 = vmax.f32 %v3271_v43, %v12507_v3  ;;  %v12511_v13 = vpop.f32.mrb[62].mxu0  ;;  %v2875_v43 = vrot.slane %v2874_v33, 2  ;;  %v12531_v41 = vpop.trf.xlu0 }
 0x857   : > { %9702 = vmatpush3.bf16.msra.mxu0 %v3675_v6  ;;  %v3643_v60 = vadd.f32 %v3642_v37, %v3573_v27  ;;  %v3253_v36 = vmax.f32 %v3251_v34, %v12511_v13  ;;  %v12514_v51 = vpop.f32.mrb[63].mxu0  ;;  %v3315_v6 = vmul.f32 1.442695, %v3310_v44 }
 0x858   : > { %9703 = vmatprep.subr.bf16.mxu0 %v15144_v12  ;;  %v3274_v59 = vmax.f32 %v3272_v61, %v12514_v51  ;;  %v2876_v7 = vadd.f32 %v2875_v43, %v2874_v33 }
 0x859   : > { %v3644_v1 = vadd.f32 %v3643_v60, %v3576_v31  ;;  %10662 = vpow2.f32 %v3315_v6 }
 0x85a   : > { %v2877_v58 = vrot.slane %v2876_v7, 1 }
 0x85b   : > { %9704 = vmatpush3.bf16.msra.mxu0 %v3678_v16  ;;  %v3645_v35 = vadd.f32 %v3644_v1, %v3579_v29  ;;  %v15186_v16 = vld [vmem:[#allocation22_spill] sm:$0xff] }
 0x85c   : > { %9705 = vmatprep.subr.bf16.mxu0 %v15144_v12  ;;  %v12523_v27 = vpop.f32.mrb[64].mxu0  ;;  %v2150_v29 = vadd.f32 %v15186_v16, %v15185_v53  ;;  %v12538_v16 = vpop.trf.xlu0 }
 0x85d   : > { %v3646_v34 = vadd.f32 %v3645_v35, %v3582_v46  ;;  %v3254_v40 = vmax.f32 %v3252_v15, %v12523_v27  ;;  %v12526_v37 = vpop.f32.mrb[65].mxu0 }
 0x85e   : > { %v3275_v61 = vmax.f32 %v3273_v28, %v12526_v37  ;;  %v3140_v31 = vpop.f32.mrb[66].mxu0  ;;  %v12534_v28 = vpack.c.bf16 %v2150_v29, %v2150_v29 }
 0x85f   : > { %9706 = vmatpush3.bf16.msra.mxu0 %v3681_v18  ;;  %v3647_v60 = vadd.f32 %v3646_v34, %v3585_v39  ;;  %v3255_v1 = vmax.f32 %v3253_v36, %v3140_v31  ;;  %v3142_v44 = vpop.f32.mrb[67].mxu0  ;;  %v10661_v36 = vpop.eup %10660 }
 0x860   : > { %9707 = vmatprep.subr.bf16.mxu0 %v15144_v12  ;;  %v3276_v46 = vmax.f32 %v3274_v59, %v3142_v44 }
 0x861   : > { %v3648_v15 = vadd.f32 %v3647_v60, %v3588_v10  ;;  %v3256_v35 = vmax.f32 %v3254_v40, %v3255_v1  ;;  %v2878_v10 = vadd.f32 %v2877_v58, %v2876_v7  ;;  %v12544_v40 = vmul.f32 0.0, %v10661_v36  ;;  %v12549_v58 = vpop.trf.xlu0 }
 0x862   : > { %v3277_v33 = vmax.f32 %v3275_v61, %v3276_v46 }
 0x863   : > { %v3649_v43 = vrot.slane %v3648_v15, 4  ;;  %9708 = vmatpush3.bf16.msra.mxu0 %v3684_v50  ;;  %v3257_v39 = vrot.slane %v3256_v35, 4  ;;  %v12546_v60 = vpop.eup %10662  ;;  %v2881_v1 = vadd.f32 %v2878_v10, %v12544_v40 }
 0x864   : > { %9972 = vmatprep.subr.msk.bf16.mxu0 %vm1228_vm9, %v15150_v62  ;;  %v3278_v18 = vrot.slane %v3277_v33, 4 }
 0x865   : > { %v3650_v34 = vadd.f32 %v3649_v43, %v3648_v15  ;;  %v3258_v53 = vmax.f32 %v3256_v35, %v3257_v39  ;;  %v12564_v36 = vpop.trf.xlu0 }
 0x866   : > { %9710 = vmatmul.mubr.bf16.vlgmr.msra.gmra.mrb[68].mxu0 %v12534_v28  ;;  %v3279_v59 = vmax.f32 %v3277_v33, %v3278_v18  ;;  %v3591_v33 = vmul.f32 %v12546_v60, %v2881_v1 }
 0x867   : > { %v3651_v6 = vrot.slane %v3650_v34, 2  ;;  %9714 = vmatpush3.bf16.msra.mxu0 %v15152_v25  ;;  %9715 = vmatprep.mubr.msk.bf16.mxu0 %vm2087_vm11, %v12520_v47  ;;  %v3259_v50 = vrot.slane %v3258_v53, 2 }
 0x868   : > { %v3280_v62 = vrot.slane %v3279_v59, 2 }
 0x869   : > { %v3652_v61 = vadd.f32 %v3651_v6, %v3650_v34  ;;  %v3260_v29 = vmax.f32 %v3258_v53, %v3259_v50 }
 0x86a   : > { %v3281_v46 = vmax.f32 %v3279_v59, %v3280_v62 }
 0x86b   : > { %v3653_v15 = vrot.slane %v3652_v61, 1  ;;  %v3261_v7 = vrot.slane %v3260_v29, 1 }
 0x86c   : > { %v3282_v35 = vrot.slane %v3281_v46, 1 }
 0x86d   : > { %v3654_v25 = vadd.f32 %v3653_v15, %v3652_v61  ;;  %v3262_v43 = vmax.f32 %v3260_v29, %v3261_v7  ;;  %v12592_v7 = vpop.trf.xlu0 }
 0x86e   : > { %9716 = vmatmul.mubr.msk.bf16.vlgmr.msra.gmra.mrb[72].mxu0 %vm2087_vm11, %v12531_v41  ;;  %v3283_v39 = vmax.f32 %v3281_v46, %v3282_v35 }
 0x86f   : > { %9719 = vmatprep.mubr.msk.bf16.mxu0 %vm2087_vm11, %v12538_v16  ;;  %v12556_v53 = vadd.f32 %v3654_v25, %v3591_v33  ;;  %v12559_v18 = vmax.f32 %v12057_v4, %v3262_v43  ;;  %v2532_v33 = vsub.f32 -1e+30, %v12057_v4 }
 0x870   : > { %v12562_v34 = vmax.f32 %v12062_v17, %v3283_v39 }
 0x871   : > { %v3362_v10 = vsub.f32 %v3140_v31, %v12559_v18  ;;  %v3317_v59 = vsub.f32 %v12339_v45, %v12559_v18  ;;  %v3320_v6 = vsub.f32 %v12343_v63, %v12559_v18  ;;  %v3323_v31 = vsub.f32 %v12349_v38, %v12559_v18 }
 0x872   : > { %v3363_v50 = vsub.f32 %v3142_v44, %v12562_v34  ;;  %v3318_v62 = vsub.f32 %v12341_v52, %v12562_v34  ;;  %v3321_v61 = vsub.f32 %v12345_v26, %v12562_v34  ;;  %v3324_v29 = vsub.f32 %v12353_v56, %v12562_v34 }
 0x873   : > { %v3455_v1 = vmul.f32 1.442695, %v3362_v10  ;;  %v3327_v63 = vsub.f32 %v12364_v14, %v12562_v34  ;;  %v3365_v52 = vmul.f32 1.442695, %v3317_v59  ;;  %v3371_v44 = vmul.f32 1.442695, %v3320_v6 }
 0x874   : > { %v3457_v46 = vmul.f32 1.442695, %v3363_v50  ;;  %v3367_v45 = vmul.f32 1.442695, %v3318_v62  ;;  %v3373_v15 = vmul.f32 1.442695, %v3321_v61  ;;  %v3326_v26 = vsub.f32 %v12357_v54, %v12559_v18 }
 0x875   : > { %10664 = vpow2.f32 %v3455_v1  ;;  %v3379_v38 = vmul.f32 1.442695, %v3324_v29  ;;  %v3330_v56 = vsub.f32 %v12390_v32, %v12562_v34  ;;  %v3333_v14 = vsub.f32 %v12406_v30, %v12562_v34  ;;  %v12613_v29 = vpop.trf.xlu0 }
 0x876   : > { %9720 = vmatmul.mubr.msk.bf16.gmra.mrb[76].mxu0 %vm2087_vm11, %v12549_v58  ;;  %10666 = vpow2.f32 %v3457_v46  ;;  %v3329_v35 = vsub.f32 %v12383_v19, %v12559_v18  ;;  %v3332_v54 = vsub.f32 %v12399_v11, %v12559_v18  ;;  %v3336_v25 = vsub.f32 %v12429_v0, %v12562_v34 }
 0x877   : > { %9723 = vmatprep.mubr.msk.bf16.mxu0 %vm2087_vm11, %v12564_v36  ;;  %10668 = vpow2.f32 %v3367_v45  ;;  %v3385_v43 = vmul.f32 1.442695, %v3327_v63  ;;  %v3377_v32 = vmul.f32 1.442695, %v3323_v31  ;;  %v3383_v39 = vmul.f32 1.442695, %v3326_v26 }
 0x878   : > { %10670 = vpow2.f32 %v3373_v15  ;;  %v3391_v30 = vmul.f32 1.442695, %v3330_v56  ;;  %v3339_v10 = vsub.f32 %v12437_v24, %v12562_v34  ;;  %v3397_v59 = vmul.f32 1.442695, %v3333_v14 }
 0x879   : > { %10672 = vpow2.f32 %v3365_v52  ;;  %v3335_v19 = vsub.f32 %v12423_v5, %v12559_v18  ;;  %v3338_v11 = vsub.f32 %v12433_v57, %v12559_v18  ;;  %v3389_v0 = vmul.f32 1.442695, %v3329_v35 }
 0x87a   : > { %10674 = vpow2.f32 %v3371_v44  ;;  %v3395_v6 = vmul.f32 1.442695, %v3332_v54  ;;  %v3403_v50 = vmul.f32 1.442695, %v3336_v25  ;;  %v3342_v62 = vsub.f32 %v12452_v55, %v12562_v34 }
 0x87b   : > { %10676 = vpow2.f32 %v3379_v38  ;;  %v3345_v61 = vsub.f32 %v12464_v22, %v12562_v34  ;;  %v3341_v24 = vsub.f32 %v12446_v42, %v12559_v18  ;;  %v3409_v5 = vmul.f32 1.442695, %v3339_v10 }
 0x87c   : > { %10678 = vpow2.f32 %v3385_v43  ;;  %v3401_v57 = vmul.f32 1.442695, %v3335_v19  ;;  %v3344_v1 = vsub.f32 %v12458_v8, %v12559_v18  ;;  %v3407_v55 = vmul.f32 1.442695, %v3338_v11 }
 0x87d   : > { %10680 = vpow2.f32 %v3377_v32  ;;  %v3348_v22 = vsub.f32 %v12484_v9, %v12562_v34  ;;  %v3351_v42 = vsub.f32 %v12496_v49, %v12562_v34  ;;  %v3347_v46 = vsub.f32 %v12479_v20, %v12559_v18  ;;  %v12643_v32 = vpop.trf.xlu0 }
 0x87e   : > { %9724 = vmatmul.mubr.msk.bf16.gmra.mrb[80].mxu0 %vm2087_vm11, %v12592_v7  ;;  %10682 = vpow2.f32 %v3383_v39  ;;  %v3350_v8 = vsub.f32 %v12491_v21, %v12559_v18  ;;  %v3354_v45 = vsub.f32 %v12507_v3, %v12562_v34  ;;  %v3415_v63 = vmul.f32 1.442695, %v3342_v62 }
 0x87f   : > { %9727 = vmatprep.mubr.msk.bf16.mxu0 %vm2087_vm11, %v12613_v29  ;;  %v12625_v31 = vpop.eup %10664  ;;  %10684 = vpow2.f32 %v3391_v30  ;;  %v3421_v9 = vmul.f32 1.442695, %v3345_v61  ;;  %v3413_v52 = vmul.f32 1.442695, %v3341_v24  ;;  %v3419_v49 = vmul.f32 1.442695, %v3344_v1 }
 0x880   : > { %v12633_v15 = vpop.eup %10666  ;;  %10686 = vpow2.f32 %v3397_v59  ;;  %v3427_v26 = vmul.f32 1.442695, %v3348_v22  ;;  %v3433_v38 = vmul.f32 1.442695, %v3351_v42  ;;  %v3425_v14 = vmul.f32 1.442695, %v3347_v46 }
 0x881   : > { %v10669_v44 = vpop.eup %10668  ;;  %10688 = vpow2.f32 %v3389_v0  ;;  %v3357_v21 = vsub.f32 %v12514_v51, %v12562_v34  ;;  %v12639_v54 = vmul.f32 1.442695, %v3350_v8  ;;  %v12641_v25 = vmul.f32 1.442695, %v3354_v45  ;;  %v15189_v1 = vld [vmem:[#allocation27_spill] sm:$0xff] }
 0x882   : > { %v10671_v56 = vpop.eup %10670  ;;  %v3542_v20 = vmul.f32 %v10669_v44, %v12274_v48  ;;  %10690 = vpow2.f32 %v3395_v6  ;;  %v3353_v30 = vsub.f32 %v12504_v23, %v12559_v18  ;;  %v3356_v51 = vsub.f32 %v12511_v13, %v12559_v18  ;;  %v15187_v6 = vld [vmem:[#allocation41_spill] sm:$0xff] }
 0x883   : > { %v10673_v3 = vpop.eup %10672  ;;  %v3545_v35 = vmul.f32 %v10671_v56, %v12276_v2  ;;  %10692 = vpow2.f32 %v3403_v50  ;;  %v3445_v62 = vmul.f32 1.442695, %v3357_v21  ;;  %v3360_v23 = vsub.f32 %v12526_v37, %v12562_v34 }
 0x884   : > { %v10675_v43 = vpop.eup %10674  ;;  %v3541_v39 = vmul.f32 %v10673_v3, %v12274_v48  ;;  %10694 = vpow2.f32 %v3409_v5  ;;  %v15188_v61 = vmov 0   ;;  %v3437_v8 = vmul.f32 1.442695, %v3353_v30  ;;  %v15190_v3 = vld [vmem:[#allocation44_spill] sm:$0xff] }
 0x885   : > { %v10677_v10 = vpop.eup %10676  ;;  %v3613_v59 = vadd.f32 %v3545_v35, %v3542_v20  ;;  %v3662_v19 = vpack.c.bf16 %v3545_v35, %v3542_v20  ;;  %v3544_v11 = vmul.f32 %v10675_v43, %v12276_v2  ;;  %10696 = vpow2.f32 %v3401_v57 }
 0x886   : > { %9728 = vmatmul.mubr.msk.bf16.gmra.mrb[84].mxu0 %vm2087_vm11, %v12643_v32  ;;  %v10679_v0 = vpop.eup %10678  ;;  %v3548_v50 = vmul.f32 %v10677_v10, %v15187_v6  ;;  %10698 = vpow2.f32 %v3407_v55  ;;  %v3443_v44 = vmul.f32 1.442695, %v3356_v51 }
 0x887   : > { %4496 = vmatprep.mubr.bf16.mxu0 %v15188_v61  ;;  %v10681_v13 = vpop.eup %10680  ;;  %3685 = vmatprep.subr.bf16.mxu1 %v3662_v19  ;;  %v3592_v24 = vadd.f32 %v3544_v11, %v3541_v39  ;;  %v3661_v5 = vpack.c.bf16 %v3544_v11, %v3541_v39  ;;  %v3551_v22 = vmul.f32 %v10679_v0, %v15189_v1  ;;  %10700 = vpow2.f32 %v3415_v63  ;;  %v15191_v39 = vld [vmem:[#allocation47_spill] sm:$0xff] }
 0x888   : > { %v10683_v42 = vpop.eup %10682  ;;  %v3614_v46 = vadd.f32 %v3613_v59, %v3548_v50  ;;  %v3547_v57 = vmul.f32 %v10681_v13, %v15187_v6  ;;  %10702 = vpow2.f32 %v3421_v9  ;;  %v3359_v9 = vsub.f32 %v12523_v27, %v12559_v18 }
 0x889   : > { %v10685_v55 = vpop.eup %10684  ;;  %3686 = vmatpush1.bf16.msra.mxu1 %v3661_v5  ;;  %v3665_v45 = vpack.c.bf16 %v3551_v22, %v3548_v50  ;;  %v3550_v37 = vmul.f32 %v10683_v42, %v15189_v1  ;;  %10704 = vpow2.f32 %v3413_v52  ;;  %v3451_v0 = vmul.f32 1.442695, %v3360_v23  ;;  %v15193_v42 = vld [vmem:[#allocation56_spill] sm:$0xff] }
 0x88a   : > { %v10687_v56 = vpop.eup %10686  ;;  %v3615_v20 = vadd.f32 %v3614_v46, %v3551_v22  ;;  %v3593_v21 = vadd.f32 %v3592_v24, %v3547_v57  ;;  %v3554_v35 = vmul.f32 %v10685_v55, %v15190_v3  ;;  %10706 = vpow2.f32 %v3419_v49 }
 0x88b   : > { %v10689_v63 = vpop.eup %10688  ;;  %3687 = vmatprep.subr.bf16.mxu1 %v3665_v45  ;;  %v3664_v43 = vpack.c.bf16 %v3550_v37, %v3547_v57  ;;  %v3557_v10 = vmul.f32 %v10687_v56, %v15191_v39  ;;  %10708 = vpow2.f32 %v3427_v26  ;;  %v15192_v26 = vld [vmem:[#allocation49_spill] sm:$0xff] }
 0x88c   : > { %v10691_v30 = vpop.eup %10690  ;;  %v3594_v59 = vadd.f32 %v3593_v21, %v3550_v37  ;;  %v3616_v19 = vadd.f32 %v3615_v20, %v3554_v35  ;;  %v3553_v52 = vmul.f32 %v10689_v63, %v15190_v3  ;;  %10710 = vpow2.f32 %v3433_v38  ;;  %v15194_v63 = vld [vmem:[#allocation57_spill] sm:$0xff] }
 0x88d   : > { %v10693_v51 = vpop.eup %10692  ;;  %3688 = vmatpush1.bf16.msra.mxu1 %v3664_v43  ;;  %v3668_v11 = vpack.c.bf16 %v3557_v10, %v3554_v35  ;;  %v3556_v49 = vmul.f32 %v10691_v30, %v15191_v39  ;;  %10712 = vpow2.f32 %v3425_v14  ;;  %v3449_v38 = vmul.f32 1.442695, %v3359_v9 }
 0x88e   : > { %v10695_v50 = vpop.eup %10694  ;;  %v3617_v13 = vadd.f32 %v3616_v19, %v3557_v10  ;;  %v3595_v24 = vadd.f32 %v3594_v59, %v3553_v52  ;;  %v3560_v5 = vmul.f32 %v10693_v51, %v15192_v26  ;;  %10714 = vpow2.f32 %v12639_v54  ;;  %v15195_v10 = vld [vmem:[#allocation40_spill] sm:$0xff] }
 0x88f   : > { %v10697_v27 = vpop.eup %10696  ;;  %3689 = vmatprep.subr.bf16.mxu1 %v3668_v11  ;;  %v3667_v22 = vpack.c.bf16 %v3556_v49, %v3553_v52  ;;  %v3563_v46 = vmul.f32 %v10695_v50, %v15193_v42  ;;  %10716 = vpow2.f32 %v12641_v25  ;;  %v2533_v37 = vsub.f32 -1e+30, %v12062_v17 }
 0x890   : > { %v10699_v57 = vpop.eup %10698  ;;  %v3596_v55 = vadd.f32 %v3595_v24, %v3556_v49  ;;  %v3618_v45 = vadd.f32 %v3617_v13, %v3560_v5  ;;  %v3559_v14 = vmul.f32 %v10697_v27, %v15192_v26  ;;  %10718 = vpow2.f32 %v3445_v62  ;;  %v15196_v62 = vld [vmem:[#allocation63_spill] sm:$0xff]  ;;  %v15197_v24 = vld [vmem:[#allocation37_spill] sm:$0xff] }
 0x891   : > { %v10701_v23 = vpop.eup %10700  ;;  %3690 = vmatpush1.bf16.msra.mxu1 %v3667_v22  ;;  %v3671_v56 = vpack.c.bf16 %v3563_v46, %v3560_v5  ;;  %v3562_v54 = vmul.f32 %v10699_v57, %v15193_v42  ;;  %10720 = vpow2.f32 %v3437_v8  ;;  %v2852_v9 = vrot.slane %v15195_v10, 4 }
 0x892   : > { %v10703_v20 = vpop.eup %10702  ;;  %v3619_v21 = vadd.f32 %v3618_v45, %v3563_v46  ;;  %v3597_v35 = vadd.f32 %v3596_v55, %v3559_v14  ;;  %v3566_v25 = vmul.f32 %v10701_v23, %v15194_v63  ;;  %10722 = vpow2.f32 %v3443_v44  ;;  %v15198_v46 = vld [vmem:[#allocation58_spill] sm:$0xff] }
 0x893   : > { %v10705_v43 = vpop.eup %10704  ;;  %3691 = vmatprep.subr.bf16.mxu1 %v3671_v56  ;;  %v3670_v30 = vpack.c.bf16 %v3562_v54, %v3559_v14  ;;  %v3569_v59 = vmul.f32 %v10703_v20, %v15196_v62  ;;  %10724 = vpow2.f32 %v3451_v0  ;;  %v2537_v49 = vmul.f32 1.442695, %v2533_v37  ;;  %v15199_v14 = vld [vmem:[#allocation59_spill] sm:$0xff] }
 0x894   : > { %v10707_v19 = vpop.eup %10706  ;;  %v3598_v52 = vadd.f32 %v3597_v35, %v3562_v54  ;;  %v3620_v51 = vadd.f32 %v3619_v21, %v3566_v25  ;;  %v3565_v11 = vmul.f32 %v10705_v43, %v15194_v63  ;;  %10726 = vpow2.f32 %v3449_v38 }
 0x895   : > { %v10709_v8 = vpop.eup %10708  ;;  %3692 = vmatpush1.bf16.msra.mxu1 %v3670_v30  ;;  %v3674_v50 = vpack.c.bf16 %v3569_v59, %v3566_v25  ;;  %v3568_v44 = vmul.f32 %v10707_v19, %v15196_v62  ;;  %v2831_v5 = vrot.slane %v15197_v24, 4  ;;  %v2853_v55 = vadd.f32 %v2852_v9, %v15195_v10  ;;  %v15200_v19 = vld [vmem:[#allocation60_spill] sm:$0xff] }
 0x896   : > { %v10711_v13 = vpop.eup %10710  ;;  %v3621_v27 = vadd.f32 %v3620_v51, %v3569_v59  ;;  %v3599_v22 = vadd.f32 %v3598_v52, %v3565_v11  ;;  %v3572_v57 = vmul.f32 %v10709_v8, %v15198_v46  ;;  %v2535_v37 = vmul.f32 1.442695, %v2532_v33  ;;  %v15201_v8 = vld [vmem:[#allocation61_spill] sm:$0xff] }
 0x897   : > { %v10713_v0 = vpop.eup %10712  ;;  %3693 = vmatprep.subr.bf16.mxu1 %v3674_v50  ;;  %v3673_v45 = vpack.c.bf16 %v3568_v44, %v3565_v11  ;;  %v3575_v38 = vmul.f32 %v10711_v13, %v15199_v14  ;;  %10728 = vpow2.f32 %v2537_v49  ;;  %v3309_v43 = vsub.f32 %v12062_v17, %v12562_v34 }
 0x898   : > { %v10715_v23 = vpop.eup %10714  ;;  %v3600_v56 = vadd.f32 %v3599_v22, %v3568_v44  ;;  %v3622_v54 = vadd.f32 %v3621_v27, %v3572_v57  ;;  %v3571_v20 = vmul.f32 %v10713_v0, %v15198_v46  ;;  %v2832_v9 = vadd.f32 %v2831_v5, %v15197_v24  ;;  %v15202_v22 = vld [vmem:[#allocation64_spill] sm:$0xff] }
 0x899   : > { %v10717_v21 = vpop.eup %10716  ;;  %3694 = vmatpush1.bf16.msra.mxu1 %v3673_v45  ;;  %v3677_v35 = vpack.c.bf16 %v3575_v38, %v3572_v57  ;;  %v3574_v25 = vmul.f32 %v10715_v23, %v15199_v14  ;;  %v2854_v51 = vrot.slane %v2853_v55, 2  ;;  %v3308_v50 = vsub.f32 %v12057_v4, %v12559_v18 }
 0x89a   : > { %v10719_v10 = vpop.eup %10718  ;;  %v3623_v30 = vadd.f32 %v3622_v54, %v3575_v38  ;;  %v3601_v59 = vadd.f32 %v3600_v56, %v3571_v20  ;;  %v3578_v33 = vmul.f32 %v10717_v21, %v15200_v19  ;;  %v3587_v24 = vmul.f32 %v12633_v15, %v15202_v22 }
 0x89b   : > { %v10721_v52 = vpop.eup %10720  ;;  %3695 = vmatprep.subr.bf16.mxu1 %v3677_v35  ;;  %v3676_v11 = vpack.c.bf16 %v3574_v25, %v3571_v20  ;;  %v3581_v49 = vmul.f32 %v10719_v10, %v15201_v8  ;;  %v3586_v45 = vmul.f32 %v12625_v31, %v15202_v22  ;;  %v3313_v38 = vmul.f32 1.442695, %v3309_v43  ;;  %v15203_v20 = vld [vmem:[#allocation62_spill] sm:$0xff] }
 0x89c   : > { %v10723_v44 = vpop.eup %10722  ;;  %v3602_v13 = vadd.f32 %v3601_v59, %v3574_v25  ;;  %v3624_v27 = vadd.f32 %v3623_v30, %v3578_v33  ;;  %v3577_v17 = vmul.f32 %v10721_v52, %v15200_v19  ;;  %v2833_v56 = vrot.slane %v2832_v9, 2 }
 0x89d   : > { %v10725_v5 = vpop.eup %10724  ;;  %3696 = vmatpush1.bf16.msra.mxu1 %v3676_v11  ;;  %v3680_v57 = vpack.c.bf16 %v3581_v49, %v3578_v33  ;;  %v3580_v0 = vmul.f32 %v10723_v44, %v15201_v8  ;;  %10730 = vpow2.f32 %v2535_v37  ;;  %v3311_v25 = vmul.f32 1.442695, %v3308_v50 }
 0x89e   : > { %v10727_v23 = vpop.eup %10726  ;;  %v3625_v4 = vadd.f32 %v3624_v27, %v3581_v49  ;;  %v3603_v54 = vadd.f32 %v3602_v13, %v3577_v17  ;;  %v3584_v21 = vmul.f32 %v10725_v5, %v15203_v20  ;;  %v2855_v10 = vadd.f32 %v2854_v51, %v2853_v55  ;;  %v15204_v55 = vld [vmem:[#allocation23_spill] sm:$0xff] }
 0x89f   : > { %3697 = vmatprep.subr.bf16.mxu1 %v3680_v57  ;;  %v3679_v35 = vpack.c.bf16 %v3580_v0, %v3577_v17  ;;  %v3583_v15 = vmul.f32 %v10727_v23, %v15203_v20  ;;  %10732 = vpow2.f32 %v3313_v38  ;;  %v2834_v31 = vadd.f32 %v2833_v56, %v2832_v9  ;;  %v15218_v20 = vld [vmem:[#allocation48_spill] sm:$0xff] }
 0x8a0   : > { %v3604_v30 = vadd.f32 %v3603_v54, %v3580_v0  ;;  %v3626_v59 = vadd.f32 %v3625_v4, %v3584_v21  ;;  %v3683_v33 = vpack.c.bf16 %v3587_v24, %v3584_v21  ;;  %10734 = vpow2.f32 %v3311_v25 }
 0x8a1   : > { %3698 = vmatpush1.bf16.msra.mxu1 %v3679_v35  ;;  %v3682_v52 = vpack.c.bf16 %v3586_v45, %v3583_v15  ;;  %v10729_v49 = vpop.eup %10728  ;;  %v2856_v44 = vrot.slane %v2855_v10, 1  ;;  %v2835_v27 = vrot.slane %v2834_v31, 1 }
 0x8a2   : > { %v3627_v43 = vadd.f32 %v3626_v59, %v3587_v24  ;;  %3699 = vmatprep.subr.bf16.mxu1 %v3683_v33  ;;  %v3605_v11 = vadd.f32 %v3604_v30, %v3583_v15  ;;  %v15205_v24 = vld [vmem:[#allocation24_spill] sm:$0xff]  ;;  %v12706_v38 = vmul.f32 0.0, %v10729_v49 }
 0x8a3   : > { %v2857_v51 = vadd.f32 %v2856_v44, %v2855_v10  ;;  %v2836_v0 = vadd.f32 %v2835_v27, %v2834_v31 }
 0x8a4   : > { %v3628_v37 = vrot.slane %v3627_v43, 4  ;;  %v3606_v13 = vadd.f32 %v3605_v11, %v3586_v45 }
 0x8a5   : > { %3700 = vmatpush1.bf16.msra.mxu1 %v3682_v52  ;;  %v2880_v54 = vadd.f32 %v2857_v51, %v12706_v38 }
 0x8a6   : > { %v3629_v17 = vadd.f32 %v3628_v37, %v3627_v43  ;;  %v3607_v50 = vrot.slane %v3606_v13, 4  ;;  %9316 = vmatprep.subr.msk.bf16.mxu1 %vm1228_vm9, %v15204_v55 }
 0x8a7   : > { %v10731_v9 = vpop.eup %10730 }
 0x8a8   : > { %v3630_v5 = vrot.slane %v3629_v17, 2  ;;  %v3608_v57 = vadd.f32 %v3607_v50, %v3606_v13  ;;  %3718 = vmatmul.mubr.bf16.vlgmr.msra.gmra.mrb[72].mxu1 %v12534_v28  ;;  %v12711_v4 = vmul.f32 0.0, %v10731_v9 }
 0x8a9   : > { %3812 = vmatpush1.bf16.msra.mxu1 %v15205_v24  ;;  %3843 = vmatprep.mubr.bf16.mxu1 %v15188_v61  ;;  %v12709_v56 = vpop.eup %10732 }
 0x8aa   : > { %v3631_v45 = vadd.f32 %v3630_v5, %v3629_v17  ;;  %v3609_v23 = vrot.slane %v3608_v57, 2  ;;  %9731 = vmatprep.subr.bf16.mxu1 %v15144_v12  ;;  %v12714_v35 = vpop.eup %10734  ;;  %v2879_v15 = vadd.f32 %v2836_v0, %v12711_v4  ;;  %v3590_v30 = vmul.f32 %v12709_v56, %v2880_v54 }
 0x8ac   : > { %v3632_v21 = vrot.slane %v3631_v45, 1  ;;  %v3610_v28 = vadd.f32 %v3609_v23, %v3608_v57  ;;  %v3589_v33 = vmul.f32 %v12714_v35, %v2879_v15 }
 0x8ae   : > { %v3633_v25 = vadd.f32 %v3632_v21, %v3631_v45  ;;  %v3611_v10 = vrot.slane %v3610_v28, 1 }
 0x8b0   : > { %v3612_v59 = vadd.f32 %v3611_v10, %v3610_v28  ;;  %9317 = vmatmul.mubr.msk.bf16.vlgmr.msra.gmra.mrb[76].mxu1 %vm2087_vm11, %v12520_v47  ;;  %v12721_v52 = vadd.f32 %v3633_v25, %v3590_v30  ;;  %v15208_v47 = vld [vmem:[#allocation38_spill] sm:$0xff] }
 0x8b1   : > { %3853 = vmatprep.mubr.bf16.mxu1 %v15188_v61 }
 0x8b2   : > { %15206 = vst [vmem:[#allocation22_spill] sm:$0xff] %v12721_v52  ;;  %v12724_v31 = vadd.f32 %v3612_v59, %v3589_v33 }
 0x8b4   : > { %15207 = vst [vmem:[#allocation40_spill] sm:$0xff] %v12724_v31 }
 0x8b8   : > { %9318 = vmatmul.mubr.msk.bf16.gmra.mrb[80].mxu1 %vm2087_vm11, %v12531_v41  ;;  %v2989_v41 = vadd.f32 %v15208_v47, %v12544_v40 }
 0x8b9   : > { %3863 = vmatprep.mubr.bf16.mxu1 %v15188_v61 }
 0x8c0   : > { %9319 = vmatmul.mubr.msk.bf16.gmra.mrb[84].mxu1 %vm2087_vm11, %v12538_v16  ;;  %v3660_v16 = vmul.f32 %v12546_v60, %v2989_v41 }
 0x8c1   : > { %3873 = vmatprep.mubr.bf16.mxu1 %v15188_v61 }
 0x8c8   : > { %9320 = vmatmul.mubr.msk.bf16.gmra.mrb[88].mxu1 %vm2087_vm11, %v12549_v58 }
 0x8c9   : > { %3883 = vmatprep.mubr.bf16.mxu1 %v15188_v61 }
 0x8d0   : > { %9321 = vmatmul.mubr.msk.bf16.gmra.mrb[92].mxu1 %vm2087_vm11, %v12564_v36  ;;  %v12751_v36 = vpop.permute.xlu1 %4242 }
 0x8d1   : > { %3893 = vmatprep.mubr.bf16.mxu1 %v15188_v61  ;;  %15209 = vst [vmem:[#allocation37_spill] sm:$0xff] %v12751_v36 }
 0x8d4   : > { %v12755_v49 = vpop.permute.xlu1 %4247 }
 0x8d5   : > { %15210 = vst [vmem:[#allocation23_spill] sm:$0xff] %v12755_v49 }
 0x8d8   : > { %9322 = vmatmul.mubr.msk.bf16.gmra.mrb[96].mxu1 %vm2087_vm11, %v12592_v7  ;;  %v12757_v50 = vpop.permute.xlu1 %4252 }
 0x8d9   : > { %3903 = vmatprep.mubr.bf16.mxu1 %v15188_v61  ;;  %15211 = vst [vmem:[#allocation24_spill] sm:$0xff] %v12757_v50 }
 0x8dc   : > { %v12763_v5 = vpop.permute.xlu1 %4257 }
 0x8dd   : > { %15212 = vst [vmem:[#allocation38_spill] sm:$0xff] %v12763_v5 }
 0x8e0   : > { %9323 = vmatmul.mubr.msk.bf16.gmra.mrb[100].mxu1 %vm2087_vm11, %v12613_v29  ;;  %v12769_v23 = vpop.permute.xlu1 %4262 }
 0x8e1   : > { %3913 = vmatprep.mubr.bf16.mxu1 %v15188_v61  ;;  %15213 = vst [vmem:[#allocation65_spill] sm:$0xff] %v12769_v23 }
 0x8e4   : > { %v12775_v59 = vpop.permute.xlu1 %4267 }
 0x8e5   : > { %15214 = vst [vmem:[#allocation66_spill] sm:$0xff] %v12775_v59 }
 0x8e8   : > { %9324 = vmatmul.mubr.msk.bf16.gmra.mrb[104].mxu1 %vm2087_vm11, %v12643_v32 }
 0x8e9   : > { %9747 = vmatprep.mubr.msk.bf16.mxu1 %vm11209_vm0, %v15144_v12 }
 0x939   : > { %v3760_v58 = vpop.f32.mrb[68].mxu0 }
 0x93a   : > { %v12753_v7 = vadd.f32 %v3760_v58, %v3660_v16  ;;  %v9711_v43 = vpop.f32.mrb[69].mxu0 }
 0x93b   : > { %v3763_v29 = vpop.f32.mrb[70].mxu0 }
 0x93c   : > { %v9712_v11 = vpop.f32.mrb[71].mxu0 }
 0x93d   : > { %v12785_v11 = vpop.permute.xlu1 %4272 }
 0x93e   : > { %15215 = vst [vmem:[#allocation67_spill] sm:$0xff] %v12785_v11 }
 0x941   : > { %v9717_v44 = vpop.f32.mrb[72].mxu0 }
 0x942   : > { %v3958_v32 = vpop.f32.mrb[73].mxu0 }
 0x943   : > { %v4063_v37 = vmax.f32 %v3958_v32, %v9717_v44  ;;  %v9718_v13 = vpop.f32.mrb[74].mxu0 }
 0x944   : > { %v3961_v27 = vpop.f32.mrb[75].mxu0 }
 0x945   : > { %v4064_v17 = vmax.f32 %v3961_v27, %v9718_v13 }
 0x949   : > { %v12759_v40 = vpop.f32.mrb[76].mxu0 }
 0x94a   : > { %v3974_v60 = vpop.f32.mrb[77].mxu0 }
 0x94b   : > { %v4065_v55 = vmax.f32 %v4063_v37, %v3974_v60  ;;  %v12761_v51 = vpop.f32.mrb[78].mxu0 }
 0x94c   : > { %v3977_v57 = vpop.f32.mrb[79].mxu0 }
 0x94d   : > { %v4066_v9 = vmax.f32 %v4064_v17, %v3977_v57  ;;  %v4067_v24 = vmax.f32 %v4065_v55, %v12759_v40 }
 0x94f   : > { %v4068_v0 = vmax.f32 %v4066_v9, %v12761_v51  ;;  %v12788_v9 = vpop.permute.xlu1 %4282 }
 0x950   : > { %15216 = vst [vmem:[#allocation68_spill] sm:$0xff] %v12788_v9 }
 0x951   : > { %v12767_v45 = vpop.f32.mrb[80].mxu0 }
 0x952   : > { %v3990_v54 = vpop.f32.mrb[81].mxu0 }
 0x953   : > { %v4069_v21 = vmax.f32 %v4067_v24, %v3990_v54  ;;  %v12771_v28 = vpop.f32.mrb[82].mxu0 }
 0x954   : > { %v3993_v15 = vpop.f32.mrb[83].mxu0 }
 0x955   : > { %v4070_v25 = vmax.f32 %v4068_v0, %v3993_v15  ;;  %v4071_v10 = vmax.f32 %v4069_v21, %v12767_v45 }
 0x957   : > { %v4072_v30 = vmax.f32 %v4070_v25, %v12771_v28  ;;  %v12790_v25 = vpop.permute.xlu1 %4287 }
 0x958   : > { %15217 = vst [vmem:[#allocation69_spill] sm:$0xff] %v12790_v25 }
 0x959   : > { %v12777_v33 = vpop.f32.mrb[84].mxu0 }
 0x95a   : > { %v12779_v47 = vpop.f32.mrb[85].mxu0 }
 0x95b   : > { %v4073_v41 = vmax.f32 %v4071_v10, %v12779_v47  ;;  %v12782_v16 = vpop.f32.mrb[86].mxu0 }
 0x95c   : > { %v4009_v58 = vpop.f32.mrb[87].mxu0 }
 0x95d   : > { %v4075_v43 = vmax.f32 %v4073_v41, %v12777_v33  ;;  %v4074_v29 = vmax.f32 %v4072_v30, %v4009_v58  ;;  %v12795_v41 = vpop.permute.xlu1 %4292 }
 0x95e   : > { %15219 = vst [vmem:[#allocation48_spill] sm:$0xff] %v12795_v41 }
 0x95f   : > { %v4076_v37 = vmax.f32 %v4074_v29, %v12782_v16 }
 0x961   : > { %v4077_v17 = vmax.f32 %v4075_v43, %v4076_v37 }
 0x963   : > { %v4078_v55 = vrot.slane %v4077_v17, 4 }
 0x965   : > { %v4079_v24 = vmax.f32 %v4077_v17, %v4078_v55 }
 0x967   : > { %v4080_v0 = vrot.slane %v4079_v24, 2 }
 0x969   : > { %v4081_v21 = vmax.f32 %v4079_v24, %v4080_v0 }
 0x96b   : > { %v4082_v10 = vrot.slane %v4081_v21, 1 }
 0x96d   : > { %v4083_v22 = vmax.f32 %v4081_v21, %v4082_v10 }
 0x96f   : > { %v12793_v19 = vmax.f32 %v15218_v20, %v4083_v22 }
 0x971   : > { %v4137_v30 = vsub.f32 %v4009_v58, %v12793_v19  ;;  %v4098_v29 = vsub.f32 %v3958_v32, %v12793_v19  ;;  %v4101_v43 = vsub.f32 %v3961_v27, %v12793_v19  ;;  %v4104_v37 = vsub.f32 %v9717_v44, %v12793_v19 }
 0x972   : > { %v4107_v17 = vsub.f32 %v9718_v13, %v12793_v19  ;;  %v4110_v55 = vsub.f32 %v3974_v60, %v12793_v19  ;;  %v4113_v24 = vsub.f32 %v3977_v57, %v12793_v19  ;;  %v4116_v22 = vsub.f32 %v12759_v40, %v12793_v19  ;;  %v12809_v13 = vpop.permute.xlu1 %4297 }
 0x973   : > { %v4226_v0 = vmul.f32 1.442695, %v4137_v30  ;;  %v4148_v21 = vmul.f32 1.442695, %v4098_v29  ;;  %v4154_v10 = vmul.f32 1.442695, %v4101_v43  ;;  %v4119_v58 = vsub.f32 %v12761_v51, %v12793_v19 }
 0x974   : > { %v4160_v32 = vmul.f32 1.442695, %v4104_v37  ;;  %v4122_v27 = vsub.f32 %v3990_v54, %v12793_v19  ;;  %v4166_v44 = vmul.f32 1.442695, %v4107_v17  ;;  %v4172_v14 = vmul.f32 1.442695, %v4110_v55 }
 0x975   : > { %10736 = vpow2.f32 %v4226_v0  ;;  %15220 = vst [vmem:[#allocation70_spill] sm:$0xff] %v12809_v13  ;;  %v4178_v60 = vmul.f32 1.442695, %v4113_v24  ;;  %v4125_v57 = vsub.f32 %v3993_v15, %v12793_v19  ;;  %v4128_v40 = vsub.f32 %v12767_v45, %v12793_v19  ;;  %v15221_v15 = vld [vmem:[#allocation50_spill] sm:$0xff] }
 0x976   : > { %10738 = vpow2.f32 %v4148_v21  ;;  %v4131_v30 = vsub.f32 %v12771_v28, %v12793_v19  ;;  %v4134_v51 = vsub.f32 %v12779_v47, %v12793_v19  ;;  %v4140_v54 = vsub.f32 %v12777_v33, %v12793_v19  ;;  %v15222_v17 = vld [vmem:[#allocation46_spill] sm:$0xff]  ;;  %v12827_v33 = vpop.permute.xlu1 %4302 }
 0x977   : > { %10740 = vpow2.f32 %v4154_v10  ;;  %v4184_v29 = vmul.f32 1.442695, %v4116_v22  ;;  %v4143_v43 = vsub.f32 %v12782_v16, %v12793_v19  ;;  %v2987_v37 = vadd.f32 %v15221_v15, %v12711_v4  ;;  %15223 = vst [vmem:[#allocation50_spill] sm:$0xff] %v12827_v33 }
 0x978   : > { %10742 = vpow2.f32 %v4160_v32  ;;  %v4190_v45 = vmul.f32 1.442695, %v4119_v58  ;;  %v2988_v55 = vadd.f32 %v15222_v17, %v12706_v38  ;;  %v4196_v28 = vmul.f32 1.442695, %v4122_v27 }
 0x979   : > { %10744 = vpow2.f32 %v4166_v44  ;;  %v3658_v47 = vmul.f32 %v12714_v35, %v2987_v37  ;;  %v4202_v24 = vmul.f32 1.442695, %v4125_v57  ;;  %v4208_v16 = vmul.f32 1.442695, %v4128_v40 }
 0x97a   : > { %10746 = vpow2.f32 %v4172_v14  ;;  %v3659_v0 = vmul.f32 %v12709_v56, %v2988_v55  ;;  %v4214_v10 = vmul.f32 1.442695, %v4131_v30  ;;  %v4089_v14 = vsub.f32 %v15218_v20, %v12793_v19  ;;  %v12837_v15 = vpop.permute.xlu1 %4307 }
 0x97b   : > { %10748 = vpow2.f32 %v4178_v60  ;;  %v3719_v22 = vpop.f32.mrb[72].mxu1  ;;  %v4220_v58 = vmul.f32 1.442695, %v4134_v51  ;;  %v4232_v44 = vmul.f32 1.442695, %v4140_v54  ;;  %15226 = vst [vmem:[#allocation72_spill] sm:$0xff] %v12837_v15 }
 0x97c   : > { %10750 = vpow2.f32 %v4184_v29  ;;  %v12830_v21 = vadd.f32 %v3719_v22, %v3658_v47  ;;  %v3721_v4 = vpop.f32.mrb[73].mxu1  ;;  %v4238_v60 = vmul.f32 1.442695, %v4143_v43  ;;  %v4094_v30 = vmul.f32 1.442695, %v4089_v14  ;;  %v12850_v14 = vpop.permute.xlu0 %4277 }
 0x97d   : > { %10752 = vpow2.f32 %v4190_v45  ;;  %v12834_v38 = vadd.f32 %v3721_v4, %v3659_v0  ;;  %v3723_v35 = vpop.f32.mrb[74].mxu1  ;;  %15227 = vst [vmem:[#allocation73_spill] sm:$0xff] %v12850_v14 }
 0x97e   : > { %15224 = vst [vmem:[#allocation46_spill] sm:$0xff] %v12830_v21  ;;  %10754 = vpow2.f32 %v4196_v28  ;;  %v3724_v27 = vpop.f32.mrb[75].mxu1 }
 0x97f   : > { %15225 = vst [vmem:[#allocation71_spill] sm:$0xff] %v12834_v38  ;;  %v10737_v32 = vpop.eup %10736  ;;  %10756 = vpow2.f32 %v4202_v24 }
 0x980   : > { %v10739_v56 = vpop.eup %10738  ;;  %10758 = vpow2.f32 %v4208_v16 }
 0x981   : > { %v10741_v57 = vpop.eup %10740  ;;  %v4322_v40 = vmul.f32 %v10739_v56, %v12751_v36  ;;  %10760 = vpow2.f32 %v4214_v10 }
 0x982   : > { %v10743_v29 = vpop.eup %10742  ;;  %v4325_v19 = vmul.f32 %v10741_v57, %v12755_v49  ;;  %10762 = vpow2.f32 %v4220_v58 }
 0x983   : > { %v10745_v20 = vpop.eup %10744  ;;  %v4328_v51 = vmul.f32 %v10743_v29, %v12757_v50  ;;  %10764 = vpow2.f32 %v4232_v44  ;;  %v12841_v54 = vpop.f32.mrb[76].mxu1 }
 0x984   : > { %v10747_v37 = vpop.eup %10746  ;;  %v4413_v45 = vadd.f32 %v4325_v19, %v4322_v40  ;;  %v4442_v43 = vpack.c.bf16 %v4325_v19, %v4322_v40  ;;  %v4331_v17 = vmul.f32 %v10745_v20, %v12763_v5  ;;  %10766 = vpow2.f32 %v4238_v60  ;;  %v12844_v28 = vpop.f32.mrb[77].mxu1 }
 0x985   : > { %v10749_v55 = vpop.eup %10748  ;;  %v4334_v47 = vmul.f32 %v10747_v37, %v12769_v23  ;;  %10768 = vpow2.f32 %v4094_v30  ;;  %v12847_v22 = vpop.f32.mrb[78].mxu1 }
 0x986   : > { %v10751_v24 = vpop.eup %10750  ;;  %9732 = vmatpush3.bf16.msra.mxu1 %v4442_v43  ;;  %v4414_v0 = vadd.f32 %v4413_v45, %v4328_v51  ;;  %v4445_v16 = vpack.c.bf16 %v4331_v17, %v4328_v51  ;;  %v4337_v4 = vmul.f32 %v10749_v55, %v12775_v59  ;;  %v12852_v35 = vpop.f32.mrb[79].mxu1  ;;  %v4361_v43 = vmul.f32 %v10737_v32, %v12837_v15 }
 0x987   : > { %v10753_v10 = vpop.eup %10752  ;;  %9733 = vmatprep.subr.bf16.mxu1 %v15144_v12  ;;  %v4340_v58 = vmul.f32 %v10751_v24, %v12785_v11  ;;  %v12856_v44 = vpop.permute.xlu1 %4312 }
 0x988   : > { %v10755_v27 = vpop.eup %10754  ;;  %15228 = vst [vmem:[#allocation74_spill] sm:$0xff] %v12856_v44  ;;  %v4415_v56 = vadd.f32 %v4414_v0, %v4331_v17  ;;  %v4448_v60 = vpack.c.bf16 %v4337_v4, %v4334_v47  ;;  %v4343_v57 = vmul.f32 %v10753_v10, %v12850_v14 }
 0x989   : > { %v10757_v40 = vpop.eup %10756  ;;  %v4346_v30 = vmul.f32 %v10755_v27, %v12788_v9 }
 0x98a   : > { %v10759_v29 = vpop.eup %10758  ;;  %9734 = vmatpush3.bf16.msra.mxu1 %v4445_v16  ;;  %v4416_v19 = vadd.f32 %v4415_v56, %v4334_v47  ;;  %v4451_v20 = vpack.c.bf16 %v4343_v57, %v4340_v58  ;;  %v4349_v51 = vmul.f32 %v10757_v40, %v12790_v25 }
 0x98b   : > { %v10761_v37 = vpop.eup %10760  ;;  %9735 = vmatprep.subr.bf16.mxu1 %v15144_v12  ;;  %v4352_v45 = vmul.f32 %v10759_v29, %v12795_v41  ;;  %v12864_v55 = vpop.f32.mrb[80].mxu1 }
 0x98c   : > { %v10763_v17 = vpop.eup %10762  ;;  %v4417_v24 = vadd.f32 %v4416_v19, %v4337_v4  ;;  %v4454_v0 = vpack.c.bf16 %v4349_v51, %v4346_v30  ;;  %v4355_v10 = vmul.f32 %v10761_v37, %v12809_v13  ;;  %v4021_v47 = vmax.f32 %v12841_v54, %v12864_v55  ;;  %v12869_v16 = vpop.f32.mrb[81].mxu1 }
 0x98d   : > { %v10765_v27 = vpop.eup %10764  ;;  %v4358_v56 = vmul.f32 %v10763_v17, %v12827_v33  ;;  %v12872_v8 = vpop.permute.xlu1 %4317  ;;  %v4042_v32 = vmax.f32 %v12844_v28, %v12869_v16 }
 0x98e   : > { %v10767_v40 = vpop.eup %10766  ;;  %15229 = vst [vmem:[#allocation75_spill] sm:$0xff] %v12872_v8  ;;  %v12876_v29 = vpop.f32.mrb[82].mxu1  ;;  %9736 = vmatpush3.bf16.msra.mxu1 %v4448_v60  ;;  %v4418_v4 = vadd.f32 %v4417_v24, %v4340_v58  ;;  %v4457_v19 = vpack.c.bf16 %v4355_v10, %v4352_v45  ;;  %v4364_v37 = vmul.f32 %v10765_v27, %v12856_v44 }
 0x98f   : > { %v10769_v46 = vpop.eup %10768  ;;  %v4022_v62 = vmax.f32 %v12847_v22, %v12876_v29  ;;  %v12881_v63 = vpop.f32.mrb[83].mxu1  ;;  %9737 = vmatprep.subr.bf16.mxu1 %v15144_v12  ;;  %v4460_v17 = vpack.c.bf16 %v4361_v43, %v4358_v56  ;;  %v4367_v42 = vmul.f32 %v10767_v40, %v12872_v8 }
 0x990   : > { %v4043_v26 = vmax.f32 %v12852_v35, %v12881_v63  ;;  %v4419_v39 = vadd.f32 %v4418_v4, %v4343_v57  ;;  %v4370_v58 = vmul.f32 %v10769_v46, %v12556_v53  ;;  %v12889_v60 = vmul.f32 %v10769_v46, %v12753_v7  ;;  %v15231_v4 = vld [vmem:[#allocation54_spill] sm:$0xff] }
 0x991   : > { %v4463_v24 = vpack.c.bf16 %v4367_v42, %v4364_v37 }
 0x992   : > { %15230 = vst [vmem:[#allocation76_spill] sm:$0xff] %v12889_v60  ;;  %9738 = vmatpush3.bf16.msra.mxu1 %v4451_v20  ;;  %v4420_v27 = vadd.f32 %v4419_v39, %v4346_v30 }
 0x993   : > { %9739 = vmatprep.subr.bf16.mxu1 %v15144_v12  ;;  %v12892_v3 = vpop.f32.mrb[84].mxu1 }
 0x994   : > { %v4421_v1 = vadd.f32 %v4420_v27, %v4349_v51  ;;  %v4023_v6 = vmax.f32 %v4021_v47, %v12892_v3  ;;  %v12895_v40 = vpop.f32.mrb[85].mxu1 }
 0x995   : > { %v4044_v2 = vmax.f32 %v4042_v32, %v12895_v40  ;;  %v12898_v57 = vpop.f32.mrb[86].mxu1 }
 0x996   : > { %9740 = vmatpush3.bf16.msra.mxu1 %v4454_v0  ;;  %v4422_v53 = vadd.f32 %v4421_v1, %v4352_v45  ;;  %v4024_v46 = vmax.f32 %v4022_v62, %v12898_v57  ;;  %v12901_v7 = vpop.f32.mrb[87].mxu1 }
 0x997   : > { %9741 = vmatprep.subr.bf16.mxu1 %v15144_v12  ;;  %v4045_v39 = vmax.f32 %v4043_v26, %v12901_v7  ;;  %v15232_v26 = vld [vmem:[#allocation25_spill] sm:$0xff] }
 0x998   : > { %v4423_v30 = vadd.f32 %v4422_v53, %v4355_v10  ;;  %v2197_v10 = vadd.f32 %v15232_v26, %v15231_v4 }
 0x99a   : > { %9742 = vmatpush3.bf16.msra.mxu1 %v4457_v19  ;;  %v4424_v20 = vadd.f32 %v4423_v30, %v4358_v56  ;;  %v12921_v53 = vpack.c.bf16 %v2197_v10, %v2197_v10 }
 0x99b   : > { %9743 = vmatprep.subr.bf16.mxu1 %v15144_v12  ;;  %v12906_v51 = vpop.f32.mrb[88].mxu1 }
 0x99c   : > { %v4425_v47 = vadd.f32 %v4424_v20, %v4361_v43  ;;  %v4025_v32 = vmax.f32 %v4023_v6, %v12906_v51  ;;  %v12909_v0 = vpop.f32.mrb[89].mxu1  ;;  %15233 = vst [vmem:[#allocation54_spill] sm:$0xff] %v12921_v53 }
 0x99d   : > { %v4046_v1 = vmax.f32 %v4044_v2, %v12909_v0  ;;  %v12912_v62 = vpop.f32.mrb[90].mxu1 }
 0x99e   : > { %9744 = vmatpush3.bf16.msra.mxu1 %v4460_v17  ;;  %v4426_v45 = vadd.f32 %v4425_v47, %v4364_v37  ;;  %v4026_v56 = vmax.f32 %v4024_v46, %v12912_v62  ;;  %v12917_v19 = vpop.f32.mrb[91].mxu1 }
 0x99f   : > { %9745 = vmatprep.subr.bf16.mxu1 %v15144_v12  ;;  %v4047_v43 = vmax.f32 %v4045_v39, %v12917_v19 }
 0x9a0   : > { %v4427_v6 = vadd.f32 %v4426_v45, %v4367_v42 }
 0x9a2   : > { %v4428_v27 = vrot.slane %v4427_v6, 4  ;;  %9746 = vmatpush3.bf16.msra.mxu1 %v4463_v24 }
 0x9a3   : > { %9757 = vmatprep.subr.bf16.mxu1 %v15144_v12  ;;  %v12924_v2 = vpop.f32.mrb[92].mxu1 }
 0x9a4   : > { %v4429_v37 = vadd.f32 %v4428_v27, %v4427_v6  ;;  %v4027_v17 = vmax.f32 %v4025_v32, %v12924_v2  ;;  %v12927_v30 = vpop.f32.mrb[93].mxu1 }
 0x9a5   : > { %9748 = vmatmul.mubr.bf16.vlgmr.msra.gmra.mrb[108].mxu1 %v12921_v53  ;;  %v4048_v46 = vmax.f32 %v4046_v1, %v12927_v30  ;;  %v12931_v20 = vpop.f32.mrb[94].mxu1 }
 0x9a6   : > { %v4430_v42 = vrot.slane %v4429_v37, 2  ;;  %9767 = vmatprep.mubr.msk.bf16.mxu1 %vm11209_vm0, %v15144_v12  ;;  %v4028_v24 = vmax.f32 %v4026_v56, %v12931_v20  ;;  %v12936_v39 = vpop.f32.mrb[95].mxu1 }
 0x9a7   : > { %v4049_v47 = vmax.f32 %v4047_v43, %v12936_v39 }
 0x9a8   : > { %v4431_v45 = vadd.f32 %v4430_v42, %v4429_v37 }
 0x9aa   : > { %v4432_v32 = vrot.slane %v4431_v45, 1 }
 0x9ab   : > { %v12939_v4 = vpop.f32.mrb[96].mxu1 }
 0x9ac   : > { %v4433_v26 = vadd.f32 %v4432_v32, %v4431_v45  ;;  %v4029_v10 = vmax.f32 %v4027_v17, %v12939_v4  ;;  %v12942_v1 = vpop.f32.mrb[97].mxu1 }
 0x9ad   : > { %v4050_v6 = vmax.f32 %v4048_v46, %v12942_v1  ;;  %v12945_v27 = vpop.f32.mrb[98].mxu1 }
 0x9ae   : > { %v12947_v48 = vadd.f32 %v4433_v26, %v4370_v58  ;;  %v4030_v56 = vmax.f32 %v4028_v24, %v12945_v27  ;;  %v12950_v12 = vpop.f32.mrb[99].mxu1 }
 0x9af   : > { %v4051_v43 = vmax.f32 %v4049_v47, %v12950_v12 }
 0x9b0   : > { %15234 = vst [vmem:[#allocation25_spill] sm:$0xff] %v12947_v48 }
 0x9b3   : > { %v12953_v37 = vpop.f32.mrb[100].mxu1 }
 0x9b4   : > { %v4031_v42 = vmax.f32 %v4029_v10, %v12953_v37  ;;  %v12956_v45 = vpop.f32.mrb[101].mxu1 }
 0x9b5   : > { %v4052_v17 = vmax.f32 %v4050_v6, %v12956_v45  ;;  %v12959_v32 = vpop.f32.mrb[102].mxu1 }
 0x9b6   : > { %v4032_v46 = vmax.f32 %v4030_v56, %v12959_v32  ;;  %v12962_v58 = vpop.f32.mrb[103].mxu1 }
 0x9b7   : > { %v4053_v24 = vmax.f32 %v4051_v43, %v12962_v58 }
 0x9bb   : > { %v12965_v26 = vpop.f32.mrb[104].mxu1 }
 0x9bc   : > { %v4033_v47 = vmax.f32 %v4031_v42, %v12965_v26  ;;  %v12968_v60 = vpop.f32.mrb[105].mxu1 }
 0x9bd   : > { %v4054_v10 = vmax.f32 %v4052_v17, %v12968_v60  ;;  %v3919_v48 = vpop.f32.mrb[106].mxu1 }
 0x9be   : > { %v4034_v61 = vmax.f32 %v4032_v46, %v3919_v48  ;;  %v3921_v53 = vpop.f32.mrb[107].mxu1 }
 0x9bf   : > { %v4055_v6 = vmax.f32 %v4053_v24, %v3921_v53 }
 0x9c0   : > { %v4035_v38 = vmax.f32 %v4033_v47, %v4034_v61 }
 0x9c1   : > { %v4056_v52 = vmax.f32 %v4054_v10, %v4055_v6 }
 0x9c2   : > { %v4036_v21 = vrot.slane %v4035_v38, 4 }
 0x9c3   : > { %v4057_v56 = vrot.slane %v4056_v52, 4 }
 0x9c4   : > { %v4037_v31 = vmax.f32 %v4035_v38, %v4036_v21 }
 0x9c5   : > { %v4058_v44 = vmax.f32 %v4056_v52, %v4057_v56 }
 0x9c6   : > { %v4038_v8 = vrot.slane %v4037_v31, 2 }
 0x9c7   : > { %v4059_v43 = vrot.slane %v4058_v44, 2 }
 0x9c8   : > { %v4039_v15 = vmax.f32 %v4037_v31, %v4038_v8 }
 0x9c9   : > { %v4060_v33 = vmax.f32 %v4058_v44, %v4059_v43 }
 0x9ca   : > { %v4040_v13 = vrot.slane %v4039_v15, 1 }
 0x9cb   : > { %v4061_v42 = vrot.slane %v4060_v33, 1 }
 0x9cc   : > { %v4041_v41 = vmax.f32 %v4039_v15, %v4040_v13 }
 0x9cd   : > { %v4062_v25 = vmax.f32 %v4060_v33, %v4061_v42 }
 0x9ce   : > { %v12972_v17 = vmax.f32 %v12559_v18, %v4041_v41 }
 0x9cf   : > { %v12975_v46 = vmax.f32 %v12562_v34, %v4062_v25 }
 0x9d0   : > { %v4141_v61 = vsub.f32 %v3919_v48, %v12972_v17  ;;  %v4096_v21 = vsub.f32 %v12841_v54, %v12972_v17  ;;  %v4099_v52 = vsub.f32 %v12847_v22, %v12972_v17  ;;  %v4102_v8 = vsub.f32 %v12864_v55, %v12972_v17 }
 0x9d1   : > { %v4142_v31 = vsub.f32 %v3921_v53, %v12975_v46  ;;  %v4097_v41 = vsub.f32 %v12844_v28, %v12975_v46  ;;  %v4100_v25 = vsub.f32 %v12852_v35, %v12975_v46  ;;  %v4103_v48 = vsub.f32 %v12869_v16, %v12975_v46 }
 0x9d2   : > { %v4234_v13 = vmul.f32 1.442695, %v4141_v61  ;;  %v4106_v33 = vsub.f32 %v12881_v63, %v12975_v46  ;;  %v4105_v22 = vsub.f32 %v12876_v29, %v12972_v17  ;;  %v4144_v44 = vmul.f32 1.442695, %v4096_v21 }
 0x9d3   : > { %v4236_v38 = vmul.f32 1.442695, %v4142_v31  ;;  %v4146_v15 = vmul.f32 1.442695, %v4097_v41  ;;  %v4152_v54 = vmul.f32 1.442695, %v4100_v25  ;;  %v4109_v35 = vsub.f32 %v12895_v40, %v12975_v46 }
 0x9d4   : > { %10770 = vpow2.f32 %v4234_v13  ;;  %v4150_v55 = vmul.f32 1.442695, %v4099_v52  ;;  %v4158_v28 = vmul.f32 1.442695, %v4103_v48  ;;  %v4164_v53 = vmul.f32 1.442695, %v4106_v33 }
 0x9d5   : > { %10772 = vpow2.f32 %v4236_v38  ;;  %v4112_v16 = vsub.f32 %v12901_v7, %v12975_v46  ;;  %v4108_v63 = vsub.f32 %v12892_v3, %v12972_v17  ;;  %v4111_v24 = vsub.f32 %v12898_v57, %v12972_v17 }
 0x9d6   : > { %10774 = vpow2.f32 %v4146_v15  ;;  %v4115_v29 = vsub.f32 %v12909_v0, %v12975_v46  ;;  %v4156_v47 = vmul.f32 1.442695, %v4102_v8  ;;  %v4162_v10 = vmul.f32 1.442695, %v4105_v22 }
 0x9d7   : > { %10776 = vpow2.f32 %v4152_v54  ;;  %v4118_v6 = vsub.f32 %v12917_v19, %v12975_v46  ;;  %v4170_v40 = vmul.f32 1.442695, %v4109_v35  ;;  %v4176_v56 = vmul.f32 1.442695, %v4112_v16 }
 0x9d8   : > { %10778 = vpow2.f32 %v4144_v44  ;;  %v4168_v7 = vmul.f32 1.442695, %v4108_v63  ;;  %v4174_v43 = vmul.f32 1.442695, %v4111_v24  ;;  %v4114_v3 = vsub.f32 %v12906_v51, %v12972_v17 }
 0x9d9   : > { %10780 = vpow2.f32 %v4150_v55  ;;  %v4117_v57 = vsub.f32 %v12912_v62, %v12972_v17  ;;  %v4121_v0 = vsub.f32 %v12927_v30, %v12975_v46  ;;  %v4124_v42 = vsub.f32 %v12936_v39, %v12975_v46 }
 0x9da   : > { %10782 = vpow2.f32 %v4158_v28  ;;  %v4120_v19 = vsub.f32 %v12924_v2, %v12972_v17  ;;  %v4182_v61 = vmul.f32 1.442695, %v4115_v29  ;;  %v4188_v21 = vmul.f32 1.442695, %v4118_v6 }
 0x9db   : > { %10784 = vpow2.f32 %v4164_v53  ;;  %v4123_v52 = vsub.f32 %v12931_v20, %v12972_v17  ;;  %v4180_v51 = vmul.f32 1.442695, %v4114_v3  ;;  %v4186_v8 = vmul.f32 1.442695, %v4117_v57 }
 0x9dc   : > { %10786 = vpow2.f32 %v4156_v47  ;;  %v4194_v62 = vmul.f32 1.442695, %v4121_v0  ;;  %v4200_v31 = vmul.f32 1.442695, %v4124_v42  ;;  %v4127_v30 = vsub.f32 %v12942_v1, %v12975_v46 }
 0x9dd   : > { %10788 = vpow2.f32 %v4162_v10  ;;  %v4130_v39 = vsub.f32 %v12950_v12, %v12975_v46  ;;  %v4126_v2 = vsub.f32 %v12939_v4, %v12972_v17  ;;  %v4129_v20 = vsub.f32 %v12945_v27, %v12972_v17 }
 0x9de   : > { %v13023_v41 = vpop.eup %10770  ;;  %10790 = vpow2.f32 %v4170_v40  ;;  %v4133_v25 = vsub.f32 %v12956_v45, %v12975_v46  ;;  %v4192_v13 = vmul.f32 1.442695, %v4120_v19  ;;  %v4198_v1 = vmul.f32 1.442695, %v4123_v52 }
 0x9df   : > { %v13031_v48 = vpop.eup %10772  ;;  %10792 = vpow2.f32 %v4176_v56  ;;  %v4136_v12 = vsub.f32 %v12962_v58, %v12975_v46  ;;  %v4206_v38 = vmul.f32 1.442695, %v4127_v30  ;;  %v4212_v15 = vmul.f32 1.442695, %v4130_v39 }
 0x9e0   : > { %v10775_v33 = vpop.eup %10774  ;;  %10794 = vpow2.f32 %v4168_v7  ;;  %v13035_v54 = vmul.f32 1.442695, %v4126_v2  ;;  %v13038_v22 = vmul.f32 1.442695, %v4129_v20  ;;  %v4132_v45 = vsub.f32 %v12953_v37, %v12972_v17 }
 0x9e1   : > { %v10777_v4 = vpop.eup %10776  ;;  %v4321_v27 = vmul.f32 %v10775_v33, %v12751_v36  ;;  %10796 = vpow2.f32 %v4174_v43  ;;  %v4135_v58 = vsub.f32 %v12959_v32, %v12972_v17  ;;  %v4139_v28 = vsub.f32 %v12968_v60, %v12975_v46 }
 0x9e2   : > { %v10779_v44 = vpop.eup %10778  ;;  %v4324_v55 = vmul.f32 %v10777_v4, %v12755_v49  ;;  %10798 = vpow2.f32 %v4182_v61  ;;  %v4218_v16 = vmul.f32 1.442695, %v4133_v25  ;;  %v13048_v63 = vmul.f32 1.442695, %v4136_v12 }
 0x9e3   : > { %v10781_v53 = vpop.eup %10780  ;;  %v4320_v35 = vmul.f32 %v10779_v44, %v12751_v36  ;;  %10800 = vpow2.f32 %v4188_v21  ;;  %v4216_v32 = vmul.f32 1.442695, %v4132_v45  ;;  %v13052_v40 = vmul.f32 1.442695, %v4135_v58 }
 0x9e4   : > { %v10783_v24 = vpop.eup %10782  ;;  %v4392_v29 = vadd.f32 %v4324_v55, %v4321_v27  ;;  %v4441_v37 = vpack.c.bf16 %v4324_v55, %v4321_v27  ;;  %v4323_v47 = vmul.f32 %v10781_v53, %v12755_v49  ;;  %10802 = vpow2.f32 %v4180_v51 }
 0x9e5   : > { %v10785_v10 = vpop.eup %10784  ;;  %v4327_v6 = vmul.f32 %v10783_v24, %v12757_v50  ;;  %10804 = vpow2.f32 %v4186_v8  ;;  %v4138_v42 = vsub.f32 %v12965_v26, %v12972_v17  ;;  %v4230_v52 = vmul.f32 1.442695, %v4139_v28 }
 0x9e6   : > { %v10787_v60 = vpop.eup %10786  ;;  %4464 = vmatprep.subr.bf16.mxu0 %v4441_v37  ;;  %v4371_v56 = vadd.f32 %v4323_v47, %v4320_v35  ;;  %v4440_v7 = vpack.c.bf16 %v4323_v47, %v4320_v35  ;;  %v4330_v43 = vmul.f32 %v10785_v10, %v12763_v5  ;;  %10806 = vpow2.f32 %v4194_v62 }
 0x9e7   : > { %v10789_v3 = vpop.eup %10788  ;;  %v4393_v57 = vadd.f32 %v4392_v29, %v4327_v6  ;;  %v4326_v0 = vmul.f32 %v10787_v60, %v12757_v50  ;;  %10808 = vpow2.f32 %v4200_v31  ;;  %v4228_v26 = vmul.f32 1.442695, %v4138_v42 }
 0x9e8   : > { %v10791_v19 = vpop.eup %10790  ;;  %4465 = vmatpush1.bf16.msra.mxu0 %v4440_v7  ;;  %v4444_v61 = vpack.c.bf16 %v4330_v43, %v4327_v6  ;;  %v4329_v21 = vmul.f32 %v10789_v3, %v12763_v5  ;;  %10810 = vpow2.f32 %v4192_v13 }
 0x9e9   : > { %v10793_v51 = vpop.eup %10792  ;;  %v4394_v8 = vadd.f32 %v4393_v57, %v4330_v43  ;;  %v4372_v30 = vadd.f32 %v4371_v56, %v4326_v0  ;;  %v4333_v62 = vmul.f32 %v10791_v19, %v12769_v23  ;;  %10812 = vpow2.f32 %v4198_v1 }
 0x9ea   : > { %v10795_v39 = vpop.eup %10794  ;;  %4466 = vmatprep.subr.bf16.mxu0 %v4444_v61  ;;  %v4443_v2 = vpack.c.bf16 %v4329_v21, %v4326_v0  ;;  %v4336_v31 = vmul.f32 %v10793_v51, %v12775_v59  ;;  %10814 = vpow2.f32 %v4206_v38  ;;  %v4087_v1 = vsub.f32 %v12559_v18, %v12972_v17 }
 0x9eb   : > { %v10797_v20 = vpop.eup %10796  ;;  %v4373_v25 = vadd.f32 %v4372_v30, %v4329_v21  ;;  %v4395_v12 = vadd.f32 %v4394_v8, %v4333_v62  ;;  %v4332_v33 = vmul.f32 %v10795_v39, %v12769_v23  ;;  %10816 = vpow2.f32 %v4212_v15  ;;  %v15236_v21 = vld [vmem:[#allocation48_spill] sm:$0xff]  ;;  %v15237_v30 = vld [vmem:[#allocation70_spill] sm:$0xff] }
 0x9ec   : > { %v10799_v13 = vpop.eup %10798  ;;  %4467 = vmatpush1.bf16.msra.mxu0 %v4443_v2  ;;  %v4447_v4 = vpack.c.bf16 %v4336_v31, %v4333_v62  ;;  %v4335_v27 = vmul.f32 %v10797_v20, %v12775_v59  ;;  %10818 = vpow2.f32 %v13035_v54  ;;  %v4090_v53 = vmul.f32 1.442695, %v4087_v1 }
 0x9ed   : > { %v10801_v45 = vpop.eup %10800  ;;  %v4396_v44 = vadd.f32 %v4395_v12, %v4336_v31  ;;  %v4374_v38 = vadd.f32 %v4373_v25, %v4332_v33  ;;  %v4339_v55 = vmul.f32 %v10799_v13, %v12785_v11  ;;  %10820 = vpow2.f32 %v13038_v22 }
 0x9ee   : > { %v10803_v58 = vpop.eup %10802  ;;  %4468 = vmatprep.subr.bf16.mxu0 %v4447_v4  ;;  %v4446_v15 = vpack.c.bf16 %v4335_v27, %v4332_v33  ;;  %v4342_v28 = vmul.f32 %v10801_v45, %v12850_v14  ;;  %10822 = vpow2.f32 %v4218_v16  ;;  %v4088_v22 = vsub.f32 %v12562_v34, %v12975_v46 }
 0x9ef   : > { %v10805_v35 = vpop.eup %10804  ;;  %v4375_v24 = vadd.f32 %v4374_v38, %v4335_v27  ;;  %v4397_v54 = vadd.f32 %v4396_v44, %v4339_v55  ;;  %v4338_v29 = vmul.f32 %v10803_v58, %v12785_v11  ;;  %10824 = vpow2.f32 %v13048_v63  ;;  %v15235_v63 = vld [vmem:[#allocation69_spill] sm:$0xff]  ;;  %v15238_v27 = vld [vmem:[#allocation50_spill] sm:$0xff]  ;;  %v15239_v38 = vld [vmem:[#allocation72_spill] sm:$0xff] }
 0x9f0   : > { %v10807_v18 = vpop.eup %10806  ;;  %4469 = vmatpush1.bf16.msra.mxu0 %v4446_v15  ;;  %v4450_v17 = vpack.c.bf16 %v4342_v28, %v4339_v55  ;;  %v4341_v37 = vmul.f32 %v10805_v35, %v12850_v14  ;;  %10826 = vpow2.f32 %v4216_v32  ;;  %v4092_v43 = vmul.f32 1.442695, %v4088_v22  ;;  %v15240_v35 = vld [vmem:[#allocation75_spill] sm:$0xff] }
 0x9f1   : > { %v10809_v47 = vpop.eup %10808  ;;  %v4398_v10 = vadd.f32 %v4397_v54, %v4342_v28  ;;  %v4376_v16 = vadd.f32 %v4375_v24, %v4338_v29  ;;  %v4345_v6 = vmul.f32 %v10807_v18, %v12788_v9  ;;  %10828 = vpow2.f32 %v13052_v40 }
 0x9f2   : > { %v10811_v60 = vpop.eup %10810  ;;  %4470 = vmatprep.subr.bf16.mxu0 %v4450_v17  ;;  %v4449_v56 = vpack.c.bf16 %v4341_v37, %v4338_v29  ;;  %v4348_v7 = vmul.f32 %v10809_v47, %v15235_v63  ;;  %10830 = vpow2.f32 %v4230_v52  ;;  %v4366_v24 = vmul.f32 %v13031_v48, %v15240_v35 }
 0x9f3   : > { %v10813_v3 = vpop.eup %10812  ;;  %v4377_v57 = vadd.f32 %v4376_v16, %v4341_v37  ;;  %v4399_v32 = vadd.f32 %v4398_v10, %v4345_v6  ;;  %v4344_v0 = vmul.f32 %v10811_v60, %v12788_v9  ;;  %10832 = vpow2.f32 %v4228_v26  ;;  %v15241_v10 = vld [vmem:[#allocation74_spill] sm:$0xff] }
 0x9f4   : > { %v10815_v34 = vpop.eup %10814  ;;  %4471 = vmatpush1.bf16.msra.mxu0 %v4449_v56  ;;  %v4453_v46 = vpack.c.bf16 %v4348_v7, %v4345_v6  ;;  %v4347_v42 = vmul.f32 %v10813_v3, %v15235_v63  ;;  %10834 = vpow2.f32 %v4090_v53  ;;  %v4365_v17 = vmul.f32 %v13023_v41, %v15240_v35 }
 0x9f5   : > { %v10817_v40 = vpop.eup %10816  ;;  %v4400_v19 = vadd.f32 %v4399_v32, %v4348_v7  ;;  %v4378_v61 = vadd.f32 %v4377_v57, %v4344_v0  ;;  %v4351_v51 = vmul.f32 %v10815_v34, %v15236_v21  ;;  %10836 = vpow2.f32 %v4092_v43  ;;  %v15242_v57 = vld [vmem:[#allocation40_spill] sm:$0xff]  ;;  %v15243_v34 = vld [vmem:[#allocation46_spill] sm:$0xff] }
 0x9f6   : > { %v10819_v52 = vpop.eup %10818  ;;  %4472 = vmatprep.subr.bf16.mxu0 %v4453_v46  ;;  %v4452_v8 = vpack.c.bf16 %v4347_v42, %v4344_v0  ;;  %v4354_v62 = vmul.f32 %v10817_v40, %v15237_v30  ;;  %v15244_v46 = vld [vmem:[#allocation22_spill] sm:$0xff]  ;;  %v15245_v40 = vld [vmem:[#allocation71_spill] sm:$0xff] }
 0x9f7   : > { %v10821_v39 = vpop.eup %10820  ;;  %v4379_v2 = vadd.f32 %v4378_v61, %v4347_v42  ;;  %v4401_v31 = vadd.f32 %v4400_v19, %v4351_v51  ;;  %v4350_v26 = vmul.f32 %v10819_v52, %v15236_v21 }
 0x9f8   : > { %v10823_v20 = vpop.eup %10822  ;;  %4473 = vmatpush1.bf16.msra.mxu0 %v4452_v8  ;;  %v4456_v25 = vpack.c.bf16 %v4354_v62, %v4351_v51  ;;  %v4353_v12 = vmul.f32 %v10821_v39, %v15237_v30 }
 0x9f9   : > { %v10825_v33 = vpop.eup %10824  ;;  %v4402_v13 = vadd.f32 %v4401_v31, %v4354_v62  ;;  %v4380_v4 = vadd.f32 %v4379_v2, %v4350_v26  ;;  %v4357_v1 = vmul.f32 %v10823_v20, %v15238_v27  ;;  %v15247_v20 = vmov 0  }
 0x9fa   : > { %v10827_v45 = vpop.eup %10826  ;;  %4474 = vmatprep.subr.bf16.mxu0 %v4456_v25  ;;  %v4455_v44 = vpack.c.bf16 %v4353_v12, %v4350_v26  ;;  %v4360_v55 = vmul.f32 %v10825_v33, %v15239_v38  ;;  %v15246_v26 = vld [vmem:[#allocation54_spill] sm:$0xff] }
 0x9fb   : > { %v10829_v58 = vpop.eup %10828  ;;  %v4381_v15 = vadd.f32 %v4380_v4, %v4353_v12  ;;  %v4403_v28 = vadd.f32 %v4402_v13, %v4357_v1  ;;  %v4356_v53 = vmul.f32 %v10827_v45, %v15238_v27 }
 0x9fc   : > { %v10831_v54 = vpop.eup %10830  ;;  %4475 = vmatpush1.bf16.msra.mxu0 %v4455_v44  ;;  %v4459_v29 = vpack.c.bf16 %v4360_v55, %v4357_v1  ;;  %v4359_v18 = vmul.f32 %v10829_v58, %v15239_v38  ;;  %v15248_v58 = vld [vmem:[#allocation25_spill] sm:$0xff] }
 0x9fd   : > { %v10833_v37 = vpop.eup %10832  ;;  %v4404_v22 = vadd.f32 %v4403_v28, %v4360_v55  ;;  %v4382_v47 = vadd.f32 %v4381_v15, %v4356_v53  ;;  %v4363_v16 = vmul.f32 %v10831_v54, %v15241_v10  ;;  %10838 = vrcp.f32 %v15248_v58  ;;  %v15249_v28 = vld [vmem:[#allocation76_spill] sm:$0xff] }
 0x9fe   : > { %v10835_v6 = vpop.eup %10834  ;;  %4476 = vmatprep.subr.bf16.mxu0 %v4459_v29  ;;  %v4458_v60 = vpack.c.bf16 %v4359_v18, %v4356_v53  ;;  %v4362_v56 = vmul.f32 %v10833_v37, %v15241_v10 }
 0x9ff   : > { %v10837_v7 = vpop.eup %10836  ;;  %v4383_v48 = vadd.f32 %v4382_v47, %v4359_v18  ;;  %v4405_v43 = vadd.f32 %v4404_v22, %v4363_v16  ;;  %v4462_v3 = vpack.c.bf16 %v4366_v24, %v4363_v16  ;;  %v4368_v32 = vmul.f32 %v10835_v6, %v15242_v57 }
 0xa00   : > { %4477 = vmatpush1.bf16.msra.mxu0 %v4458_v60  ;;  %v4461_v0 = vpack.c.bf16 %v4365_v17, %v4362_v56  ;;  %v4437_v41 = vmul.f32 %v10835_v6, %v15243_v34  ;;  %v4369_v42 = vmul.f32 %v10837_v7, %v15244_v46  ;;  %v4438_v19 = vmul.f32 %v10837_v7, %v15245_v40  ;;  %v4554_v34 = vld [vmem:[%s11273_s24] sm:$0xf] }
 0xa01   : > { %v4406_v61 = vadd.f32 %v4405_v43, %v4366_v24  ;;  %4478 = vmatprep.subr.bf16.mxu0 %v4462_v3  ;;  %v4384_v51 = vadd.f32 %v4383_v48, %v4362_v56  ;;  %v15250_v46 = vmov 0.0  }
 0xa03   : > { %v4407_v52 = vrot.slane %v4406_v61, 4  ;;  %v4385_v8 = vadd.f32 %v4384_v51, %v4365_v17 }
 0xa04   : > { %4479 = vmatpush1.bf16.msra.mxu0 %v4461_v0 }
 0xa05   : > { %v4408_v62 = vadd.f32 %v4407_v52, %v4406_v61  ;;  %v4386_v39 = vrot.slane %v4385_v8, 4 }
 0xa07   : > { %v4409_v2 = vrot.slane %v4408_v62, 2  ;;  %v4387_v31 = vadd.f32 %v4386_v39, %v4385_v8  ;;  %4497 = vmatmul.mubr.bf16.vlgmr.msra.gmra.mrb[88].mxu0 %v15246_v26  ;;  %v10839_v54 = vpop.eup %10838  ;;  %v15251_v8 = vld [vmem:[#allocation19_spill] sm:$0xff]  ;;  %v15253_v26 = vld [vmem:[#allocation17_spill] sm:$0xff] }
 0xa08   : > { %4608 = vmatprep.mubr.bf16.mxu0 %v15247_v20 }
 0xa09   : > { %v4410_v25 = vadd.f32 %v4409_v2, %v4408_v62  ;;  %v4388_v12 = vrot.slane %v4387_v31, 2  ;;  %v15252_v2 = vld [vmem:[#allocation20_spill] sm:$0xff] }
 0xa0b   : > { %v4411_v33 = vrot.slane %v4410_v25, 1  ;;  %v4389_v13 = vadd.f32 %v4388_v12, %v4387_v31  ;;  %v15254_v12 = vld [vmem:[#allocation18_spill] sm:$0xff] }
 0xa0d   : > { %v4412_v4 = vadd.f32 %v4411_v33, %v4410_v25  ;;  %v4390_v1 = vrot.slane %v4389_v13, 1 }
 0xa0f   : > { %v4391_v45 = vadd.f32 %v4390_v1, %v4389_v13  ;;  %v4435_v44 = vadd.f32 %v4412_v4, %v4369_v42  ;;  %v4562_v42 = vpop.permute.xlu1 %4561 }
 0xa11   : > { %v4434_v55 = vadd.f32 %v4391_v45, %v4368_v32 }
 0xa13   : > { %10840 = vrcp.f32 %v4434_v55  ;;  %v15255_v55 = vld [vmem:[#allocation21_spill] sm:$0xff] }
 0xa14   : > { %10842 = vrcp.f32 %v4435_v44 }
 0xa1d   : > { %v10841_v16 = vpop.eup %10840 }
 0xa1e   : > { %v10843_v56 = vpop.eup %10842 }
 0xa78   : > { %v4539_v15 = vpop.f32.mrb[108].mxu1 }
 0xa79   : > { %v4547_v53 = vadd.f32 %v4539_v15, %v15249_v28  ;;  %v9749_v24 = vpop.f32.mrb[109].mxu1  ;;  %v15256_v28 = vld [vmem:[#allocation16_spill] sm:$0xff] }
 0xa7a   : > { %v4542_v29 = vpop.f32.mrb[110].mxu1 }
 0xa7b   : > { %v4553_v18 = vmul.f32 %v10839_v54, %v4547_v53  ;;  %v9750_v17 = vpop.f32.mrb[111].mxu1  ;;  %v4915_v29 = vld [vmem:[%s11288_s12] sm:$0xff] }
 0xa7c   : > { %v4725_v17 = vpop.permute.xlu0 %4724 }
 0xa7d   : > { %v4557_v0 = vpack.c.bf16 %v4553_v18, %v4553_v18  ;;  %v4750_v18 = vpop.permute.xlu1 %4749 }
 0xada   : > { %v4498_v37 = vpop.f32.mrb[88].mxu0 }
 0xadb   : > { %v4545_v22 = vadd.f32 %v4498_v37, %v4437_v41  ;;  %v4500_v47 = vpop.f32.mrb[89].mxu0  ;;  %v4574_v41 = vsel %vm1228_vm9, %v4557_v0, 0 }
 0xadc   : > { %v4546_v6 = vadd.f32 %v4500_v47, %v4438_v19  ;;  %v4502_v60 = vpop.f32.mrb[90].mxu0 }
 0xadd   : > { %v4551_v7 = vmul.f32 %v10841_v16, %v4545_v22  ;;  %v4503_v48 = vpop.f32.mrb[91].mxu0 }
 0xade   : > { %v4552_v43 = vmul.f32 %v10843_v56, %v4546_v6 }
 0xadf   : > { %v4555_v3 = vpack.c.bf16 %v4551_v7, %v4551_v7 }
 0xae0   : > { %v4556_v57 = vpack.c.bf16 %v4552_v43, %v4552_v43 }
 0xae1   : > { %v4568_v32 = vsel %vm1228_vm9, %v4555_v3, 0 }
 0xae2   : > { %9333 = vmatprep.subr.msk.bf16.mxu0 %vm1228_vm9, %v4556_v57 }
 0xae3   : > { %4577 = vmatpush1.bf16.msra.mxu0 %v4568_v32 }
 0xae4   : > { %9751 = vmatprep.subr.bf16.mxu0 %v15250_v46 }
 0xae6   : > { %9334 = vmatmul.mubr.msk.bf16.vlgmr.msra.gmra.mrb[92].mxu0 %vm2087_vm11, %v4554_v34 }
 0xae7   : > { %9752 = vmatpush3.bf16.msra.mxu0 %v4574_v41  ;;  %9753 = vmatprep.mubr.msk.bf16.mxu0 %vm11209_vm0, %v15250_v46 }
 0xaee   : > { %9754 = vmatmul.mubr.msk.bf16.vlgmr.msra.gmra.mrb[96].mxu0 %vm2087_vm11, %v4554_v34 }
 0xaef   : > { %4965 = vmatprep.mubr.bf16.mxu0 %v15247_v20 }
 0xbb9   : > { %v4610_v40 = vpop.f32.mrb[92].mxu0 }
 0xbba   : > { %v4611_v19 = vadd.f32 %v4610_v40, %v4562_v42  ;;  %v4612_v61 = vpop.f32.mrb[93].mxu0 }
 0xbbb   : > { %v4613_v51 = vadd.f32 %v4612_v61, %v4562_v42  ;;  %v4614_v52 = vpop.f32.mrb[94].mxu0 }
 0xbbc   : > { %v4657_v62 = vadd.f32 %v4611_v19, %v15251_v8  ;;  %v4615_v39 = vpop.f32.mrb[95].mxu0 }
 0xbbd   : > { %v4658_v31 = vadd.f32 %v4613_v51, %v15252_v2 }
 0xbbe   : > { %v13114_v25 = vmul.f32 %v4657_v62, %v15253_v26 }
 0xbbf   : > { %v13117_v33 = vmul.f32 %v4658_v31, %v15254_v12 }
 0xbc0   : > { %4805 = vrot.lane.b32.xlu0 %v13114_v25, %s15087_s28  ;;  %4780 = vrot.lane.b32.xlu1 %v13114_v25, %s11204_s23 }
 0xbc1   : > { %v4651_v13 = vpop.f32.mrb[96].mxu0  ;;  %v10168_v4 = vpack.i.bf16 %v13117_v33, %v13114_v25 }
 0xbc2   : > { %v4652_v1 = vadd.f32 %v4651_v13, %v4562_v42  ;;  %v9755_v45 = vpop.f32.mrb[97].mxu0 }
 0xbc3   : > { %v4654_v44 = vpop.f32.mrb[98].mxu0 }
 0xbc4   : > { %v4659_v58 = vadd.f32 %v4652_v1, %v15255_v55  ;;  %v9756_v15 = vpop.f32.mrb[99].mxu0  ;;  %10169 = vrot.lane.b32.xlu0 %v10168_v4, %s11200_s15  ;;  %10174 = vrot.lane.b32.xlu1 %v10168_v4, %s11201_s16 }
 0xbc6   : > { %v13129_v53 = vmul.f32 %v4659_v58, %v15256_v28 }
 0xbc8   : > { %10179 = vrot.lane.b32.xlu0 %v10168_v4, %s11203_s22  ;;  %10184 = vrot.lane.b32.xlu1 %v10168_v4, %s15089_s18  ;;  %v10188_v24 = vpack.i.bf16 %v13129_v53, %v15250_v46  ;;  %v10203_v54 = vpack.i.bf16 %v13129_v53, %v13117_v33 }
 0xbcc   : > { %10189 = vrot.lane.b32.xlu0 %v10188_v24, %s11200_s15  ;;  %10194 = vrot.lane.b32.xlu1 %v10188_v24, %s11201_s16 }
 0xbd0   : > { %10199 = vrot.lane.b32.xlu0 %v10168_v4, %s15031_s1  ;;  %4830 = vrot.lane.b32.xlu1 %v13114_v25, %s15091_s26 }
 0xbd4   : > { %10204 = vrot.lane.b32.xlu0 %v10203_v54, %s11204_s23  ;;  %10214 = vrot.lane.b32.xlu1 %v10203_v54, %s15091_s26 }
 0xbd8   : > { %10209 = vrot.lane.b32.xlu0 %v10203_v54, %s15087_s28  ;;  %4755 = vrot.lane.b32.xlu1 %v13129_v53, %s15089_s18 }
 0xbdc   : > { %4730 = vrot.lane.b32.xlu0 %v13129_v53, %s11203_s22  ;;  %4859 = vrot.lane.b32.xlu1 %v13129_v53, %s15031_s1 }
 0xbe0   : > { %4786 = vrot.lane.b32.xlu0 %v15250_v46, %s11204_s23  ;;  %4811 = vrot.lane.b32.xlu1 %v15250_v46, %s15087_s28 }
 0xbe4   : > { %4836 = vrot.lane.b32.xlu0 %v15250_v46, %s15091_s26  ;;  %4861 = vrot.lane.b32.xlu1 %v15250_v46, %s15031_s1 }
 0xbe8   : > { %4918 = vperm.xlu0 %10076, %v4915_v29   ;;  %5081 = vrot.lane.b32.xlu1 %v15250_v46, %s11203_s22 }
 0xbec   : > { %5106 = vrot.lane.b32.xlu0 %v15250_v46, %s15089_s18 }
 0xc32   : > { %v13164_v37 = vpop.permute.xlu0 %4805  ;;  %v4781_v22 = vpop.permute.xlu1 %4780 }
 0xc36   : > { %v10170_v47 = vpop.permute.xlu0 %10169  ;;  %v10175_v16 = vpop.permute.xlu1 %10174 }
 0xc37   : > { %v10172_v6 = vunpack.i.h.bf16 %v10170_v47  ;;  %v10171_v60 = vunpack.i.l.bf16 %v10170_v47  ;;  %v10177_v56 = vunpack.i.h.bf16 %v10175_v16  ;;  %v10176_v7 = vunpack.i.l.bf16 %v10175_v16 }
 0xc39   : > { %v4683_v48 = vsel %vm977_vm1, %v10171_v60, %v10172_v6  ;;  %v4708_v43 = vsel %vm1003_vm2, %v10176_v7, %v10177_v56 }
 0xc3a   : > { %v13168_v3 = vpop.permute.xlu0 %10179  ;;  %v10185_v57 = vpop.permute.xlu1 %10184  ;;  %v4901_v32 = vpack.c.bf16 %v4708_v43, %v4683_v48 }
 0xc3b   : > { %v10182_v0 = vunpack.i.h.bf16 %v13168_v3  ;;  %v10181_v34 = vunpack.i.l.bf16 %v13168_v3  ;;  %v10187_v41 = vunpack.i.h.bf16 %v10185_v57  ;;  %v10186_v42 = vunpack.i.l.bf16 %v10185_v57 }
 0xc3c   : > { %4933 = vmatprep.subr.bf16.mxu0 %v4901_v32 }
 0xc3d   : > { %v4733_v62 = vsel %vm1029_vm4, %v10181_v34, %v10182_v0  ;;  %v4758_v39 = vsel %vm1055_vm3, %v10186_v42, %v10187_v41  ;;  %v4732_v58 = vsel %vm1029_vm4, %v4725_v17, %v10181_v34  ;;  %v4757_v15 = vsel %vm1055_vm3, %v4750_v18, %v10186_v42 }
 0xc3e   : > { %v10190_v40 = vpop.permute.xlu0 %10189  ;;  %v10195_v19 = vpop.permute.xlu1 %10194  ;;  %v4904_v24 = vpack.c.bf16 %v4758_v39, %v4733_v62  ;;  %v4903_v47 = vpack.c.bf16 %v4757_v15, %v4732_v58  ;;  %v4872_v58 = vld [vmem:[%s15257_s2] sm:$0xf]  ;;  %s15258_s2 = sld [smem:[#allocation6_spill]] }
 0xc3f   : > { %v10192_v61 = vunpack.i.h.bf16 %v10190_v40  ;;  %v10191_v51 = vunpack.i.l.bf16 %v10190_v40  ;;  %v10197_v52 = vunpack.i.h.bf16 %v10195_v19  ;;  %v10196_v8 = vunpack.i.l.bf16 %v10195_v19 }
 0xc41   : > { %v4682_v2 = vsel %vm977_vm1, %v10191_v51, %v10171_v60  ;;  %v4684_v31 = vsel %vm977_vm1, %v10172_v6, %v10192_v61  ;;  %v4707_v13 = vsel %vm1003_vm2, %v10196_v8, %v10176_v7  ;;  %v4709_v4 = vsel %vm1003_vm2, %v10177_v56, %v10197_v52 }
 0xc42   : > { %v10200_v1 = vpop.permute.xlu0 %10199  ;;  %v4831_v45 = vpop.permute.xlu1 %4830  ;;  %v4900_v44 = vpack.c.bf16 %v4707_v13, %v4682_v2  ;;  %v4902_v55 = vpack.c.bf16 %v4709_v4, %v4684_v31 }
 0xc43   : > { %v10202_v60 = vunpack.i.h.bf16 %v10200_v1  ;;  %v10201_v56 = vunpack.i.l.bf16 %v10200_v1 }
 0xc44   : > { %4934 = vmatpush1.bf16.msra.mxu0 %v4900_v44  ;;  %9758 = vmatpush3.bf16.msra.mxu1 %v4902_v55 }
 0xc45   : > { %4935 = vmatprep.subr.bf16.mxu0 %v4904_v24  ;;  %9759 = vmatprep.subr.bf16.mxu1 %v15250_v46  ;;  %v4863_v40 = vsel %vm1165_vm8, %v10201_v56, %v10202_v60 }
 0xc46   : > { %v10205_v54 = vpop.permute.xlu0 %10204  ;;  %v10215_v29 = vpop.permute.xlu1 %10214 }
 0xc47   : > { %v10207_v16 = vunpack.i.h.bf16 %v10205_v54  ;;  %v10206_v6 = vunpack.i.l.bf16 %v10205_v54  ;;  %v10217_v48 = vunpack.i.h.bf16 %v10215_v29  ;;  %v10216_v17 = vunpack.i.l.bf16 %v10215_v29 }
 0xc48   : > { %4936 = vmatpush1.bf16.msra.mxu0 %v4903_v47 }
 0xc49   : > { %v4788_v7 = vsel %vm1087_vm5, %v4781_v22, %v10206_v6  ;;  %v4789_v18 = vsel %vm1087_vm5, %v10206_v6, %v10207_v16  ;;  %v4838_v19 = vsel %vm1139_vm6, %v4831_v45, %v10216_v17  ;;  %v4839_v51 = vsel %vm1139_vm6, %v10216_v17, %v10217_v48 }
 0xc4a   : > { %v10210_v43 = vpop.permute.xlu0 %10209  ;;  %v4756_v3 = vpop.permute.xlu1 %4755  ;;  %v4907_v57 = vpack.c.bf16 %v4789_v18, %v13117_v33  ;;  %v4906_v32 = vpack.c.bf16 %v4788_v7, %v13114_v25 }
 0xc4b   : > { %v10212_v34 = vunpack.i.h.bf16 %v10210_v43  ;;  %v10211_v42 = vunpack.i.l.bf16 %v10210_v43  ;;  %v4759_v2 = vsel %vm1055_vm3, %v10187_v41, %v4756_v3 }
 0xc4c   : > { %4937 = vmatprep.subr.bf16.mxu0 %v4907_v57 }
 0xc4d   : > { %v4813_v22 = vsel %vm1113_vm7, %v13164_v37, %v10211_v42  ;;  %4938 = vmatpush1.bf16.msra.mxu0 %v4906_v32  ;;  %v4814_v61 = vsel %vm1113_vm7, %v10211_v42, %v10212_v34  ;;  %v4912_v37 = vpack.c.bf16 %v4863_v40, %v4863_v40 }
 0xc4e   : > { %v4731_v52 = vpop.permute.xlu0 %4730  ;;  %v4860_v8 = vpop.permute.xlu1 %4859  ;;  %v4910_v62 = vpack.c.bf16 %v4839_v51, %v4814_v61  ;;  %v4909_v39 = vpack.c.bf16 %v4838_v19, %v4813_v22 }
 0xc4f   : > { %v4734_v31 = vsel %vm1029_vm4, %v10182_v0, %v4731_v52  ;;  %v4864_v13 = vsel %vm1165_vm8, %v10202_v60, %v4860_v8  ;;  %v4925_v0 = vsel %vm1228_vm9, %v4912_v37, 0 }
 0xc50   : > { %v4905_v4 = vpack.c.bf16 %v4759_v2, %v4734_v31  ;;  %v4913_v1 = vpack.c.bf16 %v4864_v13, %v4864_v13  ;;  %4939 = vmatprep.subr.bf16.mxu0 %v4910_v62  ;;  %v5272_v31 = vld [vmem:[%s15258_s2] sm:$0xff]  ;;  %s15259_s2 = sld [smem:[#allocation5_spill]] }
 0xc51   : > { %4940 = vmatpush1.bf16.msra.mxu0 %v4909_v39 }
 0xc52   : > { %v4787_v45 = vpop.permute.xlu0 %4786  ;;  %v4812_v44 = vpop.permute.xlu1 %4811  ;;  %9336 = vmatprep.subr.msk.bf16.mxu0 %vm1228_vm9, %v4913_v1  ;;  %9760 = vmatpush3.bf16.msra.mxu1 %v4905_v4 }
 0xc53   : > { %v4790_v55 = vsel %vm1087_vm5, %v10207_v16, %v4787_v45  ;;  %9761 = vmatprep.subr.bf16.mxu1 %v15250_v46  ;;  %v4815_v54 = vsel %vm1113_vm7, %v10212_v34, %v4812_v44 }
 0xc54   : > { %v4908_v41 = vpack.c.bf16 %v4790_v55, %v13129_v53 }
 0xc55   : > { %4942 = vmatpush1.bf16.msra.mxu0 %v4925_v0 }
 0xc56   : > { %v4837_v15 = vpop.permute.xlu0 %4836  ;;  %v4862_v24 = vpop.permute.xlu1 %4861  ;;  %9762 = vmatpush3.bf16.msra.mxu1 %v4908_v41 }
 0xc57   : > { %v4840_v29 = vsel %vm1139_vm6, %v10217_v48, %v4837_v15  ;;  %v4865_v47 = vsel %vm1165_vm8, %v4860_v8, %v4862_v24  ;;  %9763 = vmatprep.subr.bf16.mxu1 %v15250_v46 }
 0xc58   : > { %v4911_v16 = vpack.c.bf16 %v4840_v29, %v4815_v54  ;;  %9337 = vmatmul.mubr.msk.bf16.vlgmr.msra.gmra.mrb[100].mxu0 %vm1224_vm10, %v4872_v58  ;;  %v4914_v6 = vpack.c.bf16 %v4865_v47, %v4865_v47 }
 0xc59   : > { %5322 = vmatprep.mubr.bf16.mxu0 %v15247_v20 }
 0xc5a   : > { %9764 = vmatpush3.bf16.msra.mxu1 %v4911_v16  ;;  %v4931_v60 = vsel %vm1228_vm9, %v4914_v6, 0  ;;  %v5082_v4 = vpop.permute.xlu1 %5081 }
 0xc5b   : > { %9765 = vmatprep.subr.bf16.mxu1 %v15250_v46 }
 0xc5e   : > { %9766 = vmatpush3.bf16.msra.mxu1 %v4931_v60 }
 0xc5f   : > { %9771 = vmatprep.subr.bf16.mxu1 %v15250_v46 }
 0xc61   : > { %9768 = vmatmul.mubr.msk.bf16.vlgmr.msra.gmra.mrb[112].mxu1 %vm1224_vm10, %v4872_v58 }
 0xc62   : > { %9781 = vmatprep.mubr.msk.bf16.mxu1 %vm11209_vm0, %v15250_v46 }
 0xc67   : > { %v4919_v56 = vpop.permute.xlu0 %4918 }
 0xc6b   : > { %v5107_v13 = vpop.permute.xlu0 %5106 }
 0xd2b   : > { %v4967_v7 = vpop.f32.mrb[100].mxu0 }
 0xd2c   : > { %v4968_v48 = vadd.f32 %v4967_v7, %v4919_v56  ;;  %v4969_v17 = vpop.f32.mrb[101].mxu0 }
 0xd2d   : > { %v4970_v18 = vadd.f32 %v4969_v17, %v4919_v56  ;;  %v4971_v43 = vpop.f32.mrb[102].mxu0 }
 0xd2e   : > { %v5014_v3 = vmax.f32 %v4968_v48, 0.0  ;;  %v4972_v57 = vpop.f32.mrb[103].mxu0 }
 0xd2f   : > { %v5015_v32 = vmax.f32 %v4970_v18, 0.0 }
 0xd30   : > { %v13213_v34 = vmul.f32 %v5014_v3, %v15253_v26 }
 0xd31   : > { %v13216_v42 = vmul.f32 %v5015_v32, %v15254_v12 }
 0xd32   : > { %5162 = vrot.lane.b32.xlu1 %v13213_v34, %s15087_s28  ;;  %5137 = vrot.lane.b32.xlu0 %v13213_v34, %s11204_s23 }
 0xd33   : > { %v10218_v40 = vpack.i.bf16 %v13216_v42, %v13213_v34 }
 0xd34   : > { %v5008_v19 = vpop.f32.mrb[112].mxu1 }
 0xd35   : > { %v5009_v22 = vadd.f32 %v5008_v19, %v4919_v56  ;;  %v9769_v61 = vpop.f32.mrb[113].mxu1 }
 0xd36   : > { %v5011_v51 = vpop.f32.mrb[114].mxu1  ;;  %10219 = vrot.lane.b32.xlu1 %v10218_v40, %s11200_s15  ;;  %10224 = vrot.lane.b32.xlu0 %v10218_v40, %s11201_s16 }
 0xd37   : > { %v5016_v52 = vmax.f32 %v5009_v22, 0.0  ;;  %v9770_v8 = vpop.f32.mrb[115].mxu1 }
 0xd39   : > { %v13227_v62 = vmul.f32 %v5016_v52, %v15256_v28 }
 0xd3a   : > { %10229 = vrot.lane.b32.xlu1 %v10218_v40, %s11203_s22  ;;  %10234 = vrot.lane.b32.xlu0 %v10218_v40, %s15089_s18 }
 0xd3b   : > { %v10238_v39 = vpack.i.bf16 %v13227_v62, %v15250_v46  ;;  %v10253_v2 = vpack.i.bf16 %v13227_v62, %v13216_v42 }
 0xd3e   : > { %10239 = vrot.lane.b32.xlu1 %v10238_v39, %s11200_s15  ;;  %10244 = vrot.lane.b32.xlu0 %v10238_v39, %s11201_s16 }
 0xd42   : > { %10249 = vrot.lane.b32.xlu1 %v10218_v40, %s15031_s1  ;;  %5187 = vrot.lane.b32.xlu0 %v13213_v34, %s15091_s26 }
 0xd46   : > { %10254 = vrot.lane.b32.xlu1 %v10253_v2, %s11204_s23  ;;  %10264 = vrot.lane.b32.xlu0 %v10253_v2, %s15091_s26 }
 0xd4a   : > { %10259 = vrot.lane.b32.xlu1 %v10253_v2, %s15087_s28  ;;  %5112 = vrot.lane.b32.xlu0 %v13227_v62, %s15089_s18 }
 0xd4e   : > { %5087 = vrot.lane.b32.xlu1 %v13227_v62, %s11203_s22  ;;  %5216 = vrot.lane.b32.xlu0 %v13227_v62, %s15031_s1 }
 0xd52   : > { %5143 = vrot.lane.b32.xlu1 %v15250_v46, %s11204_s23  ;;  %5168 = vrot.lane.b32.xlu0 %v15250_v46, %s15087_s28 }
 0xd56   : > { %5193 = vrot.lane.b32.xlu1 %v15250_v46, %s15091_s26  ;;  %5218 = vrot.lane.b32.xlu0 %v15250_v46, %s15031_s1 }
 0xd5a   : > { %5275 = vperm.xlu1 %10167, %v5272_v31   ;;  %5388 = vrot.lane.b32.xlu0 %v15250_v46, %s11200_s15 }
 0xd5e   : > { %5413 = vrot.lane.b32.xlu1 %v15250_v46, %s11201_s16  ;;  %5438 = vrot.lane.b32.xlu0 %v15250_v46, %s11203_s22 }
 0xd62   : > { %5463 = vrot.lane.b32.xlu1 %v15250_v46, %s15089_s18 }
 0xda4   : > { %v13266_v1 = vpop.permute.xlu1 %5162  ;;  %v5138_v37 = vpop.permute.xlu0 %5137 }
 0xda8   : > { %v10220_v45 = vpop.permute.xlu1 %10219  ;;  %v10225_v44 = vpop.permute.xlu0 %10224 }
 0xda9   : > { %v10222_v55 = vunpack.i.h.bf16 %v10220_v45  ;;  %v10221_v41 = vunpack.i.l.bf16 %v10220_v45  ;;  %v10227_v0 = vunpack.i.h.bf16 %v10225_v44  ;;  %v10226_v58 = vunpack.i.l.bf16 %v10225_v44 }
 0xdab   : > { %v5040_v15 = vsel %vm977_vm1, %v10221_v41, %v10222_v55  ;;  %v5065_v24 = vsel %vm1003_vm2, %v10226_v58, %v10227_v0 }
 0xdac   : > { %v13270_v54 = vpop.permute.xlu1 %10229  ;;  %v10235_v29 = vpop.permute.xlu0 %10234  ;;  %v5258_v47 = vpack.c.bf16 %v5065_v24, %v5040_v15 }
 0xdad   : > { %v10232_v16 = vunpack.i.h.bf16 %v13270_v54  ;;  %v10231_v6 = vunpack.i.l.bf16 %v13270_v54  ;;  %v10237_v60 = vunpack.i.h.bf16 %v10235_v29  ;;  %v10236_v56 = vunpack.i.l.bf16 %v10235_v29 }
 0xdae   : > { %5290 = vmatprep.subr.bf16.mxu0 %v5258_v47 }
 0xdaf   : > { %v5090_v57 = vsel %vm1029_vm4, %v10231_v6, %v10232_v16  ;;  %v5115_v32 = vsel %vm1055_vm3, %v10236_v56, %v10237_v60  ;;  %v5089_v2 = vsel %vm1029_vm4, %v5082_v4, %v10231_v6  ;;  %v5114_v31 = vsel %vm1055_vm3, %v5107_v13, %v10236_v56 }
 0xdb0   : > { %v10240_v7 = vpop.permute.xlu1 %10239  ;;  %v10245_v48 = vpop.permute.xlu0 %10244  ;;  %v5261_v45 = vpack.c.bf16 %v5115_v32, %v5090_v57 }
 0xdb1   : > { %v10242_v17 = vunpack.i.h.bf16 %v10240_v7  ;;  %v10241_v18 = vunpack.i.l.bf16 %v10240_v7  ;;  %v10247_v43 = vunpack.i.h.bf16 %v10245_v48  ;;  %v10246_v3 = vunpack.i.l.bf16 %v10245_v48 }
 0xdb3   : > { %v5039_v40 = vsel %vm977_vm1, %v10241_v18, %v10221_v41  ;;  %v5041_v19 = vsel %vm977_vm1, %v10222_v55, %v10242_v17  ;;  %v5064_v22 = vsel %vm1003_vm2, %v10246_v3, %v10226_v58  ;;  %v5066_v61 = vsel %vm1003_vm2, %v10227_v0, %v10247_v43 }
 0xdb4   : > { %v10250_v51 = vpop.permute.xlu1 %10249  ;;  %v5188_v52 = vpop.permute.xlu0 %5187  ;;  %v5257_v8 = vpack.c.bf16 %v5064_v22, %v5039_v40  ;;  %v5259_v39 = vpack.c.bf16 %v5066_v61, %v5041_v19  ;;  %v5260_v41 = vpack.c.bf16 %v5114_v31, %v5089_v2  ;;  %v5229_v31 = vld [vmem:[%s15259_s2] sm:$0xf]  ;;  %s15260_s2 = sld [smem:[#allocation8_spill]] }
 0xdb5   : > { %v10252_v0 = vunpack.i.h.bf16 %v10250_v51  ;;  %v10251_v24 = vunpack.i.l.bf16 %v10250_v51 }
 0xdb6   : > { %5291 = vmatpush1.bf16.msra.mxu0 %v5257_v8  ;;  %9772 = vmatpush3.bf16.msra.mxu1 %v5259_v39 }
 0xdb7   : > { %5292 = vmatprep.subr.bf16.mxu0 %v5261_v45  ;;  %9773 = vmatprep.subr.bf16.mxu1 %v15250_v46  ;;  %v5220_v18 = vsel %vm1165_vm8, %v10251_v24, %v10252_v0 }
 0xdb8   : > { %v10255_v44 = vpop.permute.xlu1 %10254  ;;  %v10265_v55 = vpop.permute.xlu0 %10264 }
 0xdb9   : > { %v10257_v58 = vunpack.i.h.bf16 %v10255_v44  ;;  %v10256_v15 = vunpack.i.l.bf16 %v10255_v44  ;;  %v10267_v29 = vunpack.i.h.bf16 %v10265_v55  ;;  %v10266_v4 = vunpack.i.l.bf16 %v10265_v55 }
 0xdba   : > { %5293 = vmatpush1.bf16.msra.mxu0 %v5260_v41 }
 0xdbb   : > { %v5145_v54 = vsel %vm1087_vm5, %v5138_v37, %v10256_v15  ;;  %v5146_v13 = vsel %vm1087_vm5, %v10256_v15, %v10257_v58  ;;  %v5195_v43 = vsel %vm1139_vm6, %v5188_v52, %v10266_v4  ;;  %v5196_v57 = vsel %vm1139_vm6, %v10266_v4, %v10267_v29 }
 0xdbc   : > { %v10260_v47 = vpop.permute.xlu1 %10259  ;;  %v5113_v6 = vpop.permute.xlu0 %5112  ;;  %v5264_v56 = vpack.c.bf16 %v5146_v13, %v13216_v42  ;;  %v5263_v7 = vpack.c.bf16 %v5145_v54, %v13213_v34 }
 0xdbd   : > { %v10262_v48 = vunpack.i.h.bf16 %v10260_v47  ;;  %v10261_v17 = vunpack.i.l.bf16 %v10260_v47  ;;  %v5116_v34 = vsel %vm1055_vm3, %v10237_v60, %v5113_v6 }
 0xdbe   : > { %5294 = vmatprep.subr.bf16.mxu0 %v5264_v56 }
 0xdbf   : > { %v5170_v37 = vsel %vm1113_vm7, %v13266_v1, %v10261_v17  ;;  %5295 = vmatpush1.bf16.msra.mxu0 %v5263_v7  ;;  %v5171_v3 = vsel %vm1113_vm7, %v10261_v17, %v10262_v48  ;;  %v5269_v1 = vpack.c.bf16 %v5220_v18, %v5220_v18 }
 0xdc0   : > { %v5088_v32 = vpop.permute.xlu1 %5087  ;;  %v5217_v40 = vpop.permute.xlu0 %5216  ;;  %v5267_v42 = vpack.c.bf16 %v5196_v57, %v5171_v3  ;;  %v5266_v19 = vpack.c.bf16 %v5195_v43, %v5170_v37 }
 0xdc1   : > { %v5091_v22 = vsel %vm1029_vm4, %v10232_v16, %v5088_v32  ;;  %v5221_v61 = vsel %vm1165_vm8, %v10252_v0, %v5217_v40  ;;  %v5282_v16 = vsel %vm1228_vm9, %v5269_v1, 0 }
 0xdc2   : > { %v5262_v51 = vpack.c.bf16 %v5116_v34, %v5091_v22  ;;  %v5270_v52 = vpack.c.bf16 %v5221_v61, %v5221_v61  ;;  %5296 = vmatprep.subr.bf16.mxu0 %v5267_v42  ;;  %v5629_v34 = vld [vmem:[%s15260_s2] sm:$0xff]  ;;  %v5741_v22 = vld [vmem:[%s15261_s0 + $0x8] sm:$0xff]  ;;  %s15262_s2 = sld [smem:[#allocation7_spill]] }
 0xdc3   : > { %5297 = vmatpush1.bf16.msra.mxu0 %v5266_v19  ;;  %v5740_v61 = vld [vmem:[%s15261_s0] sm:$0xff] }
 0xdc4   : > { %v5144_v8 = vpop.permute.xlu1 %5143  ;;  %v5169_v39 = vpop.permute.xlu0 %5168  ;;  %9339 = vmatprep.subr.msk.bf16.mxu0 %vm1228_vm9, %v5270_v52  ;;  %9774 = vmatpush3.bf16.msra.mxu1 %v5262_v51  ;;  %v5742_v51 = vld [vmem:[%s15261_s0 + $0x10] sm:$0xff] }
 0xdc5   : > { %v5147_v2 = vsel %vm1087_vm5, %v10257_v58, %v5144_v8  ;;  %9775 = vmatprep.subr.bf16.mxu1 %v15250_v46  ;;  %v5172_v55 = vsel %vm1113_vm7, %v10262_v48, %v5169_v39 }
 0xdc6   : > { %v5265_v60 = vpack.c.bf16 %v5147_v2, %v13227_v62 }
 0xdc7   : > { %5299 = vmatpush1.bf16.msra.mxu0 %v5282_v16 }
 0xdc8   : > { %v5194_v45 = vpop.permute.xlu1 %5193  ;;  %v5219_v44 = vpop.permute.xlu0 %5218  ;;  %9776 = vmatpush3.bf16.msra.mxu1 %v5265_v60 }
 0xdc9   : > { %v5197_v41 = vsel %vm1139_vm6, %v10267_v29, %v5194_v45  ;;  %v5222_v15 = vsel %vm1165_vm8, %v5217_v40, %v5219_v44  ;;  %9777 = vmatprep.subr.bf16.mxu1 %v15250_v46 }
 0xdca   : > { %v5268_v58 = vpack.c.bf16 %v5197_v41, %v5172_v55  ;;  %9340 = vmatmul.mubr.msk.bf16.vlgmr.msra.gmra.mrb[104].mxu0 %vm1224_vm10, %v5229_v31  ;;  %v5271_v0 = vpack.c.bf16 %v5222_v15, %v5222_v15 }
 0xdcb   : > { %5679 = vmatprep.mubr.bf16.mxu0 %v15247_v20 }
 0xdcc   : > { %9778 = vmatpush3.bf16.msra.mxu1 %v5268_v58  ;;  %v5288_v62 = vsel %vm1228_vm9, %v5271_v0, 0  ;;  %v5389_v1 = vpop.permute.xlu0 %5388 }
 0xdcd   : > { %9779 = vmatprep.subr.bf16.mxu1 %v15250_v46 }
 0xdd0   : > { %9780 = vmatpush3.bf16.msra.mxu1 %v5288_v62  ;;  %v5439_v39 = vpop.permute.xlu0 %5438 }
 0xdd1   : > { %9785 = vmatprep.subr.bf16.mxu1 %v15250_v46 }
 0xdd3   : > { %9782 = vmatmul.mubr.msk.bf16.vlgmr.msra.gmra.mrb[116].mxu1 %vm1224_vm10, %v5229_v31 }
 0xdd4   : > { %9795 = vmatprep.mubr.msk.bf16.mxu1 %vm11209_vm0, %v15250_v46 }
 0xdd9   : > { %v5276_v24 = vpop.permute.xlu1 %5275 }
 0xddd   : > { %v5414_v52 = vpop.permute.xlu1 %5413 }
 0xde1   : > { %v5464_v8 = vpop.permute.xlu1 %5463 }
 0xe9d   : > { %v5324_v54 = vpop.f32.mrb[104].mxu0 }
 0xe9e   : > { %v5325_v29 = vadd.f32 %v5324_v54, %v5276_v24  ;;  %v5326_v4 = vpop.f32.mrb[105].mxu0 }
 0xe9f   : > { %v5327_v13 = vadd.f32 %v5326_v4, %v5276_v24  ;;  %v5328_v47 = vpop.f32.mrb[106].mxu0 }
 0xea0   : > { %v5371_v6 = vmax.f32 %v5325_v29, 0.0  ;;  %v5329_v56 = vpop.f32.mrb[107].mxu0 }
 0xea1   : > { %v5372_v7 = vmax.f32 %v5327_v13, 0.0 }
 0xea2   : > { %v13315_v48 = vmul.f32 %v5371_v6, %v15253_v26 }
 0xea3   : > { %v13318_v17 = vmul.f32 %v5372_v7, %v15254_v12 }
 0xea4   : > { %5519 = vrot.lane.b32.xlu0 %v13315_v48, %s15087_s28  ;;  %5494 = vrot.lane.b32.xlu1 %v13315_v48, %s11204_s23 }
 0xea5   : > { %v10268_v18 = vpack.i.bf16 %v13318_v17, %v13315_v48 }
 0xea6   : > { %v5365_v43 = vpop.f32.mrb[116].mxu1 }
 0xea7   : > { %v5366_v37 = vadd.f32 %v5365_v43, %v5276_v24  ;;  %v9783_v3 = vpop.f32.mrb[117].mxu1 }
 0xea8   : > { %v5368_v57 = vpop.f32.mrb[118].mxu1  ;;  %10269 = vrot.lane.b32.xlu0 %v10268_v18, %s11200_s15  ;;  %10274 = vrot.lane.b32.xlu1 %v10268_v18, %s11201_s16 }
 0xea9   : > { %v5373_v32 = vmax.f32 %v5366_v37, 0.0  ;;  %v9784_v40 = vpop.f32.mrb[119].mxu1 }
 0xeab   : > { %v13329_v42 = vmul.f32 %v5373_v32, %v15256_v28 }
 0xeac   : > { %10279 = vrot.lane.b32.xlu0 %v10268_v18, %s11203_s22  ;;  %10284 = vrot.lane.b32.xlu1 %v10268_v18, %s15089_s18 }
 0xead   : > { %v10288_v19 = vpack.i.bf16 %v13329_v42, %v13318_v17 }
 0xeb0   : > { %10289 = vrot.lane.b32.xlu0 %v10288_v19, %s11204_s23  ;;  %5544 = vrot.lane.b32.xlu1 %v13315_v48, %s15091_s26 }
 0xeb4   : > { %10294 = vrot.lane.b32.xlu0 %v10288_v19, %s15087_s28  ;;  %10304 = vrot.lane.b32.xlu1 %v10288_v19, %s15091_s26 }
 0xeb8   : > { %10299 = vrot.lane.b32.xlu0 %v10268_v18, %s15031_s1  ;;  %5573 = vrot.lane.b32.xlu1 %v13329_v42, %s15031_s1 }
 0xebc   : > { %5394 = vrot.lane.b32.xlu0 %v13329_v42, %s11200_s15  ;;  %5419 = vrot.lane.b32.xlu1 %v13329_v42, %s11201_s16 }
 0xec0   : > { %5444 = vrot.lane.b32.xlu0 %v13329_v42, %s11203_s22  ;;  %5469 = vrot.lane.b32.xlu1 %v13329_v42, %s15089_s18 }
 0xec4   : > { %5500 = vrot.lane.b32.xlu0 %v15250_v46, %s11204_s23  ;;  %5525 = vrot.lane.b32.xlu1 %v15250_v46, %s15087_s28 }
 0xec8   : > { %5550 = vrot.lane.b32.xlu0 %v15250_v46, %s15091_s26  ;;  %5575 = vrot.lane.b32.xlu1 %v15250_v46, %s15031_s1  ;;  %s15269_s1 = sld [smem:[#allocation12_spill]] }
 0xecc   : > { %5632 = vperm.xlu0 %10076, %v5629_v34   ;;  %5750 = vperm.xlu1 %10167, %v5741_v22  }
 0xed0   : > { %5745 = vperm.xlu0 %10076, %v5740_v61  }
 0xed4   : > { %5755 = vperm.xlu0 %10076, %v5742_v51  }
 0xf16   : > { %v5520_v2 = vpop.permute.xlu0 %5519  ;;  %v5495_v60 = vpop.permute.xlu1 %5494 }
 0xf1a   : > { %v13363_v16 = vpop.permute.xlu0 %10269  ;;  %v13365_v31 = vpop.permute.xlu1 %10274 }
 0xf1b   : > { %v10272_v45 = vunpack.i.h.bf16 %v13363_v16  ;;  %v10271_v44 = vunpack.i.l.bf16 %v13363_v16  ;;  %v10277_v55 = vunpack.i.h.bf16 %v13365_v31  ;;  %v10276_v41 = vunpack.i.l.bf16 %v13365_v31 }
 0xf1d   : > { %v5396_v15 = vsel %vm977_vm1, %v5389_v1, %v10271_v44  ;;  %v5421_v58 = vsel %vm1003_vm2, %v5414_v52, %v10276_v41  ;;  %v5397_v0 = vsel %vm977_vm1, %v10271_v44, %v10272_v45  ;;  %v5422_v62 = vsel %vm1003_vm2, %v10276_v41, %v10277_v55 }
 0xf1e   : > { %v13375_v24 = vpop.permute.xlu0 %10279  ;;  %v13377_v54 = vpop.permute.xlu1 %10284  ;;  %v5615_v29 = vpack.c.bf16 %v5422_v62, %v5397_v0  ;;  %v5614_v4 = vpack.c.bf16 %v5421_v58, %v5396_v15 }
 0xf1f   : > { %v10282_v13 = vunpack.i.h.bf16 %v13375_v24  ;;  %v10281_v47 = vunpack.i.l.bf16 %v13375_v24  ;;  %v10287_v6 = vunpack.i.h.bf16 %v13377_v54  ;;  %v10286_v56 = vunpack.i.l.bf16 %v13377_v54 }
 0xf20   : > { %5647 = vmatprep.subr.bf16.mxu0 %v5615_v29 }
 0xf21   : > { %v5446_v7 = vsel %vm1029_vm4, %v5439_v39, %v10281_v47  ;;  %v5471_v18 = vsel %vm1055_vm3, %v5464_v8, %v10286_v56  ;;  %5648 = vmatpush1.bf16.msra.mxu0 %v5614_v4  ;;  %v5447_v43 = vsel %vm1029_vm4, %v10281_v47, %v10282_v13  ;;  %v5472_v37 = vsel %vm1055_vm3, %v10286_v56, %v10287_v6 }
 0xf22   : > { %v10290_v3 = vpop.permute.xlu0 %10289  ;;  %v5545_v57 = vpop.permute.xlu1 %5544  ;;  %v5618_v32 = vpack.c.bf16 %v5472_v37, %v5447_v43  ;;  %v5617_v40 = vpack.c.bf16 %v5471_v18, %v5446_v7 }
 0xf23   : > { %v10292_v19 = vunpack.i.h.bf16 %v10290_v3  ;;  %v10291_v34 = vunpack.i.l.bf16 %v10290_v3 }
 0xf24   : > { %5649 = vmatprep.subr.bf16.mxu0 %v5618_v32 }
 0xf25   : > { %v5502_v22 = vsel %vm1087_vm5, %v5495_v60, %v10291_v34  ;;  %5650 = vmatpush1.bf16.msra.mxu0 %v5617_v40  ;;  %v5503_v61 = vsel %vm1087_vm5, %v10291_v34, %v10292_v19 }
 0xf26   : > { %v5620_v51 = vpack.c.bf16 %v5502_v22, %v13315_v48  ;;  %v10295_v52 = vpop.permute.xlu0 %10294  ;;  %v10305_v1 = vpop.permute.xlu1 %10304  ;;  %v5621_v8 = vpack.c.bf16 %v5503_v61, %v13318_v17 }
 0xf27   : > { %v10297_v39 = vunpack.i.h.bf16 %v10295_v52  ;;  %v10296_v16 = vunpack.i.l.bf16 %v10295_v52  ;;  %v10307_v31 = vunpack.i.h.bf16 %v10305_v1  ;;  %v10306_v44 = vunpack.i.l.bf16 %v10305_v1 }
 0xf28   : > { %5651 = vmatprep.subr.bf16.mxu0 %v5621_v8 }
 0xf29   : > { %v5527_v41 = vsel %vm1113_vm7, %v5520_v2, %v10296_v16  ;;  %v5552_v15 = vsel %vm1139_vm6, %v5545_v57, %v10306_v44  ;;  %5652 = vmatpush1.bf16.msra.mxu0 %v5620_v51  ;;  %v5528_v60 = vsel %vm1113_vm7, %v10296_v16, %v10297_v39  ;;  %v5553_v58 = vsel %vm1139_vm6, %v10306_v44, %v10307_v31  ;;  %v5586_v57 = vld [vmem:[%s15262_s2] sm:$0xf]  ;;  %s15263_s2 = sld [smem:[#allocation9_spill]] }
 0xf2a   : > { %v5623_v0 = vpack.c.bf16 %v5552_v15, %v5527_v41  ;;  %v10300_v48 = vpop.permute.xlu0 %10299  ;;  %v5574_v62 = vpop.permute.xlu1 %5573  ;;  %v5624_v24 = vpack.c.bf16 %v5553_v58, %v5528_v60 }
 0xf2b   : > { %v10302_v54 = vunpack.i.h.bf16 %v10300_v48  ;;  %v10301_v17 = vunpack.i.l.bf16 %v10300_v48 }
 0xf2c   : > { %5653 = vmatprep.subr.bf16.mxu0 %v5624_v24 }
 0xf2d   : > { %v5578_v29 = vsel %vm1165_vm8, %v10302_v54, %v5574_v62  ;;  %5654 = vmatpush1.bf16.msra.mxu0 %v5623_v0  ;;  %v5577_v2 = vsel %vm1165_vm8, %v10301_v17, %v10302_v54 }
 0xf2e   : > { %v5627_v4 = vpack.c.bf16 %v5578_v29, %v5578_v29  ;;  %v5395_v47 = vpop.permute.xlu0 %5394  ;;  %v5420_v56 = vpop.permute.xlu1 %5419  ;;  %v5626_v7 = vpack.c.bf16 %v5577_v2, %v5577_v2 }
 0xf2f   : > { %v5398_v18 = vsel %vm977_vm1, %v10272_v45, %v5395_v47  ;;  %v5423_v43 = vsel %vm1003_vm2, %v10277_v55, %v5420_v56  ;;  %v10531_v56 = vld [vmem:[%s15263_s2 + $0x8] ss:$0 sps:$4 sm:$0xff]  }
 0xf30   : > { %v5616_v37 = vpack.c.bf16 %v5423_v43, %v5398_v18  ;;  %9342 = vmatprep.subr.msk.bf16.mxu0 %vm1228_vm9, %v5627_v4  ;;  %v5639_v3 = vsel %vm1228_vm9, %v5626_v7, 0 }
 0xf31   : > { %5656 = vmatpush1.bf16.msra.mxu0 %v5639_v3 }
 0xf32   : > { %v5445_v32 = vpop.permute.xlu0 %5444  ;;  %v5470_v40 = vpop.permute.xlu1 %5469  ;;  %9786 = vmatpush3.bf16.msra.mxu1 %v5616_v37 }
 0xf33   : > { %v5448_v34 = vsel %vm1029_vm4, %v10282_v13, %v5445_v32  ;;  %v5473_v22 = vsel %vm1055_vm3, %v10287_v6, %v5470_v40  ;;  %9787 = vmatprep.subr.bf16.mxu1 %v15250_v46 }
 0xf34   : > { %v5619_v61 = vpack.c.bf16 %v5473_v22, %v5448_v34  ;;  %9343 = vmatmul.mubr.msk.bf16.vlgmr.msra.gmra.mrb[108].mxu0 %vm1224_vm10, %v5586_v57 }
 0xf35   : > { %5813 = vmatprep.mubr.bf16.mxu0 %v15247_v20 }
 0xf36   : > { %v5501_v45 = vpop.permute.xlu0 %5500  ;;  %v5526_v55 = vpop.permute.xlu1 %5525  ;;  %9788 = vmatpush3.bf16.msra.mxu1 %v5619_v61 }
 0xf37   : > { %v5504_v51 = vsel %vm1087_vm5, %v10292_v19, %v5501_v45  ;;  %9789 = vmatprep.subr.bf16.mxu1 %v15250_v46  ;;  %v5529_v6 = vsel %vm1113_vm7, %v10297_v39, %v5526_v55 }
 0xf38   : > { %v5622_v52 = vpack.c.bf16 %v5504_v51, %v13329_v42  ;;  %v10530_v42 = vld [vmem:[%s15263_s2] sm:$0xff]  }
 0xf3a   : > { %v5551_v13 = vpop.permute.xlu0 %5550  ;;  %v5576_v1 = vpop.permute.xlu1 %5575  ;;  %9790 = vmatpush3.bf16.msra.mxu1 %v5622_v52 }
 0xf3b   : > { %v5554_v8 = vsel %vm1139_vm6, %v10307_v31, %v5551_v13  ;;  %v5579_v16 = vsel %vm1165_vm8, %v5574_v62, %v5576_v1  ;;  %9791 = vmatprep.subr.bf16.mxu1 %v15250_v46 }
 0xf3c   : > { %v5625_v44 = vpack.c.bf16 %v5554_v8, %v5529_v6  ;;  %v5628_v41 = vpack.c.bf16 %v5579_v16, %v5579_v16 }
 0xf3e   : > { %9792 = vmatpush3.bf16.msra.mxu1 %v5625_v44  ;;  %v5645_v19 = vsel %vm1228_vm9, %v5628_v41, 0 }
 0xf3f   : > { %9793 = vmatprep.subr.bf16.mxu1 %v15250_v46 }
 0xf42   : > { %9794 = vmatpush3.bf16.msra.mxu1 %v5645_v19 }
 0xf45   : > { %9796 = vmatmul.mubr.msk.bf16.vlgmr.msra.gmra.mrb[120].mxu1 %vm1224_vm10, %v5586_v57 }
 0xf46   : > { %9801 = vmatprep.mubr.msk.bf16.mxu1 %vm2087_vm11, %v10530_v42 }
 0xf4b   : > { %v5633_v39 = vpop.permute.xlu0 %5632 }
 0xf4f   : > { %v5746_v32 = vpop.permute.xlu0 %5745 }
0x1007   : > { %v5681_v15 = vpop.f32.mrb[108].mxu0 }
0x1008   : > { %v5682_v31 = vadd.f32 %v5681_v15, %v5633_v39  ;;  %v5683_v60 = vpop.f32.mrb[109].mxu0 }
0x1009   : > { %v5684_v58 = vadd.f32 %v5683_v60, %v5633_v39  ;;  %v5685_v0 = vpop.f32.mrb[110].mxu0 }
0x100a   : > { %v5728_v48 = vmul.f32 %v5682_v31, %v15253_v26  ;;  %v5686_v62 = vpop.f32.mrb[111].mxu0 }
0x100b   : > { %v5729_v24 = vmul.f32 %v5684_v58, %v15254_v12 }
0x100c   : > { %v13422_v54 = vadd.f32 %v5728_v48, %v13114_v25 }
0x100d   : > { %v13425_v17 = vadd.f32 %v5729_v24, %v13117_v33 }
0x100e   : > { %15264 = vst [vmem:[#allocation40_spill] sm:$0xff] %v13422_v54  ;;  %v5737_v29 = vpack.c.bf16 %v13422_v54, %v13422_v54 }
0x100f   : > { %15265 = vst [vmem:[#allocation46_spill] sm:$0xff] %v13425_v17  ;;  %v5738_v2 = vpack.c.bf16 %v13425_v17, %v13425_v17 }
0x1010   : > { %v5773_v4 = vsel %vm1228_vm9, %v5737_v29, 0  ;;  %v7996_v29 = vld [vmem:[%s15269_s1] sm:$0xff]  ;;  %s15399_s1 = sld [smem:[#allocation11_spill]] }
0x1011   : > { %9347 = vmatprep.subr.msk.bf16.mxu0 %vm1228_vm9, %v5738_v2 }
0x1012   : > { %5782 = vmatpush1.bf16.msra.mxu0 %v5773_v4 }
0x1015   : > { %9348 = vmatmul.mubr.msk.bf16.vlgmr.msra.gmra.mrb[112].mxu0 %vm2087_vm11, %v10530_v42 }
0x1016   : > { %5823 = vmatprep.mubr.bf16.mxu0 %v15247_v20 }
0x1018   : > { %v5722_v25 = vpop.f32.mrb[120].mxu1 }
0x1019   : > { %v5723_v47 = vadd.f32 %v5722_v25, %v5633_v39  ;;  %v9797_v33 = vpop.f32.mrb[121].mxu1 }
0x101a   : > { %v5725_v7 = vpop.f32.mrb[122].mxu1 }
0x101b   : > { %v5730_v18 = vmul.f32 %v5723_v47, %v15256_v28  ;;  %v9798_v43 = vpop.f32.mrb[123].mxu1 }
0x101d   : > { %v13438_v37 = vadd.f32 %v5730_v18, %v13129_v53  ;;  %9349 = vmatmul.mubr.msk.bf16.gmra.mrb[116].mxu0 %vm2087_vm11, %v10531_v56  ;;  %v5751_v53 = vpop.permute.xlu1 %5750 }
0x101e   : > { %5966 = vmatprep.mubr.bf16.mxu0 %v15247_v20 }
0x101f   : > { %15266 = vst [vmem:[#allocation22_spill] sm:$0xff] %v13438_v37  ;;  %v5739_v3 = vpack.c.bf16 %v13438_v37, %v13438_v37 }
0x1021   : > { %9973 = vmatprep.subr.msk.bf16.mxu1 %vm1228_vm9, %v5739_v3  ;;  %v5779_v57 = vsel %vm1228_vm9, %v5739_v3, 0 }
0x1022   : > { %9800 = vmatpush3.bf16.msra.mxu1 %v5779_v57 }
0x1025   : > { %9802 = vmatmul.mubr.msk.bf16.vlgmr.msra.gmra.mrb[124].mxu1 %vm2087_vm11, %v10531_v56 }
0x10e8   : > { %v5815_v40 = vpop.f32.mrb[112].mxu0 }
0x10e9   : > { %v5816_v34 = vadd.f32 %v5815_v40, %v5746_v32  ;;  %v5817_v22 = vpop.f32.mrb[113].mxu0 }
0x10ea   : > { %v5818_v61 = vadd.f32 %v5817_v22, %v5746_v32  ;;  %v5819_v45 = vpop.f32.mrb[114].mxu0 }
0x10eb   : > { %v5880_v55 = vpack.c.bf16 %v5816_v34, %v5816_v34  ;;  %v5820_v51 = vadd.f32 %v5819_v45, %v5751_v53  ;;  %v5821_v52 = vpop.f32.mrb[115].mxu0 }
0x10ec   : > { %v13447_v13 = vpack.c.bf16 %v5818_v61, %v5818_v61  ;;  %v5822_v1 = vadd.f32 %v5821_v52, %v5751_v53 }
0x10ed   : > { %v13450_v6 = vsel %vm1228_vm9, %v5880_v55, 0  ;;  %v5883_v8 = vpack.c.bf16 %v5820_v51, %v5820_v51 }
0x10ee   : > { %15267 = vst [vmem:[#allocation71_spill] sm:$0xff] %v13447_v13  ;;  %15268 = vst [vmem:[#allocation54_spill] sm:$0xff] %v13450_v6  ;;  %v6588_v16 = vpack.c.bf16 %v5822_v1, %v5822_v1  ;;  %9352 = vmatprep.subr.msk.bf16.mxu0 %vm1228_vm9, %v13447_v13 }
0x10ef   : > { %5885 = vxpose.xlu1.c.b16.start.end [1/1] (short) %v5883_v8, 128  ;;  %5935 = vmatpush1.bf16.msra.mxu0 %v13450_v6 }
0x10f0   : > { %v13455_v44 = vpop.f32.mrb[116].mxu0  ;;  %6590 = vxpose.xlu0.c.b16.start.end [1/1] (short) %v6588_v16, 128  ;;  %9823 = vmatprep.subr.bf16.mxu0 %v15250_v46 }
0x10f1   : > { %v13458_v41 = vpop.f32.mrb[117].mxu0 }
0x10f2   : > { %15270 = vst [vmem:[#allocation25_spill] sm:$0xff] %v13458_v41  ;;  %v5829_v19 = vpop.f32.mrb[118].mxu0 }
0x10f3   : > { %v5830_v42 = vpop.f32.mrb[119].mxu0 }
0x10f8   : > { %v13460_v39 = vpop.f32.mrb[124].mxu1 }
0x10f9   : > { %15271 = vst [vmem:[#allocation76_spill] sm:$0xff] %v13460_v39  ;;  %v5866_v15 = vpop.f32.mrb[125].mxu1 }
0x10fa   : > { %v5867_v31 = vadd.f32 %v5866_v15, %v5746_v32  ;;  %v9804_v60 = vpop.f32.mrb[126].mxu1 }
0x10fb   : > { %v5869_v58 = vpop.f32.mrb[127].mxu1 }
0x10fc   : > { %v13462_v0 = vpack.c.bf16 %v5867_v31, %v5867_v31  ;;  %v5870_v62 = vadd.f32 %v5869_v58, %v5751_v53 }
0x10fe   : > { %9974 = vmatprep.subr.msk.bf16.mxu1 %vm1228_vm9, %v13462_v0  ;;  %v13468_v48 = vsel %vm1228_vm9, %v13462_v0, 0  ;;  %v7287_v24 = vpack.c.bf16 %v5870_v62, %v5870_v62 }
0x10ff   : > { %9806 = vmatpush3.bf16.msra.mxu1 %v13468_v48 }
0x110c   : > { %7289 = vxpose.xlu1.c.b16.start.end [1/1] (short) %v7287_v24, 128 }
0x1115   : > { %7999 = vperm.xlu0 %10076, %v7996_v29  }
0x1155   : > { %v5893_v2 = vpop.trf.xlu1 }
0x1156   : > { %9353 = vmatmul.mubr.msk.bf16.vlgmr.msra.gmra.mrb[120].mxu0 %vm2087_vm11, %v5893_v2  ;;  %9807 = vmatprep.mubr.msk.bf16.mxu1 %vm2087_vm11, %v5893_v2 }
0x1157   : > { %5976 = vmatprep.mubr.bf16.mxu0 %v15247_v20 }
0x1159   : > { %v5894_v4 = vpop.trf.xlu1 }
0x115a   : > { %9808 = vmatmul.mubr.msk.bf16.vlgmr.msra.gmra.mrb[128].mxu1 %vm2087_vm11, %v5894_v4 }
0x115d   : > { %v5895_v25 = vpop.trf.xlu1 }
0x115e   : > { %9354 = vmatmul.mubr.msk.bf16.gmra.mrb[124].mxu0 %vm2087_vm11, %v5894_v4  ;;  %9811 = vmatprep.mubr.msk.bf16.mxu1 %vm2087_vm11, %v5895_v25 }
0x115f   : > { %5986 = vmatprep.mubr.bf16.mxu0 %v15247_v20 }
0x1161   : > { %v5896_v47 = vpop.trf.xlu1 }
0x1162   : > { %9812 = vmatmul.mubr.msk.bf16.gmra.mrb[132].mxu1 %vm2087_vm11, %v5896_v47 }
0x1165   : > { %v5897_v56 = vpop.trf.xlu1 }
0x1166   : > { %9355 = vmatmul.mubr.msk.bf16.gmra.mrb[128].mxu0 %vm2087_vm11, %v5895_v25  ;;  %9815 = vmatprep.mubr.msk.bf16.mxu1 %vm2087_vm11, %v5897_v56 }
0x1167   : > { %5996 = vmatprep.mubr.bf16.mxu0 %v15247_v20 }
0x1169   : > { %v5898_v33 = vpop.trf.xlu1 }
0x116a   : > { %9816 = vmatmul.mubr.msk.bf16.gmra.mrb[136].mxu1 %vm2087_vm11, %v5898_v33 }
0x116d   : > { %v5899_v7 = vpop.trf.xlu1 }
0x116e   : > { %9356 = vmatmul.mubr.msk.bf16.gmra.mrb[132].mxu0 %vm2087_vm11, %v5896_v47  ;;  %9819 = vmatprep.mubr.msk.bf16.mxu1 %vm2087_vm11, %v5899_v7 }
0x116f   : > { %6006 = vmatprep.mubr.bf16.mxu0 %v15247_v20 }
0x1171   : > { %v5900_v18 = vpop.trf.xlu1 }
0x1172   : > { %9820 = vmatmul.mubr.msk.bf16.gmra.mrb[140].mxu1 %vm2087_vm11, %v5900_v18 }
0x1173   : > { %6536 = vmatprep.mubr.bf16.mxu1 %v15247_v20 }
0x1176   : > { %9357 = vmatmul.mubr.msk.bf16.gmra.mrb[136].mxu0 %vm2087_vm11, %v5897_v56 }
0x1177   : > { %6016 = vmatprep.mubr.bf16.mxu0 %v15247_v20 }
0x117e   : > { %9358 = vmatmul.mubr.msk.bf16.gmra.mrb[140].mxu0 %vm2087_vm11, %v5898_v33 }
0x117f   : > { %6026 = vmatprep.mubr.bf16.mxu0 %v15247_v20 }
0x1186   : > { %9359 = vmatmul.mubr.msk.bf16.gmra.mrb[144].mxu0 %vm2087_vm11, %v5899_v7 }
0x1187   : > { %6036 = vmatprep.mubr.bf16.mxu0 %v15247_v20 }
0x118e   : > { %9360 = vmatmul.mubr.msk.bf16.gmra.mrb[148].mxu0 %vm2087_vm11, %v5900_v18 }
0x118f   : > { %9839 = vmatprep.mubr.msk.bf16.mxu0 %vm11209_vm0, %v15250_v46 }
0x1229   : > { %v13498_v43 = vpop.f32.mrb[120].mxu0 }
0x122a   : > { %v13500_v3 = vpop.f32.mrb[121].mxu0 }
0x122b   : > { %v13502_v57 = vpop.f32.mrb[122].mxu0 }
0x122c   : > { %v13504_v32 = vpop.f32.mrb[123].mxu0 }
0x122d   : > { %v13506_v40 = vpop.f32.mrb[128].mxu1 }
0x122e   : > { %v13508_v34 = vpop.f32.mrb[129].mxu1 }
0x122f   : > { %v6186_v22 = vmax.f32 %v13508_v34, %v13506_v40  ;;  %v13512_v53 = vpop.f32.mrb[130].mxu1 }
0x1230   : > { %v13514_v61 = vpop.f32.mrb[131].mxu1 }
0x1231   : > { %v13516_v45 = vpop.f32.mrb[124].mxu0  ;;  %v6187_v55 = vmax.f32 %v13514_v61, %v13512_v53 }
0x1232   : > { %v6144_v51 = vmax.f32 %v13498_v43, %v13516_v45  ;;  %v13522_v52 = vpop.f32.mrb[125].mxu0 }
0x1233   : > { %v6165_v1 = vmax.f32 %v13500_v3, %v13522_v52  ;;  %v13526_v8 = vpop.f32.mrb[126].mxu0 }
0x1234   : > { %v6145_v16 = vmax.f32 %v13502_v57, %v13526_v8  ;;  %v13530_v19 = vpop.f32.mrb[127].mxu0 }
0x1235   : > { %v6166_v42 = vmax.f32 %v13504_v32, %v13530_v19  ;;  %v13534_v15 = vpop.f32.mrb[132].mxu1 }
0x1236   : > { %v13536_v31 = vpop.f32.mrb[133].mxu1 }
0x1237   : > { %v6188_v60 = vmax.f32 %v6186_v22, %v13536_v31  ;;  %v13539_v58 = vpop.f32.mrb[134].mxu1 }
0x1238   : > { %v13541_v62 = vpop.f32.mrb[135].mxu1 }
0x1239   : > { %v6189_v24 = vmax.f32 %v6187_v55, %v13541_v62  ;;  %v13544_v29 = vpop.f32.mrb[128].mxu0  ;;  %v6190_v2 = vmax.f32 %v6188_v60, %v13534_v15 }
0x123a   : > { %v6146_v4 = vmax.f32 %v6144_v51, %v13544_v29  ;;  %v13548_v25 = vpop.f32.mrb[129].mxu0 }
0x123b   : > { %v6167_v47 = vmax.f32 %v6165_v1, %v13548_v25  ;;  %v13551_v56 = vpop.f32.mrb[130].mxu0  ;;  %v6191_v33 = vmax.f32 %v6189_v24, %v13539_v58 }
0x123c   : > { %v6147_v7 = vmax.f32 %v6145_v16, %v13551_v56  ;;  %v13555_v18 = vpop.f32.mrb[131].mxu0 }
0x123d   : > { %v6168_v22 = vmax.f32 %v6166_v42, %v13555_v18  ;;  %v13558_v55 = vpop.f32.mrb[136].mxu1 }
0x123e   : > { %v13560_v28 = vpop.f32.mrb[137].mxu1 }
0x123f   : > { %v6192_v51 = vmax.f32 %v6190_v2, %v13560_v28  ;;  %v13563_v60 = vpop.f32.mrb[138].mxu1 }
0x1240   : > { %v13565_v37 = vpop.f32.mrb[139].mxu1 }
0x1241   : > { %v6193_v1 = vmax.f32 %v6191_v33, %v13565_v37  ;;  %v13568_v12 = vpop.f32.mrb[132].mxu0  ;;  %v6194_v16 = vmax.f32 %v6192_v51, %v13558_v55 }
0x1242   : > { %v6148_v24 = vmax.f32 %v6146_v4, %v13568_v12  ;;  %v13572_v26 = vpop.f32.mrb[133].mxu0 }
0x1243   : > { %v6169_v42 = vmax.f32 %v6167_v47, %v13572_v26  ;;  %v13575_v17 = vpop.f32.mrb[134].mxu0  ;;  %v6195_v2 = vmax.f32 %v6193_v1, %v13563_v60 }
0x1244   : > { %v6149_v54 = vmax.f32 %v6147_v7, %v13575_v17  ;;  %v13579_v39 = vpop.f32.mrb[135].mxu0 }
0x1245   : > { %v6170_v33 = vmax.f32 %v6168_v22, %v13579_v39  ;;  %v13582_v35 = vpop.f32.mrb[140].mxu1 }
0x1246   : > { %v13584_v10 = vpop.f32.mrb[141].mxu1 }
0x1247   : > { %v6196_v4 = vmax.f32 %v6194_v16, %v13584_v10  ;;  %v13587_v51 = vpop.f32.mrb[142].mxu1 }
0x1248   : > { %v6132_v27 = vpop.f32.mrb[143].mxu1 }
0x1249   : > { %v6198_v47 = vmax.f32 %v6196_v4, %v13582_v35  ;;  %v6197_v30 = vmax.f32 %v6195_v2, %v6132_v27  ;;  %v13590_v38 = vpop.f32.mrb[136].mxu0 }
0x124a   : > { %v6150_v7 = vmax.f32 %v6148_v24, %v13590_v38  ;;  %v13593_v1 = vpop.f32.mrb[137].mxu0 }
0x124b   : > { %v6199_v22 = vmax.f32 %v6197_v30, %v13587_v51  ;;  %v6171_v21 = vmax.f32 %v6169_v42, %v13593_v1  ;;  %v13597_v63 = vpop.f32.mrb[138].mxu0 }
0x124c   : > { %v6151_v16 = vmax.f32 %v6149_v54, %v13597_v63  ;;  %v13600_v9 = vpop.f32.mrb[139].mxu0 }
0x124d   : > { %v6200_v14 = vmax.f32 %v6198_v47, %v6199_v22  ;;  %v6172_v4 = vmax.f32 %v6170_v33, %v13600_v9 }
0x124f   : > { %v6201_v2 = vrot.slane %v6200_v14, 4 }
0x1251   : > { %v6202_v11 = vmax.f32 %v6200_v14, %v6201_v2  ;;  %v13603_v59 = vpop.f32.mrb[140].mxu0 }
0x1252   : > { %v6152_v24 = vmax.f32 %v6150_v7, %v13603_v59  ;;  %v13606_v23 = vpop.f32.mrb[141].mxu0 }
0x1253   : > { %v6203_v30 = vrot.slane %v6202_v11, 2  ;;  %v6173_v42 = vmax.f32 %v6171_v21, %v13606_v23  ;;  %v13609_v5 = vpop.f32.mrb[142].mxu0 }
0x1254   : > { %v6153_v54 = vmax.f32 %v6151_v16, %v13609_v5  ;;  %v13612_v50 = vpop.f32.mrb[143].mxu0 }
0x1255   : > { %v6204_v47 = vmax.f32 %v6202_v11, %v6203_v30  ;;  %v6174_v33 = vmax.f32 %v6172_v4, %v13612_v50 }
0x1257   : > { %v6205_v22 = vrot.slane %v6204_v47, 1 }
0x1259   : > { %v6206_v14 = vmax.f32 %v6204_v47, %v6205_v22  ;;  %v13615_v2 = vpop.f32.mrb[144].mxu0 }
0x125a   : > { %15272 = vst [vmem:[#allocation19_spill] sm:$0xff] %v13615_v2  ;;  %v6154_v7 = vmax.f32 %v6152_v24, %v13615_v2  ;;  %v13618_v49 = vpop.f32.mrb[145].mxu0 }
0x125b   : > { %15273 = vst [vmem:[#allocation20_spill] sm:$0xff] %v13618_v49  ;;  %v13620_v36 = vmax.f32 %v6206_v14, -1e+30  ;;  %v6175_v21 = vmax.f32 %v6173_v42, %v13618_v49  ;;  %v13623_v41 = vpop.f32.mrb[146].mxu0 }
0x125c   : > { %15275 = vst [vmem:[#allocation77_spill] sm:$0xff] %v13623_v41  ;;  %v6155_v16 = vmax.f32 %v6153_v54, %v13623_v41  ;;  %v13626_v6 = vpop.f32.mrb[147].mxu0 }
0x125d   : > { %15274 = vst [vmem:[#allocation21_spill] sm:$0xff] %v13620_v36  ;;  %15276 = vst [vmem:[#allocation78_spill] sm:$0xff] %v13626_v6  ;;  %v6260_v11 = vsub.f32 %v6132_v27, %v13620_v36  ;;  %v6176_v4 = vmax.f32 %v6174_v33, %v13626_v6  ;;  %v6221_v30 = vsub.f32 %v13508_v34, %v13620_v36 }
0x125e   : > { %v6224_v24 = vsub.f32 %v13514_v61, %v13620_v36  ;;  %v6227_v47 = vsub.f32 %v13506_v40, %v13620_v36  ;;  %v6230_v42 = vsub.f32 %v13512_v53, %v13620_v36  ;;  %v6233_v54 = vsub.f32 %v13536_v31, %v13620_v36 }
0x125f   : > { %v6349_v22 = vmul.f32 1.442695, %v6260_v11  ;;  %v6271_v14 = vmul.f32 1.442695, %v6221_v30  ;;  %v6236_v33 = vsub.f32 %v13541_v62, %v13620_v36  ;;  %v6239_v34 = vsub.f32 %v13534_v15, %v13620_v36 }
0x1260   : > { %v6277_v27 = vmul.f32 1.442695, %v6224_v24  ;;  %v6283_v20 = vmul.f32 1.442695, %v6227_v47  ;;  %v6289_v40 = vmul.f32 1.442695, %v6230_v42  ;;  %v6242_v53 = vsub.f32 %v13539_v58, %v13620_v36 }
0x1261   : > { %10844 = vpow2.f32 %v6349_v22  ;;  %v13644_v61 = vpop.f32.mrb[148].mxu0  ;;  %v6295_v11 = vmul.f32 1.442695, %v6233_v54  ;;  %v6245_v62 = vsub.f32 %v13560_v28, %v13620_v36  ;;  %v6301_v15 = vmul.f32 1.442695, %v6236_v33 }
0x1262   : > { %15277 = vst [vmem:[#allocation79_spill] sm:$0xff] %v13644_v61  ;;  %v6156_v13 = vmax.f32 %v6154_v7, %v13644_v61  ;;  %v13649_v31 = vpop.f32.mrb[149].mxu0  ;;  %10846 = vpow2.f32 %v6271_v14  ;;  %v6248_v47 = vsub.f32 %v13565_v37, %v13620_v36  ;;  %v6307_v7 = vmul.f32 1.442695, %v6239_v34 }
0x1263   : > { %15278 = vst [vmem:[#allocation80_spill] sm:$0xff] %v13649_v31  ;;  %v6177_v30 = vmax.f32 %v6175_v21, %v13649_v31  ;;  %v13654_v24 = vpop.f32.mrb[150].mxu0  ;;  %10848 = vpow2.f32 %v6277_v27  ;;  %v6251_v54 = vsub.f32 %v13558_v55, %v13620_v36  ;;  %v6313_v21 = vmul.f32 1.442695, %v6242_v53 }
0x1264   : > { %v6157_v58 = vmax.f32 %v6155_v16, %v13654_v24  ;;  %v13659_v42 = vpop.f32.mrb[151].mxu0  ;;  %10850 = vpow2.f32 %v6283_v20  ;;  %v6254_v22 = vsub.f32 %v13563_v60, %v13620_v36  ;;  %v6319_v27 = vmul.f32 1.442695, %v6245_v62 }
0x1265   : > { %v6178_v28 = vmax.f32 %v6176_v4, %v13659_v42  ;;  %10852 = vpow2.f32 %v6289_v40  ;;  %v6257_v37 = vsub.f32 %v13584_v10, %v13620_v36  ;;  %v6325_v20 = vmul.f32 1.442695, %v6248_v47 }
0x1266   : > { %v6158_v14 = vmax.f32 %v6156_v13, %v6157_v58  ;;  %10854 = vpow2.f32 %v6295_v11  ;;  %v6263_v33 = vsub.f32 %v13582_v35, %v13620_v36  ;;  %v6331_v4 = vmul.f32 1.442695, %v6251_v54  ;;  %v15279_v58 = vld [vmem:[#allocation28_spill] sm:$0xff] }
0x1267   : > { %v6179_v16 = vmax.f32 %v6177_v30, %v6178_v28  ;;  %10856 = vpow2.f32 %v6301_v15  ;;  %v6337_v40 = vmul.f32 1.442695, %v6254_v22  ;;  %v6266_v13 = vsub.f32 %v13587_v51, %v13620_v36  ;;  %v15280_v22 = vld [vmem:[#allocation29_spill] sm:$0xff]  ;;  %v15283_v36 = vld [vmem:[#allocation31_spill] sm:$0xff] }
0x1268   : > { %v6159_v55 = vrot.slane %v6158_v14, 4  ;;  %10858 = vpow2.f32 %v6307_v7  ;;  %v6343_v53 = vmul.f32 1.442695, %v6257_v37  ;;  %v6355_v62 = vmul.f32 1.442695, %v6263_v33  ;;  %v15281_v37 = vld [vmem:[#allocation30_spill] sm:$0xff]  ;;  %v13675_v33 = vpop.permute.xlu0 %5755 }
0x1269   : > { %v6180_v34 = vrot.slane %v6179_v16, 4  ;;  %10860 = vpow2.f32 %v6313_v21  ;;  %v6361_v54 = vmul.f32 1.442695, %v6266_v13  ;;  %15282 = vst [vmem:[#allocation28_spill] sm:$0xff] %v13675_v33  ;;  %v5826_v13 = vadd.f32 %v13455_v44, %v13675_v33 }
0x126a   : > { %v6160_v60 = vmax.f32 %v6158_v14, %v6159_v55  ;;  %10862 = vpow2.f32 %v6319_v27 }
0x126b   : > { %v10845_v11 = vpop.eup %10844  ;;  %v6181_v10 = vmax.f32 %v6179_v16, %v6180_v34  ;;  %10864 = vpow2.f32 %v6325_v20 }
0x126c   : > { %v10847_v30 = vpop.eup %10846  ;;  %v6161_v15 = vrot.slane %v6160_v60, 2  ;;  %10866 = vpow2.f32 %v6331_v4 }
0x126d   : > { %v10849_v35 = vpop.eup %10848  ;;  %v6182_v47 = vrot.slane %v6181_v10, 2  ;;  %v6365_v7 = vmul.f32 %v10847_v30, %v15279_v58  ;;  %10868 = vpow2.f32 %v6337_v40 }
0x126e   : > { %v10851_v28 = vpop.eup %10850  ;;  %v6162_v21 = vmax.f32 %v6160_v60, %v6161_v15  ;;  %v6368_v51 = vmul.f32 %v10849_v35, %v15280_v22  ;;  %10870 = vpow2.f32 %v6343_v53  ;;  %v15284_v15 = vld [vmem:[#allocation32_spill] sm:$0xff] }
0x126f   : > { %v10853_v14 = vpop.eup %10852  ;;  %v6183_v27 = vmax.f32 %v6181_v10, %v6182_v47  ;;  %v6371_v16 = vmul.f32 %v10851_v28, %v15281_v37  ;;  %10872 = vpow2.f32 %v6355_v62  ;;  %v15285_v28 = vld [vmem:[#allocation33_spill] sm:$0xff] }
0x1270   : > { %v10855_v20 = vpop.eup %10854  ;;  %v6163_v55 = vrot.slane %v6162_v21, 1  ;;  %v6456_v4 = vadd.f32 %v6368_v51, %v6365_v7  ;;  %v6482_v34 = vpack.c.bf16 %v6368_v51, %v6365_v7  ;;  %v6374_v30 = vmul.f32 %v10853_v14, %v15283_v36  ;;  %v15286_v7 = vld [vmem:[#allocation34_spill] sm:$0xff] }
0x1271   : > { %v10857_v40 = vpop.eup %10856  ;;  %v6184_v60 = vrot.slane %v6183_v27, 1  ;;  %v6377_v53 = vmul.f32 %v10855_v20, %v15284_v15  ;;  %10874 = vpow2.f32 %v6361_v54  ;;  %v15287_v20 = vld [vmem:[#allocation35_spill] sm:$0xff] }
0x1272   : > { %v10859_v10 = vpop.eup %10858  ;;  %v6164_v35 = vmax.f32 %v6162_v21, %v6163_v55  ;;  %9824 = vmatpush3.bf16.msra.mxu0 %v6482_v34  ;;  %v6457_v62 = vadd.f32 %v6456_v4, %v6371_v16  ;;  %v6485_v47 = vpack.c.bf16 %v6374_v30, %v6371_v16  ;;  %v6380_v61 = vmul.f32 %v10857_v40, %v15285_v28  ;;  %v15288_v16 = vld [vmem:[#allocation55_spill] sm:$0xff] }
0x1273   : > { %v10861_v31 = vpop.eup %10860  ;;  %v6185_v41 = vmax.f32 %v6183_v27, %v6184_v60  ;;  %9825 = vmatprep.subr.bf16.mxu0 %v15250_v46  ;;  %v6383_v51 = vmul.f32 %v10859_v10, %v15286_v7  ;;  %v13687_v21 = vpack.c.bf16 %v5826_v13, %v5826_v13  ;;  %v15289_v34 = vld [vmem:[#allocation51_spill] sm:$0xff] }
0x1274   : > { %v10863_v14 = vpop.eup %10862  ;;  %v13684_v2 = vmax.f32 %v6164_v35, -1e+30  ;;  %v6458_v44 = vadd.f32 %v6457_v62, %v6374_v30  ;;  %v6488_v33 = vpack.c.bf16 %v6380_v61, %v6377_v53  ;;  %v6386_v54 = vmul.f32 %v10861_v31, %v15287_v20  ;;  %v15290_v35 = vld [vmem:[#allocation36_spill] sm:$0xff]  ;;  %v15293_v20 = vld [vmem:[#allocation45_spill] sm:$0xff] }
0x1275   : > { %v10865_v6 = vpop.eup %10864  ;;  %v13689_v55 = vmax.f32 %v6185_v41, -1e+30  ;;  %v6389_v4 = vmul.f32 %v10863_v14, %v15288_v16  ;;  %v13693_v27 = vmul.f32 %v10845_v11, %v15289_v34  ;;  %v15291_v41 = vld [vmem:[#allocation39_spill] sm:$0xff] }
0x1276   : > { %v10867_v40 = vpop.eup %10866  ;;  %v6264_v60 = vsub.f32 %v13654_v24, %v13684_v2  ;;  %9826 = vmatpush3.bf16.msra.mxu0 %v6485_v47  ;;  %v6459_v10 = vadd.f32 %v6458_v44, %v6377_v53  ;;  %v6491_v30 = vpack.c.bf16 %v6386_v54, %v6383_v51  ;;  %v6392_v62 = vmul.f32 %v10865_v6, %v15290_v35  ;;  %v15292_v6 = vld [vmem:[#allocation42_spill] sm:$0xff] }
0x1277   : > { %v10869_v31 = vpop.eup %10868  ;;  %v6265_v13 = vsub.f32 %v13659_v42, %v13689_v55  ;;  %9827 = vmatprep.subr.bf16.mxu0 %v15250_v46  ;;  %v13702_v14 = vmul.f32 %v10867_v40, %v15291_v41  ;;  %v6220_v11 = vsub.f32 %v13500_v3, %v13689_v55  ;;  %v6223_v24 = vsub.f32 %v13504_v32, %v13689_v55 }
0x1278   : > { %v10871_v47 = vpop.eup %10870  ;;  %v6357_v53 = vmul.f32 1.442695, %v6264_v60  ;;  %v6460_v44 = vadd.f32 %v6459_v10, %v6380_v61  ;;  %v6494_v34 = vpack.c.bf16 %v6392_v62, %v6389_v4  ;;  %v13709_v35 = vmul.f32 %v10869_v31, %v15292_v6 }
0x1279   : > { %v10873_v16 = vpop.eup %10872  ;;  %v6359_v42 = vmul.f32 1.442695, %v6265_v13  ;;  %v13712_v49 = vmul.f32 %v10871_v47, %v15293_v20  ;;  %v6269_v40 = vmul.f32 1.442695, %v6220_v11  ;;  %v6275_v41 = vmul.f32 1.442695, %v6223_v24 }
0x127a   : > { %10876 = vpow2.f32 %v6357_v53  ;;  %9828 = vmatpush3.bf16.msra.mxu0 %v6488_v33  ;;  %v6461_v3 = vadd.f32 %v6460_v44, %v6383_v51  ;;  %v6497_v32 = vpack.c.bf16 %v13709_v35, %v13702_v14  ;;  %v6219_v61 = vsub.f32 %v13498_v43, %v13684_v2  ;;  %v15294_v47 = vld [vmem:[#allocation52_spill] sm:$0xff] }
0x127b   : > { %v10875_v60 = vpop.eup %10874  ;;  %10878 = vpow2.f32 %v6359_v42  ;;  %9829 = vmatprep.subr.bf16.mxu0 %v15250_v46  ;;  %v6222_v31 = vsub.f32 %v13502_v57, %v13684_v2  ;;  %v6226_v33 = vsub.f32 %v13522_v52, %v13689_v55  ;;  %v6229_v11 = vsub.f32 %v13530_v19, %v13689_v55  ;;  %v15295_v57 = vld [vmem:[#allocation53_spill] sm:$0xff] }
0x127c   : > { %v6462_v51 = vadd.f32 %v6461_v3, %v6386_v54  ;;  %10880 = vpow2.f32 %v6269_v40  ;;  %v6267_v13 = vmul.f32 1.442695, %v6219_v61  ;;  %v13728_v53 = vmul.f32 %v10873_v16, %v15294_v47 }
0x127d   : > { %10882 = vpow2.f32 %v6275_v41  ;;  %v6273_v43 = vmul.f32 1.442695, %v6222_v31  ;;  %v6281_v24 = vmul.f32 1.442695, %v6226_v33  ;;  %v6287_v42 = vmul.f32 1.442695, %v6229_v11  ;;  %v13761_v33 = vpop.trf.xlu0 }
0x127e   : > { %9830 = vmatpush3.bf16.msra.mxu0 %v6491_v30  ;;  %v6463_v44 = vadd.f32 %v6462_v51, %v6389_v4  ;;  %10884 = vpow2.f32 %v6267_v13  ;;  %v13731_v10 = vmul.f32 %v10875_v60, %v15295_v57  ;;  %v6225_v52 = vsub.f32 %v13516_v45, %v13684_v2 }
0x127f   : > { %9831 = vmatprep.subr.bf16.mxu0 %v15250_v46  ;;  %10886 = vpow2.f32 %v6273_v43  ;;  %v6228_v19 = vsub.f32 %v13526_v8, %v13684_v2  ;;  %v6232_v54 = vsub.f32 %v13548_v25, %v13689_v55  ;;  %v6235_v30 = vsub.f32 %v13555_v18, %v13689_v55 }
0x1280   : > { %v6464_v16 = vadd.f32 %v6463_v44, %v6392_v62  ;;  %10888 = vpow2.f32 %v6281_v24  ;;  %v6503_v4 = vpack.c.bf16 %v13731_v10, %v13728_v53  ;;  %v6279_v41 = vmul.f32 1.442695, %v6225_v52 }
0x1281   : > { %10890 = vpow2.f32 %v6287_v42  ;;  %v6285_v40 = vmul.f32 1.442695, %v6228_v19  ;;  %v6293_v3 = vmul.f32 1.442695, %v6232_v54  ;;  %v6299_v61 = vmul.f32 1.442695, %v6235_v30 }
0x1282   : > { %9832 = vmatpush3.bf16.msra.mxu0 %v6494_v34  ;;  %v6465_v45 = vadd.f32 %v6464_v16, %v13702_v14  ;;  %v6231_v8 = vsub.f32 %v13544_v29, %v13684_v2  ;;  %v6234_v25 = vsub.f32 %v13551_v56, %v13684_v2  ;;  %10892 = vpow2.f32 %v6279_v41 }
0x1283   : > { %9833 = vmatprep.subr.bf16.mxu0 %v15250_v46  ;;  %v6238_v18 = vsub.f32 %v13572_v26, %v13689_v55  ;;  %v6241_v62 = vsub.f32 %v13579_v39, %v13689_v55  ;;  %v6237_v34 = vsub.f32 %v13568_v12, %v13684_v2  ;;  %10894 = vpow2.f32 %v6285_v40 }
0x1284   : > { %v13756_v14 = vpop.eup %10876  ;;  %v6466_v60 = vadd.f32 %v6465_v45, %v13709_v35  ;;  %v6291_v29 = vmul.f32 1.442695, %v6231_v8  ;;  %v6297_v31 = vmul.f32 1.442695, %v6234_v25  ;;  %10896 = vpow2.f32 %v6293_v3  ;;  %v13782_v25 = vpop.trf.xlu0 }
0x1285   : > { %v13759_v56 = vpop.eup %10878  ;;  %v6305_v51 = vmul.f32 1.442695, %v6238_v18  ;;  %v6311_v26 = vmul.f32 1.442695, %v6241_v62  ;;  %v6240_v39 = vsub.f32 %v13575_v17, %v13684_v2  ;;  %10898 = vpow2.f32 %v6299_v61 }
0x1286   : > { %v10881_v13 = vpop.eup %10880  ;;  %9834 = vmatpush3.bf16.msra.mxu0 %v6497_v32  ;;  %v6467_v12 = vadd.f32 %v6466_v60, %v13712_v49  ;;  %v6303_v11 = vmul.f32 1.442695, %v6237_v34  ;;  %v6244_v35 = vsub.f32 %v13593_v1, %v13689_v55  ;;  %10900 = vpow2.f32 %v6291_v29 }
0x1287   : > { %v10883_v43 = vpop.eup %10882  ;;  %9835 = vmatprep.subr.bf16.mxu0 %v15250_v46  ;;  %v6364_v24 = vmul.f32 %v10881_v13, %v15279_v58  ;;  %v6309_v44 = vmul.f32 1.442695, %v6240_v39  ;;  %v6247_v42 = vsub.f32 %v13600_v9, %v13689_v55  ;;  %10902 = vpow2.f32 %v6297_v31 }
0x1288   : > { %v10885_v17 = vpop.eup %10884  ;;  %v6468_v32 = vadd.f32 %v6467_v12, %v13693_v27  ;;  %v6367_v52 = vmul.f32 %v10883_v43, %v15280_v22  ;;  %v6317_v19 = vmul.f32 1.442695, %v6244_v35  ;;  %10904 = vpow2.f32 %v6305_v51 }
0x1289   : > { %v10887_v54 = vpop.eup %10886  ;;  %v6363_v1 = vmul.f32 %v10885_v17, %v15279_v58  ;;  %v6323_v16 = vmul.f32 1.442695, %v6247_v42  ;;  %v6243_v30 = vsub.f32 %v13590_v38, %v13684_v2  ;;  %v15296_v40 = vpack.c.bf16 %v13693_v27, %v13712_v49 }
0x128a   : > { %v10889_v41 = vpop.eup %10888  ;;  %v6435_v9 = vadd.f32 %v6367_v52, %v6364_v24  ;;  %v6481_v3 = vpack.c.bf16 %v6367_v52, %v6364_v24  ;;  %v6366_v45 = vmul.f32 %v10887_v54, %v15280_v22  ;;  %v6469_v61 = vadd.f32 %v6468_v32, %v13728_v53 }
0x128b   : > { %9836 = vmatpush3.bf16.msra.mxu0 %v15296_v40  ;;  %v10891_v8 = vpop.eup %10890  ;;  %v6370_v58 = vmul.f32 %v10889_v41, %v15281_v37  ;;  %10906 = vpow2.f32 %v6311_v26  ;;  %v6246_v38 = vsub.f32 %v13597_v63, %v13684_v2  ;;  %v6315_v18 = vmul.f32 1.442695, %v6243_v30 }
0x128c   : > { %9837 = vmatprep.subr.bf16.mxu0 %v15250_v46  ;;  %6504 = vmatprep.subr.bf16.mxu1 %v6481_v3  ;;  %v6414_v49 = vadd.f32 %v6366_v45, %v6363_v1  ;;  %v6480_v27 = vpack.c.bf16 %v6366_v45, %v6363_v1  ;;  %v6373_v62 = vmul.f32 %v10891_v8, %v15283_v36  ;;  %v10893_v34 = vpop.eup %10892  ;;  %10908 = vpow2.f32 %v6303_v11  ;;  %v15297_v3 = vld [vmem:[#allocation20_spill] sm:$0xff]  ;;  %v15298_v8 = vld [vmem:[#allocation35_spill] sm:$0xff] }
0x128d   : > { %v13790_v22 = vadd.f32 %v6469_v61, %v13731_v10  ;;  %v6436_v60 = vadd.f32 %v6435_v9, %v6370_v58  ;;  %v6321_v29 = vmul.f32 1.442695, %v6246_v38  ;;  %v6250_v31 = vsub.f32 %v13606_v23, %v13689_v55  ;;  %v10895_v51 = vpop.eup %10894  ;;  %v15299_v38 = vld [vmem:[#allocation78_spill] sm:$0xff] }
0x128e   : > { %6505 = vmatpush1.bf16.msra.mxu1 %v6480_v27  ;;  %v6484_v26 = vpack.c.bf16 %v6373_v62, %v6370_v58  ;;  %v6369_v63 = vmul.f32 %v10893_v34, %v15281_v37  ;;  %10910 = vpow2.f32 %v6309_v44  ;;  %v6253_v39 = vsub.f32 %v13612_v50, %v13689_v55  ;;  %v10897_v13 = vpop.eup %10896 }
0x128f   : > { %9838 = vmatpush3.bf16.msra.mxu0 %v6503_v4  ;;  %v6437_v12 = vadd.f32 %v6436_v60, %v6373_v62  ;;  %v6372_v23 = vmul.f32 %v10895_v51, %v15283_v36  ;;  %10912 = vpow2.f32 %v6317_v19  ;;  %v6329_v11 = vmul.f32 1.442695, %v6250_v31  ;;  %v10899_v35 = vpop.eup %10898  ;;  %v13804_v4 = vpop.trf.xlu0  ;;  %v15300_v62 = vld [vmem:[#allocation19_spill] sm:$0xff]  ;;  %v15301_v60 = vld [vmem:[#allocation77_spill] sm:$0xff] }
0x1290   : > { %9975 = vmatprep.subr.msk.bf16.mxu0 %vm1228_vm9, %v13462_v0  ;;  %6506 = vmatprep.subr.bf16.mxu1 %v6484_v26  ;;  %v6415_v43 = vadd.f32 %v6414_v49, %v6369_v63  ;;  %v6376_v10 = vmul.f32 %v10897_v13, %v15284_v15  ;;  %10914 = vpow2.f32 %v6323_v16  ;;  %v6335_v37 = vmul.f32 1.442695, %v6253_v39  ;;  %v10901_v53 = vpop.eup %10900 }
0x1291   : > { %v6483_v50 = vpack.c.bf16 %v6372_v23, %v6369_v63  ;;  %v6379_v24 = vmul.f32 %v10899_v35, %v15285_v28  ;;  %10916 = vpow2.f32 %v6315_v18  ;;  %v6249_v36 = vsub.f32 %v13603_v59, %v13684_v2  ;;  %v10903_v44 = vpop.eup %10902 }
0x1292   : > { %9840 = vmatmul.mubr.bf16.vlgmr.msra.gmra.mrb[152].mxu0 %v13687_v21  ;;  %v6416_v42 = vadd.f32 %v6415_v43, %v6372_v23  ;;  %v6438_v17 = vadd.f32 %v6437_v12, %v6376_v10  ;;  %v6375_v32 = vmul.f32 %v10901_v53, %v15284_v15  ;;  %10918 = vpow2.f32 %v6321_v29  ;;  %v10905_v52 = vpop.eup %10904  ;;  %v15302_v43 = vld [vmem:[#allocation55_spill] sm:$0xff] }
0x1293   : > { %9844 = vmatpush3.bf16.msra.mxu0 %v13468_v48  ;;  %9845 = vmatprep.mubr.msk.bf16.mxu0 %vm2087_vm11, %v13761_v33  ;;  %v6487_v19 = vpack.c.bf16 %v6379_v24, %v6376_v10  ;;  %v6378_v54 = vmul.f32 %v10903_v44, %v15285_v28  ;;  %10920 = vpow2.f32 %v6329_v11  ;;  %v6252_v59 = vsub.f32 %v13609_v5, %v13684_v2  ;;  %v13823_v49 = vpop.trf.xlu0 }
0x1294   : > { %6507 = vmatpush1.bf16.msra.mxu1 %v6483_v50  ;;  %v6439_v1 = vadd.f32 %v6438_v17, %v6379_v24  ;;  %v6417_v16 = vadd.f32 %v6416_v42, %v6375_v32  ;;  %v6382_v30 = vmul.f32 %v10905_v52, %v15286_v7  ;;  %10922 = vpow2.f32 %v6335_v37 }
0x1295   : > { %v10907_v41 = vpop.eup %10906  ;;  %6508 = vmatprep.subr.bf16.mxu1 %v6487_v19  ;;  %v6486_v15 = vpack.c.bf16 %v6378_v54, %v6375_v32  ;;  %v6327_v40 = vmul.f32 1.442695, %v6249_v36  ;;  %v6333_v9 = vmul.f32 1.442695, %v6252_v59  ;;  %v6256_v45 = vsub.f32 %v15297_v3, %v13689_v55  ;;  %v15304_v36 = vld [vmem:[#allocation36_spill] sm:$0xff]  ;;  %v15306_v3 = vld [vmem:[#allocation79_spill] sm:$0xff] }
0x1296   : > { %v6418_v61 = vadd.f32 %v6417_v16, %v6378_v54  ;;  %v6385_v28 = vmul.f32 %v10907_v41, %v15298_v8  ;;  %v6440_v58 = vadd.f32 %v6439_v1, %v6382_v30  ;;  %v6259_v5 = vsub.f32 %v15299_v38, %v13689_v55  ;;  %v10909_v18 = vpop.eup %10908 }
0x1297   : > { %10924 = vpow2.f32 %v6327_v40  ;;  %v6341_v27 = vmul.f32 1.442695, %v6256_v45  ;;  %v6255_v34 = vsub.f32 %v15300_v62, %v13684_v2  ;;  %v6258_v29 = vsub.f32 %v15301_v60, %v13684_v2  ;;  %v13840_v54 = vpop.trf.xlu0  ;;  %v15305_v40 = vld [vmem:[#allocation39_spill] sm:$0xff] }
0x1298   : > { %6509 = vmatpush1.bf16.msra.mxu1 %v6486_v15  ;;  %v10911_v31 = vpop.eup %10910  ;;  %v6441_v51 = vadd.f32 %v6440_v58, %v6385_v28  ;;  %v6490_v26 = vpack.c.bf16 %v6385_v28, %v6382_v30  ;;  %v6381_v63 = vmul.f32 %v10909_v18, %v15286_v7  ;;  %10926 = vpow2.f32 %v6333_v9  ;;  %v15303_v7 = vld [vmem:[#allocation80_spill] sm:$0xff] }
0x1299   : > { %v10913_v39 = vpop.eup %10912  ;;  %v6384_v13 = vmul.f32 %v10911_v31, %v15298_v8  ;;  %10928 = vpow2.f32 %v6341_v27  ;;  %v6347_v12 = vmul.f32 1.442695, %v6259_v5  ;;  %v6339_v23 = vmul.f32 1.442695, %v6255_v34 }
0x129a   : > { %9846 = vmatmul.mubr.msk.bf16.vlgmr.msra.gmra.mrb[156].mxu0 %vm2087_vm11, %v13782_v25  ;;  %v10915_v11 = vpop.eup %10914  ;;  %6510 = vmatprep.subr.bf16.mxu1 %v6490_v26  ;;  %v6419_v35 = vadd.f32 %v6418_v61, %v6381_v63  ;;  %v6388_v10 = vmul.f32 %v10913_v39, %v15302_v43  ;;  %v6345_v37 = vmul.f32 1.442695, %v6258_v29  ;;  %v6262_v53 = vsub.f32 %v15303_v7, %v13689_v55 }
0x129b   : > { %9849 = vmatprep.mubr.msk.bf16.mxu0 %vm2087_vm11, %v13804_v4  ;;  %v10917_v50 = vpop.eup %10916  ;;  %v6489_v24 = vpack.c.bf16 %v6384_v13, %v6381_v63  ;;  %v6391_v44 = vmul.f32 %v10915_v11, %v15304_v36  ;;  %10930 = vpow2.f32 %v6347_v12  ;;  %v6261_v45 = vsub.f32 %v15306_v3, %v13684_v2  ;;  %v6603_v29 = vpop.trf.xlu0 }
0x129c   : > { %v10919_v42 = vpop.eup %10918  ;;  %v6420_v17 = vadd.f32 %v6419_v35, %v6384_v13  ;;  %v6442_v32 = vadd.f32 %v6441_v51, %v6388_v10  ;;  %v6387_v52 = vmul.f32 %v10917_v50, %v15302_v43  ;;  %10932 = vpow2.f32 %v6339_v23  ;;  %v15307_v23 = vld [vmem:[#allocation51_spill] sm:$0xff] }
0x129d   : > { %v10921_v19 = vpop.eup %10920  ;;  %6511 = vmatpush1.bf16.msra.mxu1 %v6489_v24  ;;  %v6493_v59 = vpack.c.bf16 %v6391_v44, %v6388_v10  ;;  %v6390_v1 = vmul.f32 %v10919_v42, %v15304_v36  ;;  %10934 = vpow2.f32 %v6345_v37  ;;  %v6353_v16 = vmul.f32 1.442695, %v6262_v53 }
0x129e   : > { %v10923_v30 = vpop.eup %10922  ;;  %v6443_v41 = vadd.f32 %v6442_v32, %v6391_v44  ;;  %v6421_v15 = vadd.f32 %v6420_v17, %v6387_v52  ;;  %v6394_v9 = vmul.f32 %v10921_v19, %v15305_v40  ;;  %v6351_v38 = vmul.f32 1.442695, %v6261_v45 }
0x129f   : > { %6512 = vmatprep.subr.bf16.mxu1 %v6493_v59  ;;  %v6492_v61 = vpack.c.bf16 %v6390_v1, %v6387_v52  ;;  %v6397_v8 = vmul.f32 %v10923_v30, %v15292_v6  ;;  %10936 = vpow2.f32 %v6353_v16  ;;  %v6604_v24 = vpop.trf.xlu0 }
0x12a0   : > { %v6422_v28 = vadd.f32 %v6421_v15, %v6390_v1  ;;  %v6444_v58 = vadd.f32 %v6443_v41, %v6394_v9  ;;  %10938 = vpow2.f32 %v6351_v38  ;;  %v15310_v15 = vld [vmem:[#allocation71_spill] sm:$0xff] }
0x12a1   : > { %v10925_v5 = vpop.eup %10924  ;;  %6513 = vmatpush1.bf16.msra.mxu1 %v6492_v61  ;;  %v6496_v18 = vpack.c.bf16 %v6397_v8, %v6394_v9 }
0x12a2   : > { %9850 = vmatmul.mubr.msk.bf16.gmra.mrb[160].mxu0 %vm2087_vm11, %v13823_v49  ;;  %v10927_v27 = vpop.eup %10926  ;;  %v6445_v62 = vadd.f32 %v6444_v58, %v6397_v8  ;;  %v6393_v34 = vmul.f32 %v10925_v5, %v15305_v40 }
0x12a3   : > { %9853 = vmatprep.mubr.msk.bf16.mxu0 %vm2087_vm11, %v13840_v54  ;;  %v10929_v60 = vpop.eup %10928  ;;  %6514 = vmatprep.subr.bf16.mxu1 %v6496_v18  ;;  %v6396_v31 = vmul.f32 %v10927_v27, %v15292_v6  ;;  %v6409_v6 = vmul.f32 %v13759_v56, %v15295_v57  ;;  %v6605_v30 = vpop.trf.xlu0 }
0x12a4   : > { %v6423_v51 = vadd.f32 %v6422_v28, %v6393_v34  ;;  %v6400_v26 = vmul.f32 %v10929_v60, %v15293_v20 }
0x12a5   : > { %v10931_v63 = vpop.eup %10930  ;;  %v6495_v39 = vpack.c.bf16 %v6396_v31, %v6393_v34 }
0x12a6   : > { %v10933_v13 = vpop.eup %10932  ;;  %v6424_v12 = vadd.f32 %v6423_v51, %v6396_v31  ;;  %v6403_v11 = vmul.f32 %v10931_v63, %v15307_v23  ;;  %v6446_v35 = vadd.f32 %v6445_v62, %v6400_v26 }
0x12a7   : > { %v10935_v43 = vpop.eup %10934  ;;  %6515 = vmatpush1.bf16.msra.mxu1 %v6495_v39  ;;  %v6399_v10 = vmul.f32 %v10933_v13, %v15293_v20  ;;  %v6408_v20 = vmul.f32 %v13756_v14, %v15295_v57  ;;  %v15311_v57 = vmov 0   ;;  %v15312_v14 = vld [vmem:[#allocation54_spill] sm:$0xff] }
0x12a8   : > { %v6447_v37 = vadd.f32 %v6446_v35, %v6403_v11  ;;  %v6499_v7 = vpack.c.bf16 %v6403_v11, %v6400_v26  ;;  %v6402_v53 = vmul.f32 %v10935_v43, %v15307_v23 }
0x12a9   : > { %v10937_v50 = vpop.eup %10936  ;;  %v6425_v36 = vadd.f32 %v6424_v12, %v6399_v10 }
0x12aa   : > { %9854 = vmatmul.mubr.msk.bf16.gmra.mrb[164].mxu0 %vm2087_vm11, %v6603_v29  ;;  %6516 = vmatprep.subr.bf16.mxu1 %v6499_v7  ;;  %v6498_v44 = vpack.c.bf16 %v6402_v53, %v6399_v10  ;;  %v6406_v42 = vmul.f32 %v10937_v50, %v15294_v47  ;;  %v10939_v32 = vpop.eup %10938 }
0x12ab   : > { %9857 = vmatprep.mubr.msk.bf16.mxu0 %vm2087_vm11, %v6604_v24  ;;  %v6426_v17 = vadd.f32 %v6425_v36, %v6402_v53  ;;  %v6405_v56 = vmul.f32 %v10939_v32, %v15294_v47 }
0x12ac   : > { %6517 = vmatpush1.bf16.msra.mxu1 %v6498_v44  ;;  %v6448_v52 = vadd.f32 %v6447_v37, %v6406_v42  ;;  %v6502_v19 = vpack.c.bf16 %v6409_v6, %v6406_v42 }
0x12ad   : > { %v6427_v1 = vadd.f32 %v6426_v17, %v6405_v56  ;;  %v6501_v16 = vpack.c.bf16 %v6408_v20, %v6405_v56 }
0x12ae   : > { %v13865_v59 = vadd.f32 %v6448_v52, %v6409_v6  ;;  %6518 = vmatprep.subr.bf16.mxu1 %v6502_v19 }
0x12af   : > { %v13867_v41 = vadd.f32 %v6427_v1, %v6408_v20 }
0x12b0   : > { %15308 = vst [vmem:[#allocation29_spill] sm:$0xff] %v13865_v59  ;;  %6519 = vmatpush1.bf16.msra.mxu1 %v6501_v16 }
0x12b1   : > { %15309 = vst [vmem:[#allocation30_spill] sm:$0xff] %v13867_v41  ;;  %9369 = vmatprep.subr.msk.bf16.mxu1 %vm1228_vm9, %v15310_v15  ;;  %v15327_v15 = vld [vmem:[#allocation63_spill] sm:$0xff] }
0x12b2   : > { %9858 = vmatmul.mubr.msk.bf16.gmra.mrb[168].mxu0 %vm2087_vm11, %v6605_v30 }
0x12b3   : > { %7235 = vmatprep.mubr.bf16.mxu0 %v15311_v57  ;;  %6537 = vmatmul.mubr.bf16.vlgmr.msra.gmra.mrb[144].mxu1 %v13687_v21 }
0x12b4   : > { %6631 = vmatpush1.bf16.msra.mxu1 %v15312_v14  ;;  %6662 = vmatprep.mubr.bf16.mxu1 %v15311_v57 }
0x12b5   : > { %9861 = vmatprep.subr.bf16.mxu1 %v15250_v46 }
0x12bb   : > { %9370 = vmatmul.mubr.msk.bf16.vlgmr.msra.gmra.mrb[148].mxu1 %vm2087_vm11, %v13761_v33 }
0x12bc   : > { %6672 = vmatprep.mubr.bf16.mxu1 %v15311_v57 }
0x12c3   : > { %9371 = vmatmul.mubr.msk.bf16.gmra.mrb[152].mxu1 %vm2087_vm11, %v13782_v25 }
0x12c4   : > { %6682 = vmatprep.mubr.bf16.mxu1 %v15311_v57 }
0x12cb   : > { %9372 = vmatmul.mubr.msk.bf16.gmra.mrb[156].mxu1 %vm2087_vm11, %v13804_v4 }
0x12cc   : > { %6692 = vmatprep.mubr.bf16.mxu1 %v15311_v57 }
0x12d3   : > { %9373 = vmatmul.mubr.msk.bf16.gmra.mrb[160].mxu1 %vm2087_vm11, %v13823_v49 }
0x12d4   : > { %6702 = vmatprep.mubr.bf16.mxu1 %v15311_v57 }
0x12db   : > { %9374 = vmatmul.mubr.msk.bf16.gmra.mrb[164].mxu1 %vm2087_vm11, %v13840_v54 }
0x12dc   : > { %6712 = vmatprep.mubr.bf16.mxu1 %v15311_v57 }
0x12e3   : > { %9375 = vmatmul.mubr.msk.bf16.gmra.mrb[168].mxu1 %vm2087_vm11, %v6603_v29 }
0x12e4   : > { %6722 = vmatprep.mubr.bf16.mxu1 %v15311_v57 }
0x12eb   : > { %9376 = vmatmul.mubr.msk.bf16.gmra.mrb[172].mxu1 %vm2087_vm11, %v6604_v24 }
0x12ec   : > { %6732 = vmatprep.mubr.bf16.mxu1 %v15311_v57 }
0x12f3   : > { %9377 = vmatmul.mubr.msk.bf16.gmra.mrb[176].mxu1 %vm2087_vm11, %v6605_v30 }
0x12f4   : > { %9877 = vmatprep.mubr.msk.bf16.mxu1 %vm11209_vm0, %v15250_v46 }
0x1365   : > { %v13899_v21 = vpop.f32.mrb[152].mxu0 }
0x1366   : > { %15313 = vst [vmem:[#allocation31_spill] sm:$0xff] %v13899_v21  ;;  %v9841_v47 = vpop.f32.mrb[153].mxu0 }
0x1367   : > { %v6582_v33 = vpop.f32.mrb[154].mxu0 }
0x1368   : > { %v9842_v25 = vpop.f32.mrb[155].mxu0  ;;  %v15316_v33 = vld [vmem:[#allocation21_spill] sm:$0xff] }
0x136d   : > { %v13901_v4 = vpop.f32.mrb[156].mxu0 }
0x136e   : > { %v6777_v49 = vpop.f32.mrb[157].mxu0 }
0x136f   : > { %v6882_v54 = vmax.f32 %v6777_v49, %v13901_v4  ;;  %v13904_v40 = vpop.f32.mrb[158].mxu0 }
0x1370   : > { %v6780_v9 = vpop.f32.mrb[159].mxu0 }
0x1371   : > { %v6883_v3 = vmax.f32 %v6780_v9, %v13904_v40 }
0x1375   : > { %v13907_v45 = vpop.f32.mrb[160].mxu0 }
0x1376   : > { %v13909_v61 = vpop.f32.mrb[161].mxu0 }
0x1377   : > { %v6884_v8 = vmax.f32 %v6882_v54, %v13909_v61  ;;  %v13912_v28 = vpop.f32.mrb[162].mxu0 }
0x1378   : > { %v13914_v58 = vpop.f32.mrb[163].mxu0 }
0x1379   : > { %v6885_v38 = vmax.f32 %v6883_v3, %v13914_v58  ;;  %v6886_v5 = vmax.f32 %v6884_v8, %v13907_v45 }
0x137b   : > { %v6887_v18 = vmax.f32 %v6885_v38, %v13912_v28 }
0x137d   : > { %v13919_v27 = vpop.f32.mrb[164].mxu0 }
0x137e   : > { %v13921_v62 = vpop.f32.mrb[165].mxu0 }
0x137f   : > { %v6888_v34 = vmax.f32 %v6886_v5, %v13921_v62  ;;  %v13924_v60 = vpop.f32.mrb[166].mxu0 }
0x1380   : > { %v13926_v29 = vpop.f32.mrb[167].mxu0 }
0x1381   : > { %v6889_v31 = vmax.f32 %v6887_v18, %v13926_v29  ;;  %v6890_v51 = vmax.f32 %v6888_v34, %v13919_v27 }
0x1383   : > { %v6891_v26 = vmax.f32 %v6889_v31, %v13924_v60 }
0x1385   : > { %v13931_v63 = vpop.f32.mrb[168].mxu0 }
0x1386   : > { %v13933_v39 = vpop.f32.mrb[169].mxu0  ;;  %v13938_v23 = vpop.f32.mrb[144].mxu1 }
0x1387   : > { %v6892_v13 = vmax.f32 %v6890_v51, %v13933_v39  ;;  %v13936_v12 = vpop.f32.mrb[170].mxu0  ;;  %15314 = vst [vmem:[#allocation32_spill] sm:$0xff] %v13938_v23  ;;  %v13940_v35 = vpop.f32.mrb[145].mxu1  ;;  %v15325_v23 = vld [vmem:[#allocation56_spill] sm:$0xff] }
0x1388   : > { %v6828_v11 = vpop.f32.mrb[171].mxu0  ;;  %15315 = vst [vmem:[#allocation33_spill] sm:$0xff] %v13940_v35  ;;  %v6542_v37 = vpop.f32.mrb[146].mxu1 }
0x1389   : > { %v6894_v43 = vmax.f32 %v6892_v13, %v13931_v63  ;;  %v6893_v10 = vmax.f32 %v6891_v26, %v6828_v11  ;;  %v6543_v7 = vpop.f32.mrb[147].mxu1 }
0x138b   : > { %v6895_v53 = vmax.f32 %v6893_v10, %v13936_v12 }
0x138d   : > { %v6896_v6 = vmax.f32 %v6894_v43, %v6895_v53 }
0x138e   : > { %v13944_v24 = vpop.f32.mrb[148].mxu1 }
0x138f   : > { %v6897_v50 = vrot.slane %v6896_v6, 4  ;;  %v13946_v44 = vpop.f32.mrb[149].mxu1 }
0x1390   : > { %v13948_v42 = vpop.f32.mrb[150].mxu1 }
0x1391   : > { %v6898_v36 = vmax.f32 %v6896_v6, %v6897_v50  ;;  %v13950_v20 = vpop.f32.mrb[151].mxu1 }
0x1393   : > { %v6899_v17 = vrot.slane %v6898_v36, 2 }
0x1395   : > { %v6900_v32 = vmax.f32 %v6898_v36, %v6899_v17 }
0x1396   : > { %v13952_v19 = vpop.f32.mrb[152].mxu1 }
0x1397   : > { %v6901_v52 = vrot.slane %v6900_v32, 1  ;;  %v6840_v1 = vmax.f32 %v13944_v24, %v13952_v19  ;;  %v13956_v16 = vpop.f32.mrb[153].mxu1 }
0x1398   : > { %v6861_v30 = vmax.f32 %v13946_v44, %v13956_v16  ;;  %v13960_v47 = vpop.f32.mrb[154].mxu1 }
0x1399   : > { %v6902_v56 = vmax.f32 %v6900_v32, %v6901_v52  ;;  %v6841_v54 = vmax.f32 %v13948_v42, %v13960_v47  ;;  %v13967_v3 = vpop.f32.mrb[155].mxu1 }
0x139a   : > { %v6862_v8 = vmax.f32 %v13950_v20, %v13967_v3 }
0x139b   : > { %v13963_v25 = vmax.f32 %v15316_v33, %v6902_v56 }
0x139d   : > { %15317 = vst [vmem:[#allocation34_spill] sm:$0xff] %v13963_v25  ;;  %v6956_v38 = vsub.f32 %v6828_v11, %v13963_v25  ;;  %v6917_v5 = vsub.f32 %v6777_v49, %v13963_v25  ;;  %v6920_v18 = vsub.f32 %v6780_v9, %v13963_v25  ;;  %v6923_v34 = vsub.f32 %v13901_v4, %v13963_v25 }
0x139e   : > { %v6926_v31 = vsub.f32 %v13904_v40, %v13963_v25  ;;  %v6929_v51 = vsub.f32 %v13909_v61, %v13963_v25  ;;  %v6932_v10 = vsub.f32 %v13914_v58, %v13963_v25  ;;  %v13982_v11 = vpop.f32.mrb[156].mxu1  ;;  %v6935_v9 = vsub.f32 %v13907_v45, %v13963_v25 }
0x139f   : > { %v7045_v26 = vmul.f32 1.442695, %v6956_v38  ;;  %v6967_v13 = vmul.f32 1.442695, %v6917_v5  ;;  %v6973_v43 = vmul.f32 1.442695, %v6920_v18  ;;  %v13987_v4 = vmax.f32 %v6840_v1, %v13982_v11 }
0x13a0   : > { %v6979_v49 = vmul.f32 1.442695, %v6923_v34  ;;  %v13989_v40 = vpop.f32.mrb[157].mxu1  ;;  %v6985_v37 = vmul.f32 1.442695, %v6926_v31  ;;  %v6938_v61 = vsub.f32 %v13912_v28, %v13963_v25  ;;  %v6941_v45 = vsub.f32 %v13921_v62, %v13963_v25 }
0x13a1   : > { %10940 = vpow2.f32 %v7045_v26  ;;  %v13994_v7 = vmax.f32 %v6861_v30, %v13989_v40  ;;  %v13996_v58 = vpop.f32.mrb[158].mxu1  ;;  %v6991_v53 = vmul.f32 1.442695, %v6929_v51  ;;  %v6997_v36 = vmul.f32 1.442695, %v6932_v10 }
0x13a2   : > { %10942 = vpow2.f32 %v6967_v13  ;;  %v14001_v6 = vmax.f32 %v6841_v54, %v13996_v58  ;;  %v14003_v50 = vpop.f32.mrb[159].mxu1  ;;  %v6944_v28 = vsub.f32 %v13926_v29, %v13963_v25  ;;  %v7003_v32 = vmul.f32 1.442695, %v6935_v9  ;;  %v15318_v9 = vld [vmem:[#allocation43_spill] sm:$0xff] }
0x13a3   : > { %10944 = vpow2.f32 %v6973_v43  ;;  %v14008_v17 = vmax.f32 %v6862_v8, %v14003_v50  ;;  %v6947_v52 = vsub.f32 %v13919_v27, %v13963_v25  ;;  %v7009_v62 = vmul.f32 1.442695, %v6938_v61  ;;  %v15319_v61 = vld [vmem:[#allocation26_spill] sm:$0xff] }
0x13a4   : > { %10946 = vpow2.f32 %v6979_v49  ;;  %v6950_v56 = vsub.f32 %v13924_v60, %v13963_v25  ;;  %v7015_v1 = vmul.f32 1.442695, %v6941_v45  ;;  %v6953_v30 = vsub.f32 %v13933_v39, %v13963_v25  ;;  %v15320_v45 = vld [vmem:[#allocation41_spill] sm:$0xff] }
0x13a5   : > { %10948 = vpow2.f32 %v6985_v37  ;;  %v7021_v29 = vmul.f32 1.442695, %v6944_v28  ;;  %v6959_v54 = vsub.f32 %v13931_v63, %v13963_v25  ;;  %v7027_v38 = vmul.f32 1.442695, %v6947_v52 }
0x13a6   : > { %10950 = vpow2.f32 %v6991_v53  ;;  %v14018_v8 = vpop.f32.mrb[160].mxu1  ;;  %v6962_v27 = vsub.f32 %v13936_v12, %v13963_v25  ;;  %v7033_v18 = vmul.f32 1.442695, %v6950_v56  ;;  %v7039_v63 = vmul.f32 1.442695, %v6953_v30 }
0x13a7   : > { %10952 = vpow2.f32 %v6997_v36  ;;  %v6844_v60 = vmax.f32 %v13987_v4, %v14018_v8  ;;  %v14024_v5 = vpop.f32.mrb[161].mxu1  ;;  %v7051_v12 = vmul.f32 1.442695, %v6959_v54 }
0x13a8   : > { %10954 = vpow2.f32 %v7003_v32  ;;  %v6865_v39 = vmax.f32 %v13994_v7, %v14024_v5  ;;  %v14028_v34 = vpop.f32.mrb[162].mxu1  ;;  %v7057_v10 = vmul.f32 1.442695, %v6962_v27 }
0x13a9   : > { %10956 = vpow2.f32 %v7009_v62  ;;  %v6845_v51 = vmax.f32 %v14001_v6, %v14028_v34  ;;  %v14032_v26 = vpop.f32.mrb[163].mxu1 }
0x13aa   : > { %10958 = vpow2.f32 %v7015_v1  ;;  %v6866_v43 = vmax.f32 %v14008_v17, %v14032_v26  ;;  %v15321_v17 = vld [vmem:[#allocation27_spill] sm:$0xff] }
0x13ab   : > { %v10941_v31 = vpop.eup %10940  ;;  %10960 = vpow2.f32 %v7021_v29  ;;  %v15322_v29 = vld [vmem:[#allocation44_spill] sm:$0xff] }
0x13ac   : > { %v10943_v13 = vpop.eup %10942  ;;  %10962 = vpow2.f32 %v7027_v38 }
0x13ad   : > { %v10945_v49 = vpop.eup %10944  ;;  %v7061_v4 = vmul.f32 %v10943_v13, %v15318_v9  ;;  %10964 = vpow2.f32 %v7033_v18  ;;  %v15323_v13 = vld [vmem:[#allocation47_spill] sm:$0xff] }
0x13ae   : > { %v10947_v37 = vpop.eup %10946  ;;  %v7064_v7 = vmul.f32 %v10945_v49, %v15319_v61  ;;  %10966 = vpow2.f32 %v7039_v63  ;;  %v14039_v28 = vpop.f32.mrb[164].mxu1 }
0x13af   : > { %v10949_v53 = vpop.eup %10948  ;;  %v7067_v6 = vmul.f32 %v10947_v37, %v15320_v45  ;;  %10968 = vpow2.f32 %v7051_v12  ;;  %v14043_v1 = vmax.f32 %v6844_v60, %v14039_v28  ;;  %v14045_v30 = vpop.f32.mrb[165].mxu1  ;;  %v15324_v60 = vld [vmem:[#allocation49_spill] sm:$0xff]  ;;  %v6471_v45 = vrot.slane %v13790_v22, 4 }
0x13b0   : > { %v10951_v36 = vpop.eup %10950  ;;  %v7152_v32 = vadd.f32 %v7064_v7, %v7061_v4  ;;  %v7181_v52 = vpack.c.bf16 %v7064_v7, %v7061_v4  ;;  %v7070_v62 = vmul.f32 %v10949_v53, %v15321_v17  ;;  %10970 = vpow2.f32 %v7057_v10  ;;  %v14049_v18 = vpop.f32.mrb[166].mxu1  ;;  %v15333_v17 = vld [vmem:[#allocation64_spill] sm:$0xff] }
0x13b1   : > { %v10953_v56 = vpop.eup %10952  ;;  %v7073_v54 = vmul.f32 %v10951_v36, %v15322_v29  ;;  %v6867_v27 = vmax.f32 %v6865_v39, %v14045_v30  ;;  %v6847_v10 = vmax.f32 %v6845_v51, %v14049_v18  ;;  %v14053_v37 = vpop.f32.mrb[167].mxu1  ;;  %v15330_v29 = vld [vmem:[#allocation59_spill] sm:$0xff] }
0x13b2   : > { %v10955_v38 = vpop.eup %10954  ;;  %9862 = vmatpush3.bf16.msra.mxu1 %v7181_v52  ;;  %v7153_v63 = vadd.f32 %v7152_v32, %v7067_v6  ;;  %v7184_v12 = vpack.c.bf16 %v7070_v62, %v7067_v6  ;;  %v7076_v49 = vmul.f32 %v10953_v56, %v15323_v13  ;;  %v6868_v36 = vmax.f32 %v6866_v43, %v14053_v37  ;;  %v15326_v6 = vld [vmem:[#allocation57_spill] sm:$0xff] }
0x13b3   : > { %v10957_v4 = vpop.eup %10956  ;;  %9863 = vmatprep.subr.bf16.mxu1 %v15250_v46  ;;  %v7079_v7 = vmul.f32 %v10955_v38, %v15324_v60  ;;  %v15328_v38 = vld [vmem:[#allocation58_spill] sm:$0xff]  ;;  %v15329_v13 = vld [vmem:[#allocation61_spill] sm:$0xff] }
0x13b4   : > { %v10959_v53 = vpop.eup %10958  ;;  %v7154_v39 = vadd.f32 %v7153_v63, %v7070_v62  ;;  %v7187_v35 = vpack.c.bf16 %v7076_v49, %v7073_v54  ;;  %v7082_v52 = vmul.f32 %v10957_v4, %v15325_v23  ;;  %v7100_v43 = vmul.f32 %v10941_v31, %v15329_v13 }
0x13b5   : > { %v10961_v32 = vpop.eup %10960  ;;  %v7085_v21 = vmul.f32 %v10959_v53, %v15326_v6 }
0x13b6   : > { %v10963_v56 = vpop.eup %10962  ;;  %9864 = vmatpush3.bf16.msra.mxu1 %v7184_v12  ;;  %v7155_v14 = vadd.f32 %v7154_v39, %v7073_v54  ;;  %v7190_v51 = vpack.c.bf16 %v7082_v52, %v7079_v7  ;;  %v7088_v41 = vmul.f32 %v10961_v32, %v15327_v15  ;;  %v14064_v63 = vpop.f32.mrb[168].mxu1  ;;  %v15331_v39 = vld [vmem:[#allocation60_spill] sm:$0xff] }
0x13b7   : > { %v10965_v59 = vpop.eup %10964  ;;  %9865 = vmatprep.subr.bf16.mxu1 %v15250_v46  ;;  %v7091_v60 = vmul.f32 %v10963_v56, %v15328_v38  ;;  %v6848_v54 = vmax.f32 %v14043_v1, %v14064_v63  ;;  %v14069_v12 = vpop.f32.mrb[169].mxu1 }
0x13b8   : > { %v10967_v62 = vpop.eup %10966  ;;  %v7156_v4 = vadd.f32 %v7155_v14, %v7076_v49  ;;  %v7193_v23 = vpack.c.bf16 %v7088_v41, %v7085_v21  ;;  %v7094_v53 = vmul.f32 %v10965_v59, %v15330_v29  ;;  %v6869_v56 = vmax.f32 %v6867_v27, %v14069_v12  ;;  %v14073_v38 = vpop.f32.mrb[170].mxu1  ;;  %v15332_v14 = vld [vmem:[#allocation62_spill] sm:$0xff] }
0x13b9   : > { %v10969_v6 = vpop.eup %10968  ;;  %v7097_v32 = vmul.f32 %v10967_v62, %v15331_v39  ;;  %v6849_v59 = vmax.f32 %v6847_v10, %v14073_v38  ;;  %v14077_v29 = vpop.f32.mrb[171].mxu1 }
0x13ba   : > { %v10971_v15 = vpop.eup %10970  ;;  %9866 = vmatpush3.bf16.msra.mxu1 %v7187_v35  ;;  %v7157_v31 = vadd.f32 %v7156_v4, %v7079_v7  ;;  %v7196_v13 = vpack.c.bf16 %v7094_v53, %v7091_v60  ;;  %v7103_v49 = vmul.f32 %v10969_v6, %v15332_v14  ;;  %v6870_v62 = vmax.f32 %v6868_v36, %v14077_v29 }
0x13bb   : > { %9867 = vmatprep.subr.bf16.mxu1 %v15250_v46  ;;  %v7199_v1 = vpack.c.bf16 %v7100_v43, %v7097_v32  ;;  %v7106_v57 = vmul.f32 %v10971_v15, %v15333_v17  ;;  %v6212_v7 = vsub.f32 -1e+30, %v15316_v33  ;;  %v6472_v15 = vadd.f32 %v6471_v45, %v13790_v22  ;;  %v14101_v22 = vpop.trf.xlu1 }
0x13bc   : > { %v7158_v39 = vadd.f32 %v7157_v31, %v7082_v52 }
0x13bd   : > { %v7202_v27 = vpack.c.bf16 %v7106_v57, %v7103_v49  ;;  %v6473_v45 = vrot.slane %v6472_v15, 2 }
0x13be   : > { %9868 = vmatpush3.bf16.msra.mxu1 %v7190_v51  ;;  %v7159_v35 = vadd.f32 %v7158_v39, %v7085_v21  ;;  %v14085_v10 = vpop.f32.mrb[172].mxu1  ;;  %v6217_v21 = vmul.f32 1.442695, %v6212_v7 }
0x13bf   : > { %9869 = vmatprep.subr.bf16.mxu1 %v15250_v46  ;;  %v6850_v4 = vmax.f32 %v6848_v54, %v14085_v10  ;;  %v14088_v14 = vpop.f32.mrb[173].mxu1 }
0x13c0   : > { %v7160_v6 = vadd.f32 %v7159_v35, %v7088_v41  ;;  %v6871_v36 = vmax.f32 %v6869_v56, %v14088_v14  ;;  %v14092_v52 = vpop.f32.mrb[174].mxu1  ;;  %v6908_v41 = vsub.f32 %v15316_v33, %v13963_v25  ;;  %10972 = vpow2.f32 %v6217_v21  ;;  %v14110_v25 = vpop.trf.xlu1 }
0x13c1   : > { %v6851_v39 = vmax.f32 %v6849_v59, %v14092_v52  ;;  %v14095_v31 = vpop.f32.mrb[175].mxu1  ;;  %v6474_v33 = vadd.f32 %v6473_v45, %v6472_v15 }
0x13c2   : > { %9870 = vmatpush3.bf16.msra.mxu1 %v7193_v23  ;;  %v7161_v51 = vadd.f32 %v7160_v6, %v7091_v60  ;;  %v6872_v54 = vmax.f32 %v6870_v62, %v14095_v31  ;;  %v6913_v23 = vmul.f32 1.442695, %v6908_v41 }
0x13c3   : > { %9871 = vmatprep.subr.bf16.mxu1 %v15250_v46  ;;  %v6475_v17 = vrot.slane %v6474_v33, 1 }
0x13c4   : > { %v7162_v35 = vadd.f32 %v7161_v51, %v7094_v53  ;;  %10974 = vpow2.f32 %v6913_v23 }
0x13c6   : > { %9872 = vmatpush3.bf16.msra.mxu1 %v7196_v13  ;;  %v7163_v56 = vadd.f32 %v7162_v35, %v7097_v32  ;;  %v14104_v60 = vpop.f32.mrb[176].mxu1  ;;  %v15334_v13 = vld [vmem:[#allocation28_spill] sm:$0xff]  ;;  %v15335_v32 = vld [vmem:[#allocation25_spill] sm:$0xff] }
0x13c7   : > { %9873 = vmatprep.subr.bf16.mxu1 %v15250_v46  ;;  %v6852_v7 = vmax.f32 %v6850_v4, %v14104_v60  ;;  %v14107_v6 = vpop.f32.mrb[177].mxu1  ;;  %v5828_v21 = vadd.f32 %v15335_v32, %v15334_v13 }
0x13c8   : > { %v7164_v59 = vadd.f32 %v7163_v56, %v7100_v43  ;;  %v6873_v62 = vmax.f32 %v6871_v36, %v14107_v6  ;;  %v6738_v53 = vpop.f32.mrb[178].mxu1 }
0x13c9   : > { %v6853_v35 = vmax.f32 %v6851_v39, %v6738_v53  ;;  %v6740_v41 = vpop.f32.mrb[179].mxu1  ;;  %v14115_v36 = vpack.c.bf16 %v5828_v21, %v5828_v21  ;;  %v14119_v39 = vpop.trf.xlu1 }
0x13ca   : > { %9874 = vmatpush3.bf16.msra.mxu1 %v7199_v1  ;;  %v7165_v51 = vadd.f32 %v7164_v59, %v7103_v49  ;;  %v6874_v43 = vmax.f32 %v6872_v54, %v6740_v41  ;;  %v10973_v32 = vpop.eup %10972 }
0x13cb   : > { %9875 = vmatprep.subr.bf16.mxu1 %v15250_v46  ;;  %v6854_v56 = vmax.f32 %v6852_v7, %v6853_v35  ;;  %v14125_v7 = vmul.f32 0.0, %v10973_v32 }
0x13cc   : > { %v7166_v4 = vadd.f32 %v7165_v51, %v7106_v57  ;;  %v6875_v15 = vmax.f32 %v6873_v62, %v6874_v43  ;;  %v6476_v57 = vadd.f32 %v6475_v17, %v6474_v33 }
0x13cd   : > { %v6855_v49 = vrot.slane %v6854_v56, 4  ;;  %v14130_v17 = vpop.trf.xlu1 }
0x13ce   : > { %v7167_v45 = vrot.slane %v7166_v4, 4  ;;  %9876 = vmatpush3.bf16.msra.mxu1 %v7202_v27  ;;  %v6876_v1 = vrot.slane %v6875_v15, 4  ;;  %v14127_v51 = vpop.eup %10974  ;;  %v6479_v35 = vadd.f32 %v6476_v57, %v14125_v7 }
0x13cf   : > { %9976 = vmatprep.subr.msk.bf16.mxu1 %vm1228_vm9, %v13462_v0  ;;  %v6856_v13 = vmax.f32 %v6854_v56, %v6855_v49 }
0x13d0   : > { %v7168_v59 = vadd.f32 %v7167_v45, %v7166_v4  ;;  %v6877_v54 = vmax.f32 %v6875_v15, %v6876_v1  ;;  %v7109_v15 = vmul.f32 %v14127_v51, %v6479_v35 }
0x13d1   : > { %9878 = vmatmul.mubr.bf16.vlgmr.msra.gmra.mrb[180].mxu1 %v14115_v36  ;;  %v6857_v27 = vrot.slane %v6856_v13, 2  ;;  %v14145_v32 = vpop.trf.xlu1 }
0x13d2   : > { %v7169_v23 = vrot.slane %v7168_v59, 2  ;;  %9882 = vmatpush3.bf16.msra.mxu1 %v13468_v48  ;;  %9883 = vmatprep.mubr.msk.bf16.mxu1 %vm2087_vm11, %v14101_v22  ;;  %v6878_v0 = vrot.slane %v6877_v54, 2 }
0x13d3   : > { %v6858_v21 = vmax.f32 %v6856_v13, %v6857_v27 }
0x13d4   : > { %v7170_v62 = vadd.f32 %v7169_v23, %v7168_v59  ;;  %v6879_v43 = vmax.f32 %v6877_v54, %v6878_v0 }
0x13d5   : > { %v6859_v33 = vrot.slane %v6858_v21, 1 }
0x13d6   : > { %v7171_v4 = vrot.slane %v7170_v62, 1  ;;  %v6880_v56 = vrot.slane %v6879_v43, 1 }
0x13d7   : > { %v6860_v45 = vmax.f32 %v6858_v21, %v6859_v33 }
0x13d8   : > { %v7172_v48 = vadd.f32 %v7171_v4, %v7170_v62  ;;  %v6881_v49 = vmax.f32 %v6879_v43, %v6880_v56 }
0x13d9   : > { %9884 = vmatmul.mubr.msk.bf16.vlgmr.msra.gmra.mrb[184].mxu1 %vm2087_vm11, %v14110_v25  ;;  %v14140_v1 = vmax.f32 %v13684_v2, %v6860_v45 }
0x13da   : > { %9887 = vmatprep.mubr.msk.bf16.mxu1 %vm2087_vm11, %v14119_v39  ;;  %v14137_v13 = vadd.f32 %v7172_v48, %v7109_v15  ;;  %v14143_v59 = vmax.f32 %v13689_v55, %v6881_v49  ;;  %v6210_v15 = vsub.f32 -1e+30, %v13684_v2 }
0x13db   : > { %v6960_v57 = vsub.f32 %v6738_v53, %v14140_v1  ;;  %v6915_v54 = vsub.f32 %v13944_v24, %v14140_v1  ;;  %v6918_v23 = vsub.f32 %v13948_v42, %v14140_v1  ;;  %v6921_v53 = vsub.f32 %v13952_v19, %v14140_v1 }
0x13dc   : > { %v6961_v27 = vsub.f32 %v6740_v41, %v14143_v59  ;;  %v6916_v0 = vsub.f32 %v13946_v44, %v14143_v59  ;;  %v6919_v62 = vsub.f32 %v13950_v20, %v14143_v59  ;;  %v6922_v21 = vsub.f32 %v13956_v16, %v14143_v59  ;;  %v14167_v16 = vpop.trf.xlu1 }
0x13dd   : > { %v7053_v35 = vmul.f32 1.442695, %v6960_v57  ;;  %v6925_v42 = vsub.f32 %v13967_v3, %v14143_v59  ;;  %v6963_v44 = vmul.f32 1.442695, %v6915_v54  ;;  %v6969_v41 = vmul.f32 1.442695, %v6918_v23 }
0x13de   : > { %v7055_v43 = vmul.f32 1.442695, %v6961_v27  ;;  %v6965_v24 = vmul.f32 1.442695, %v6916_v0  ;;  %v6971_v4 = vmul.f32 1.442695, %v6919_v62  ;;  %v6924_v20 = vsub.f32 %v13960_v47, %v14140_v1 }
0x13df   : > { %10976 = vpow2.f32 %v7053_v35  ;;  %v6977_v19 = vmul.f32 1.442695, %v6922_v21  ;;  %v6928_v33 = vsub.f32 %v13989_v40, %v14143_v59  ;;  %v6931_v3 = vsub.f32 %v14003_v50, %v14143_v59 }
0x13e0   : > { %10978 = vpow2.f32 %v7055_v43  ;;  %v6927_v56 = vsub.f32 %v13982_v11, %v14140_v1  ;;  %v6930_v47 = vsub.f32 %v13996_v58, %v14140_v1  ;;  %v6934_v48 = vsub.f32 %v14024_v5, %v14143_v59  ;;  %v14188_v0 = vpop.trf.xlu1 }
0x13e1   : > { %9888 = vmatmul.mubr.msk.bf16.gmra.mrb[188].mxu1 %vm2087_vm11, %v14130_v17  ;;  %10980 = vpow2.f32 %v6965_v24  ;;  %v6983_v45 = vmul.f32 1.442695, %v6925_v42  ;;  %v6975_v49 = vmul.f32 1.442695, %v6921_v53  ;;  %v6981_v40 = vmul.f32 1.442695, %v6924_v20 }
0x13e2   : > { %9891 = vmatprep.mubr.msk.bf16.mxu1 %vm2087_vm11, %v14145_v32  ;;  %10982 = vpow2.f32 %v6971_v4  ;;  %v6989_v57 = vmul.f32 1.442695, %v6928_v33  ;;  %v6937_v50 = vsub.f32 %v14032_v26, %v14143_v59  ;;  %v6995_v54 = vmul.f32 1.442695, %v6931_v3 }
0x13e3   : > { %10984 = vpow2.f32 %v6963_v44  ;;  %v6933_v11 = vsub.f32 %v14018_v8, %v14140_v1  ;;  %v6936_v58 = vsub.f32 %v14028_v34, %v14140_v1  ;;  %v6987_v5 = vmul.f32 1.442695, %v6927_v56 }
0x13e4   : > { %10986 = vpow2.f32 %v6969_v41  ;;  %v6993_v23 = vmul.f32 1.442695, %v6930_v47  ;;  %v7001_v27 = vmul.f32 1.442695, %v6934_v48  ;;  %v6940_v62 = vsub.f32 %v14045_v30, %v14143_v59  ;;  %v14217_v3 = vpop.trf.xlu1 }
0x13e5   : > { %10988 = vpow2.f32 %v6977_v19  ;;  %v6943_v26 = vsub.f32 %v14053_v37, %v14143_v59  ;;  %v6939_v21 = vsub.f32 %v14039_v28, %v14140_v1  ;;  %v7007_v8 = vmul.f32 1.442695, %v6937_v50 }
0x13e6   : > { %10990 = vpow2.f32 %v6983_v45  ;;  %v6999_v34 = vmul.f32 1.442695, %v6933_v11  ;;  %v6942_v35 = vsub.f32 %v14049_v18, %v14140_v1  ;;  %v7005_v30 = vmul.f32 1.442695, %v6936_v58 }
0x13e7   : > { %10992 = vpow2.f32 %v6975_v49  ;;  %v6946_v37 = vsub.f32 %v14069_v12, %v14143_v59  ;;  %v6949_v28 = vsub.f32 %v14077_v29, %v14143_v59  ;;  %v6945_v43 = vsub.f32 %v14064_v63, %v14140_v1 }
0x13e8   : > { %10994 = vpow2.f32 %v6981_v40  ;;  %v6948_v18 = vsub.f32 %v14073_v38, %v14140_v1  ;;  %v6952_v24 = vsub.f32 %v14088_v14, %v14143_v59  ;;  %v7013_v42 = vmul.f32 1.442695, %v6940_v62 }
0x13e9   : > { %9892 = vmatmul.mubr.msk.bf16.gmra.mrb[192].mxu1 %vm2087_vm11, %v14167_v16  ;;  %v14206_v53 = vpop.eup %10976  ;;  %10996 = vpow2.f32 %v6989_v57  ;;  %v7019_v12 = vmul.f32 1.442695, %v6943_v26  ;;  %v7011_v44 = vmul.f32 1.442695, %v6939_v21  ;;  %v7017_v29 = vmul.f32 1.442695, %v6942_v35 }
0x13ea   : > { %9895 = vmatprep.mubr.msk.bf16.mxu1 %vm2087_vm11, %v14188_v0  ;;  %v14214_v4 = vpop.eup %10978  ;;  %10998 = vpow2.f32 %v6995_v54  ;;  %v7025_v20 = vmul.f32 1.442695, %v6946_v37  ;;  %v7031_v19 = vmul.f32 1.442695, %v6949_v28  ;;  %v7023_v38 = vmul.f32 1.442695, %v6945_v43 }
0x13eb   : > { %v10981_v41 = vpop.eup %10980  ;;  %11000 = vpow2.f32 %v6987_v5  ;;  %v6955_v14 = vsub.f32 %v14095_v31, %v14143_v59  ;;  %v7029_v48 = vmul.f32 1.442695, %v6948_v18  ;;  %v14222_v45 = vmul.f32 1.442695, %v6952_v24 }
0x13ec   : > { %v10983_v33 = vpop.eup %10982  ;;  %v7060_v63 = vmul.f32 %v10981_v41, %v15318_v9  ;;  %11002 = vpow2.f32 %v6993_v23  ;;  %v6951_v57 = vsub.f32 %v14085_v10, %v14140_v1  ;;  %v6954_v50 = vsub.f32 %v14092_v52, %v14140_v1  ;;  %v15336_v23 = vld [vmem:[#allocation41_spill] sm:$0xff] }
0x13ed   : > { %v10985_v56 = vpop.eup %10984  ;;  %v7063_v47 = vmul.f32 %v10983_v33, %v15319_v61  ;;  %11004 = vpow2.f32 %v7001_v27  ;;  %v6958_v10 = vsub.f32 %v14107_v6, %v14143_v59  ;;  %v15337_v62 = vmov 0  }
0x13ee   : > { %v10987_v49 = vpop.eup %10986  ;;  %v7059_v40 = vmul.f32 %v10985_v56, %v15318_v9  ;;  %11006 = vpow2.f32 %v7007_v8  ;;  %v7043_v9 = vmul.f32 1.442695, %v6955_v14  ;;  %v15338_v8 = vld [vmem:[#allocation27_spill] sm:$0xff]  ;;  %v7035_v28 = vmul.f32 1.442695, %v6951_v57 }
0x13ef   : > { %v10989_v54 = vpop.eup %10988  ;;  %v7131_v11 = vadd.f32 %v7063_v47, %v7060_v63  ;;  %v7180_v31 = vpack.c.bf16 %v7063_v47, %v7060_v63  ;;  %v7062_v58 = vmul.f32 %v10987_v49, %v15319_v61  ;;  %11008 = vpow2.f32 %v6999_v34  ;;  %v15339_v63 = vld [vmem:[#allocation44_spill] sm:$0xff]  ;;  %v15340_v47 = vld [vmem:[#allocation47_spill] sm:$0xff] }
0x13f0   : > { %v10991_v5 = vpop.eup %10990  ;;  %v7066_v27 = vmul.f32 %v10989_v54, %v15336_v23  ;;  %11010 = vpow2.f32 %v7005_v30  ;;  %v7041_v18 = vmul.f32 1.442695, %v6954_v50 }
0x13f1   : > { %9896 = vmatmul.mubr.msk.bf16.gmra.mrb[196].mxu1 %vm2087_vm11, %v14217_v3  ;;  %v10993_v52 = vpop.eup %10992  ;;  %7203 = vmatprep.subr.bf16.mxu0 %v7180_v31  ;;  %v7110_v26 = vadd.f32 %v7062_v58, %v7059_v40  ;;  %v7179_v21 = vpack.c.bf16 %v7062_v58, %v7059_v40  ;;  %v7069_v61 = vmul.f32 %v10991_v5, %v15338_v8  ;;  %11012 = vpow2.f32 %v7013_v42 }
0x13f2   : > { %7934 = vmatprep.mubr.bf16.mxu1 %v15337_v62  ;;  %v10995_v35 = vpop.eup %10994  ;;  %v7132_v37 = vadd.f32 %v7131_v11, %v7066_v27  ;;  %v7065_v34 = vmul.f32 %v10993_v52, %v15336_v23  ;;  %11014 = vpow2.f32 %v7019_v12  ;;  %v6957_v12 = vsub.f32 %v14104_v60, %v14140_v1 }
0x13f3   : > { %v10997_v30 = vpop.eup %10996  ;;  %7204 = vmatpush1.bf16.msra.mxu0 %v7179_v21  ;;  %v7183_v43 = vpack.c.bf16 %v7069_v61, %v7066_v27  ;;  %v7068_v6 = vmul.f32 %v10995_v35, %v15338_v8  ;;  %11016 = vpow2.f32 %v7011_v44  ;;  %v7049_v31 = vmul.f32 1.442695, %v6958_v10 }
0x13f4   : > { %v10999_v24 = vpop.eup %10998  ;;  %v7133_v41 = vadd.f32 %v7132_v37, %v7069_v61  ;;  %v7111_v33 = vadd.f32 %v7110_v26, %v7065_v34  ;;  %v7072_v14 = vmul.f32 %v10997_v30, %v15339_v63  ;;  %11018 = vpow2.f32 %v7017_v29  ;;  %v15342_v26 = vld [vmem:[#allocation56_spill] sm:$0xff] }
0x13f5   : > { %v11001_v42 = vpop.eup %11000  ;;  %7205 = vmatprep.subr.bf16.mxu0 %v7183_v43  ;;  %v7182_v56 = vpack.c.bf16 %v7068_v6, %v7065_v34  ;;  %v7075_v49 = vmul.f32 %v10999_v24, %v15340_v47  ;;  %11020 = vpow2.f32 %v7025_v20  ;;  %v15341_v20 = vld [vmem:[#allocation49_spill] sm:$0xff]  ;;  %v6211_v37 = vsub.f32 -1e+30, %v13689_v55 }
0x13f6   : > { %v11003_v40 = vpop.eup %11002  ;;  %v7112_v57 = vadd.f32 %v7111_v33, %v7068_v6  ;;  %v7134_v54 = vadd.f32 %v7133_v41, %v7072_v14  ;;  %v7071_v44 = vmul.f32 %v11001_v42, %v15339_v63  ;;  %11022 = vpow2.f32 %v7031_v19  ;;  %v15343_v24 = vld [vmem:[#allocation57_spill] sm:$0xff] }
0x13f7   : > { %v11005_v50 = vpop.eup %11004  ;;  %7206 = vmatpush1.bf16.msra.mxu0 %v7182_v56  ;;  %v7186_v11 = vpack.c.bf16 %v7075_v49, %v7072_v14  ;;  %v7074_v29 = vmul.f32 %v11003_v40, %v15340_v47  ;;  %11024 = vpow2.f32 %v7023_v38  ;;  %v7047_v19 = vmul.f32 1.442695, %v6957_v12  ;;  %v15344_v33 = vld [vmem:[#allocation29_spill] sm:$0xff] }
0x13f8   : > { %v11007_v58 = vpop.eup %11006  ;;  %v7135_v5 = vadd.f32 %v7134_v54, %v7075_v49  ;;  %v7113_v23 = vadd.f32 %v7112_v57, %v7071_v44  ;;  %v7078_v27 = vmul.f32 %v11005_v50, %v15341_v20  ;;  %11026 = vpow2.f32 %v7029_v48 }
0x13f9   : > { %v11009_v60 = vpop.eup %11008  ;;  %7207 = vmatprep.subr.bf16.mxu0 %v7186_v11  ;;  %v7185_v52 = vpack.c.bf16 %v7074_v29, %v7071_v44  ;;  %v7081_v21 = vmul.f32 %v11007_v58, %v15342_v26  ;;  %11028 = vpow2.f32 %v14222_v45  ;;  %v6450_v63 = vrot.slane %v15344_v33, 4  ;;  %v15346_v44 = vld [vmem:[#allocation30_spill] sm:$0xff] }
0x13fa   : > { %v11011_v8 = vpop.eup %11010  ;;  %v7114_v61 = vadd.f32 %v7113_v23, %v7074_v29  ;;  %v7136_v35 = vadd.f32 %v7135_v5, %v7078_v27  ;;  %v7077_v38 = vmul.f32 %v11009_v60, %v15341_v20  ;;  %11030 = vpow2.f32 %v7043_v9  ;;  %v15345_v9 = vld [vmem:[#allocation63_spill] sm:$0xff]  ;;  %v15347_v58 = vld [vmem:[#allocation58_spill] sm:$0xff] }
0x13fb   : > { %v11013_v10 = vpop.eup %11012  ;;  %7208 = vmatpush1.bf16.msra.mxu0 %v7185_v52  ;;  %v7189_v34 = vpack.c.bf16 %v7081_v21, %v7078_v27  ;;  %v7080_v48 = vmul.f32 %v11011_v8, %v15342_v26  ;;  %11032 = vpow2.f32 %v7035_v28  ;;  %v6215_v40 = vmul.f32 1.442695, %v6211_v37  ;;  %v15348_v27 = vld [vmem:[#allocation59_spill] sm:$0xff] }
0x13fc   : > { %v11015_v30 = vpop.eup %11014  ;;  %v7137_v43 = vadd.f32 %v7136_v35, %v7081_v21  ;;  %v7115_v6 = vadd.f32 %v7114_v61, %v7077_v38  ;;  %v7084_v45 = vmul.f32 %v11013_v10, %v15343_v24  ;;  %11034 = vpow2.f32 %v7041_v18 }
0x13fd   : > { %v11017_v41 = vpop.eup %11016  ;;  %7209 = vmatprep.subr.bf16.mxu0 %v7189_v34  ;;  %v7188_v14 = vpack.c.bf16 %v7080_v48, %v7077_v38  ;;  %v7087_v42 = vmul.f32 %v11015_v30, %v15345_v9  ;;  %11036 = vpow2.f32 %v7049_v31  ;;  %v6429_v50 = vrot.slane %v15346_v44, 4 }
0x13fe   : > { %v11019_v56 = vpop.eup %11018  ;;  %v7116_v47 = vadd.f32 %v7115_v6, %v7080_v48  ;;  %v7138_v49 = vadd.f32 %v7137_v43, %v7084_v45  ;;  %v7083_v12 = vmul.f32 %v11017_v41, %v15343_v24  ;;  %11038 = vpow2.f32 %v7047_v19  ;;  %v15349_v43 = vld [vmem:[#allocation60_spill] sm:$0xff]  ;;  %v15350_v41 = vld [vmem:[#allocation61_spill] sm:$0xff] }
0x13ff   : > { %v11021_v28 = vpop.eup %11020  ;;  %7210 = vmatpush1.bf16.msra.mxu0 %v7188_v14  ;;  %v7192_v57 = vpack.c.bf16 %v7087_v42, %v7084_v45  ;;  %v7086_v18 = vmul.f32 %v11019_v56, %v15345_v9  ;;  %v6451_v23 = vadd.f32 %v6450_v63, %v15344_v33  ;;  %v6213_v26 = vmul.f32 1.442695, %v6210_v15  ;;  %v15351_v56 = vld [vmem:[#allocation64_spill] sm:$0xff] }
0x1400   : > { %v11023_v54 = vpop.eup %11022  ;;  %v7139_v11 = vadd.f32 %v7138_v49, %v7087_v42  ;;  %v7117_v29 = vadd.f32 %v7116_v47, %v7083_v12  ;;  %v7090_v5 = vmul.f32 %v11021_v28, %v15347_v58  ;;  %11040 = vpow2.f32 %v6215_v40 }
0x1401   : > { %v11025_v31 = vpop.eup %11024  ;;  %7211 = vmatprep.subr.bf16.mxu0 %v7192_v57  ;;  %v7191_v20 = vpack.c.bf16 %v7086_v18, %v7083_v12  ;;  %v7093_v60 = vmul.f32 %v11023_v54, %v15348_v27  ;;  %v6907_v10 = vsub.f32 %v13689_v55, %v14143_v59  ;;  %v6430_v34 = vadd.f32 %v6429_v50, %v15346_v44  ;;  %v15352_v50 = vld [vmem:[#allocation62_spill] sm:$0xff] }
0x1402   : > { %v11027_v52 = vpop.eup %11026  ;;  %v7118_v21 = vadd.f32 %v7117_v29, %v7086_v18  ;;  %v7140_v19 = vadd.f32 %v7139_v11, %v7090_v5  ;;  %v7089_v8 = vmul.f32 %v11025_v31, %v15347_v58  ;;  %v6452_v24 = vrot.slane %v6451_v23, 2 }
0x1403   : > { %v11029_v61 = vpop.eup %11028  ;;  %7212 = vmatpush1.bf16.msra.mxu0 %v7191_v20  ;;  %v7195_v35 = vpack.c.bf16 %v7093_v60, %v7090_v5  ;;  %v7092_v38 = vmul.f32 %v11027_v52, %v15348_v27  ;;  %v6906_v63 = vsub.f32 %v13684_v2, %v14140_v1  ;;  %v7105_v47 = vmul.f32 %v14214_v4, %v15351_v56 }
0x1404   : > { %v11031_v37 = vpop.eup %11030  ;;  %v7141_v48 = vadd.f32 %v7140_v19, %v7093_v60  ;;  %v7119_v30 = vadd.f32 %v7118_v21, %v7089_v8  ;;  %v7096_v15 = vmul.f32 %v11029_v61, %v15349_v43  ;;  %v7104_v40 = vmul.f32 %v14206_v53, %v15351_v56 }
0x1405   : > { %v11033_v6 = vpop.eup %11032  ;;  %7213 = vmatprep.subr.bf16.mxu0 %v7195_v35  ;;  %v7194_v45 = vpack.c.bf16 %v7092_v38, %v7089_v8  ;;  %v7099_v33 = vmul.f32 %v11031_v37, %v15350_v41  ;;  %v6911_v57 = vmul.f32 1.442695, %v6907_v10  ;;  %v6431_v54 = vrot.slane %v6430_v34, 2 }
0x1406   : > { %v11035_v14 = vpop.eup %11034  ;;  %v7120_v9 = vadd.f32 %v7119_v30, %v7092_v38  ;;  %v7142_v42 = vadd.f32 %v7141_v48, %v7096_v15  ;;  %v7095_v55 = vmul.f32 %v11033_v6, %v15349_v43  ;;  %11042 = vpow2.f32 %v6213_v26  ;;  %v15354_v43 = vld [vmem:[#allocation54_spill] sm:$0xff] }
0x1407   : > { %v11037_v49 = vpop.eup %11036  ;;  %7214 = vmatpush1.bf16.msra.mxu0 %v7194_v45  ;;  %v7198_v12 = vpack.c.bf16 %v7099_v33, %v7096_v15  ;;  %v7098_v28 = vmul.f32 %v11035_v14, %v15350_v41  ;;  %v6909_v58 = vmul.f32 1.442695, %v6906_v63  ;;  %v6453_v5 = vadd.f32 %v6452_v24, %v6451_v23  ;;  %v15353_v23 = vld [vmem:[#allocation71_spill] sm:$0xff] }
0x1408   : > { %v11039_v18 = vpop.eup %11038  ;;  %v7143_v2 = vadd.f32 %v7142_v42, %v7099_v33  ;;  %v7121_v44 = vadd.f32 %v7120_v9, %v7095_v55  ;;  %v7102_v11 = vmul.f32 %v11037_v49, %v15352_v50  ;;  %11044 = vpow2.f32 %v6911_v57 }
0x1409   : > { %7215 = vmatprep.subr.bf16.mxu0 %v7198_v12  ;;  %v7197_v29 = vpack.c.bf16 %v7098_v28, %v7095_v55  ;;  %v7101_v4 = vmul.f32 %v11039_v18, %v15352_v50  ;;  %v6432_v53 = vadd.f32 %v6431_v54, %v6430_v34  ;;  %11046 = vpow2.f32 %v6909_v58 }
0x140a   : > { %v7122_v31 = vadd.f32 %v7121_v44, %v7098_v28  ;;  %v7144_v20 = vadd.f32 %v7143_v2, %v7102_v11  ;;  %v7201_v27 = vpack.c.bf16 %v7105_v47, %v7102_v11  ;;  %v11041_v19 = vpop.eup %11040  ;;  %v6454_v8 = vrot.slane %v6453_v5, 1 }
0x140b   : > { %7216 = vmatpush1.bf16.msra.mxu0 %v7197_v29  ;;  %v7200_v60 = vpack.c.bf16 %v7104_v40, %v7101_v4  ;;  %v6433_v35 = vrot.slane %v6432_v53, 1  ;;  %v14284_v6 = vmul.f32 0.0, %v11041_v19 }
0x140c   : > { %v7145_v52 = vadd.f32 %v7144_v20, %v7105_v47  ;;  %7217 = vmatprep.subr.bf16.mxu0 %v7201_v27  ;;  %v7123_v21 = vadd.f32 %v7122_v31, %v7101_v4  ;;  %v6455_v37 = vadd.f32 %v6454_v8, %v6453_v5 }
0x140d   : > { %v6434_v15 = vadd.f32 %v6433_v35, %v6432_v53 }
0x140e   : > { %v7146_v26 = vrot.slane %v7145_v52, 4  ;;  %v7124_v61 = vadd.f32 %v7123_v21, %v7104_v40  ;;  %v6478_v63 = vadd.f32 %v6455_v37, %v14284_v6 }
0x140f   : > { %7218 = vmatpush1.bf16.msra.mxu0 %v7200_v60 }
0x1410   : > { %v7147_v38 = vadd.f32 %v7146_v26, %v7145_v52  ;;  %v7125_v10 = vrot.slane %v7124_v61, 4  ;;  %9386 = vmatprep.subr.msk.bf16.mxu0 %vm1228_vm9, %v15353_v23  ;;  %v11043_v34 = vpop.eup %11042 }
0x1411   : > { %v14289_v33 = vmul.f32 0.0, %v11043_v34 }
0x1412   : > { %v7148_v48 = vrot.slane %v7147_v38, 2  ;;  %v7126_v30 = vadd.f32 %v7125_v10, %v7124_v61  ;;  %7236 = vmatmul.mubr.bf16.vlgmr.msra.gmra.mrb[172].mxu0 %v14115_v36  ;;  %v14287_v41 = vpop.eup %11044 }
0x1413   : > { %7330 = vmatpush1.bf16.msra.mxu0 %v15354_v43  ;;  %7361 = vmatprep.mubr.bf16.mxu0 %v15337_v62  ;;  %v14292_v9 = vpop.eup %11046  ;;  %v6477_v42 = vadd.f32 %v6434_v15, %v14289_v33  ;;  %v7108_v47 = vmul.f32 %v14287_v41, %v6478_v63 }
0x1414   : > { %v7149_v24 = vadd.f32 %v7148_v48, %v7147_v38  ;;  %v7127_v45 = vrot.slane %v7126_v30, 2  ;;  %9899 = vmatprep.subr.bf16.mxu0 %v15250_v46 }
0x1415   : > { %v7107_v12 = vmul.f32 %v14292_v9, %v6477_v42 }
0x1416   : > { %v7150_v14 = vrot.slane %v7149_v24, 1  ;;  %v7128_v36 = vadd.f32 %v7127_v45, %v7126_v30 }
0x1418   : > { %v7151_v55 = vadd.f32 %v7150_v14, %v7149_v24  ;;  %v7129_v56 = vrot.slane %v7128_v36, 1  ;;  %v15358_v14 = vld [vmem:[#allocation34_spill] sm:$0xff] }
0x141a   : > { %v7130_v49 = vadd.f32 %v7129_v56, %v7128_v36  ;;  %9387 = vmatmul.mubr.msk.bf16.vlgmr.msra.gmra.mrb[176].mxu0 %vm2087_vm11, %v14101_v22  ;;  %v14299_v28 = vadd.f32 %v7151_v55, %v7108_v47 }
0x141b   : > { %7371 = vmatprep.mubr.bf16.mxu0 %v15337_v62 }
0x141c   : > { %15355 = vst [vmem:[#allocation42_spill] sm:$0xff] %v14299_v28  ;;  %v14302_v40 = vadd.f32 %v7130_v49, %v7107_v12 }
0x141e   : > { %15356 = vst [vmem:[#allocation45_spill] sm:$0xff] %v14302_v40 }
0x1422   : > { %9388 = vmatmul.mubr.msk.bf16.gmra.mrb[180].mxu0 %vm2087_vm11, %v14110_v25  ;;  %v15357_v25 = vld [vmem:[#allocation31_spill] sm:$0xff] }
0x1423   : > { %7381 = vmatprep.mubr.bf16.mxu0 %v15337_v62  ;;  %v6587_v22 = vadd.f32 %v15357_v25, %v14125_v7 }
0x142a   : > { %9389 = vmatmul.mubr.msk.bf16.gmra.mrb[184].mxu0 %vm2087_vm11, %v14119_v39  ;;  %v7178_v39 = vmul.f32 %v14127_v51, %v6587_v22 }
0x142b   : > { %7391 = vmatprep.mubr.bf16.mxu0 %v15337_v62 }
0x1432   : > { %9390 = vmatmul.mubr.msk.bf16.gmra.mrb[188].mxu0 %vm2087_vm11, %v14130_v17 }
0x1433   : > { %7401 = vmatprep.mubr.bf16.mxu0 %v15337_v62 }
0x143a   : > { %9391 = vmatmul.mubr.msk.bf16.gmra.mrb[192].mxu0 %vm2087_vm11, %v14145_v32 }
0x143b   : > { %7411 = vmatprep.mubr.bf16.mxu0 %v15337_v62 }
0x1442   : > { %9392 = vmatmul.mubr.msk.bf16.gmra.mrb[196].mxu0 %vm2087_vm11, %v14167_v16 }
0x1443   : > { %7421 = vmatprep.mubr.bf16.mxu0 %v15337_v62 }
0x144a   : > { %9393 = vmatmul.mubr.msk.bf16.gmra.mrb[200].mxu0 %vm2087_vm11, %v14188_v0 }
0x144b   : > { %7431 = vmatprep.mubr.bf16.mxu0 %v15337_v62 }
0x1452   : > { %9394 = vmatmul.mubr.msk.bf16.gmra.mrb[204].mxu0 %vm2087_vm11, %v14217_v3 }
0x1453   : > { %9915 = vmatprep.mubr.msk.bf16.mxu0 %vm11209_vm0, %v15250_v46 }
0x14a4   : > { %v7278_v17 = vpop.f32.mrb[180].mxu1 }
0x14a5   : > { %v14329_v32 = vadd.f32 %v7278_v17, %v7178_v39  ;;  %v9879_v16 = vpop.f32.mrb[181].mxu1 }
0x14a6   : > { %v7281_v57 = vpop.f32.mrb[182].mxu1 }
0x14a7   : > { %v9880_v18 = vpop.f32.mrb[183].mxu1 }
0x14ac   : > { %v9885_v0 = vpop.f32.mrb[184].mxu1 }
0x14ad   : > { %v7476_v54 = vpop.f32.mrb[185].mxu1 }
0x14ae   : > { %v7581_v2 = vmax.f32 %v7476_v54, %v9885_v0  ;;  %v9886_v44 = vpop.f32.mrb[186].mxu1 }
0x14af   : > { %v7479_v50 = vpop.f32.mrb[187].mxu1 }
0x14b0   : > { %v7582_v3 = vmax.f32 %v7479_v50, %v9886_v44 }
0x14b4   : > { %v9889_v11 = vpop.f32.mrb[188].mxu1 }
0x14b5   : > { %v7492_v29 = vpop.f32.mrb[189].mxu1 }
0x14b6   : > { %v7583_v4 = vmax.f32 %v7581_v2, %v7492_v29  ;;  %v9890_v58 = vpop.f32.mrb[190].mxu1 }
0x14b7   : > { %v7495_v5 = vpop.f32.mrb[191].mxu1 }
0x14b8   : > { %v7584_v7 = vmax.f32 %v7582_v3, %v7495_v5  ;;  %v7585_v31 = vmax.f32 %v7583_v4, %v9889_v11 }
0x14ba   : > { %v7586_v51 = vmax.f32 %v7584_v7, %v9890_v58 }
0x14bc   : > { %v14331_v20 = vpop.f32.mrb[192].mxu1 }
0x14bd   : > { %v7508_v27 = vpop.f32.mrb[193].mxu1 }
0x14be   : > { %v7587_v60 = vmax.f32 %v7585_v31, %v7508_v27  ;;  %v14333_v53 = vpop.f32.mrb[194].mxu1 }
0x14bf   : > { %v7511_v52 = vpop.f32.mrb[195].mxu1 }
0x14c0   : > { %v7588_v21 = vmax.f32 %v7586_v51, %v7511_v52  ;;  %v7589_v19 = vmax.f32 %v7587_v60, %v14331_v20 }
0x14c2   : > { %v7590_v8 = vmax.f32 %v7588_v21, %v14333_v53 }
0x14c4   : > { %v14337_v26 = vpop.f32.mrb[196].mxu1 }
0x14c5   : > { %v14339_v61 = vpop.f32.mrb[197].mxu1 }
0x14c6   : > { %v7591_v35 = vmax.f32 %v7589_v19, %v14339_v61  ;;  %v14342_v38 = vpop.f32.mrb[198].mxu1 }
0x14c7   : > { %v7527_v10 = vpop.f32.mrb[199].mxu1 }
0x14c8   : > { %v7593_v23 = vmax.f32 %v7591_v35, %v14337_v26  ;;  %v7592_v37 = vmax.f32 %v7590_v8, %v7527_v10 }
0x14ca   : > { %v7594_v48 = vmax.f32 %v7592_v37, %v14342_v38 }
0x14cc   : > { %v7595_v30 = vmax.f32 %v7593_v23, %v7594_v48 }
0x14ce   : > { %v7596_v34 = vrot.slane %v7595_v30, 4 }
0x14d0   : > { %v7597_v43 = vmax.f32 %v7595_v30, %v7596_v34  ;;  %v15363_v34 = vld [vmem:[#allocation37_spill] sm:$0xff] }
0x14d2   : > { %v7598_v15 = vrot.slane %v7597_v43, 2 }
0x14d4   : > { %v7599_v24 = vmax.f32 %v7597_v43, %v7598_v15 }
0x14d6   : > { %v7600_v45 = vrot.slane %v7599_v24, 1 }
0x14d8   : > { %v7601_v63 = vmax.f32 %v7599_v24, %v7600_v45  ;;  %v15364_v45 = vld [vmem:[#allocation23_spill] sm:$0xff] }
0x14da   : > { %v7604_v36 = vmax.f32 %v15358_v14, %v7601_v63 }
0x14dc   : > { %v7655_v42 = vsub.f32 %v7527_v10, %v7604_v36  ;;  %v7616_v55 = vsub.f32 %v7476_v54, %v7604_v36  ;;  %v7619_v56 = vsub.f32 %v7479_v50, %v7604_v36  ;;  %v7622_v47 = vsub.f32 %v9885_v0, %v7604_v36 }
0x14dd   : > { %v7625_v49 = vsub.f32 %v9886_v44, %v7604_v36  ;;  %v7628_v12 = vsub.f32 %v7492_v29, %v7604_v36  ;;  %v7631_v25 = vsub.f32 %v7495_v5, %v7604_v36  ;;  %v7634_v22 = vsub.f32 %v9889_v11, %v7604_v36 }
0x14de   : > { %v7744_v39 = vmul.f32 1.442695, %v7655_v42  ;;  %v7666_v17 = vmul.f32 1.442695, %v7616_v55  ;;  %v7672_v16 = vmul.f32 1.442695, %v7619_v56  ;;  %v7637_v57 = vsub.f32 %v9890_v58, %v7604_v36 }
0x14df   : > { %v7678_v18 = vmul.f32 1.442695, %v7622_v47  ;;  %v7640_v2 = vsub.f32 %v7508_v27, %v7604_v36  ;;  %v7684_v3 = vmul.f32 1.442695, %v7625_v49  ;;  %v7690_v4 = vmul.f32 1.442695, %v7628_v12 }
0x14e0   : > { %11048 = vpow2.f32 %v7744_v39  ;;  %v7696_v7 = vmul.f32 1.442695, %v7631_v25  ;;  %v7643_v31 = vsub.f32 %v7511_v52, %v7604_v36  ;;  %v7646_v54 = vsub.f32 %v14331_v20, %v7604_v36  ;;  %v15359_v58 = vld [vmem:[#allocation32_spill] sm:$0xff]  ;;  %v15360_v27 = vld [vmem:[#allocation33_spill] sm:$0xff]  ;;  %v15366_v12 = vld [vmem:[#allocation38_spill] sm:$0xff] }
0x14e1   : > { %11050 = vpow2.f32 %v7666_v17  ;;  %v7649_v0 = vsub.f32 %v14333_v53, %v7604_v36  ;;  %v7652_v44 = vsub.f32 %v14339_v61, %v7604_v36  ;;  %v7658_v50 = vsub.f32 %v14337_v26, %v7604_v36  ;;  %v15367_v17 = vld [vmem:[#allocation65_spill] sm:$0xff] }
0x14e2   : > { %11052 = vpow2.f32 %v7672_v16  ;;  %v7702_v11 = vmul.f32 1.442695, %v7634_v22  ;;  %v7661_v29 = vsub.f32 %v14342_v38, %v7604_v36  ;;  %v6585_v5 = vadd.f32 %v15359_v58, %v14289_v33  ;;  %v15370_v58 = vld [vmem:[#allocation73_spill] sm:$0xff] }
0x14e3   : > { %11054 = vpow2.f32 %v7678_v18  ;;  %v7708_v51 = vmul.f32 1.442695, %v7637_v57  ;;  %v6586_v60 = vadd.f32 %v15360_v27, %v14284_v6  ;;  %v7714_v20 = vmul.f32 1.442695, %v7640_v2  ;;  %v15371_v27 = vld [vmem:[#allocation68_spill] sm:$0xff] }
0x14e4   : > { %11056 = vpow2.f32 %v7684_v3  ;;  %v7176_v53 = vmul.f32 %v14292_v9, %v6585_v5  ;;  %v7720_v52 = vmul.f32 1.442695, %v7643_v31  ;;  %v7726_v8 = vmul.f32 1.442695, %v7646_v54 }
0x14e5   : > { %11058 = vpow2.f32 %v7690_v4  ;;  %v7237_v21 = vpop.f32.mrb[172].mxu0  ;;  %v7177_v19 = vmul.f32 %v14287_v41, %v6586_v60  ;;  %v7732_v33 = vmul.f32 1.442695, %v7649_v0  ;;  %v7607_v35 = vsub.f32 %v15358_v14, %v7604_v36  ;;  %v15365_v36 = vld [vmem:[#allocation24_spill] sm:$0xff]  ;;  %v15368_v4 = vld [vmem:[#allocation66_spill] sm:$0xff]  ;;  %v15369_v0 = vld [vmem:[#allocation67_spill] sm:$0xff] }
0x14e6   : > { %11060 = vpow2.f32 %v7696_v7  ;;  %v14358_v26 = vadd.f32 %v7237_v21, %v7176_v53  ;;  %v7239_v61 = vpop.f32.mrb[173].mxu0  ;;  %v7738_v10 = vmul.f32 1.442695, %v7652_v44  ;;  %v7750_v37 = vmul.f32 1.442695, %v7658_v50  ;;  %v15372_v21 = vld [vmem:[#allocation69_spill] sm:$0xff] }
0x14e7   : > { %11062 = vpow2.f32 %v7702_v11  ;;  %v14361_v38 = vadd.f32 %v7239_v61, %v7177_v19  ;;  %v7241_v6 = vpop.f32.mrb[174].mxu0  ;;  %v7756_v41 = vmul.f32 1.442695, %v7661_v29  ;;  %v7612_v15 = vmul.f32 1.442695, %v7607_v35  ;;  %v15373_v61 = vld [vmem:[#allocation48_spill] sm:$0xff] }
0x14e8   : > { %15361 = vst [vmem:[#allocation52_spill] sm:$0xff] %v14358_v26  ;;  %11064 = vpow2.f32 %v7708_v51  ;;  %v7242_v23 = vpop.f32.mrb[175].mxu0  ;;  %v15374_v35 = vld [vmem:[#allocation72_spill] sm:$0xff] }
0x14e9   : > { %15362 = vst [vmem:[#allocation53_spill] sm:$0xff] %v14361_v38  ;;  %11066 = vpow2.f32 %v7714_v20 }
0x14ea   : > { %v11049_v9 = vpop.eup %11048  ;;  %11068 = vpow2.f32 %v7720_v52 }
0x14eb   : > { %v11051_v48 = vpop.eup %11050  ;;  %11070 = vpow2.f32 %v7726_v8  ;;  %v7799_v6 = vmul.f32 %v11049_v9, %v15374_v35 }
0x14ec   : > { %v11053_v30 = vpop.eup %11052  ;;  %v7760_v43 = vmul.f32 %v11051_v48, %v15363_v34  ;;  %11072 = vpow2.f32 %v7732_v33 }
0x14ed   : > { %v11055_v24 = vpop.eup %11054  ;;  %v7763_v63 = vmul.f32 %v11053_v30, %v15364_v45  ;;  %11074 = vpow2.f32 %v7738_v10  ;;  %v14366_v56 = vpop.f32.mrb[176].mxu0 }
0x14ee   : > { %v11057_v14 = vpop.eup %11056  ;;  %v7766_v42 = vmul.f32 %v11055_v24, %v15365_v36  ;;  %11076 = vpow2.f32 %v7750_v37  ;;  %v14369_v39 = vpop.f32.mrb[177].mxu0 }
0x14ef   : > { %v11059_v55 = vpop.eup %11058  ;;  %v7851_v47 = vadd.f32 %v7763_v63, %v7760_v43  ;;  %v7880_v49 = vpack.c.bf16 %v7763_v63, %v7760_v43  ;;  %v7769_v25 = vmul.f32 %v11057_v14, %v15366_v12  ;;  %11078 = vpow2.f32 %v7756_v41  ;;  %v14372_v18 = vpop.f32.mrb[178].mxu0  ;;  %v15375_v41 = vld [vmem:[#allocation70_spill] sm:$0xff] }
0x14f0   : > { %v11061_v22 = vpop.eup %11060  ;;  %v7772_v16 = vmul.f32 %v11059_v55, %v15367_v17  ;;  %11080 = vpow2.f32 %v7612_v15  ;;  %v14375_v54 = vpop.f32.mrb[179].mxu0  ;;  %v15376_v63 = vld [vmem:[#allocation50_spill] sm:$0xff] }
0x14f1   : > { %v11063_v57 = vpop.eup %11062  ;;  %9900 = vmatpush3.bf16.msra.mxu0 %v7880_v49  ;;  %v7852_v2 = vadd.f32 %v7851_v47, %v7766_v42  ;;  %v7883_v3 = vpack.c.bf16 %v7769_v25, %v7766_v42  ;;  %v7775_v7 = vmul.f32 %v11061_v22, %v15368_v4 }
0x14f2   : > { %v11065_v31 = vpop.eup %11064  ;;  %9901 = vmatprep.subr.bf16.mxu0 %v15250_v46  ;;  %v7778_v44 = vmul.f32 %v11063_v57, %v15369_v0 }
0x14f3   : > { %v11067_v50 = vpop.eup %11066  ;;  %v7853_v11 = vadd.f32 %v7852_v2, %v7769_v25  ;;  %v7886_v29 = vpack.c.bf16 %v7775_v7, %v7772_v16  ;;  %v7781_v5 = vmul.f32 %v11065_v31, %v15370_v58  ;;  %v15377_v25 = vld [vmem:[#allocation74_spill] sm:$0xff] }
0x14f4   : > { %v11069_v51 = vpop.eup %11068  ;;  %v7784_v60 = vmul.f32 %v11067_v50, %v15371_v27 }
0x14f5   : > { %v11071_v20 = vpop.eup %11070  ;;  %9902 = vmatpush3.bf16.msra.mxu0 %v7883_v3  ;;  %v7854_v53 = vadd.f32 %v7853_v11, %v7772_v16  ;;  %v7889_v52 = vpack.c.bf16 %v7781_v5, %v7778_v44  ;;  %v7787_v19 = vmul.f32 %v11069_v51, %v15372_v21  ;;  %v14385_v23 = vpop.f32.mrb[180].mxu0 }
0x14f6   : > { %v11073_v8 = vpop.eup %11072  ;;  %9903 = vmatprep.subr.bf16.mxu0 %v15250_v46  ;;  %v7790_v33 = vmul.f32 %v11071_v20, %v15373_v61  ;;  %v7539_v15 = vmax.f32 %v14366_v56, %v14385_v23  ;;  %v14390_v24 = vpop.f32.mrb[181].mxu0 }
0x14f7   : > { %v11075_v10 = vpop.eup %11074  ;;  %v7855_v37 = vadd.f32 %v7854_v53, %v7775_v7  ;;  %v7892_v48 = vpack.c.bf16 %v7787_v19, %v7784_v60  ;;  %v7793_v30 = vmul.f32 %v11073_v8, %v15375_v41  ;;  %v7560_v55 = vmax.f32 %v14369_v39, %v14390_v24  ;;  %v14395_v9 = vpop.f32.mrb[182].mxu0  ;;  %v15378_v7 = vld [vmem:[#allocation75_spill] sm:$0xff] }
0x14f8   : > { %v11077_v43 = vpop.eup %11076  ;;  %v7796_v14 = vmul.f32 %v11075_v10, %v15376_v63  ;;  %v7540_v57 = vmax.f32 %v14372_v18, %v14395_v9  ;;  %v14400_v2 = vpop.f32.mrb[183].mxu0 }
0x14f9   : > { %v11079_v42 = vpop.eup %11078  ;;  %9904 = vmatpush3.bf16.msra.mxu0 %v7886_v29  ;;  %v7856_v47 = vadd.f32 %v7855_v37, %v7778_v44  ;;  %v7895_v49 = vpack.c.bf16 %v7793_v30, %v7790_v33  ;;  %v7802_v22 = vmul.f32 %v11077_v43, %v15377_v25  ;;  %v7561_v50 = vmax.f32 %v14375_v54, %v14400_v2 }
0x14fa   : > { %v11081_v16 = vpop.eup %11080  ;;  %9905 = vmatprep.subr.bf16.mxu0 %v15250_v46  ;;  %v7898_v3 = vpack.c.bf16 %v7799_v6, %v7796_v14  ;;  %v7805_v31 = vmul.f32 %v11079_v42, %v15378_v7 }
0x14fb   : > { %v7857_v11 = vadd.f32 %v7856_v47, %v7781_v5  ;;  %v7808_v44 = vmul.f32 %v11081_v16, %v14137_v13  ;;  %v14408_v29 = vmul.f32 %v11081_v16, %v14329_v32 }
0x14fc   : > { %v7901_v51 = vpack.c.bf16 %v7805_v31, %v7802_v22 }
0x14fd   : > { %15379 = vst [vmem:[#allocation20_spill] sm:$0xff] %v14408_v29  ;;  %9906 = vmatpush3.bf16.msra.mxu0 %v7889_v52  ;;  %v7858_v20 = vadd.f32 %v7857_v11, %v7784_v60  ;;  %v14411_v53 = vpop.f32.mrb[184].mxu0  ;;  %v15380_v11 = vld [vmem:[#allocation28_spill] sm:$0xff] }
0x14fe   : > { %9907 = vmatprep.subr.bf16.mxu0 %v15250_v46  ;;  %v7541_v10 = vmax.f32 %v7539_v15, %v14411_v53  ;;  %v14414_v37 = vpop.f32.mrb[185].mxu0 }
0x14ff   : > { %v7859_v8 = vadd.f32 %v7858_v20, %v7787_v19  ;;  %v7562_v43 = vmax.f32 %v7560_v55, %v14414_v37  ;;  %v14417_v5 = vpop.f32.mrb[186].mxu0 }
0x1500   : > { %v7542_v32 = vmax.f32 %v7540_v57, %v14417_v5  ;;  %v14420_v42 = vpop.f32.mrb[187].mxu0 }
0x1501   : > { %9908 = vmatpush3.bf16.msra.mxu0 %v7892_v48  ;;  %v7860_v13 = vadd.f32 %v7859_v8, %v7790_v33  ;;  %v7563_v60 = vmax.f32 %v7561_v50, %v14420_v42  ;;  %v15381_v50 = vld [vmem:[#allocation76_spill] sm:$0xff] }
0x1502   : > { %9909 = vmatprep.subr.bf16.mxu0 %v15250_v46 }
0x1503   : > { %v7861_v52 = vadd.f32 %v7860_v13, %v7793_v30  ;;  %v5875_v30 = vadd.f32 %v15381_v50, %v15380_v11 }
0x1505   : > { %9910 = vmatpush3.bf16.msra.mxu0 %v7895_v49  ;;  %v7862_v19 = vadd.f32 %v7861_v52, %v7796_v14  ;;  %v14425_v15 = vpop.f32.mrb[188].mxu0 }
0x1506   : > { %9911 = vmatprep.subr.bf16.mxu0 %v15250_v46  ;;  %v7543_v47 = vmax.f32 %v7541_v10, %v14425_v15  ;;  %v14428_v48 = vpop.f32.mrb[189].mxu0  ;;  %v14440_v10 = vpack.c.bf16 %v5875_v30, %v5875_v30 }
0x1507   : > { %v7863_v55 = vadd.f32 %v7862_v19, %v7799_v6  ;;  %v7564_v33 = vmax.f32 %v7562_v43, %v14428_v48  ;;  %v14431_v16 = vpop.f32.mrb[190].mxu0 }
0x1508   : > { %v7544_v14 = vmax.f32 %v7542_v32, %v14431_v16  ;;  %v14436_v49 = vpop.f32.mrb[191].mxu0  ;;  %15382 = vst [vmem:[#allocation35_spill] sm:$0xff] %v14440_v10 }
0x1509   : > { %9912 = vmatpush3.bf16.msra.mxu0 %v7898_v3  ;;  %v7864_v57 = vadd.f32 %v7863_v55, %v7802_v22  ;;  %v7565_v6 = vmax.f32 %v7563_v60, %v14436_v49 }
0x150a   : > { %9913 = vmatprep.subr.bf16.mxu0 %v15250_v46 }
0x150b   : > { %v7865_v20 = vadd.f32 %v7864_v57, %v7805_v31 }
0x150d   : > { %v7866_v8 = vrot.slane %v7865_v20, 4  ;;  %9914 = vmatpush3.bf16.msra.mxu0 %v7901_v51  ;;  %v14443_v3 = vpop.f32.mrb[192].mxu0 }
0x150e   : > { %9925 = vmatprep.subr.bf16.mxu0 %v15250_v46  ;;  %v7545_v43 = vmax.f32 %v7543_v47, %v14443_v3  ;;  %v14446_v13 = vpop.f32.mrb[193].mxu0 }
0x150f   : > { %v7867_v22 = vadd.f32 %v7866_v8, %v7865_v20  ;;  %v7566_v32 = vmax.f32 %v7564_v33, %v14446_v13  ;;  %v14450_v52 = vpop.f32.mrb[194].mxu0 }
0x1510   : > { %9916 = vmatmul.mubr.bf16.vlgmr.msra.gmra.mrb[208].mxu0 %v14440_v10  ;;  %v7546_v51 = vmax.f32 %v7544_v14, %v14450_v52  ;;  %v14455_v60 = vpop.f32.mrb[195].mxu0 }
0x1511   : > { %v7868_v31 = vrot.slane %v7867_v22, 2  ;;  %9935 = vmatprep.mubr.msk.bf16.mxu0 %vm11209_vm0, %v15250_v46  ;;  %v7567_v19 = vmax.f32 %v7565_v6, %v14455_v60 }
0x1513   : > { %v7869_v55 = vadd.f32 %v7868_v31, %v7867_v22 }
0x1515   : > { %v7870_v47 = vrot.slane %v7869_v55, 1  ;;  %v14458_v57 = vpop.f32.mrb[196].mxu0 }
0x1516   : > { %v7547_v50 = vmax.f32 %v7545_v43, %v14458_v57  ;;  %v14461_v33 = vpop.f32.mrb[197].mxu0 }
0x1517   : > { %v7871_v11 = vadd.f32 %v7870_v47, %v7869_v55  ;;  %v7568_v30 = vmax.f32 %v7566_v32, %v14461_v33  ;;  %v14464_v20 = vpop.f32.mrb[198].mxu0 }
0x1518   : > { %v7548_v14 = vmax.f32 %v7546_v51, %v14464_v20  ;;  %v14469_v46 = vpop.f32.mrb[199].mxu0 }
0x1519   : > { %v14466_v8 = vadd.f32 %v7871_v11, %v7808_v44  ;;  %v7569_v6 = vmax.f32 %v7567_v19, %v14469_v46 }
0x151b   : > { %15383 = vst [vmem:[#allocation78_spill] sm:$0xff] %v14466_v8 }
0x151d   : > { %v14472_v22 = vpop.f32.mrb[200].mxu0 }
0x151e   : > { %v7549_v31 = vmax.f32 %v7547_v50, %v14472_v22  ;;  %v14475_v55 = vpop.f32.mrb[201].mxu0 }
0x151f   : > { %v7570_v43 = vmax.f32 %v7568_v30, %v14475_v55  ;;  %v14478_v47 = vpop.f32.mrb[202].mxu0 }
0x1520   : > { %v7550_v32 = vmax.f32 %v7548_v14, %v14478_v47  ;;  %v14481_v44 = vpop.f32.mrb[203].mxu0 }
0x1521   : > { %v7571_v51 = vmax.f32 %v7569_v6, %v14481_v44 }
0x1525   : > { %v14484_v11 = vpop.f32.mrb[204].mxu0 }
0x1526   : > { %v7551_v19 = vmax.f32 %v7549_v31, %v14484_v11  ;;  %v14487_v29 = vpop.f32.mrb[205].mxu0 }
0x1527   : > { %v7572_v50 = vmax.f32 %v7570_v43, %v14487_v29  ;;  %v7437_v8 = vpop.f32.mrb[206].mxu0 }
0x1528   : > { %v7552_v62 = vmax.f32 %v7550_v32, %v7437_v8  ;;  %v7439_v10 = vpop.f32.mrb[207].mxu0 }
0x1529   : > { %v7573_v30 = vmax.f32 %v7571_v51, %v7439_v10 }
0x152a   : > { %v7553_v38 = vmax.f32 %v7551_v19, %v7552_v62 }
0x152b   : > { %v7574_v28 = vmax.f32 %v7572_v50, %v7573_v30 }
0x152c   : > { %v7554_v26 = vrot.slane %v7553_v38, 4 }
0x152d   : > { %v7575_v14 = vrot.slane %v7574_v28, 4 }
0x152e   : > { %v7555_v40 = vmax.f32 %v7553_v38, %v7554_v26 }
0x152f   : > { %v7576_v25 = vmax.f32 %v7574_v28, %v7575_v14 }
0x1530   : > { %v7556_v7 = vrot.slane %v7555_v40, 2 }
0x1531   : > { %v7577_v6 = vrot.slane %v7576_v25, 2 }
0x1532   : > { %v7557_v35 = vmax.f32 %v7555_v40, %v7556_v7 }
0x1533   : > { %v7578_v63 = vmax.f32 %v7576_v25, %v7577_v6 }
0x1534   : > { %v7558_v41 = vrot.slane %v7557_v35, 1 }
0x1535   : > { %v7579_v31 = vrot.slane %v7578_v63, 1 }
0x1536   : > { %v7559_v61 = vmax.f32 %v7557_v35, %v7558_v41 }
0x1537   : > { %v7580_v21 = vmax.f32 %v7578_v63, %v7579_v31 }
0x1538   : > { %v14491_v43 = vmax.f32 %v14140_v1, %v7559_v61 }
0x1539   : > { %v14494_v32 = vmax.f32 %v14143_v59, %v7580_v21 }
0x153a   : > { %v7659_v62 = vsub.f32 %v7437_v8, %v14491_v43  ;;  %v7614_v26 = vsub.f32 %v14366_v56, %v14491_v43  ;;  %v7617_v28 = vsub.f32 %v14372_v18, %v14491_v43  ;;  %v7620_v40 = vsub.f32 %v14385_v23, %v14491_v43 }
0x153b   : > { %v7660_v38 = vsub.f32 %v7439_v10, %v14494_v32  ;;  %v7615_v61 = vsub.f32 %v14369_v39, %v14494_v32  ;;  %v7618_v21 = vsub.f32 %v14375_v54, %v14494_v32  ;;  %v7621_v35 = vsub.f32 %v14390_v24, %v14494_v32 }
0x153c   : > { %v7752_v41 = vmul.f32 1.442695, %v7659_v62  ;;  %v7624_v56 = vsub.f32 %v14400_v2, %v14494_v32  ;;  %v7623_v23 = vsub.f32 %v14395_v9, %v14491_v43  ;;  %v7662_v7 = vmul.f32 1.442695, %v7614_v26 }
0x153d   : > { %v7754_v63 = vmul.f32 1.442695, %v7660_v38  ;;  %v7664_v18 = vmul.f32 1.442695, %v7615_v61  ;;  %v7670_v25 = vmul.f32 1.442695, %v7618_v21  ;;  %v7627_v54 = vsub.f32 %v14414_v37, %v14494_v32 }
0x153e   : > { %11082 = vpow2.f32 %v7752_v41  ;;  %v7668_v10 = vmul.f32 1.442695, %v7617_v28  ;;  %v7676_v39 = vmul.f32 1.442695, %v7621_v35  ;;  %v7682_v8 = vmul.f32 1.442695, %v7624_v56 }
0x153f   : > { %11084 = vpow2.f32 %v7754_v63  ;;  %v7630_v24 = vsub.f32 %v14420_v42, %v14494_v32  ;;  %v7626_v2 = vsub.f32 %v14411_v53, %v14491_v43  ;;  %v7629_v51 = vsub.f32 %v14417_v5, %v14491_v43 }
0x1540   : > { %11086 = vpow2.f32 %v7664_v18  ;;  %v7633_v9 = vsub.f32 %v14428_v48, %v14494_v32  ;;  %v7674_v19 = vmul.f32 1.442695, %v7620_v40  ;;  %v7680_v50 = vmul.f32 1.442695, %v7623_v23 }
0x1541   : > { %11088 = vpow2.f32 %v7670_v25  ;;  %v7636_v30 = vsub.f32 %v14436_v49, %v14494_v32  ;;  %v7688_v37 = vmul.f32 1.442695, %v7627_v54  ;;  %v7694_v14 = vmul.f32 1.442695, %v7630_v24 }
0x1542   : > { %11090 = vpow2.f32 %v7662_v7  ;;  %v7686_v42 = vmul.f32 1.442695, %v7626_v2  ;;  %v7692_v6 = vmul.f32 1.442695, %v7629_v51  ;;  %v7632_v53 = vsub.f32 %v14425_v15, %v14491_v43 }
0x1543   : > { %11092 = vpow2.f32 %v7668_v10  ;;  %v7635_v5 = vsub.f32 %v14431_v16, %v14491_v43  ;;  %v7639_v48 = vsub.f32 %v14446_v13, %v14494_v32  ;;  %v7642_v31 = vsub.f32 %v14455_v60, %v14494_v32 }
0x1544   : > { %11094 = vpow2.f32 %v7676_v39  ;;  %v7638_v49 = vsub.f32 %v14443_v3, %v14491_v43  ;;  %v7700_v62 = vmul.f32 1.442695, %v7633_v9  ;;  %v7706_v26 = vmul.f32 1.442695, %v7636_v30 }
0x1545   : > { %11096 = vpow2.f32 %v7682_v8  ;;  %v7641_v28 = vsub.f32 %v14450_v52, %v14491_v43  ;;  %v7698_v15 = vmul.f32 1.442695, %v7632_v53  ;;  %v7704_v40 = vmul.f32 1.442695, %v7635_v5 }
0x1546   : > { %11098 = vpow2.f32 %v7674_v19  ;;  %v7712_v16 = vmul.f32 1.442695, %v7639_v48  ;;  %v7718_v38 = vmul.f32 1.442695, %v7642_v31  ;;  %v7645_v13 = vsub.f32 %v14461_v33, %v14494_v32 }
0x1547   : > { %11100 = vpow2.f32 %v7680_v50  ;;  %v7648_v60 = vsub.f32 %v14469_v46, %v14494_v32  ;;  %v7644_v3 = vsub.f32 %v14458_v57, %v14491_v43  ;;  %v7647_v52 = vsub.f32 %v14464_v20, %v14491_v43 }
0x1548   : > { %v14542_v61 = vpop.eup %11082  ;;  %11102 = vpow2.f32 %v7688_v37  ;;  %v7651_v21 = vsub.f32 %v14475_v55, %v14494_v32  ;;  %v7710_v41 = vmul.f32 1.442695, %v7638_v49  ;;  %v7716_v33 = vmul.f32 1.442695, %v7641_v28 }
0x1549   : > { %v14550_v35 = vpop.eup %11084  ;;  %11104 = vpow2.f32 %v7694_v14  ;;  %v7654_v46 = vsub.f32 %v14481_v44, %v14494_v32  ;;  %v7724_v63 = vmul.f32 1.442695, %v7645_v13  ;;  %v7730_v18 = vmul.f32 1.442695, %v7648_v60 }
0x154a   : > { %v11087_v56 = vpop.eup %11086  ;;  %11106 = vpow2.f32 %v7686_v42  ;;  %v14554_v25 = vmul.f32 1.442695, %v7644_v3  ;;  %v14557_v23 = vmul.f32 1.442695, %v7647_v52  ;;  %v7650_v55 = vsub.f32 %v14472_v22, %v14491_v43 }
0x154b   : > { %v11089_v57 = vpop.eup %11088  ;;  %v7759_v20 = vmul.f32 %v11087_v56, %v15363_v34  ;;  %11108 = vpow2.f32 %v7692_v6  ;;  %v7653_v44 = vsub.f32 %v14478_v47, %v14491_v43  ;;  %v7657_v39 = vsub.f32 %v14487_v29, %v14494_v32 }
0x154c   : > { %v11091_v7 = vpop.eup %11090  ;;  %v7762_v10 = vmul.f32 %v11089_v57, %v15364_v45  ;;  %11110 = vpow2.f32 %v7700_v62  ;;  %v7736_v24 = vmul.f32 1.442695, %v7651_v21  ;;  %v14567_v2 = vmul.f32 1.442695, %v7654_v46 }
0x154d   : > { %v11093_v8 = vpop.eup %11092  ;;  %v7758_v54 = vmul.f32 %v11091_v7, %v15363_v34  ;;  %11112 = vpow2.f32 %v7706_v26  ;;  %v7734_v47 = vmul.f32 1.442695, %v7650_v55  ;;  %v14571_v37 = vmul.f32 1.442695, %v7653_v44 }
0x154e   : > { %v11095_v51 = vpop.eup %11094  ;;  %v7830_v9 = vadd.f32 %v7762_v10, %v7759_v20  ;;  %v7879_v22 = vpack.c.bf16 %v7762_v10, %v7759_v20  ;;  %v7761_v19 = vmul.f32 %v11093_v8, %v15364_v45  ;;  %11114 = vpow2.f32 %v7698_v15 }
0x154f   : > { %v11097_v50 = vpop.eup %11096  ;;  %v7765_v30 = vmul.f32 %v11095_v51, %v15365_v36  ;;  %11116 = vpow2.f32 %v7704_v40  ;;  %v7656_v45 = vsub.f32 %v14484_v11, %v14491_v43  ;;  %v7748_v62 = vmul.f32 1.442695, %v7657_v39 }
0x1550   : > { %v11099_v29 = vpop.eup %11098  ;;  %7902 = vmatprep.subr.bf16.mxu1 %v7879_v22  ;;  %v7809_v34 = vadd.f32 %v7761_v19, %v7758_v54  ;;  %v7878_v14 = vpack.c.bf16 %v7761_v19, %v7758_v54  ;;  %v7768_v42 = vmul.f32 %v11097_v50, %v15366_v12  ;;  %11118 = vpow2.f32 %v7712_v16 }
0x1551   : > { %v11101_v6 = vpop.eup %11100  ;;  %v7831_v53 = vadd.f32 %v7830_v9, %v7765_v30  ;;  %v7764_v5 = vmul.f32 %v11099_v29, %v15365_v36  ;;  %11120 = vpow2.f32 %v7718_v38  ;;  %v7746_v11 = vmul.f32 1.442695, %v7656_v45 }
0x1552   : > { %v11103_v48 = vpop.eup %11102  ;;  %7903 = vmatpush1.bf16.msra.mxu1 %v7878_v14  ;;  %v7882_v31 = vpack.c.bf16 %v7768_v42, %v7765_v30  ;;  %v7767_v49 = vmul.f32 %v11101_v6, %v15366_v12  ;;  %11122 = vpow2.f32 %v7710_v41  ;;  %v15385_v14 = vld [vmem:[#allocation48_spill] sm:$0xff] }
0x1553   : > { %v11105_v26 = vpop.eup %11104  ;;  %v7832_v28 = vadd.f32 %v7831_v53, %v7768_v42  ;;  %v7810_v15 = vadd.f32 %v7809_v34, %v7764_v5  ;;  %v7771_v40 = vmul.f32 %v11103_v48, %v15367_v17  ;;  %11124 = vpow2.f32 %v7716_v33 }
0x1554   : > { %v11107_v16 = vpop.eup %11106  ;;  %7904 = vmatprep.subr.bf16.mxu1 %v7882_v31  ;;  %v7881_v36 = vpack.c.bf16 %v7767_v49, %v7764_v5  ;;  %v7774_v38 = vmul.f32 %v11105_v26, %v15368_v4  ;;  %11126 = vpow2.f32 %v7724_v63  ;;  %v7605_v33 = vsub.f32 %v14140_v1, %v14491_v43  ;;  %v15386_v5 = vld [vmem:[#allocation70_spill] sm:$0xff] }
0x1555   : > { %v11109_v13 = vpop.eup %11108  ;;  %v7811_v60 = vadd.f32 %v7810_v15, %v7767_v49  ;;  %v7833_v3 = vadd.f32 %v7832_v28, %v7771_v40  ;;  %v7770_v12 = vmul.f32 %v11107_v16, %v15367_v17  ;;  %11128 = vpow2.f32 %v7730_v18 }
0x1556   : > { %v11111_v52 = vpop.eup %11110  ;;  %7905 = vmatpush1.bf16.msra.mxu1 %v7881_v36  ;;  %v7885_v21 = vpack.c.bf16 %v7774_v38, %v7771_v40  ;;  %v7773_v41 = vmul.f32 %v11109_v13, %v15368_v4  ;;  %11130 = vpow2.f32 %v14554_v25  ;;  %v7608_v55 = vmul.f32 1.442695, %v7605_v33  ;;  %v15387_v36 = vld [vmem:[#allocation50_spill] sm:$0xff]  ;;  %v15389_v33 = vld [vmem:[#allocation75_spill] sm:$0xff] }
0x1557   : > { %v11113_v46 = vpop.eup %11112  ;;  %v7834_v56 = vadd.f32 %v7833_v3, %v7774_v38  ;;  %v7812_v63 = vadd.f32 %v7811_v60, %v7770_v12  ;;  %v7777_v57 = vmul.f32 %v11111_v52, %v15369_v0  ;;  %11132 = vpow2.f32 %v14557_v23  ;;  %v15388_v60 = vld [vmem:[#allocation72_spill] sm:$0xff] }
0x1558   : > { %v11115_v20 = vpop.eup %11114  ;;  %7906 = vmatprep.subr.bf16.mxu1 %v7885_v21  ;;  %v7884_v17 = vpack.c.bf16 %v7773_v41, %v7770_v12  ;;  %v7780_v18 = vmul.f32 %v11113_v46, %v15370_v58  ;;  %11134 = vpow2.f32 %v7736_v24  ;;  %v7606_v23 = vsub.f32 %v14143_v59, %v14494_v32 }
0x1559   : > { %v11117_v4 = vpop.eup %11116  ;;  %v7813_v7 = vadd.f32 %v7812_v63, %v7773_v41  ;;  %v7835_v25 = vadd.f32 %v7834_v56, %v7777_v57  ;;  %v7776_v10 = vmul.f32 %v11115_v20, %v15369_v0  ;;  %11136 = vpow2.f32 %v14567_v2  ;;  %v15384_v2 = vld [vmem:[#allocation69_spill] sm:$0xff] }
0x155a   : > { %v11119_v1 = vpop.eup %11118  ;;  %7907 = vmatpush1.bf16.msra.mxu1 %v7884_v17  ;;  %v7888_v43 = vpack.c.bf16 %v7780_v18, %v7777_v57  ;;  %v7779_v44 = vmul.f32 %v11117_v4, %v15370_v58  ;;  %11138 = vpow2.f32 %v7734_v47  ;;  %v7610_v22 = vmul.f32 1.442695, %v7606_v23  ;;  %v15390_v4 = vld [vmem:[#allocation74_spill] sm:$0xff] }
0x155b   : > { %v11121_v39 = vpop.eup %11120  ;;  %v7836_v8 = vadd.f32 %v7835_v25, %v7780_v18  ;;  %v7814_v54 = vadd.f32 %v7813_v7, %v7776_v10  ;;  %v7783_v24 = vmul.f32 %v11119_v1, %v15371_v27  ;;  %11140 = vpow2.f32 %v14571_v37 }
0x155c   : > { %v11123_v51 = vpop.eup %11122  ;;  %7908 = vmatprep.subr.bf16.mxu1 %v7888_v43  ;;  %v7887_v0 = vpack.c.bf16 %v7779_v44, %v7776_v10  ;;  %v7786_v9 = vmul.f32 %v11121_v39, %v15384_v2  ;;  %11142 = vpow2.f32 %v7748_v62  ;;  %v7804_v46 = vmul.f32 %v14550_v35, %v15389_v33  ;;  %v15391_v39 = vld [vmem:[#allocation45_spill] sm:$0xff] }
0x155d   : > { %v11125_v19 = vpop.eup %11124  ;;  %v7815_v58 = vadd.f32 %v7814_v54, %v7779_v44  ;;  %v7837_v50 = vadd.f32 %v7836_v8, %v7783_v24  ;;  %v7782_v30 = vmul.f32 %v11123_v51, %v15371_v27  ;;  %11144 = vpow2.f32 %v7746_v11  ;;  %v15393_v51 = vld [vmem:[#allocation42_spill] sm:$0xff] }
0x155e   : > { %v11127_v59 = vpop.eup %11126  ;;  %7909 = vmatpush1.bf16.msra.mxu1 %v7887_v0  ;;  %v7891_v32 = vpack.c.bf16 %v7786_v9, %v7783_v24  ;;  %v7785_v47 = vmul.f32 %v11125_v19, %v15384_v2  ;;  %11146 = vpow2.f32 %v7608_v55  ;;  %v7803_v20 = vmul.f32 %v14542_v61, %v15389_v33  ;;  %v15392_v24 = vld [vmem:[#allocation52_spill] sm:$0xff]  ;;  %v15394_v2 = vld [vmem:[#allocation53_spill] sm:$0xff] }
0x155f   : > { %v11129_v37 = vpop.eup %11128  ;;  %v7838_v29 = vadd.f32 %v7837_v50, %v7786_v9  ;;  %v7816_v34 = vadd.f32 %v7815_v58, %v7782_v30  ;;  %v7789_v42 = vmul.f32 %v11127_v59, %v15385_v14  ;;  %11148 = vpow2.f32 %v7610_v22 }
0x1560   : > { %v11131_v6 = vpop.eup %11130  ;;  %7910 = vmatprep.subr.bf16.mxu1 %v7891_v32  ;;  %v7890_v53 = vpack.c.bf16 %v7785_v47, %v7782_v30  ;;  %v7792_v45 = vmul.f32 %v11129_v37, %v15386_v5  ;;  %v15395_v37 = vld [vmem:[#allocation35_spill] sm:$0xff] }
0x1561   : > { %v11133_v48 = vpop.eup %11132  ;;  %v7817_v27 = vadd.f32 %v7816_v34, %v7785_v47  ;;  %v7839_v31 = vadd.f32 %v7838_v29, %v7789_v42  ;;  %v7788_v49 = vmul.f32 %v11131_v6, %v15385_v14  ;;  %v15396_v29 = vmov 0  }
0x1562   : > { %v11135_v62 = vpop.eup %11134  ;;  %7911 = vmatpush1.bf16.msra.mxu1 %v7890_v53  ;;  %v7894_v26 = vpack.c.bf16 %v7792_v45, %v7789_v42  ;;  %v7791_v28 = vmul.f32 %v11133_v48, %v15386_v5 }
0x1563   : > { %v11137_v15 = vpop.eup %11136  ;;  %v7840_v40 = vadd.f32 %v7839_v31, %v7792_v45  ;;  %v7818_v16 = vadd.f32 %v7817_v27, %v7788_v49  ;;  %v7795_v38 = vmul.f32 %v11135_v62, %v15387_v36  ;;  %v15397_v31 = vld [vmem:[#allocation78_spill] sm:$0xff]  ;;  %v15398_v62 = vld [vmem:[#allocation20_spill] sm:$0xff] }
0x1564   : > { %v11139_v11 = vpop.eup %11138  ;;  %7912 = vmatprep.subr.bf16.mxu1 %v7894_v26  ;;  %v7893_v13 = vpack.c.bf16 %v7791_v28, %v7788_v49  ;;  %v7798_v3 = vmul.f32 %v11137_v15, %v15388_v60  ;;  %11150 = vrcp.f32 %v15397_v31 }
0x1565   : > { %v11141_v12 = vpop.eup %11140  ;;  %v7819_v52 = vadd.f32 %v7818_v16, %v7791_v28  ;;  %v7841_v21 = vadd.f32 %v7840_v40, %v7795_v38  ;;  %v7794_v41 = vmul.f32 %v11139_v11, %v15387_v36 }
0x1566   : > { %v11143_v56 = vpop.eup %11142  ;;  %7913 = vmatpush1.bf16.msra.mxu1 %v7893_v13  ;;  %v7897_v63 = vpack.c.bf16 %v7798_v3, %v7795_v38  ;;  %v7797_v57 = vmul.f32 %v11141_v12, %v15388_v60 }
0x1567   : > { %v11145_v17 = vpop.eup %11144  ;;  %v7842_v18 = vadd.f32 %v7841_v21, %v7798_v3  ;;  %v7820_v55 = vadd.f32 %v7819_v52, %v7794_v41  ;;  %v7801_v7 = vmul.f32 %v11143_v56, %v15390_v4 }
0x1568   : > { %v11147_v25 = vpop.eup %11146  ;;  %7914 = vmatprep.subr.bf16.mxu1 %v7897_v63  ;;  %v7896_v10 = vpack.c.bf16 %v7797_v57, %v7794_v41  ;;  %v7800_v1 = vmul.f32 %v11145_v17, %v15390_v4  ;;  %v15400_v17 = vmov 0.0  }
0x1569   : > { %v11149_v43 = vpop.eup %11148  ;;  %v7821_v35 = vadd.f32 %v7820_v55, %v7797_v57  ;;  %v7843_v44 = vadd.f32 %v7842_v18, %v7801_v7  ;;  %v7900_v23 = vpack.c.bf16 %v7804_v46, %v7801_v7  ;;  %v7806_v8 = vmul.f32 %v11147_v25, %v15391_v39  ;;  %v8000_v55 = vpop.permute.xlu0 %7999 }
0x156a   : > { %7915 = vmatpush1.bf16.msra.mxu1 %v7896_v10  ;;  %v7899_v54 = vpack.c.bf16 %v7803_v20, %v7800_v1  ;;  %v7875_v61 = vmul.f32 %v11147_v25, %v15392_v24  ;;  %v7807_v0 = vmul.f32 %v11149_v43, %v15393_v51  ;;  %v7876_v9 = vmul.f32 %v11149_v43, %v15394_v2  ;;  %v15401_v43 = vld [vmem:[#allocation40_spill] sm:$0xff]  ;;  %v15404_v24 = vld [vmem:[#allocation18_spill] sm:$0xff] }
0x156b   : > { %v7844_v22 = vadd.f32 %v7843_v44, %v7804_v46  ;;  %7916 = vmatprep.subr.bf16.mxu1 %v7900_v23  ;;  %v7822_v19 = vadd.f32 %v7821_v35, %v7800_v1  ;;  %v15402_v23 = vld [vmem:[#allocation46_spill] sm:$0xff] }
0x156d   : > { %v7845_v58 = vrot.slane %v7844_v22, 4  ;;  %v7823_v50 = vadd.f32 %v7822_v19, %v7803_v20  ;;  %v7992_v20 = vld [vmem:[%s15399_s1] sm:$0xf]  ;;  %s15406_s1 = sld [smem:[#allocation14_spill]] }
0x156e   : > { %7917 = vmatpush1.bf16.msra.mxu1 %v7899_v54  ;;  %v11151_v15 = vpop.eup %11150 }
0x156f   : > { %v7846_v30 = vadd.f32 %v7845_v58, %v7844_v22  ;;  %v7824_v59 = vrot.slane %v7823_v50, 4  ;;  %v15405_v58 = vld [vmem:[#allocation22_spill] sm:$0xff] }
0x1571   : > { %v7847_v32 = vrot.slane %v7846_v30, 2  ;;  %v7825_v47 = vadd.f32 %v7824_v59, %v7823_v50  ;;  %7935 = vmatmul.mubr.bf16.vlgmr.msra.gmra.mrb[200].mxu1 %v15395_v37  ;;  %v15407_v59 = vld [vmem:[#allocation16_spill] sm:$0xff] }
0x1572   : > { %8046 = vmatprep.mubr.bf16.mxu1 %v15396_v29 }
0x1573   : > { %v7848_v34 = vadd.f32 %v7847_v32, %v7846_v30  ;;  %v7826_v14 = vrot.slane %v7825_v47, 2 }
0x1575   : > { %v7849_v42 = vrot.slane %v7848_v34, 1  ;;  %v7827_v6 = vadd.f32 %v7826_v14, %v7825_v47 }
0x1577   : > { %v7850_v53 = vadd.f32 %v7849_v42, %v7848_v34  ;;  %v7828_v5 = vrot.slane %v7827_v6, 1  ;;  %v8353_v34 = vld [vmem:[%s15406_s1] sm:$0xff]  ;;  %s15410_s1 = sld [smem:[#allocation13_spill]] }
0x1579   : > { %v7829_v45 = vadd.f32 %v7828_v5, %v7827_v6  ;;  %v7873_v48 = vadd.f32 %v7850_v53, %v7807_v0 }
0x157b   : > { %v7872_v27 = vadd.f32 %v7829_v45, %v7806_v8  ;;  %v15403_v8 = vld [vmem:[#allocation17_spill] sm:$0xff] }
0x157d   : > { %11152 = vrcp.f32 %v7872_v27 }
0x157e   : > { %11154 = vrcp.f32 %v7873_v48 }
0x1587   : > { %v11153_v60 = vpop.eup %11152 }
0x1588   : > { %v11155_v52 = vpop.eup %11154 }
0x15e3   : > { %v7977_v49 = vpop.f32.mrb[208].mxu0 }
0x15e4   : > { %v7985_v26 = vadd.f32 %v7977_v49, %v15398_v62  ;;  %v9917_v28 = vpop.f32.mrb[209].mxu0 }
0x15e5   : > { %v7980_v40 = vpop.f32.mrb[210].mxu0 }
0x15e6   : > { %v7991_v16 = vmul.f32 %v11151_v15, %v7985_v26  ;;  %v9918_v36 = vpop.f32.mrb[211].mxu0 }
0x15e8   : > { %v7995_v57 = vpack.c.bf16 %v7991_v16, %v7991_v16 }
0x15ea   : > { %v8012_v18 = vsel %vm1228_vm9, %v7995_v57, 0 }
0x1644   : > { %v7936_v38 = vpop.f32.mrb[200].mxu1 }
0x1645   : > { %v7983_v11 = vadd.f32 %v7936_v38, %v7875_v61  ;;  %v7938_v13 = vpop.f32.mrb[201].mxu1 }
0x1646   : > { %v7984_v3 = vadd.f32 %v7938_v13, %v7876_v9  ;;  %v7940_v12 = vpop.f32.mrb[202].mxu1 }
0x1647   : > { %v7989_v21 = vmul.f32 %v11153_v60, %v7983_v11  ;;  %v7941_v41 = vpop.f32.mrb[203].mxu1 }
0x1648   : > { %v7990_v33 = vmul.f32 %v11155_v52, %v7984_v3 }
0x1649   : > { %v7993_v46 = vpack.c.bf16 %v7989_v21, %v7989_v21 }
0x164a   : > { %v7994_v56 = vpack.c.bf16 %v7990_v33, %v7990_v33 }
0x164b   : > { %v8006_v63 = vsel %vm1228_vm9, %v7993_v46, 0 }
0x164c   : > { %9403 = vmatprep.subr.msk.bf16.mxu1 %vm1228_vm9, %v7994_v56 }
0x164d   : > { %8015 = vmatpush1.bf16.msra.mxu1 %v8006_v63 }
0x164e   : > { %9919 = vmatprep.subr.bf16.mxu1 %v15400_v17 }
0x1650   : > { %9404 = vmatmul.mubr.msk.bf16.vlgmr.msra.gmra.mrb[204].mxu1 %vm2087_vm11, %v7992_v20 }
0x1651   : > { %9920 = vmatpush3.bf16.msra.mxu1 %v8012_v18  ;;  %9921 = vmatprep.mubr.msk.bf16.mxu1 %vm11209_vm0, %v15400_v17 }
0x1658   : > { %9922 = vmatmul.mubr.msk.bf16.vlgmr.msra.gmra.mrb[208].mxu1 %vm2087_vm11, %v7992_v20 }
0x1659   : > { %8403 = vmatprep.mubr.bf16.mxu1 %v15396_v29 }
0x1723   : > { %v8048_v4 = vpop.f32.mrb[204].mxu1 }
0x1724   : > { %v8049_v7 = vadd.f32 %v8048_v4, %v8000_v55  ;;  %v8050_v25 = vpop.f32.mrb[205].mxu1 }
0x1725   : > { %v8051_v10 = vadd.f32 %v8050_v25, %v8000_v55  ;;  %v8052_v1 = vpop.f32.mrb[206].mxu1 }
0x1726   : > { %v8095_v35 = vadd.f32 %v8049_v7, %v15401_v43  ;;  %v8053_v44 = vpop.f32.mrb[207].mxu1 }
0x1727   : > { %v8096_v39 = vadd.f32 %v8051_v10, %v15402_v23 }
0x1728   : > { %v14633_v54 = vmul.f32 %v8095_v35, %v15403_v8 }
0x1729   : > { %v14636_v61 = vmul.f32 %v8096_v39, %v15404_v24 }
0x172a   : > { %8243 = vrot.lane.b32.xlu0 %v14633_v54, %s15087_s28  ;;  %v10308_v51 = vpack.i.bf16 %v15400_v17, %v14633_v54  ;;  %s15408_s28 = smov 109  }
0x172b   : > { %v8089_v0 = vpop.f32.mrb[208].mxu1  ;;  %v10318_v2 = vpack.i.bf16 %v14636_v61, %v14633_v54 }
0x172c   : > { %v8090_v9 = vadd.f32 %v8089_v0, %v8000_v55  ;;  %10309 = vrot.lane.b32.xlu1 %v10308_v51, %s11204_s23  ;;  %v9923_v22 = vpop.f32.mrb[209].mxu1 }
0x172d   : > { %v8092_v19 = vpop.f32.mrb[210].mxu1 }
0x172e   : > { %v8097_v50 = vadd.f32 %v8090_v9, %v15405_v58  ;;  %10319 = vrot.lane.b32.xlu0 %v10318_v2, %s11201_s16  ;;  %v9924_v30 = vpop.f32.mrb[211].mxu1 }
0x1730   : > { %v14648_v32 = vmul.f32 %v8097_v50, %v15407_v59  ;;  %10314 = vrot.lane.b32.xlu1 %v10318_v2, %s11200_s15 }
0x1732   : > { %10324 = vrot.lane.b32.xlu0 %v10318_v2, %s11203_s22  ;;  %v10348_v47 = vpack.i.bf16 %v14648_v32, %v15400_v17  ;;  %v10368_v37 = vpack.i.bf16 %v14648_v32, %v14636_v61 }
0x1734   : > { %10349 = vrot.lane.b32.xlu1 %v10348_v47, %s15089_s18 }
0x1736   : > { %10329 = vrot.lane.b32.xlu0 %v10318_v2, %s15089_s18  ;;  %s15409_s18 = smov 111  }
0x1738   : > { %8268 = vrot.lane.b32.xlu1 %v14633_v54, %s15091_s26 }
0x173a   : > { %10334 = vrot.lane.b32.xlu0 %v10348_v47, %s11200_s15 }
0x173c   : > { %10369 = vrot.lane.b32.xlu1 %v10368_v37, %s15091_s26 }
0x173e   : > { %10339 = vrot.lane.b32.xlu0 %v10348_v47, %s11201_s16 }
0x1740   : > { %8297 = vrot.lane.b32.xlu1 %v14648_v32, %s15408_s28 }
0x1742   : > { %10344 = vrot.lane.b32.xlu0 %v10348_v47, %s11203_s22 }
0x1744   : > { %8274 = vrot.lane.b32.xlu1 %v15400_v17, %s15091_s26 }
0x1746   : > { %10354 = vrot.lane.b32.xlu0 %v10368_v37, %s11204_s23 }
0x1748   : > { %8356 = vperm.xlu1 %10167, %v8353_v34  }
0x174a   : > { %10359 = vrot.lane.b32.xlu0 %v10368_v37, %s15409_s18 }
0x174e   : > { %10364 = vrot.lane.b32.xlu0 %v10318_v2, %s15408_s28 }
0x1752   : > { %8249 = vrot.lane.b32.xlu0 %v15400_v17, %s15409_s18 }
0x1756   : > { %8299 = vrot.lane.b32.xlu0 %v15400_v17, %s15408_s28 }
0x179c   : > { %v14676_v14 = vpop.permute.xlu0 %8243 }
0x179e   : > { %v10310_v42 = vpop.permute.xlu1 %10309 }
0x179f   : > { %v10312_v9 = vunpack.i.h.bf16 %v10310_v42  ;;  %v10311_v22 = vunpack.i.l.bf16 %v10310_v42 }
0x17a0   : > { %v10320_v6 = vpop.permute.xlu0 %10319 }
0x17a1   : > { %v10322_v53 = vunpack.i.h.bf16 %v10320_v6  ;;  %v10321_v5 = vunpack.i.l.bf16 %v10320_v6 }
0x17a2   : > { %v10315_v45 = vpop.permute.xlu1 %10314 }
0x17a3   : > { %v10317_v48 = vunpack.i.h.bf16 %v10315_v45  ;;  %v10316_v27 = vunpack.i.l.bf16 %v10315_v45  ;;  %v8146_v62 = vsel %vm1003_vm2, %v10321_v5, %v10322_v53 }
0x17a4   : > { %v10325_v31 = vpop.permute.xlu0 %10324 }
0x17a5   : > { %v8121_v49 = vsel %vm977_vm1, %v10316_v27, %v10317_v48  ;;  %v10327_v13 = vunpack.i.h.bf16 %v10325_v31  ;;  %v10326_v60 = vunpack.i.l.bf16 %v10325_v31 }
0x17a6   : > { %v8339_v26 = vpack.c.bf16 %v8146_v62, %v8121_v49  ;;  %v10350_v15 = vpop.permute.xlu1 %10349 }
0x17a7   : > { %v10351_v57 = vunpack.i.l.bf16 %v10350_v15  ;;  %v8171_v4 = vsel %vm1029_vm4, %v10326_v60, %v10327_v13  ;;  %v10352_v7 = vunpack.i.h.bf16 %v10350_v15 }
0x17a8   : > { %v10330_v28 = vpop.permute.xlu0 %10329  ;;  %8371 = vmatprep.subr.bf16.mxu1 %v8339_v26 }
0x17a9   : > { %v10332_v16 = vunpack.i.h.bf16 %v10330_v28  ;;  %v10331_v36 = vunpack.i.l.bf16 %v10330_v28 }
0x17aa   : > { %v8269_v3 = vpop.permute.xlu1 %8268 }
0x17ab   : > { %v8196_v41 = vsel %vm1055_vm3, %v10331_v36, %v10332_v16  ;;  %v8195_v43 = vsel %vm1055_vm3, %v10351_v57, %v10331_v36  ;;  %v8197_v44 = vsel %vm1055_vm3, %v10332_v16, %v10352_v7 }
0x17ac   : > { %v10335_v40 = vpop.permute.xlu0 %10334  ;;  %v8342_v1 = vpack.c.bf16 %v8196_v41, %v8171_v4 }
0x17ad   : > { %v10337_v38 = vunpack.i.h.bf16 %v10335_v40  ;;  %v10336_v11 = vunpack.i.l.bf16 %v10335_v40 }
0x17ae   : > { %v10370_v35 = vpop.permute.xlu1 %10369 }
0x17af   : > { %v8120_v33 = vsel %vm977_vm1, %v10336_v11, %v10316_v27  ;;  %v8122_v46 = vsel %vm977_vm1, %v10317_v48, %v10337_v38  ;;  %v10371_v50 = vunpack.i.l.bf16 %v10370_v35  ;;  %v10372_v30 = vunpack.i.h.bf16 %v10370_v35 }
0x17b0   : > { %v10340_v12 = vpop.permute.xlu0 %10339 }
0x17b1   : > { %v10342_v52 = vunpack.i.h.bf16 %v10340_v12  ;;  %v10341_v21 = vunpack.i.l.bf16 %v10340_v12  ;;  %v8276_v31 = vsel %vm1139_vm6, %v8269_v3, %v10371_v50  ;;  %v8277_v26 = vsel %vm1139_vm6, %v10371_v50, %v10372_v30 }
0x17b2   : > { %v8298_v6 = vpop.permute.xlu1 %8297 }
0x17b3   : > { %v8145_v56 = vsel %vm1003_vm2, %v10341_v21, %v10321_v5  ;;  %v8147_v63 = vsel %vm1003_vm2, %v10322_v53, %v10342_v52  ;;  %v8310_v52 = vld [vmem:[%s15410_s1] sm:$0xf]  ;;  %s15411_s1 = smov 1  }
0x17b4   : > { %v8338_v20 = vpack.c.bf16 %v8145_v56, %v8120_v33  ;;  %v8340_v18 = vpack.c.bf16 %v8147_v63, %v8122_v46  ;;  %v10345_v55 = vpop.permute.xlu0 %10344 }
0x17b5   : > { %v10347_v25 = vunpack.i.h.bf16 %v10345_v55  ;;  %v10346_v10 = vunpack.i.l.bf16 %v10345_v55 }
0x17b6   : > { %8372 = vmatpush1.bf16.msra.mxu1 %v8338_v20  ;;  %9926 = vmatpush3.bf16.msra.mxu0 %v8340_v18  ;;  %v8275_v40 = vpop.permute.xlu1 %8274 }
0x17b7   : > { %v8170_v23 = vsel %vm1029_vm4, %v10346_v10, %v10326_v60  ;;  %v8172_v39 = vsel %vm1029_vm4, %v10327_v13, %v10347_v25  ;;  %8373 = vmatprep.subr.bf16.mxu1 %v8342_v1  ;;  %9927 = vmatprep.subr.bf16.mxu0 %v15400_v17  ;;  %v8278_v13 = vsel %vm1139_vm6, %v10372_v30, %v8275_v40 }
0x17b8   : > { %v8341_v51 = vpack.c.bf16 %v8195_v43, %v8170_v23  ;;  %v8343_v0 = vpack.c.bf16 %v8197_v44, %v8172_v39  ;;  %v10355_v2 = vpop.permute.xlu0 %10354 }
0x17b9   : > { %v10357_v19 = vunpack.i.h.bf16 %v10355_v2  ;;  %v10356_v58 = vunpack.i.l.bf16 %v10355_v2 }
0x17ba   : > { %8374 = vmatpush1.bf16.msra.mxu1 %v8341_v51  ;;  %9928 = vmatpush3.bf16.msra.mxu0 %v8343_v0 }
0x17bb   : > { %v8226_v47 = vsel %vm1087_vm5, %v10311_v22, %v10356_v58  ;;  %v8228_v37 = vsel %vm1087_vm5, %v10357_v19, %v10312_v9  ;;  %9929 = vmatprep.subr.bf16.mxu0 %v15400_v17  ;;  %v8227_v34 = vsel %vm1087_vm5, %v10356_v58, %v10357_v19  ;;  %v8710_v58 = vld [vmem:[%s11348_s6] sm:$0xff] }
0x17bc   : > { %v8344_v53 = vpack.c.bf16 %v8226_v47, %v14633_v54  ;;  %v8346_v5 = vpack.c.bf16 %v8228_v37, %v14648_v32  ;;  %v10360_v42 = vpop.permute.xlu0 %10359  ;;  %v8345_v45 = vpack.c.bf16 %v8227_v34, %v14636_v61 }
0x17bd   : > { %v10362_v48 = vunpack.i.h.bf16 %v10360_v42  ;;  %v10361_v27 = vunpack.i.l.bf16 %v10360_v42 }
0x17be   : > { %8375 = vmatprep.subr.bf16.mxu1 %v8345_v45  ;;  %9930 = vmatpush3.bf16.msra.mxu0 %v8346_v5 }
0x17bf   : > { %v8251_v49 = vsel %vm1113_vm7, %v14676_v14, %v10361_v27  ;;  %8376 = vmatpush1.bf16.msra.mxu1 %v8344_v53  ;;  %v8252_v62 = vsel %vm1113_vm7, %v10361_v27, %v10362_v48  ;;  %9931 = vmatprep.subr.bf16.mxu0 %v15400_v17 }
0x17c0   : > { %v8347_v54 = vpack.c.bf16 %v8276_v31, %v8251_v49  ;;  %v10365_v32 = vpop.permute.xlu0 %10364  ;;  %v8348_v28 = vpack.c.bf16 %v8277_v26, %v8252_v62 }
0x17c1   : > { %v10367_v61 = vunpack.i.h.bf16 %v10365_v32  ;;  %v10366_v15 = vunpack.i.l.bf16 %v10365_v32 }
0x17c2   : > { %8377 = vmatprep.subr.bf16.mxu1 %v8348_v28 }
0x17c3   : > { %v8302_v16 = vsel %vm1165_vm8, %v10367_v61, %v8298_v6  ;;  %8378 = vmatpush1.bf16.msra.mxu1 %v8347_v54  ;;  %v8301_v14 = vsel %vm1165_vm8, %v10366_v15, %v10367_v61 }
0x17c4   : > { %v8351_v36 = vpack.c.bf16 %v8302_v16, %v8302_v16  ;;  %v8250_v38 = vpop.permute.xlu0 %8249  ;;  %v8350_v11 = vpack.c.bf16 %v8301_v14, %v8301_v14 }
0x17c5   : > { %v8253_v60 = vsel %vm1113_vm7, %v10362_v48, %v8250_v38 }
0x17c6   : > { %v8349_v3 = vpack.c.bf16 %v8278_v13, %v8253_v60  ;;  %9406 = vmatprep.subr.msk.bf16.mxu1 %vm1228_vm9, %v8351_v36  ;;  %v8363_v12 = vsel %vm1228_vm9, %v8350_v11, 0 }
0x17c7   : > { %8380 = vmatpush1.bf16.msra.mxu1 %v8363_v12  ;;  %v8357_v56 = vpop.permute.xlu1 %8356 }
0x17c8   : > { %v8300_v21 = vpop.permute.xlu0 %8299  ;;  %9932 = vmatpush3.bf16.msra.mxu0 %v8349_v3 }
0x17c9   : > { %v8303_v41 = vsel %vm1165_vm8, %v8298_v6, %v8300_v21  ;;  %9933 = vmatprep.subr.bf16.mxu0 %v15400_v17 }
0x17ca   : > { %v8352_v33 = vpack.c.bf16 %v8303_v41, %v8303_v41  ;;  %9407 = vmatmul.mubr.msk.bf16.vlgmr.msra.gmra.mrb[212].mxu1 %vm1224_vm10, %v8310_v52 }
0x17cb   : > { %8760 = vmatprep.mubr.bf16.mxu1 %v15396_v29 }
0x17cc   : > { %v8369_v46 = vsel %vm1228_vm9, %v8352_v33, 0 }
0x17cd   : > { %9934 = vmatpush3.bf16.msra.mxu0 %v8369_v46 }
0x17ce   : > { %9939 = vmatprep.subr.bf16.mxu0 %v15400_v17 }
0x17d0   : > { %9936 = vmatmul.mubr.msk.bf16.vlgmr.msra.gmra.mrb[212].mxu0 %vm1224_vm10, %v8310_v52 }
0x17d1   : > { %9949 = vmatprep.mubr.msk.bf16.mxu0 %vm11209_vm0, %v15400_v17 }
0x189d   : > { %v8405_v63 = vpop.f32.mrb[212].mxu1 }
0x189e   : > { %v8406_v57 = vadd.f32 %v8405_v63, %v8357_v56  ;;  %v8407_v20 = vpop.f32.mrb[213].mxu1 }
0x189f   : > { %v8408_v18 = vadd.f32 %v8407_v20, %v8357_v56  ;;  %v8409_v55 = vpop.f32.mrb[214].mxu1 }
0x18a0   : > { %v8452_v4 = vmax.f32 %v8406_v57, 0.0  ;;  %v8410_v7 = vpop.f32.mrb[215].mxu1 }
0x18a1   : > { %v8453_v25 = vmax.f32 %v8408_v18, 0.0 }
0x18a2   : > { %v14721_v10 = vmul.f32 %v8452_v4, %v15403_v8 }
0x18a3   : > { %v8446_v1 = vpop.f32.mrb[212].mxu0  ;;  %v14724_v43 = vmul.f32 %v8453_v25, %v15404_v24 }
0x18a4   : > { %v8447_v35 = vadd.f32 %v8446_v1, %v8357_v56  ;;  %v10378_v44 = vpack.i.bf16 %v15400_v17, %v14721_v10  ;;  %v9937_v23 = vpop.f32.mrb[213].mxu0 }
0x18a5   : > { %v8449_v39 = vpop.f32.mrb[214].mxu0  ;;  %v10383_v2 = vpack.i.bf16 %v14724_v43, %v14721_v10 }
0x18a6   : > { %10379 = vrot.lane.b32.xlu0 %v10378_v44, %s15409_s18  ;;  %10374 = vrot.lane.b32.xlu1 %v10378_v44, %s11204_s23  ;;  %v9938_v51 = vpop.f32.mrb[215].mxu0  ;;  %v8454_v0 = vmax.f32 %v8447_v35, 0.0 }
0x18a8   : > { %v14735_v9 = vmul.f32 %v8454_v0, %v15407_v59 }
0x18aa   : > { %10384 = vrot.lane.b32.xlu0 %v10383_v2, %s11200_s15  ;;  %10389 = vrot.lane.b32.xlu1 %v10383_v2, %s11201_s16  ;;  %v10403_v22 = vpack.i.bf16 %v14735_v9, %v15400_v17  ;;  %v10428_v19 = vpack.i.bf16 %v14735_v9, %v14724_v43 }
0x18ae   : > { %10394 = vrot.lane.b32.xlu0 %v10383_v2, %s11203_s22  ;;  %10399 = vrot.lane.b32.xlu1 %v10383_v2, %s15411_s1 }
0x18b2   : > { %10404 = vrot.lane.b32.xlu0 %v10403_v22, %s11200_s15  ;;  %10409 = vrot.lane.b32.xlu1 %v10403_v22, %s11201_s16 }
0x18b6   : > { %10414 = vrot.lane.b32.xlu0 %v10403_v22, %s11203_s22  ;;  %10419 = vrot.lane.b32.xlu1 %v10403_v22, %s15411_s1 }
0x18ba   : > { %10429 = vrot.lane.b32.xlu0 %v10428_v19, %s11204_s23  ;;  %10424 = vrot.lane.b32.xlu1 %v10378_v44, %s15091_s26 }
0x18be   : > { %10434 = vrot.lane.b32.xlu0 %v10428_v19, %s15409_s18  ;;  %10444 = vrot.lane.b32.xlu1 %v10428_v19, %s15091_s26  ;;  %s15412_s26 = sld [smem:[#allocation15_spill]] }
0x18c2   : > { %10439 = vrot.lane.b32.xlu0 %v10383_v2, %s15408_s28  ;;  %8654 = vrot.lane.b32.xlu1 %v14735_v9, %s15408_s28 }
0x18c6   : > { %8656 = vrot.lane.b32.xlu0 %v15400_v17, %s15408_s28  ;;  %8713 = vperm.xlu1 %10167, %v8710_v58  }
0x1918   : > { %v14757_v50 = vpop.permute.xlu0 %10379  ;;  %v10375_v30 = vpop.permute.xlu1 %10374 }
0x1919   : > { %v10377_v35 = vunpack.i.h.bf16 %v10375_v30  ;;  %v10376_v44 = vunpack.i.l.bf16 %v10375_v30  ;;  %v10382_v51 = vunpack.i.h.bf16 %v14757_v50  ;;  %v10381_v0 = vunpack.i.l.bf16 %v14757_v50 }
0x191c   : > { %v10385_v47 = vpop.permute.xlu0 %10384  ;;  %v10390_v37 = vpop.permute.xlu1 %10389 }
0x191d   : > { %v10387_v34 = vunpack.i.h.bf16 %v10385_v47  ;;  %v10386_v6 = vunpack.i.l.bf16 %v10385_v47  ;;  %v10392_v53 = vunpack.i.h.bf16 %v10390_v37  ;;  %v10391_v5 = vunpack.i.l.bf16 %v10390_v37 }
0x191f   : > { %v8478_v42 = vsel %vm977_vm1, %v10386_v6, %v10387_v34  ;;  %v8503_v45 = vsel %vm1003_vm2, %v10391_v5, %v10392_v53 }
0x1920   : > { %v10395_v48 = vpop.permute.xlu0 %10394  ;;  %v10400_v27 = vpop.permute.xlu1 %10399  ;;  %v8696_v31 = vpack.c.bf16 %v8503_v45, %v8478_v42 }
0x1921   : > { %v10397_v49 = vunpack.i.h.bf16 %v10395_v48  ;;  %v10396_v62 = vunpack.i.l.bf16 %v10395_v48  ;;  %v10402_v26 = vunpack.i.h.bf16 %v10400_v27  ;;  %v10401_v54 = vunpack.i.l.bf16 %v10400_v27 }
0x1922   : > { %8728 = vmatprep.subr.bf16.mxu1 %v8696_v31 }
0x1923   : > { %v8528_v61 = vsel %vm1029_vm4, %v10396_v62, %v10397_v49  ;;  %v8553_v15 = vsel %vm1055_vm3, %v10401_v54, %v10402_v26 }
0x1924   : > { %v10405_v32 = vpop.permute.xlu0 %10404  ;;  %v10410_v28 = vpop.permute.xlu1 %10409  ;;  %v8699_v41 = vpack.c.bf16 %v8553_v15, %v8528_v61 }
0x1925   : > { %v10407_v40 = vunpack.i.h.bf16 %v10405_v32  ;;  %v10406_v16 = vunpack.i.l.bf16 %v10405_v32  ;;  %v10412_v14 = vunpack.i.h.bf16 %v10410_v28  ;;  %v10411_v36 = vunpack.i.l.bf16 %v10410_v28 }
0x1927   : > { %v8477_v38 = vsel %vm977_vm1, %v10406_v16, %v10386_v6  ;;  %v8479_v11 = vsel %vm977_vm1, %v10387_v34, %v10407_v40  ;;  %v8502_v13 = vsel %vm1003_vm2, %v10411_v36, %v10391_v5  ;;  %v8504_v60 = vsel %vm1003_vm2, %v10392_v53, %v10412_v14 }
0x1928   : > { %v8695_v3 = vpack.c.bf16 %v8502_v13, %v8477_v38  ;;  %v8697_v12 = vpack.c.bf16 %v8504_v60, %v8479_v11  ;;  %v10415_v52 = vpop.permute.xlu0 %10414  ;;  %v10420_v21 = vpop.permute.xlu1 %10419 }
0x1929   : > { %v10417_v33 = vunpack.i.h.bf16 %v10415_v52  ;;  %v10416_v46 = vunpack.i.l.bf16 %v10415_v52  ;;  %v10422_v56 = vunpack.i.h.bf16 %v10420_v21  ;;  %v10421_v63 = vunpack.i.l.bf16 %v10420_v21 }
0x192a   : > { %8729 = vmatpush1.bf16.msra.mxu1 %v8695_v3  ;;  %9940 = vmatpush3.bf16.msra.mxu0 %v8697_v12  ;;  %v8667_v3 = vld [vmem:[%s15412_s26] sm:$0xf]  ;;  %s15413_s26 = smov 110  }
0x192b   : > { %v8527_v57 = vsel %vm1029_vm4, %v10416_v46, %v10396_v62  ;;  %v8529_v20 = vsel %vm1029_vm4, %v10397_v49, %v10417_v33  ;;  %v8552_v18 = vsel %vm1055_vm3, %v10421_v63, %v10401_v54  ;;  %v8554_v55 = vsel %vm1055_vm3, %v10402_v26, %v10422_v56  ;;  %8730 = vmatprep.subr.bf16.mxu1 %v8699_v41 }
0x192c   : > { %v8698_v4 = vpack.c.bf16 %v8552_v18, %v8527_v57  ;;  %v8700_v7 = vpack.c.bf16 %v8554_v55, %v8529_v20  ;;  %v10430_v25 = vpop.permute.xlu0 %10429  ;;  %v10425_v1 = vpop.permute.xlu1 %10424  ;;  %9941 = vmatprep.subr.bf16.mxu0 %v15400_v17 }
0x192d   : > { %v10432_v23 = vunpack.i.h.bf16 %v10430_v25  ;;  %v10431_v39 = vunpack.i.l.bf16 %v10430_v25  ;;  %v10427_v19 = vunpack.i.h.bf16 %v10425_v1  ;;  %v10426_v37 = vunpack.i.l.bf16 %v10425_v1 }
0x192e   : > { %8731 = vmatpush1.bf16.msra.mxu1 %v8698_v4  ;;  %9942 = vmatpush3.bf16.msra.mxu0 %v8700_v7 }
0x192f   : > { %v8583_v2 = vsel %vm1087_vm5, %v10376_v44, %v10431_v39  ;;  %v8585_v22 = vsel %vm1087_vm5, %v10432_v23, %v10377_v35  ;;  %9943 = vmatprep.subr.bf16.mxu0 %v15400_v17  ;;  %v8584_v58 = vsel %vm1087_vm5, %v10431_v39, %v10432_v23 }
0x1930   : > { %v8701_v47 = vpack.c.bf16 %v8583_v2, %v14721_v10  ;;  %v8703_v30 = vpack.c.bf16 %v8585_v22, %v14735_v9  ;;  %v10435_v34 = vpop.permute.xlu0 %10434  ;;  %v10445_v6 = vpop.permute.xlu1 %10444  ;;  %v8702_v50 = vpack.c.bf16 %v8584_v58, %v14724_v43  ;;  %v9067_v2 = vld [vmem:[%s11358_s27] sm:$0xff] }
0x1931   : > { %v10437_v53 = vunpack.i.h.bf16 %v10435_v34  ;;  %v10436_v5 = vunpack.i.l.bf16 %v10435_v34  ;;  %v10447_v42 = vunpack.i.h.bf16 %v10445_v6  ;;  %v10446_v45 = vunpack.i.l.bf16 %v10445_v6 }
0x1932   : > { %8732 = vmatprep.subr.bf16.mxu1 %v8702_v50  ;;  %9944 = vmatpush3.bf16.msra.mxu0 %v8703_v30 }
0x1933   : > { %v8608_v48 = vsel %vm1113_vm7, %v10381_v0, %v10436_v5  ;;  %v8610_v27 = vsel %vm1113_vm7, %v10437_v53, %v10382_v51  ;;  %v8633_v31 = vsel %vm1139_vm6, %v10426_v37, %v10446_v45  ;;  %v8635_v10 = vsel %vm1139_vm6, %v10447_v42, %v10427_v19  ;;  %8733 = vmatpush1.bf16.msra.mxu1 %v8701_v47 }
0x1934   : > { %v8704_v9 = vpack.c.bf16 %v8633_v31, %v8608_v48  ;;  %v8706_v49 = vpack.c.bf16 %v8635_v10, %v8610_v27  ;;  %v10440_v62 = vpop.permute.xlu0 %10439  ;;  %9945 = vmatprep.subr.bf16.mxu0 %v15400_v17  ;;  %v8609_v43 = vsel %vm1113_vm7, %v10436_v5, %v10437_v53  ;;  %v8634_v26 = vsel %vm1139_vm6, %v10446_v45, %v10447_v42  ;;  %v8655_v61 = vpop.permute.xlu1 %8654 }
0x1935   : > { %v10442_v54 = vunpack.i.h.bf16 %v10440_v62  ;;  %v10441_v32 = vunpack.i.l.bf16 %v10440_v62  ;;  %v8705_v28 = vpack.c.bf16 %v8634_v26, %v8609_v43 }
0x1936   : > { %9946 = vmatpush3.bf16.msra.mxu0 %v8706_v49 }
0x1937   : > { %v8659_v15 = vsel %vm1165_vm8, %v10442_v54, %v8655_v61  ;;  %8734 = vmatprep.subr.bf16.mxu1 %v8705_v28  ;;  %v8658_v40 = vsel %vm1165_vm8, %v10441_v32, %v10442_v54  ;;  %9947 = vmatprep.subr.bf16.mxu0 %v15400_v17 }
0x1938   : > { %v8708_v16 = vpack.c.bf16 %v8659_v15, %v8659_v15  ;;  %8735 = vmatpush1.bf16.msra.mxu1 %v8704_v9  ;;  %v8657_v14 = vpop.permute.xlu0 %8656  ;;  %v8707_v36 = vpack.c.bf16 %v8658_v40, %v8658_v40 }
0x1939   : > { %v8660_v38 = vsel %vm1165_vm8, %v8655_v61, %v8657_v14 }
0x193a   : > { %v8709_v11 = vpack.c.bf16 %v8660_v38, %v8660_v38  ;;  %9409 = vmatprep.subr.msk.bf16.mxu1 %vm1228_vm9, %v8708_v16  ;;  %v8720_v13 = vsel %vm1228_vm9, %v8707_v36, 0 }
0x193c   : > { %8737 = vmatpush1.bf16.msra.mxu1 %v8720_v13  ;;  %v8726_v60 = vsel %vm1228_vm9, %v8709_v11, 0 }
0x193d   : > { %9948 = vmatpush3.bf16.msra.mxu0 %v8726_v60 }
0x193e   : > { %9953 = vmatprep.subr.bf16.mxu0 %v15400_v17 }
0x193f   : > { %9410 = vmatmul.mubr.msk.bf16.vlgmr.msra.gmra.mrb[216].mxu1 %vm1224_vm10, %v8667_v3 }
0x1940   : > { %9950 = vmatmul.mubr.msk.bf16.vlgmr.msra.gmra.mrb[216].mxu0 %vm1224_vm10, %v8667_v3  ;;  %9117 = vmatprep.mubr.bf16.mxu1 %v15396_v29 }
0x1941   : > { %9963 = vmatprep.mubr.msk.bf16.mxu0 %vm11209_vm0, %v15400_v17 }
0x1945   : > { %v8714_v12 = vpop.permute.xlu1 %8713 }
0x1a12   : > { %v8762_v52 = vpop.f32.mrb[216].mxu1 }
0x1a13   : > { %v8763_v21 = vadd.f32 %v8762_v52, %v8714_v12  ;;  %v8764_v41 = vpop.f32.mrb[217].mxu1  ;;  %v8803_v33 = vpop.f32.mrb[216].mxu0 }
0x1a14   : > { %v8765_v46 = vadd.f32 %v8764_v41, %v8714_v12  ;;  %v8766_v56 = vpop.f32.mrb[218].mxu1  ;;  %v9951_v63 = vpop.f32.mrb[217].mxu0  ;;  %v8804_v25 = vadd.f32 %v8803_v33, %v8714_v12 }
0x1a15   : > { %v8809_v57 = vmax.f32 %v8763_v21, 0.0  ;;  %v8767_v20 = vpop.f32.mrb[219].mxu1  ;;  %v8806_v18 = vpop.f32.mrb[218].mxu0 }
0x1a16   : > { %v8810_v55 = vmax.f32 %v8765_v46, 0.0  ;;  %v9952_v4 = vpop.f32.mrb[219].mxu0  ;;  %v8811_v35 = vmax.f32 %v8804_v25, 0.0 }
0x1a17   : > { %v14803_v7 = vmul.f32 %v8809_v57, %v15403_v8 }
0x1a18   : > { %v14806_v29 = vmul.f32 %v8810_v55, %v15404_v24  ;;  %v14817_v23 = vmul.f32 %v8811_v35, %v15407_v59 }
0x1a19   : > { %v10453_v1 = vpack.i.bf16 %v15400_v17, %v14803_v7 }
0x1a1a   : > { %v10458_v44 = vpack.i.bf16 %v14806_v29, %v14803_v7  ;;  %v10478_v39 = vpack.i.bf16 %v14817_v23, %v15400_v17  ;;  %v10503_v51 = vpack.i.bf16 %v14817_v23, %v14806_v29  ;;  %v10523_v0 = vpack.i.bf16 %v15400_v17, %v14817_v23 }
0x1a1b   : > { %10454 = vrot.lane.b32.xlu0 %v10453_v1, %s15409_s18  ;;  %10449 = vrot.lane.b32.xlu1 %v10453_v1, %s11204_s23 }
0x1a1f   : > { %10459 = vrot.lane.b32.xlu0 %v10458_v44, %s11200_s15  ;;  %10464 = vrot.lane.b32.xlu1 %v10458_v44, %s11201_s16 }
0x1a23   : > { %10469 = vrot.lane.b32.xlu0 %v10458_v44, %s11203_s22  ;;  %10474 = vrot.lane.b32.xlu1 %v10458_v44, %s15411_s1 }
0x1a27   : > { %10479 = vrot.lane.b32.xlu0 %v10478_v39, %s11200_s15  ;;  %10484 = vrot.lane.b32.xlu1 %v10478_v39, %s11201_s16  ;;  %s15414_s15 = smul.u32 24, %s15416_s10 }
0x1a29   : > { %s902_s16 = scalar_lea.vmem %s11363_s4, %s15414_s15 }
0x1a2b   : > { %10489 = vrot.lane.b32.xlu0 %v10478_v39, %s11203_s22  ;;  %10494 = vrot.lane.b32.xlu1 %v10478_v39, %s15411_s1 }
0x1a2f   : > { %10504 = vrot.lane.b32.xlu0 %v10503_v51, %s11204_s23  ;;  %10499 = vrot.lane.b32.xlu1 %v10453_v1, %s15413_s26 }
0x1a33   : > { %10509 = vrot.lane.b32.xlu0 %v10503_v51, %s15409_s18  ;;  %10519 = vrot.lane.b32.xlu1 %v10503_v51, %s15413_s26 }
0x1a37   : > { %10514 = vrot.lane.b32.xlu0 %v10458_v44, %s15408_s28  ;;  %10524 = vrot.lane.b32.xlu1 %v10523_v0, %s15408_s28 }
0x1a3b   : > { %9070 = vperm.xlu0 %10076, %v9067_v2  }
0x1a8d   : > { %v14838_v22 = vpop.permute.xlu0 %10454  ;;  %v10450_v19 = vpop.permute.xlu1 %10449 }
0x1a8e   : > { %v10452_v18 = vunpack.i.h.bf16 %v10450_v19  ;;  %v10451_v55 = vunpack.i.l.bf16 %v10450_v19  ;;  %v10457_v1 = vunpack.i.h.bf16 %v14838_v22  ;;  %v10456_v35 = vunpack.i.l.bf16 %v14838_v22 }
0x1a91   : > { %v10460_v58 = vpop.permute.xlu0 %10459  ;;  %v10465_v47 = vpop.permute.xlu1 %10464 }
0x1a92   : > { %v10462_v30 = vunpack.i.h.bf16 %v10460_v58  ;;  %v10461_v37 = vunpack.i.l.bf16 %v10460_v58  ;;  %v10467_v34 = vunpack.i.h.bf16 %v10465_v47  ;;  %v10466_v6 = vunpack.i.l.bf16 %v10465_v47 }
0x1a94   : > { %v8835_v50 = vsel %vm977_vm1, %v10461_v37, %v10462_v30  ;;  %v8860_v53 = vsel %vm1003_vm2, %v10466_v6, %v10467_v34 }
0x1a95   : > { %v10470_v5 = vpop.permute.xlu0 %10469  ;;  %v10475_v42 = vpop.permute.xlu1 %10474  ;;  %v9053_v45 = vpack.c.bf16 %v8860_v53, %v8835_v50 }
0x1a96   : > { %v10472_v48 = vunpack.i.h.bf16 %v10470_v5  ;;  %v10471_v27 = vunpack.i.l.bf16 %v10470_v5  ;;  %v10477_v31 = vunpack.i.h.bf16 %v10475_v42  ;;  %v10476_v10 = vunpack.i.l.bf16 %v10475_v42 }
0x1a97   : > { %9085 = vmatprep.subr.bf16.mxu1 %v9053_v45 }
0x1a98   : > { %v8885_v62 = vsel %vm1029_vm4, %v10471_v27, %v10472_v48  ;;  %v8910_v43 = vsel %vm1055_vm3, %v10476_v10, %v10477_v31 }
0x1a99   : > { %v10480_v9 = vpop.permute.xlu0 %10479  ;;  %v10485_v49 = vpop.permute.xlu1 %10484  ;;  %v9056_v13 = vpack.c.bf16 %v8910_v43, %v8885_v62 }
0x1a9a   : > { %v10482_v26 = vunpack.i.h.bf16 %v10480_v9  ;;  %v10481_v54 = vunpack.i.l.bf16 %v10480_v9  ;;  %v10487_v32 = vunpack.i.h.bf16 %v10485_v49  ;;  %v10486_v28 = vunpack.i.l.bf16 %v10485_v49 }
0x1a9c   : > { %v8834_v61 = vsel %vm977_vm1, %v10481_v54, %v10461_v37  ;;  %v8836_v15 = vsel %vm977_vm1, %v10462_v30, %v10482_v26  ;;  %v8859_v40 = vsel %vm1003_vm2, %v10486_v28, %v10466_v6  ;;  %v8861_v16 = vsel %vm1003_vm2, %v10467_v34, %v10487_v32 }
0x1a9d   : > { %v9052_v14 = vpack.c.bf16 %v8859_v40, %v8834_v61  ;;  %v9054_v36 = vpack.c.bf16 %v8861_v16, %v8836_v15  ;;  %v10490_v38 = vpop.permute.xlu0 %10489  ;;  %v10495_v11 = vpop.permute.xlu1 %10494 }
0x1a9e   : > { %v10492_v60 = vunpack.i.h.bf16 %v10490_v38  ;;  %v10491_v3 = vunpack.i.l.bf16 %v10490_v38  ;;  %v10497_v12 = vunpack.i.h.bf16 %v10495_v11  ;;  %v10496_v52 = vunpack.i.l.bf16 %v10495_v11 }
0x1a9f   : > { %9086 = vmatpush1.bf16.msra.mxu1 %v9052_v14  ;;  %9954 = vmatpush3.bf16.msra.mxu0 %v9054_v36  ;;  %v9024_v14 = vld [vmem:[%s11353_s20] sm:$0xf] }
0x1aa0   : > { %v8884_v21 = vsel %vm1029_vm4, %v10491_v3, %v10471_v27  ;;  %v8886_v41 = vsel %vm1029_vm4, %v10472_v48, %v10492_v60  ;;  %v8909_v33 = vsel %vm1055_vm3, %v10496_v52, %v10476_v10  ;;  %v8911_v46 = vsel %vm1055_vm3, %v10477_v31, %v10497_v12  ;;  %9087 = vmatprep.subr.bf16.mxu1 %v9056_v13 }
0x1aa1   : > { %v9055_v56 = vpack.c.bf16 %v8909_v33, %v8884_v21  ;;  %v9057_v63 = vpack.c.bf16 %v8911_v46, %v8886_v41  ;;  %v10505_v57 = vpop.permute.xlu0 %10504  ;;  %v10500_v20 = vpop.permute.xlu1 %10499  ;;  %9955 = vmatprep.subr.bf16.mxu0 %v15400_v17 }
0x1aa2   : > { %v10507_v4 = vunpack.i.h.bf16 %v10505_v57  ;;  %v10506_v25 = vunpack.i.l.bf16 %v10505_v57  ;;  %v10502_v51 = vunpack.i.h.bf16 %v10500_v20  ;;  %v10501_v58 = vunpack.i.l.bf16 %v10500_v20 }
0x1aa3   : > { %9088 = vmatpush1.bf16.msra.mxu1 %v9055_v56  ;;  %9956 = vmatpush3.bf16.msra.mxu0 %v9057_v63  ;;  %v11159_v56 = vld [vmem:[%s11380_s11 + $0x10] sm:$0xff] }
0x1aa4   : > { %v8940_v44 = vsel %vm1087_vm5, %v10451_v55, %v10506_v25  ;;  %v8942_v39 = vsel %vm1087_vm5, %v10507_v4, %v10452_v18  ;;  %9957 = vmatprep.subr.bf16.mxu0 %v15400_v17  ;;  %v8941_v0 = vsel %vm1087_vm5, %v10506_v25, %v10507_v4  ;;  %v11160_v18 = vld [vmem:[%s11380_s11] sm:$0xff]  ;;  %v11161_v4 = vld [vmem:[%s11380_s11 + $0x8] sm:$0xff] }
0x1aa5   : > { %v9058_v2 = vpack.c.bf16 %v8940_v44, %v14803_v7  ;;  %v9060_v19 = vpack.c.bf16 %v8942_v39, %v14817_v23  ;;  %v10510_v47 = vpop.permute.xlu0 %10509  ;;  %v10520_v30 = vpop.permute.xlu1 %10519  ;;  %v9059_v22 = vpack.c.bf16 %v8941_v0, %v14806_v29 }
0x1aa6   : > { %v10512_v37 = vunpack.i.h.bf16 %v10510_v47  ;;  %v10511_v34 = vunpack.i.l.bf16 %v10510_v47  ;;  %v10522_v6 = vunpack.i.h.bf16 %v10520_v30  ;;  %v10521_v50 = vunpack.i.l.bf16 %v10520_v30 }
0x1aa7   : > { %9089 = vmatprep.subr.bf16.mxu1 %v9059_v22  ;;  %9958 = vmatpush3.bf16.msra.mxu0 %v9060_v19 }
0x1aa8   : > { %v8965_v53 = vsel %vm1113_vm7, %v10456_v35, %v10511_v34  ;;  %v8967_v5 = vsel %vm1113_vm7, %v10512_v37, %v10457_v1  ;;  %v8990_v42 = vsel %vm1139_vm6, %v10501_v58, %v10521_v50  ;;  %v8992_v7 = vsel %vm1139_vm6, %v10522_v6, %v10502_v51  ;;  %9090 = vmatpush1.bf16.msra.mxu1 %v9058_v2 }
0x1aa9   : > { %v9061_v23 = vpack.c.bf16 %v8990_v42, %v8965_v53  ;;  %v9063_v45 = vpack.c.bf16 %v8992_v7, %v8967_v5  ;;  %v10515_v48 = vpop.permute.xlu0 %10514  ;;  %v10525_v27 = vpop.permute.xlu1 %10524  ;;  %9959 = vmatprep.subr.bf16.mxu0 %v15400_v17  ;;  %v8966_v29 = vsel %vm1113_vm7, %v10511_v34, %v10512_v37  ;;  %v8991_v31 = vsel %vm1139_vm6, %v10521_v50, %v10522_v6 }
0x1aaa   : > { %v10517_v10 = vunpack.i.h.bf16 %v10515_v48  ;;  %v10516_v9 = vunpack.i.l.bf16 %v10515_v48  ;;  %v10527_v49 = vunpack.i.h.bf16 %v10525_v27  ;;  %v10526_v62 = vunpack.i.l.bf16 %v10525_v27 }
0x1aab   : > { %v9062_v43 = vpack.c.bf16 %v8991_v31, %v8966_v29  ;;  %9960 = vmatpush3.bf16.msra.mxu0 %v9063_v45 }
0x1aac   : > { %v9016_v26 = vsel %vm1165_vm8, %v10517_v10, %v10526_v62  ;;  %v9017_v54 = vsel %vm1165_vm8, %v10526_v62, %v10527_v49  ;;  %9961 = vmatprep.subr.bf16.mxu0 %v15400_v17  ;;  %v9015_v32 = vsel %vm1165_vm8, %v10516_v9, %v10517_v10 }
0x1aad   : > { %v9065_v28 = vpack.c.bf16 %v9016_v26, %v9016_v26  ;;  %v9066_v61 = vpack.c.bf16 %v9017_v54, %v9017_v54  ;;  %9091 = vmatprep.subr.bf16.mxu1 %v9062_v43  ;;  %v9064_v15 = vpack.c.bf16 %v9015_v32, %v9015_v32 }
0x1aae   : > { %9092 = vmatpush1.bf16.msra.mxu1 %v9061_v23 }
0x1aaf   : > { %9412 = vmatprep.subr.msk.bf16.mxu1 %vm1228_vm9, %v9065_v28  ;;  %v9077_v40 = vsel %vm1228_vm9, %v9064_v15, 0  ;;  %v9083_v16 = vsel %vm1228_vm9, %v9066_v61, 0 }
0x1ab0   : > { %9962 = vmatpush3.bf16.msra.mxu0 %v9083_v16 }
0x1ab2   : > { %9094 = vmatpush1.bf16.msra.mxu1 %v9077_v40 }
0x1ab3   : > { %9964 = vmatmul.mubr.msk.bf16.vlgmr.msra.gmra.mrb[220].mxu0 %vm1224_vm10, %v9024_v14 }
0x1ab5   : > { %9413 = vmatmul.mubr.msk.bf16.vlgmr.msra.gmra.mrb[220].mxu1 %vm1224_vm10, %v9024_v14 }
0x1aba   : > { %v9071_v17 = vpop.permute.xlu0 %9070 }
0x1b86   : > { %v9160_v36 = vpop.f32.mrb[220].mxu0 }
0x1b87   : > { %v9161_v38 = vadd.f32 %v9160_v36, %v9071_v17  ;;  %v9965_v11 = vpop.f32.mrb[221].mxu0 }
0x1b88   : > { %v9119_v13 = vpop.f32.mrb[220].mxu1  ;;  %v9163_v60 = vpop.f32.mrb[222].mxu0 }
0x1b89   : > { %v9120_v3 = vadd.f32 %v9119_v13, %v9071_v17  ;;  %v9168_v12 = vmul.f32 %v9161_v38, %v15407_v59  ;;  %v9121_v52 = vpop.f32.mrb[221].mxu1  ;;  %v9966_v21 = vpop.f32.mrb[223].mxu0 }
0x1b8a   : > { %v9122_v41 = vadd.f32 %v9121_v52, %v9071_v17  ;;  %v9123_v33 = vpop.f32.mrb[222].mxu1 }
0x1b8b   : > { %v9166_v46 = vmul.f32 %v9120_v3, %v15403_v8  ;;  %v9171_v63 = vadd.f32 %v11159_v56, %v9168_v12  ;;  %v9124_v57 = vpop.f32.mrb[223].mxu1 }
0x1b8c   : > { %v9167_v20 = vmul.f32 %v9122_v41, %v15404_v24 }
0x1b8d   : > { %v9169_v55 = vadd.f32 %v11160_v18, %v9166_v46  ;;  %9174 = vst [vmem:[%s902_s16 + $0x10] sm:$0xff] %v9171_v63 }
0x1b8e   : > { %v9170_v25 = vadd.f32 %v11161_v4, %v9167_v20 }
0x1b8f   : > { %9172 = vst [vmem:[%s902_s16] sm:$0xff] %v9169_v55 }
0x1b90   : > { %9173 = vst [vmem:[%s902_s16 + $0x8] sm:$0xff] %v9170_v25 }
0x1b91 PF: > { %s69_s7 = sadd.s32 1, %s11168_s7  }
0x1b92   : > { %p66_p4 = scmp.ge.s32.totalorder %s69_s7, 4  }
0x1b94   :  { %68 = sbr.rel (!%p66_p4) target bundleno = 46 (0x2e), region = 195 }

</bundles_post_ra>
